<compile_context>
chip_gen: v6e
topology: v6e:2x2x1
jax: 0.10.0
libtpu: 0.0.40
codegen_flags: <defaults>
</compile_context>

<pallas_src>
import numpy as np
import jax
import jax.numpy as jnp
from jax.experimental import pallas as pl
from jax.experimental.pallas import tpu as pltpu


# ----------------------------------------------------------------------------
# Pallas kernel: the whole 4-layer network, fused, VMEM-resident.
# ----------------------------------------------------------------------------
def _fused_model_kernel(x_ref,
                        r1, t1, b1,
                        r2, t2, b2,
                        r3, t3, b3,
                        r4, t4, b4,
                        o_ref):
    def conv_tanh(x2d, r_ref, t_ref, b_ref):
        kh = r_ref.shape[0]                      # static kernel height
        acc = None
        for i in range(kh):                      # unrolled at trace time
            z = jnp.dot(x2d, t_ref[i], preferred_element_type=jnp.float32)
            y = jnp.dot(r_ref[i], z, preferred_element_type=jnp.float32)
            acc = y if acc is None else acc + y
        return jnp.tanh(acc + b_ref[...])

    x = x_ref[0]                                 # (H, W*Cin), channels-last
    y = conv_tanh(x, r1, t1, b1)                 # conv1 + tanh
    y = conv_tanh(y, r2, t2, b2)                 # conv2 + tanh
    y = conv_tanh(y, r3, t3, b3)                 # conv3 + tanh
    y = conv_tanh(y, r4, t4, b4)                 # conv4 + tanh
    o_ref[0] = y.astype(o_ref.dtype)             # (H_out, W_out*Cout)


# ----------------------------------------------------------------------------
# Host-side (one-time) construction of the banded / selection matrices.
# ----------------------------------------------------------------------------
def _conv_out(n, k, s, p, d):
    return (n + 2 * p - d * (k - 1) - 1) // s + 1


def _build_layer_mats(weight, bias, h_in, w_in, stride, padding, dilation):
    """conv2d(+tanh) == tanh( sum_i R_i @ X2d @ T_i + bias_row )."""
    w = np.asarray(weight, dtype=np.float32)     # (Cout, Cin, KH, KW) PyTorch layout
    b = np.asarray(bias, dtype=np.float32)       # (Cout,)
    cout, cin, kh, kw = w.shape
    h_out = _conv_out(h_in, kh, stride, padding, dilation)
    w_out = _conv_out(w_in, kw, stride, padding, dilation)

    # Row-selection matrices (H stride/dilation/padding folded in).
    R = np.zeros((kh, h_out, h_in), np.float32)
    for i in range(kh):
        for oh in range(h_out):
            h = oh * stride + i * dilation - padding
            if 0 <= h < h_in:
                R[i, oh, h] = 1.0

    # Banded weight matrices (W stride/dilation/padding + channel contraction).
    wt = np.transpose(w, (2, 3, 1, 0))           # (KH, KW, Cin, Cout)
    T = np.zeros((kh, w_in * cin, w_out * cout), np.float32)
    for i in range(kh):
        for j in range(kw):
            for ow in range(w_out):
                wc = ow * stride + j * dilation - padding
                if 0 <= wc < w_in:
                    T[i,
                      wc * cin:(wc + 1) * cin,
                      ow * cout:(ow + 1) * cout] = wt[i, j]

    brow = np.tile(b, w_out).reshape(1, w_out * cout)
    return ((jnp.asarray(R), jnp.asarray(T), jnp.asarray(brow)),
            (h_out, w_out, cout))


def make_fused_forward(params, h_in, w_in):
    """params: [(w1,b1), (w2,b2), (w3,b3), (w4,b4)] in PyTorch OIHW layout."""
    cfgs = [dict(stride=2, padding=1, dilation=2),    # conv1: 3 -> 1,  k=8
            dict(stride=2, padding=0, dilation=1),    # conv2: 1 -> 27, k=2
            dict(stride=1, padding=1, dilation=1),    # conv3: 27 -> 40, k=4
            dict(stride=2, padding=1, dilation=1)]    # conv4: 40 -> 27, k=4
    mats = []
    h, w = h_in, w_in
    cout = None
    for (wgt, bias), cfg in zip(params, cfgs):
        (R, T, brow), (h, w, cout) = _build_layer_mats(wgt, bias, h, w, **cfg)
        mats.extend([R, T, brow])
    oh, ow, oc = h, w, cout

    def _const_spec(arr):
        nd = arr.ndim
        return pl.BlockSpec(arr.shape, lambda b, _nd=nd: (0,) * _nd)

    def forward(x_nchw):
        n, cin, hh, ww = x_nchw.shape
        # Single NCHW -> (N, H, W*C) channels-last flatten at the model input.
        x2d = jnp.transpose(x_nchw, (0, 2, 3, 1)).reshape(n, hh, ww * cin)

        grid_spec = pltpu.PrefetchScalarGridSpec(
            num_scalar_prefetch=0,
            grid=(n,),                                         # batch grid axis
            in_specs=[pl.BlockSpec((1, hh, ww * cin), lambda b: (b, 0, 0))]
                     + [_const_spec(m) for m in mats],
            out_specs=pl.BlockSpec((1, oh, ow * oc), lambda b: (b, 0, 0)),
        )
        out2d = pl.pallas_call(
            _fused_model_kernel,
            out_shape=jax.ShapeDtypeStruct((n, oh, ow * oc), jnp.float32),
            grid_spec=grid_spec,
            compiler_params=pltpu.CompilerParams(
                dimension_semantics=("parallel",),            # megacore on v7x
                vmem_limit_bytes=32 * 1024 * 1024),           # fits v5e/v6e/v7x
        )(x2d, *mats)

        # Single (N, OH, OW*Cout) -> NCHW layout restore at the model output.
        return jnp.transpose(out2d.reshape(n, oh, ow, oc), (0, 3, 1, 2))

    return jax.jit(forward)


# ----------------------------------------------------------------------------
# Parameter init (PyTorch Conv2d default: uniform +-1/sqrt(fan_in)) + reference.
# ----------------------------------------------------------------------------
def init_conv_params(key, cout, cin, k):
    fan_in = cin * k * k
    bound = 1.0 / np.sqrt(fan_in)
    kw_, kb_ = jax.random.split(key)
    w = jax.random.uniform(kw_, (cout, cin, k, k), jnp.float32, -bound, bound)
    b = jax.random.uniform(kb_, (cout,), jnp.float32, -bound, bound)
    return w, b


def _reference_forward(x, params):
    def conv(xx, w, b, s, p, d):
        y = jax.lax.conv_general_dilated(
            xx, w, window_strides=(s, s), padding=[(p, p), (p, p)],
            rhs_dilation=(d, d),
            dimension_numbers=('NCHW', 'OIHW', 'NCHW'))
        return jnp.tanh(y + b.reshape(1, -1, 1, 1))
    (w1, b1), (w2, b2), (w3, b3), (w4, b4) = params
    v = conv(x, w1, b1, 2, 1, 2)
    v = conv(v, w2, b2, 2, 0, 1)
    v = conv(v, w3, b3, 1, 1, 1)
    v = conv(v, w4, b4, 2, 1, 1)
    return v


if __name__ == "__main__":
    key = jax.random.PRNGKey(0)
    kx, k1, k2, k3, k4 = jax.random.split(key, 5)
    # Same input shape as the PyTorch script: (1, 3, 75, 75)
    x = jax.random.normal(kx, (1, 3, 75, 75), jnp.float32)
    params = [
        init_conv_params(k1, 1, 3, 8),     # conv1: 3 -> 1,  k=8, s=2, p=1, d=2
        init_conv_params(k2, 27, 1, 2),    # conv2: 1 -> 27, k=2, s=2, p=0
        init_conv_params(k3, 40, 27, 4),   # conv3: 27 -> 40, k=4, s=1, p=1
        init_conv_params(k4, 27, 40, 4),   # conv4: 40 -> 27, k=4, s=2, p=1
    ]

    fwd = make_fused_forward(params, 75, 75)
    out = fwd(x)
    jax.block_until_ready(out)
    assert out.shape == (1, 27, 7, 7), out.shape

    ref = _reference_forward(x, params)
    np.testing.assert_allclose(np.asarray(out), np.asarray(ref),
                               atol=1e-4, rtol=1e-4)

    print("KERNEL_OK")
</pallas_src>

<mosaic_0001>
module attributes {stable_mosaic.version = 11 : i64} {
  func.func @_fused_model_kernel(%arg0: i32, %arg1: memref<1x75x225xf32, #tpu.memory_space<vmem>>, %arg2: memref<8x32x75xf32, #tpu.memory_space<vmem>>, %arg3: memref<8x225x32xf32, #tpu.memory_space<vmem>>, %arg4: memref<1x32xf32, #tpu.memory_space<vmem>>, %arg5: memref<2x16x32xf32, #tpu.memory_space<vmem>>, %arg6: memref<2x32x432xf32, #tpu.memory_space<vmem>>, %arg7: memref<1x432xf32, #tpu.memory_space<vmem>>, %arg8: memref<4x15x16xf32, #tpu.memory_space<vmem>>, %arg9: memref<4x432x600xf32, #tpu.memory_space<vmem>>, %arg10: memref<1x600xf32, #tpu.memory_space<vmem>>, %arg11: memref<4x7x15xf32, #tpu.memory_space<vmem>>, %arg12: memref<4x600x189xf32, #tpu.memory_space<vmem>>, %arg13: memref<1x189xf32, #tpu.memory_space<vmem>>, %arg14: memref<1x7x189xf32, #tpu.memory_space<vmem>>) attributes {dimension_semantics = [#tpu.dimension_semantics<parallel>], iteration_bounds = array<i64: 1>, scalar_prefetch = 0 : i64, scratch_operands = 0 : i64, tpu.core_type = #tpu.core_type<tc>, window_params = [{transform_indices = @transform_0, window_bounds = array<i64: 1, 75, 225>}, {pipeline_mode = #tpu.pipeline_mode<synchronous>, transform_indices = @transform_1, window_bounds = array<i64: 8, 32, 75>}, {pipeline_mode = #tpu.pipeline_mode<synchronous>, transform_indices = @transform_2, window_bounds = array<i64: 8, 225, 32>}, {pipeline_mode = #tpu.pipeline_mode<synchronous>, transform_indices = @transform_3, window_bounds = array<i64: 1, 32>}, {pipeline_mode = #tpu.pipeline_mode<synchronous>, transform_indices = @transform_4, window_bounds = array<i64: 2, 16, 32>}, {pipeline_mode = #tpu.pipeline_mode<synchronous>, transform_indices = @transform_5, window_bounds = array<i64: 2, 32, 432>}, {pipeline_mode = #tpu.pipeline_mode<synchronous>, transform_indices = @transform_6, window_bounds = array<i64: 1, 432>}, {pipeline_mode = #tpu.pipeline_mode<synchronous>, transform_indices = @transform_7, window_bounds = array<i64: 4, 15, 16>}, {pipeline_mode = #tpu.pipeline_mode<synchronous>, transform_indices = @transform_8, window_bounds = array<i64: 4, 432, 600>}, {pipeline_mode = #tpu.pipeline_mode<synchronous>, transform_indices = @transform_9, window_bounds = array<i64: 1, 600>}, {pipeline_mode = #tpu.pipeline_mode<synchronous>, transform_indices = @transform_10, window_bounds = array<i64: 4, 7, 15>}, {pipeline_mode = #tpu.pipeline_mode<synchronous>, transform_indices = @transform_11, window_bounds = array<i64: 4, 600, 189>}, {pipeline_mode = #tpu.pipeline_mode<synchronous>, transform_indices = @transform_12, window_bounds = array<i64: 1, 189>}, {transform_indices = @transform_13, window_bounds = array<i64: 1, 7, 189>}]} {
    %c0 = arith.constant 0 : index
    %c0_0 = arith.constant 0 : index
    %c0_1 = arith.constant 0 : index
    %0 = vector.load %arg1[%c0, %c0_0, %c0_1] : memref<1x75x225xf32, #tpu.memory_space<vmem>>, vector<1x75x225xf32>
    %1 = vector.shape_cast %0 : vector<1x75x225xf32> to vector<75x225xf32>
    %c0_2 = arith.constant 0 : index
    %c0_3 = arith.constant 0 : index
    %c0_4 = arith.constant 0 : index
    %2 = vector.load %arg3[%c0_2, %c0_3, %c0_4] : memref<8x225x32xf32, #tpu.memory_space<vmem>>, vector<1x225x32xf32>
    %3 = vector.shape_cast %2 : vector<1x225x32xf32> to vector<225x32xf32>
    %cst = arith.constant dense<0.000000e+00> : vector<75x32xf32>
    %4 = tpu.matmul %1, %3, %cst {dimension_numbers = #tpu.dot_dimension_numbers<[1], [0], [0], [1], [0, 0, 1, 1], [], []>} : vector<75x225xf32>, vector<225x32xf32>, vector<75x32xf32> -> vector<75x32xf32>
    %c0_5 = arith.constant 0 : index
    %c0_6 = arith.constant 0 : index
    %c0_7 = arith.constant 0 : index
    %5 = vector.load %arg2[%c0_5, %c0_6, %c0_7] : memref<8x32x75xf32, #tpu.memory_space<vmem>>, vector<1x32x75xf32>
    %6 = vector.shape_cast %5 : vector<1x32x75xf32> to vector<32x75xf32>
    %cst_8 = arith.constant dense<0.000000e+00> : vector<32x32xf32>
    %7 = tpu.matmul %6, %4, %cst_8 {dimension_numbers = #tpu.dot_dimension_numbers<[1], [0], [0], [1], [0, 0, 1, 1], [], []>} : vector<32x75xf32>, vector<75x32xf32>, vector<32x32xf32> -> vector<32x32xf32>
    %c1 = arith.constant 1 : index
    %c0_9 = arith.constant 0 : index
    %c0_10 = arith.constant 0 : index
    %8 = vector.load %arg3[%c1, %c0_9, %c0_10] : memref<8x225x32xf32, #tpu.memory_space<vmem>>, vector<1x225x32xf32>
    %9 = vector.shape_cast %8 : vector<1x225x32xf32> to vector<225x32xf32>
    %cst_11 = arith.constant dense<0.000000e+00> : vector<75x32xf32>
    %10 = tpu.matmul %1, %9, %cst_11 {dimension_numbers = #tpu.dot_dimension_numbers<[1], [0], [0], [1], [0, 0, 1, 1], [], []>} : vector<75x225xf32>, vector<225x32xf32>, vector<75x32xf32> -> vector<75x32xf32>
    %c1_12 = arith.constant 1 : index
    %c0_13 = arith.constant 0 : index
    %c0_14 = arith.constant 0 : index
    %11 = vector.load %arg2[%c1_12, %c0_13, %c0_14] : memref<8x32x75xf32, #tpu.memory_space<vmem>>, vector<1x32x75xf32>
    %12 = vector.shape_cast %11 : vector<1x32x75xf32> to vector<32x75xf32>
    %cst_15 = arith.constant dense<0.000000e+00> : vector<32x32xf32>
    %13 = tpu.matmul %12, %10, %cst_15 {dimension_numbers = #tpu.dot_dimension_numbers<[1], [0], [0], [1], [0, 0, 1, 1], [], []>} : vector<32x75xf32>, vector<75x32xf32>, vector<32x32xf32> -> vector<32x32xf32>
    %14 = arith.addf %7, %13 : vector<32x32xf32>
    %c2 = arith.constant 2 : index
    %c0_16 = arith.constant 0 : index
    %c0_17 = arith.constant 0 : index
    %15 = vector.load %arg3[%c2, %c0_16, %c0_17] : memref<8x225x32xf32, #tpu.memory_space<vmem>>, vector<1x225x32xf32>
    %16 = vector.shape_cast %15 : vector<1x225x32xf32> to vector<225x32xf32>
    %cst_18 = arith.constant dense<0.000000e+00> : vector<75x32xf32>
    %17 = tpu.matmul %1, %16, %cst_18 {dimension_numbers = #tpu.dot_dimension_numbers<[1], [0], [0], [1], [0, 0, 1, 1], [], []>} : vector<75x225xf32>, vector<225x32xf32>, vector<75x32xf32> -> vector<75x32xf32>
    %c2_19 = arith.constant 2 : index
    %c0_20 = arith.constant 0 : index
    %c0_21 = arith.constant 0 : index
    %18 = vector.load %arg2[%c2_19, %c0_20, %c0_21] : memref<8x32x75xf32, #tpu.memory_space<vmem>>, vector<1x32x75xf32>
    %19 = vector.shape_cast %18 : vector<1x32x75xf32> to vector<32x75xf32>
    %cst_22 = arith.constant dense<0.000000e+00> : vector<32x32xf32>
    %20 = tpu.matmul %19, %17, %cst_22 {dimension_numbers = #tpu.dot_dimension_numbers<[1], [0], [0], [1], [0, 0, 1, 1], [], []>} : vector<32x75xf32>, vector<75x32xf32>, vector<32x32xf32> -> vector<32x32xf32>
    %21 = arith.addf %14, %20 : vector<32x32xf32>
    %c3 = arith.constant 3 : index
    %c0_23 = arith.constant 0 : index
    %c0_24 = arith.constant 0 : index
    %22 = vector.load %arg3[%c3, %c0_23, %c0_24] : memref<8x225x32xf32, #tpu.memory_space<vmem>>, vector<1x225x32xf32>
    %23 = vector.shape_cast %22 : vector<1x225x32xf32> to vector<225x32xf32>
    %cst_25 = arith.constant dense<0.000000e+00> : vector<75x32xf32>
    %24 = tpu.matmul %1, %23, %cst_25 {dimension_numbers = #tpu.dot_dimension_numbers<[1], [0], [0], [1], [0, 0, 1, 1], [], []>} : vector<75x225xf32>, vector<225x32xf32>, vector<75x32xf32> -> vector<75x32xf32>
    %c3_26 = arith.constant 3 : index
    %c0_27 = arith.constant 0 : index
    %c0_28 = arith.constant 0 : index
    %25 = vector.load %arg2[%c3_26, %c0_27, %c0_28] : memref<8x32x75xf32, #tpu.memory_space<vmem>>, vector<1x32x75xf32>
    %26 = vector.shape_cast %25 : vector<1x32x75xf32> to vector<32x75xf32>
    %cst_29 = arith.constant dense<0.000000e+00> : vector<32x32xf32>
    %27 = tpu.matmul %26, %24, %cst_29 {dimension_numbers = #tpu.dot_dimension_numbers<[1], [0], [0], [1], [0, 0, 1, 1], [], []>} : vector<32x75xf32>, vector<75x32xf32>, vector<32x32xf32> -> vector<32x32xf32>
    %28 = arith.addf %21, %27 : vector<32x32xf32>
    %c4 = arith.constant 4 : index
    %c0_30 = arith.constant 0 : index
    %c0_31 = arith.constant 0 : index
    %29 = vector.load %arg3[%c4, %c0_30, %c0_31] : memref<8x225x32xf32, #tpu.memory_space<vmem>>, vector<1x225x32xf32>
    %30 = vector.shape_cast %29 : vector<1x225x32xf32> to vector<225x32xf32>
    %cst_32 = arith.constant dense<0.000000e+00> : vector<75x32xf32>
    %31 = tpu.matmul %1, %30, %cst_32 {dimension_numbers = #tpu.dot_dimension_numbers<[1], [0], [0], [1], [0, 0, 1, 1], [], []>} : vector<75x225xf32>, vector<225x32xf32>, vector<75x32xf32> -> vector<75x32xf32>
    %c4_33 = arith.constant 4 : index
    %c0_34 = arith.constant 0 : index
    %c0_35 = arith.constant 0 : index
    %32 = vector.load %arg2[%c4_33, %c0_34, %c0_35] : memref<8x32x75xf32, #tpu.memory_space<vmem>>, vector<1x32x75xf32>
    %33 = vector.shape_cast %32 : vector<1x32x75xf32> to vector<32x75xf32>
    %cst_36 = arith.constant dense<0.000000e+00> : vector<32x32xf32>
    %34 = tpu.matmul %33, %31, %cst_36 {dimension_numbers = #tpu.dot_dimension_numbers<[1], [0], [0], [1], [0, 0, 1, 1], [], []>} : vector<32x75xf32>, vector<75x32xf32>, vector<32x32xf32> -> vector<32x32xf32>
    %35 = arith.addf %28, %34 : vector<32x32xf32>
    %c5 = arith.constant 5 : index
    %c0_37 = arith.constant 0 : index
    %c0_38 = arith.constant 0 : index
    %36 = vector.load %arg3[%c5, %c0_37, %c0_38] : memref<8x225x32xf32, #tpu.memory_space<vmem>>, vector<1x225x32xf32>
    %37 = vector.shape_cast %36 : vector<1x225x32xf32> to vector<225x32xf32>
    %cst_39 = arith.constant dense<0.000000e+00> : vector<75x32xf32>
    %38 = tpu.matmul %1, %37, %cst_39 {dimension_numbers = #tpu.dot_dimension_numbers<[1], [0], [0], [1], [0, 0, 1, 1], [], []>} : vector<75x225xf32>, vector<225x32xf32>, vector<75x32xf32> -> vector<75x32xf32>
    %c5_40 = arith.constant 5 : index
    %c0_41 = arith.constant 0 : index
    %c0_42 = arith.constant 0 : index
    %39 = vector.load %arg2[%c5_40, %c0_41, %c0_42] : memref<8x32x75xf32, #tpu.memory_space<vmem>>, vector<1x32x75xf32>
    %40 = vector.shape_cast %39 : vector<1x32x75xf32> to vector<32x75xf32>
    %cst_43 = arith.constant dense<0.000000e+00> : vector<32x32xf32>
    %41 = tpu.matmul %40, %38, %cst_43 {dimension_numbers = #tpu.dot_dimension_numbers<[1], [0], [0], [1], [0, 0, 1, 1], [], []>} : vector<32x75xf32>, vector<75x32xf32>, vector<32x32xf32> -> vector<32x32xf32>
    %42 = arith.addf %35, %41 : vector<32x32xf32>
    %c6 = arith.constant 6 : index
    %c0_44 = arith.constant 0 : index
    %c0_45 = arith.constant 0 : index
    %43 = vector.load %arg3[%c6, %c0_44, %c0_45] : memref<8x225x32xf32, #tpu.memory_space<vmem>>, vector<1x225x32xf32>
    %44 = vector.shape_cast %43 : vector<1x225x32xf32> to vector<225x32xf32>
    %cst_46 = arith.constant dense<0.000000e+00> : vector<75x32xf32>
    %45 = tpu.matmul %1, %44, %cst_46 {dimension_numbers = #tpu.dot_dimension_numbers<[1], [0], [0], [1], [0, 0, 1, 1], [], []>} : vector<75x225xf32>, vector<225x32xf32>, vector<75x32xf32> -> vector<75x32xf32>
    %c6_47 = arith.constant 6 : index
    %c0_48 = arith.constant 0 : index
    %c0_49 = arith.constant 0 : index
    %46 = vector.load %arg2[%c6_47, %c0_48, %c0_49] : memref<8x32x75xf32, #tpu.memory_space<vmem>>, vector<1x32x75xf32>
    %47 = vector.shape_cast %46 : vector<1x32x75xf32> to vector<32x75xf32>
    %cst_50 = arith.constant dense<0.000000e+00> : vector<32x32xf32>
    %48 = tpu.matmul %47, %45, %cst_50 {dimension_numbers = #tpu.dot_dimension_numbers<[1], [0], [0], [1], [0, 0, 1, 1], [], []>} : vector<32x75xf32>, vector<75x32xf32>, vector<32x32xf32> -> vector<32x32xf32>
    %49 = arith.addf %42, %48 : vector<32x32xf32>
    %c7 = arith.constant 7 : index
    %c0_51 = arith.constant 0 : index
    %c0_52 = arith.constant 0 : index
    %50 = vector.load %arg3[%c7, %c0_51, %c0_52] : memref<8x225x32xf32, #tpu.memory_space<vmem>>, vector<1x225x32xf32>
    %51 = vector.shape_cast %50 : vector<1x225x32xf32> to vector<225x32xf32>
    %cst_53 = arith.constant dense<0.000000e+00> : vector<75x32xf32>
    %52 = tpu.matmul %1, %51, %cst_53 {dimension_numbers = #tpu.dot_dimension_numbers<[1], [0], [0], [1], [0, 0, 1, 1], [], []>} : vector<75x225xf32>, vector<225x32xf32>, vector<75x32xf32> -> vector<75x32xf32>
    %c7_54 = arith.constant 7 : index
    %c0_55 = arith.constant 0 : index
    %c0_56 = arith.constant 0 : index
    %53 = vector.load %arg2[%c7_54, %c0_55, %c0_56] : memref<8x32x75xf32, #tpu.memory_space<vmem>>, vector<1x32x75xf32>
    %54 = vector.shape_cast %53 : vector<1x32x75xf32> to vector<32x75xf32>
    %cst_57 = arith.constant dense<0.000000e+00> : vector<32x32xf32>
    %55 = tpu.matmul %54, %52, %cst_57 {dimension_numbers = #tpu.dot_dimension_numbers<[1], [0], [0], [1], [0, 0, 1, 1], [], []>} : vector<32x75xf32>, vector<75x32xf32>, vector<32x32xf32> -> vector<32x32xf32>
    %56 = arith.addf %49, %55 : vector<32x32xf32>
    %c0_58 = arith.constant 0 : index
    %c0_59 = arith.constant 0 : index
    %57 = vector.load %arg4[%c0_58, %c0_59] : memref<1x32xf32, #tpu.memory_space<vmem>>, vector<1x32xf32>
    %58 = vector.broadcast %57 : vector<1x32xf32> to vector<32x32xf32>
    %59 = arith.addf %56, %58 : vector<32x32xf32>
    %60 = math.tanh %59 : vector<32x32xf32>
    %c0_60 = arith.constant 0 : index
    %c0_61 = arith.constant 0 : index
    %c0_62 = arith.constant 0 : index
    %61 = vector.load %arg6[%c0_60, %c0_61, %c0_62] : memref<2x32x432xf32, #tpu.memory_space<vmem>>, vector<1x32x432xf32>
    %62 = vector.shape_cast %61 : vector<1x32x432xf32> to vector<32x432xf32>
    %cst_63 = arith.constant dense<0.000000e+00> : vector<32x432xf32>
    %63 = tpu.matmul %60, %62, %cst_63 {dimension_numbers = #tpu.dot_dimension_numbers<[1], [0], [0], [1], [0, 0, 1, 1], [], []>} : vector<32x32xf32>, vector<32x432xf32>, vector<32x432xf32> -> vector<32x432xf32>
    %c0_64 = arith.constant 0 : index
    %c0_65 = arith.constant 0 : index
    %c0_66 = arith.constant 0 : index
    %64 = vector.load %arg5[%c0_64, %c0_65, %c0_66] : memref<2x16x32xf32, #tpu.memory_space<vmem>>, vector<1x16x32xf32>
    %65 = vector.shape_cast %64 : vector<1x16x32xf32> to vector<16x32xf32>
    %cst_67 = arith.constant dense<0.000000e+00> : vector<16x432xf32>
    %66 = tpu.matmul %65, %63, %cst_67 {dimension_numbers = #tpu.dot_dimension_numbers<[1], [0], [0], [1], [0, 0, 1, 1], [], []>} : vector<16x32xf32>, vector<32x432xf32>, vector<16x432xf32> -> vector<16x432xf32>
    %c1_68 = arith.constant 1 : index
    %c0_69 = arith.constant 0 : index
    %c0_70 = arith.constant 0 : index
    %67 = vector.load %arg6[%c1_68, %c0_69, %c0_70] : memref<2x32x432xf32, #tpu.memory_space<vmem>>, vector<1x32x432xf32>
    %68 = vector.shape_cast %67 : vector<1x32x432xf32> to vector<32x432xf32>
    %cst_71 = arith.constant dense<0.000000e+00> : vector<32x432xf32>
    %69 = tpu.matmul %60, %68, %cst_71 {dimension_numbers = #tpu.dot_dimension_numbers<[1], [0], [0], [1], [0, 0, 1, 1], [], []>} : vector<32x32xf32>, vector<32x432xf32>, vector<32x432xf32> -> vector<32x432xf32>
    %c1_72 = arith.constant 1 : index
    %c0_73 = arith.constant 0 : index
    %c0_74 = arith.constant 0 : index
    %70 = vector.load %arg5[%c1_72, %c0_73, %c0_74] : memref<2x16x32xf32, #tpu.memory_space<vmem>>, vector<1x16x32xf32>
    %71 = vector.shape_cast %70 : vector<1x16x32xf32> to vector<16x32xf32>
    %cst_75 = arith.constant dense<0.000000e+00> : vector<16x432xf32>
    %72 = tpu.matmul %71, %69, %cst_75 {dimension_numbers = #tpu.dot_dimension_numbers<[1], [0], [0], [1], [0, 0, 1, 1], [], []>} : vector<16x32xf32>, vector<32x432xf32>, vector<16x432xf32> -> vector<16x432xf32>
    %73 = arith.addf %66, %72 : vector<16x432xf32>
    %c0_76 = arith.constant 0 : index
    %c0_77 = arith.constant 0 : index
    %74 = vector.load %arg7[%c0_76, %c0_77] : memref<1x432xf32, #tpu.memory_space<vmem>>, vector<1x432xf32>
    %75 = vector.broadcast %74 : vector<1x432xf32> to vector<16x432xf32>
    %76 = arith.addf %73, %75 : vector<16x432xf32>
    %77 = math.tanh %76 : vector<16x432xf32>
    %c0_78 = arith.constant 0 : index
    %c0_79 = arith.constant 0 : index
    %c0_80 = arith.constant 0 : index
    %78 = vector.load %arg9[%c0_78, %c0_79, %c0_80] : memref<4x432x600xf32, #tpu.memory_space<vmem>>, vector<1x432x600xf32>
    %79 = vector.shape_cast %78 : vector<1x432x600xf32> to vector<432x600xf32>
    %cst_81 = arith.constant dense<0.000000e+00> : vector<16x600xf32>
    %80 = tpu.matmul %77, %79, %cst_81 {dimension_numbers = #tpu.dot_dimension_numbers<[1], [0], [0], [1], [0, 0, 1, 1], [], []>} : vector<16x432xf32>, vector<432x600xf32>, vector<16x600xf32> -> vector<16x600xf32>
    %c0_82 = arith.constant 0 : index
    %c0_83 = arith.constant 0 : index
    %c0_84 = arith.constant 0 : index
    %81 = vector.load %arg8[%c0_82, %c0_83, %c0_84] : memref<4x15x16xf32, #tpu.memory_space<vmem>>, vector<1x15x16xf32>
    %82 = vector.shape_cast %81 : vector<1x15x16xf32> to vector<15x16xf32>
    %cst_85 = arith.constant dense<0.000000e+00> : vector<15x600xf32>
    %83 = tpu.matmul %82, %80, %cst_85 {dimension_numbers = #tpu.dot_dimension_numbers<[1], [0], [0], [1], [0, 0, 1, 1], [], []>} : vector<15x16xf32>, vector<16x600xf32>, vector<15x600xf32> -> vector<15x600xf32>
    %c1_86 = arith.constant 1 : index
    %c0_87 = arith.constant 0 : index
    %c0_88 = arith.constant 0 : index
    %84 = vector.load %arg9[%c1_86, %c0_87, %c0_88] : memref<4x432x600xf32, #tpu.memory_space<vmem>>, vector<1x432x600xf32>
    %85 = vector.shape_cast %84 : vector<1x432x600xf32> to vector<432x600xf32>
    %cst_89 = arith.constant dense<0.000000e+00> : vector<16x600xf32>
    %86 = tpu.matmul %77, %85, %cst_89 {dimension_numbers = #tpu.dot_dimension_numbers<[1], [0], [0], [1], [0, 0, 1, 1], [], []>} : vector<16x432xf32>, vector<432x600xf32>, vector<16x600xf32> -> vector<16x600xf32>
    %c1_90 = arith.constant 1 : index
    %c0_91 = arith.constant 0 : index
    %c0_92 = arith.constant 0 : index
    %87 = vector.load %arg8[%c1_90, %c0_91, %c0_92] : memref<4x15x16xf32, #tpu.memory_space<vmem>>, vector<1x15x16xf32>
    %88 = vector.shape_cast %87 : vector<1x15x16xf32> to vector<15x16xf32>
    %cst_93 = arith.constant dense<0.000000e+00> : vector<15x600xf32>
    %89 = tpu.matmul %88, %86, %cst_93 {dimension_numbers = #tpu.dot_dimension_numbers<[1], [0], [0], [1], [0, 0, 1, 1], [], []>} : vector<15x16xf32>, vector<16x600xf32>, vector<15x600xf32> -> vector<15x600xf32>
    %90 = arith.addf %83, %89 : vector<15x600xf32>
    %c2_94 = arith.constant 2 : index
    %c0_95 = arith.constant 0 : index
    %c0_96 = arith.constant 0 : index
    %91 = vector.load %arg9[%c2_94, %c0_95, %c0_96] : memref<4x432x600xf32, #tpu.memory_space<vmem>>, vector<1x432x600xf32>
    %92 = vector.shape_cast %91 : vector<1x432x600xf32> to vector<432x600xf32>
    %cst_97 = arith.constant dense<0.000000e+00> : vector<16x600xf32>
    %93 = tpu.matmul %77, %92, %cst_97 {dimension_numbers = #tpu.dot_dimension_numbers<[1], [0], [0], [1], [0, 0, 1, 1], [], []>} : vector<16x432xf32>, vector<432x600xf32>, vector<16x600xf32> -> vector<16x600xf32>
    %c2_98 = arith.constant 2 : index
    %c0_99 = arith.constant 0 : index
    %c0_100 = arith.constant 0 : index
    %94 = vector.load %arg8[%c2_98, %c0_99, %c0_100] : memref<4x15x16xf32, #tpu.memory_space<vmem>>, vector<1x15x16xf32>
    %95 = vector.shape_cast %94 : vector<1x15x16xf32> to vector<15x16xf32>
    %cst_101 = arith.constant dense<0.000000e+00> : vector<15x600xf32>
    %96 = tpu.matmul %95, %93, %cst_101 {dimension_numbers = #tpu.dot_dimension_numbers<[1], [0], [0], [1], [0, 0, 1, 1], [], []>} : vector<15x16xf32>, vector<16x600xf32>, vector<15x600xf32> -> vector<15x600xf32>
    %97 = arith.addf %90, %96 : vector<15x600xf32>
    %c3_102 = arith.constant 3 : index
    %c0_103 = arith.constant 0 : index
    %c0_104 = arith.constant 0 : index
    %98 = vector.load %arg9[%c3_102, %c0_103, %c0_104] : memref<4x432x600xf32, #tpu.memory_space<vmem>>, vector<1x432x600xf32>
    %99 = vector.shape_cast %98 : vector<1x432x600xf32> to vector<432x600xf32>
    %cst_105 = arith.constant dense<0.000000e+00> : vector<16x600xf32>
    %100 = tpu.matmul %77, %99, %cst_105 {dimension_numbers = #tpu.dot_dimension_numbers<[1], [0], [0], [1], [0, 0, 1, 1], [], []>} : vector<16x432xf32>, vector<432x600xf32>, vector<16x600xf32> -> vector<16x600xf32>
    %c3_106 = arith.constant 3 : index
    %c0_107 = arith.constant 0 : index
    %c0_108 = arith.constant 0 : index
    %101 = vector.load %arg8[%c3_106, %c0_107, %c0_108] : memref<4x15x16xf32, #tpu.memory_space<vmem>>, vector<1x15x16xf32>
    %102 = vector.shape_cast %101 : vector<1x15x16xf32> to vector<15x16xf32>
    %cst_109 = arith.constant dense<0.000000e+00> : vector<15x600xf32>
    %103 = tpu.matmul %102, %100, %cst_109 {dimension_numbers = #tpu.dot_dimension_numbers<[1], [0], [0], [1], [0, 0, 1, 1], [], []>} : vector<15x16xf32>, vector<16x600xf32>, vector<15x600xf32> -> vector<15x600xf32>
    %104 = arith.addf %97, %103 : vector<15x600xf32>
    %c0_110 = arith.constant 0 : index
    %c0_111 = arith.constant 0 : index
    %105 = vector.load %arg10[%c0_110, %c0_111] : memref<1x600xf32, #tpu.memory_space<vmem>>, vector<1x600xf32>
    %106 = vector.broadcast %105 : vector<1x600xf32> to vector<15x600xf32>
    %107 = arith.addf %104, %106 : vector<15x600xf32>
    %108 = math.tanh %107 : vector<15x600xf32>
    %c0_112 = arith.constant 0 : index
    %c0_113 = arith.constant 0 : index
    %c0_114 = arith.constant 0 : index
    %109 = vector.load %arg12[%c0_112, %c0_113, %c0_114] : memref<4x600x189xf32, #tpu.memory_space<vmem>>, vector<1x600x189xf32>
    %110 = vector.shape_cast %109 : vector<1x600x189xf32> to vector<600x189xf32>
    %cst_115 = arith.constant dense<0.000000e+00> : vector<15x189xf32>
    %111 = tpu.matmul %108, %110, %cst_115 {dimension_numbers = #tpu.dot_dimension_numbers<[1], [0], [0], [1], [0, 0, 1, 1], [], []>} : vector<15x600xf32>, vector<600x189xf32>, vector<15x189xf32> -> vector<15x189xf32>
    %c0_116 = arith.constant 0 : index
    %c0_117 = arith.constant 0 : index
    %c0_118 = arith.constant 0 : index
    %112 = vector.load %arg11[%c0_116, %c0_117, %c0_118] : memref<4x7x15xf32, #tpu.memory_space<vmem>>, vector<1x7x15xf32>
    %113 = vector.shape_cast %112 : vector<1x7x15xf32> to vector<7x15xf32>
    %cst_119 = arith.constant dense<0.000000e+00> : vector<7x189xf32>
    %114 = tpu.matmul %113, %111, %cst_119 {dimension_numbers = #tpu.dot_dimension_numbers<[1], [0], [0], [1], [0, 0, 1, 1], [], []>} : vector<7x15xf32>, vector<15x189xf32>, vector<7x189xf32> -> vector<7x189xf32>
    %c1_120 = arith.constant 1 : index
    %c0_121 = arith.constant 0 : index
    %c0_122 = arith.constant 0 : index
    %115 = vector.load %arg12[%c1_120, %c0_121, %c0_122] : memref<4x600x189xf32, #tpu.memory_space<vmem>>, vector<1x600x189xf32>
    %116 = vector.shape_cast %115 : vector<1x600x189xf32> to vector<600x189xf32>
    %cst_123 = arith.constant dense<0.000000e+00> : vector<15x189xf32>
    %117 = tpu.matmul %108, %116, %cst_123 {dimension_numbers = #tpu.dot_dimension_numbers<[1], [0], [0], [1], [0, 0, 1, 1], [], []>} : vector<15x600xf32>, vector<600x189xf32>, vector<15x189xf32> -> vector<15x189xf32>
    %c1_124 = arith.constant 1 : index
    %c0_125 = arith.constant 0 : index
    %c0_126 = arith.constant 0 : index
    %118 = vector.load %arg11[%c1_124, %c0_125, %c0_126] : memref<4x7x15xf32, #tpu.memory_space<vmem>>, vector<1x7x15xf32>
    %119 = vector.shape_cast %118 : vector<1x7x15xf32> to vector<7x15xf32>
    %cst_127 = arith.constant dense<0.000000e+00> : vector<7x189xf32>
    %120 = tpu.matmul %119, %117, %cst_127 {dimension_numbers = #tpu.dot_dimension_numbers<[1], [0], [0], [1], [0, 0, 1, 1], [], []>} : vector<7x15xf32>, vector<15x189xf32>, vector<7x189xf32> -> vector<7x189xf32>
    %121 = arith.addf %114, %120 : vector<7x189xf32>
    %c2_128 = arith.constant 2 : index
    %c0_129 = arith.constant 0 : index
    %c0_130 = arith.constant 0 : index
    %122 = vector.load %arg12[%c2_128, %c0_129, %c0_130] : memref<4x600x189xf32, #tpu.memory_space<vmem>>, vector<1x600x189xf32>
    %123 = vector.shape_cast %122 : vector<1x600x189xf32> to vector<600x189xf32>
    %cst_131 = arith.constant dense<0.000000e+00> : vector<15x189xf32>
    %124 = tpu.matmul %108, %123, %cst_131 {dimension_numbers = #tpu.dot_dimension_numbers<[1], [0], [0], [1], [0, 0, 1, 1], [], []>} : vector<15x600xf32>, vector<600x189xf32>, vector<15x189xf32> -> vector<15x189xf32>
    %c2_132 = arith.constant 2 : index
    %c0_133 = arith.constant 0 : index
    %c0_134 = arith.constant 0 : index
    %125 = vector.load %arg11[%c2_132, %c0_133, %c0_134] : memref<4x7x15xf32, #tpu.memory_space<vmem>>, vector<1x7x15xf32>
    %126 = vector.shape_cast %125 : vector<1x7x15xf32> to vector<7x15xf32>
    %cst_135 = arith.constant dense<0.000000e+00> : vector<7x189xf32>
    %127 = tpu.matmul %126, %124, %cst_135 {dimension_numbers = #tpu.dot_dimension_numbers<[1], [0], [0], [1], [0, 0, 1, 1], [], []>} : vector<7x15xf32>, vector<15x189xf32>, vector<7x189xf32> -> vector<7x189xf32>
    %128 = arith.addf %121, %127 : vector<7x189xf32>
    %c3_136 = arith.constant 3 : index
    %c0_137 = arith.constant 0 : index
    %c0_138 = arith.constant 0 : index
    %129 = vector.load %arg12[%c3_136, %c0_137, %c0_138] : memref<4x600x189xf32, #tpu.memory_space<vmem>>, vector<1x600x189xf32>
    %130 = vector.shape_cast %129 : vector<1x600x189xf32> to vector<600x189xf32>
    %cst_139 = arith.constant dense<0.000000e+00> : vector<15x189xf32>
    %131 = tpu.matmul %108, %130, %cst_139 {dimension_numbers = #tpu.dot_dimension_numbers<[1], [0], [0], [1], [0, 0, 1, 1], [], []>} : vector<15x600xf32>, vector<600x189xf32>, vector<15x189xf32> -> vector<15x189xf32>
    %c3_140 = arith.constant 3 : index
    %c0_141 = arith.constant 0 : index
    %c0_142 = arith.constant 0 : index
    %132 = vector.load %arg11[%c3_140, %c0_141, %c0_142] : memref<4x7x15xf32, #tpu.memory_space<vmem>>, vector<1x7x15xf32>
    %133 = vector.shape_cast %132 : vector<1x7x15xf32> to vector<7x15xf32>
    %cst_143 = arith.constant dense<0.000000e+00> : vector<7x189xf32>
    %134 = tpu.matmul %133, %131, %cst_143 {dimension_numbers = #tpu.dot_dimension_numbers<[1], [0], [0], [1], [0, 0, 1, 1], [], []>} : vector<7x15xf32>, vector<15x189xf32>, vector<7x189xf32> -> vector<7x189xf32>
    %135 = arith.addf %128, %134 : vector<7x189xf32>
    %c0_144 = arith.constant 0 : index
    %c0_145 = arith.constant 0 : index
    %136 = vector.load %arg13[%c0_144, %c0_145] : memref<1x189xf32, #tpu.memory_space<vmem>>, vector<1x189xf32>
    %137 = vector.broadcast %136 : vector<1x189xf32> to vector<7x189xf32>
    %138 = arith.addf %135, %137 : vector<7x189xf32>
    %139 = math.tanh %138 : vector<7x189xf32>
    %c0_146 = arith.constant 0 : index
    %c0_147 = arith.constant 0 : index
    %c0_148 = arith.constant 0 : index
    %140 = vector.load %arg14[%c0_146, %c0_147, %c0_148] : memref<1x7x189xf32, #tpu.memory_space<vmem>>, vector<1x7x189xf32>
    %141 = vector.shape_cast %140 : vector<1x7x189xf32> to vector<7x189xf32>
    %142 = vector.shape_cast %139 : vector<7x189xf32> to vector<1x7x189xf32>
    tpu.vector_store %arg14[%c0_146, %c0_147, %c0_148], %142 {strides = array<i32>} : memref<1x7x189xf32, #tpu.memory_space<vmem>>, vector<1x7x189xf32>,
    return
  }
  func.func @transform_0(%arg0: i32) -> (i32, i32, i32) {
    %c0_i32 = arith.constant 0 : i32
    %c0_i32_0 = arith.constant 0 : i32
    %c0_i32_1 = arith.constant 0 : i32
    return %arg0, %c0_i32, %c0_i32_0 : i32, i32, i32
  }
  func.func @transform_1(%arg0: i32) -> (i32, i32, i32) {
    %c0_i32 = arith.constant 0 : i32
    %c0_i32_0 = arith.constant 0 : i32
    %c0_i32_1 = arith.constant 0 : i32
    %c0_i32_2 = arith.constant 0 : i32
    return %c0_i32, %c0_i32_0, %c0_i32_1 : i32, i32, i32
  }
  func.func @transform_2(%arg0: i32) -> (i32, i32, i32) {
    %c0_i32 = arith.constant 0 : i32
    %c0_i32_0 = arith.constant 0 : i32
    %c0_i32_1 = arith.constant 0 : i32
    %c0_i32_2 = arith.constant 0 : i32
    return %c0_i32, %c0_i32_0, %c0_i32_1 : i32, i32, i32
  }
  func.func @transform_3(%arg0: i32) -> (i32, i32) {
    %c0_i32 = arith.constant 0 : i32
    %c0_i32_0 = arith.constant 0 : i32
    %c0_i32_1 = arith.constant 0 : i32
    return %c0_i32, %c0_i32_0 : i32, i32
  }
  func.func @transform_4(%arg0: i32) -> (i32, i32, i32) {
    %c0_i32 = arith.constant 0 : i32
    %c0_i32_0 = arith.constant 0 : i32
    %c0_i32_1 = arith.constant 0 : i32
    %c0_i32_2 = arith.constant 0 : i32
    return %c0_i32, %c0_i32_0, %c0_i32_1 : i32, i32, i32
  }
  func.func @transform_5(%arg0: i32) -> (i32, i32, i32) {
    %c0_i32 = arith.constant 0 : i32
    %c0_i32_0 = arith.constant 0 : i32
    %c0_i32_1 = arith.constant 0 : i32
    %c0_i32_2 = arith.constant 0 : i32
    return %c0_i32, %c0_i32_0, %c0_i32_1 : i32, i32, i32
  }
  func.func @transform_6(%arg0: i32) -> (i32, i32) {
    %c0_i32 = arith.constant 0 : i32
    %c0_i32_0 = arith.constant 0 : i32
    %c0_i32_1 = arith.constant 0 : i32
    return %c0_i32, %c0_i32_0 : i32, i32
  }
  func.func @transform_7(%arg0: i32) -> (i32, i32, i32) {
    %c0_i32 = arith.constant 0 : i32
    %c0_i32_0 = arith.constant 0 : i32
    %c0_i32_1 = arith.constant 0 : i32
    %c0_i32_2 = arith.constant 0 : i32
    return %c0_i32, %c0_i32_0, %c0_i32_1 : i32, i32, i32
  }
  func.func @transform_8(%arg0: i32) -> (i32, i32, i32) {
    %c0_i32 = arith.constant 0 : i32
    %c0_i32_0 = arith.constant 0 : i32
    %c0_i32_1 = arith.constant 0 : i32
    %c0_i32_2 = arith.constant 0 : i32
    return %c0_i32, %c0_i32_0, %c0_i32_1 : i32, i32, i32
  }
  func.func @transform_9(%arg0: i32) -> (i32, i32) {
    %c0_i32 = arith.constant 0 : i32
    %c0_i32_0 = arith.constant 0 : i32
    %c0_i32_1 = arith.constant 0 : i32
    return %c0_i32, %c0_i32_0 : i32, i32
  }
  func.func @transform_10(%arg0: i32) -> (i32, i32, i32) {
    %c0_i32 = arith.constant 0 : i32
    %c0_i32_0 = arith.constant 0 : i32
    %c0_i32_1 = arith.constant 0 : i32
    %c0_i32_2 = arith.constant 0 : i32
    return %c0_i32, %c0_i32_0, %c0_i32_1 : i32, i32, i32
  }
  func.func @transform_11(%arg0: i32) -> (i32, i32, i32) {
    %c0_i32 = arith.constant 0 : i32
    %c0_i32_0 = arith.constant 0 : i32
    %c0_i32_1 = arith.constant 0 : i32
    %c0_i32_2 = arith.constant 0 : i32
    return %c0_i32, %c0_i32_0, %c0_i32_1 : i32, i32, i32
  }
  func.func @transform_12(%arg0: i32) -> (i32, i32) {
    %c0_i32 = arith.constant 0 : i32
    %c0_i32_0 = arith.constant 0 : i32
    %c0_i32_1 = arith.constant 0 : i32
    return %c0_i32, %c0_i32_0 : i32, i32
  }
  func.func @transform_13(%arg0: i32) -> (i32, i32, i32) {
    %c0_i32 = arith.constant 0 : i32
    %c0_i32_0 = arith.constant 0 : i32
    %c0_i32_1 = arith.constant 0 : i32
    return %arg0, %c0_i32, %c0_i32_0 : i32, i32, i32
  }
}

</mosaic_0001>

<bundles_post_ra>
// kernel: forward.1
= control target key start
LH: loop header
LB: loop body
LE: loop exit
PB: predicated region body
PF: predicated region fallthrough
CT: control target
= control target key end

     0   :  { %18 = vsyncpa [#allocation3], 0  ;;  %s11557_s0 = inlined_call_operand.vmem [shape: f32[1,75,225], index: 0, kind: input, shape index: {}]   ;;  %s11558_s1 = inlined_call_operand.hbm [shape: f32[8,32,75], index: 1, kind: input, shape index: {}]   ;;  %s11559_s2 = inlined_call_operand.hbm [shape: f32[8,225,32], index: 2, kind: input, shape index: {}]   ;;  %s11560_s3 = inlined_call_operand.vmem [shape: f32[1,32], index: 3, kind: input, shape index: {}]   ;;  %s11561_s4 = inlined_call_operand.hbm [shape: f32[2,16,32], index: 4, kind: input, shape index: {}]   ;;  %s11562_s5 = inlined_call_operand.hbm [shape: f32[2,32,432], index: 5, kind: input, shape index: {}]   ;;  %s11563_s6 = inlined_call_operand.hbm [shape: f32[1,432], index: 6, kind: input, shape index: {}]   ;;  %s11564_s7 = inlined_call_operand.hbm [shape: f32[4,15,16], index: 7, kind: input, shape index: {}]   ;;  %s11565_s8 = inlined_call_operand.hbm [shape: f32[4,432,600], index: 8, kind: input, shape index: {}]   ;;  %s11566_s9 = inlined_call_operand.hbm [shape: f32[1,600], index: 9, kind: input, shape index: {}]   ;;  %s11567_s10 = inlined_call_operand.hbm [shape: f32[4,7,15], index: 10, kind: input, shape index: {}]   ;;  %s11568_s11 = inlined_call_operand.hbm [shape: f32[4,600,189], index: 11, kind: input, shape index: {}]   ;;  %s11569_s12 = inlined_call_operand.hbm [shape: f32[1,189], index: 12, kind: input, shape index: {}]   ;;  %s11570_s13 = inlined_call_operand.vmem [shape: f32[1,7,189], index: 13, kind: output, shape index: {}]  }
   0x1   :  { %19 = vsyncpa [#allocation5], 0 }
   0x2   :  { %20 = vsyncpa [#allocation8], 0 }
   0x3   :  { %21 = vsyncpa [#allocation11], 0 }
   0x4   :  { %22 = vsyncpa [#allocation14], 0 }
   0x5   :  { %23 = vsyncpa [#allocation17], 0  ;;  %s9967_s25 = smov [#allocation4]   ;;  %s9968_s27 = smov [#allocation7]  }
   0x6   :  { %s43_s26 = sshll.u32 %s9967_s25, 4  ;;  %s69_s28 = sshll.u32 %s9968_s27, 4  ;;  %s44_s26 = int_to_ptr.vmem [resolvable:$true] %s43_s26  ;;  %s70_s28 = int_to_ptr.vmem [resolvable:$true] %s69_s28 }
   0x7   :  { %s9743_s29 = scalar_lea.vmem %s44_s26, 29696  ;;  %p9748_p1 = scmp.lt.s32.totalorder %s44_s26, %s44_s26 }
   0x8   :  { %p9744_p0 = scmp.ne.s32.totalorder %s44_s26, %s9743_s29  ;;  %p9749_p2 = scmp.lt.s32.totalorder %s9743_s29, %s9743_s29 }
   0xa   :  { %p9750_p3 = por %p9749_p2, %p9748_p1 }
   0xc   :  { %p9751_p4 = pnand %p9750_p3, %p9744_p0 }
   0xe   :  { %9754 = shalt.err (!%p9751_p4)
}
   0xf   :  { %s9969_s30 = smov 128   ;;  %s9970_s14 = smov 8  }
  0x10   :  { %49 = dma.hbm_to_vmem [thread:$0]  %s11559_s2, 29696, %s44_s26, [#allocation5], %s9969_s30, %s9969_s30, %s9970_s14  }
  0x11   :  { %s9763_s17 = scalar_lea.vmem %s70_s28, 4096  ;;  %p9768_p6 = scmp.lt.s32.totalorder %s70_s28, %s70_s28 }
  0x12   :  { %p9764_p5 = scmp.ne.s32.totalorder %s70_s28, %s9763_s17  ;;  %p9769_p7 = scmp.lt.s32.totalorder %s9763_s17, %s9763_s17 }
  0x14   :  { %p9770_p8 = por %p9769_p7, %p9768_p6 }
  0x16   :  { %p9771_p9 = pnand %p9770_p8, %p9764_p5 }
  0x18   :  { %9774 = shalt.err (!%p9771_p9)
}
  0x19   :  { %s9971_s18 = smov 512   ;;  %s9972_s19 = smov 32  }
  0x1a   :  { %75 = dma.hbm_to_vmem [thread:$0]  %s11562_s5, 4096, %s70_s28, [#allocation8], %s9971_s18, %s9971_s18, %s9972_s19  }
  0x1b   :  { %s9973_s22 = smov [#allocation10]   ;;  %s9974_s24 = smov [#allocation13]  }
  0x1c   :  { %s91_s23 = sshll.u32 %s9973_s22, 4  ;;  %s116_s25 = sshll.u32 %s9974_s24, 4  ;;  %s92_s23 = int_to_ptr.vmem [resolvable:$true] %s91_s23  ;;  %s117_s25 = int_to_ptr.vmem [resolvable:$true] %s116_s25 }
  0x1d   :  { %s9783_s2 = scalar_lea.vmem %s92_s23, 1024  ;;  %p9788_p11 = scmp.lt.s32.totalorder %s92_s23, %s92_s23 }
  0x1e   :  { %p9784_p10 = scmp.ne.s32.totalorder %s92_s23, %s9783_s2  ;;  %p9789_p12 = scmp.lt.s32.totalorder %s9783_s2, %s9783_s2 }
  0x20   :  { %p9790_p13 = por %p9789_p12, %p9788_p11 }
  0x22   :  { %p9791_p0 = pnand %p9790_p13, %p9784_p10 }
  0x24   :  { %9794 = shalt.err (!%p9791_p0)
}
  0x25   :  { %97 = dma.hbm_to_vmem [thread:$0]  %s11564_s7, 1024, %s92_s23, [#allocation11], %s9969_s30, %s9969_s30, %s9970_s14  }
  0x26   :  { %s9803_s5 = scalar_lea.vmem %s117_s25, 80  ;;  %s9807_s28 = scalar_lea.vmem %s117_s25, 96 }
  0x27   :  { %p9804_p1 = scmp.ne.s32.totalorder %s117_s25, %s9803_s5  ;;  %p9808_p2 = scmp.lt.s32.totalorder %s117_s25, %s117_s25 }
  0x28   :  { %p9809_p3 = scmp.lt.s32.totalorder %s9807_s28, %s9803_s5 }
  0x2a   :  { %p9810_p4 = por %p9809_p3, %p9808_p2 }
  0x2c   :  { %p9811_p5 = pnand %p9810_p4, %p9804_p1 }
  0x2e   :  { %9814 = shalt.err (!%p9811_p5)
}
  0x2f   :  { %119 = dma.hbm_to_vmem [thread:$0]  %s11566_s9, 80, %s117_s25, [#allocation14]  }
  0x30   :  { %s9975_s16 = smov [#allocation16]  }
  0x31   :  { %s137_s17 = sshll.u32 %s9975_s16, 4  ;;  %s138_s17 = int_to_ptr.vmem [resolvable:$true] %s137_s17 }
  0x32   :  { %s9823_s18 = scalar_lea.vmem %s138_s17, 76800  ;;  %p9828_p7 = scmp.lt.s32.totalorder %s138_s17, %s138_s17 }
  0x33   :  { %p9824_p6 = scmp.ne.s32.totalorder %s138_s17, %s9823_s18  ;;  %p9829_p8 = scmp.lt.s32.totalorder %s9823_s18, %s9823_s18 }
  0x35   :  { %p9830_p9 = por %p9829_p8, %p9828_p7 }
  0x37   :  { %p9831_p10 = pnand %p9830_p9, %p9824_p6 }
  0x39   :  { %9834 = shalt.err (!%p9831_p10)
}
  0x3a   :  { %s9976_s7 = smov 256   ;;  %s9977_s19 = smov 16  }
  0x3b   :  { %143 = dma.hbm_to_vmem [thread:$0]  %s11568_s11, 76800, %s138_s17, [#allocation17], %s9976_s7, %s9976_s7, %s9977_s19  }
  0x3c   :  { %s9978_s22 = smov [#allocation2]   ;;  %s9979_s9 = smov [#allocation6]  }
  0x3d   :  { %s31_s23 = sshll.u32 %s9978_s22, 4  ;;  %s57_s24 = sshll.u32 %s9979_s9, 4  ;;  %s32_s23 = int_to_ptr.vmem [resolvable:$true] %s31_s23  ;;  %s58_s24 = int_to_ptr.vmem [resolvable:$true] %s57_s24 }
  0x3e   :  { %s9843_s25 = scalar_lea.vmem %s32_s23, 4096  ;;  %p9848_p12 = scmp.lt.s32.totalorder %s32_s23, %s32_s23 }
  0x3f   :  { %p9844_p11 = scmp.ne.s32.totalorder %s32_s23, %s9843_s25  ;;  %p9849_p13 = scmp.lt.s32.totalorder %s9843_s25, %s9843_s25 }
  0x41   :  { %p9850_p0 = por %p9849_p13, %p9848_p12 }
  0x43   :  { %p9851_p1 = pnand %p9850_p0, %p9844_p11 }
  0x45   :  { %9854 = shalt.err (!%p9851_p1)
}
  0x46   :  { %37 = dma.hbm_to_vmem [thread:$0]  %s11558_s1, 4096, %s32_s23, [#allocation3], %s9969_s30, %s9969_s30, %s9970_s14  }
  0x47   :  { %s9863_s11 = scalar_lea.vmem %s58_s24, 512  ;;  %p9868_p3 = scmp.lt.s32.totalorder %s58_s24, %s58_s24 }
  0x48   :  { %p9864_p2 = scmp.ne.s32.totalorder %s58_s24, %s9863_s11  ;;  %p9869_p4 = scmp.lt.s32.totalorder %s9863_s11, %s9863_s11 }
  0x4a   :  { %p9870_p5 = por %p9869_p4, %p9868_p3 }
  0x4c   :  { %p9871_p6 = pnand %p9870_p5, %p9864_p2 }
  0x4e   :  { %9874 = shalt.err (!%p9871_p6)
}
  0x4f   :  { %63 = dma.hbm_to_vmem [thread:$0]  %s11561_s4, 512, %s58_s24, [#allocation5], %s9969_s30, %s9969_s30, %s9970_s14  }
  0x50   :  { %s9980_s28 = smov [#allocation9]   ;;  %s9981_s15 = smov [#allocation12]  }
  0x51   :  { %s82_s29 = sshll.u32 %s9980_s28, 4  ;;  %s103_s1 = sshll.u32 %s9981_s15, 4  ;;  %s83_s29 = int_to_ptr.vmem [resolvable:$true] %s82_s29  ;;  %s104_s1 = int_to_ptr.vmem [resolvable:$true] %s103_s1 }
  0x52   :  { %s9883_s16 = scalar_lea.vmem %s83_s29, 64  ;;  %p9888_p8 = scmp.lt.s32.totalorder %s83_s29, %s83_s29 }
  0x53   :  { %p9884_p7 = scmp.ne.s32.totalorder %s83_s29, %s9883_s16  ;;  %p9889_p9 = scmp.lt.s32.totalorder %s9883_s16, %s9883_s16 }
  0x55   :  { %p9890_p10 = por %p9889_p9, %p9888_p8 }
  0x57   :  { %p9891_p11 = pnand %p9890_p10, %p9884_p7 }
  0x59   :  { %9894 = shalt.err (!%p9891_p11)
}
  0x5a   :  { %85 = dma.hbm_to_vmem [thread:$0]  %s11563_s6, 64, %s83_s29, [#allocation8]  }
  0x5b   :  { %s9903_s7 = scalar_lea.vmem %s104_s1, 138240  ;;  %p9908_p13 = scmp.lt.s32.totalorder %s104_s1, %s104_s1 }
  0x5c   :  { %p9904_p12 = scmp.ne.s32.totalorder %s104_s1, %s9903_s7  ;;  %p9909_p0 = scmp.lt.s32.totalorder %s9903_s7, %s9903_s7 }
  0x5e   :  { %p9910_p1 = por %p9909_p0, %p9908_p13 }
  0x60   :  { %p9911_p2 = pnand %p9910_p1, %p9904_p12 }
  0x62   :  { %9914 = shalt.err (!%p9911_p2)
}
  0x63   :  { %s9982_s4 = smov 640   ;;  %s9983_s19 = smov 40  }
  0x64   :  { %109 = dma.hbm_to_vmem [thread:$0]  %s11565_s8, 138240, %s104_s1, [#allocation11], %s9982_s4, %s9982_s4, %s9983_s19  }
  0x65   :  { %s9984_s22 = smov [#allocation15]   ;;  %s9985_s9 = smov [#allocation18]  }
  0x66   :  { %s125_s23 = sshll.u32 %s9984_s22, 4  ;;  %s150_s24 = sshll.u32 %s9985_s9, 4  ;;  %s126_s23 = int_to_ptr.vmem [resolvable:$true] %s125_s23  ;;  %s151_s24 = int_to_ptr.vmem [resolvable:$true] %s150_s24 }
  0x67   :  { %s9923_s6 = scalar_lea.vmem %s126_s23, 512  ;;  %p9928_p4 = scmp.lt.s32.totalorder %s126_s23, %s126_s23 }
  0x68   :  { %p9924_p3 = scmp.ne.s32.totalorder %s126_s23, %s9923_s6  ;;  %p9929_p5 = scmp.lt.s32.totalorder %s9923_s6, %s9923_s6 }
  0x6a   :  { %p9930_p6 = por %p9929_p5, %p9928_p4 }
  0x6c   :  { %p9931_p7 = pnand %p9930_p6, %p9924_p3 }
  0x6e   :  { %9934 = shalt.err (!%p9931_p7)
}
  0x6f   :  { %131 = dma.hbm_to_vmem [thread:$0]  %s11567_s10, 512, %s126_s23, [#allocation14], %s9969_s30, %s9969_s30, %s9970_s14  }
  0x70   :  { %s9943_s8 = scalar_lea.vmem %s151_s24, 32  ;;  %p9948_p9 = scmp.lt.s32.totalorder %s151_s24, %s151_s24 }
  0x71   :  { %p9944_p8 = scmp.ne.s32.totalorder %s151_s24, %s9943_s8  ;;  %p9949_p10 = scmp.lt.s32.totalorder %s9943_s8, %s9943_s8 }
  0x73   :  { %p9950_p11 = por %p9949_p10, %p9948_p9 }
  0x75   :  { %p9951_p12 = pnand %p9950_p11, %p9944_p8 }
  0x77   :  { %9954 = shalt.err (!%p9951_p12)
}
  0x78   :  { %153 = dma.hbm_to_vmem [thread:$0]  %s11569_s12, 32, %s151_s24, [#allocation17]  }
  0x79   :  { %9955 = dma.done.wait [#allocation3], 4096  }
  0x7a   :  { %9956 = vsyncadd [#allocation3], 4294963200 }
  0x7b   :  { %9957 = dma.done.wait [#allocation5], 30208  }
  0x7c   :  { %9958 = vsyncadd [#allocation5], 4294937088 }
  0x7d   :  { %9959 = dma.done.wait [#allocation8], 4160  }
  0x7e   :  { %9960 = vsyncadd [#allocation8], 4294963136 }
  0x7f   :  { %9961 = dma.done.wait [#allocation11], 139264  }
  0x80   :  { %9962 = vsyncadd [#allocation11], 4294828032 }
  0x81   :  { %9963 = dma.done.wait [#allocation14], 592  }
  0x82   :  { %9964 = vsyncadd [#allocation14], 4294966704 }
  0x83   :  { %9965 = dma.done.wait [#allocation17], 76832  }
  0x84   :  { %9966 = vsyncadd [#allocation17], 4294890464  ;;  %v9986_v0 = vmov 0.0   ;;  %v222_v1 = vld [vmem:[#allocation4 + $0x78] sm:$0xff]  ;;  %v406_v2 = vld [vmem:[#allocation4 + $0x160] sm:$0xff]  ;;  %vm267_vm0 = vcmask 1040384  }
  0x85   :  { %271 = vmatprep.subr.mxu0 %v9986_v0  ;;  %423 = vmatprep.subr.mxu1 %v9986_v0  ;;  %v221_v3 = vld [vmem:[#allocation4 + $0x70] sm:$0xff]  ;;  %v405_v4 = vld [vmem:[#allocation4 + $0x158] sm:$0xff]  ;;  %v220_v5 = vld [vmem:[#allocation4 + $0x68] sm:$0xff]  ;;  %vm236_vm1 = vcmask 793600   ;;  %vm543_vm2 = vcmask 613376   ;;  %vm556_vm3 = vcmask 1042432  }
  0x86   :  { %272 = vmatpush1.msra.mxu0 %v222_v1  ;;  %424 = vmatpush1.msra.mxu1 %v406_v2  ;;  %v404_v6 = vld [vmem:[#allocation4 + $0x150] sm:$0xff]  ;;  %v219_v7 = vld [vmem:[#allocation4 + $0x60] sm:$0xff]  ;;  %v403_v8 = vld [vmem:[#allocation4 + $0x148] sm:$0xff]  ;;  %vm2318_vm4 = vcmask 261120   ;;  %vm3337_vm5 = vcmask 392192   ;;  %vm4536_vm6 = vcmask 130048  }
  0x87   :  { %273 = vmatprep.subr.mxu0 %v9986_v0  ;;  %425 = vmatprep.subr.mxu1 %v9986_v0  ;;  %v218_v9 = vld [vmem:[#allocation4 + $0x58] sm:$0xff]  ;;  %v402_v10 = vld [vmem:[#allocation4 + $0x140] sm:$0xff]  ;;  %v217_v11 = vld [vmem:[#allocation4 + $0x50] sm:$0xff]  ;;  %vm7158_vm7 = vcmask 719872   ;;  %vm7785_vm8 = vcmask 1046528   ;;  %vm7781_vm9 = vcmask 121856  }
  0x88   :  { %274 = vmatpush1.msra.mxu0 %v221_v3  ;;  %426 = vmatpush1.msra.mxu1 %v405_v4  ;;  %v401_v12 = vld [vmem:[#allocation4 + $0x138] sm:$0xff]  ;;  %v216_v13 = vld [vmem:[#allocation4 + $0x48] sm:$0xff]  ;;  %v400_v14 = vld [vmem:[#allocation4 + $0x130] sm:$0xff]  ;;  %vm8892_vm10 = vcmask 497664  }
  0x89   :  { %275 = vmatprep.subr.mxu0 %v9986_v0  ;;  %427 = vmatprep.subr.mxu1 %v9986_v0  ;;  %v215_v15 = vld [vmem:[#allocation4 + $0x40] sm:$0xff]  ;;  %v399_v16 = vld [vmem:[#allocation4 + $0x128] sm:$0xff]  ;;  %v214_v17 = vld [vmem:[#allocation4 + $0x38] sm:$0xff] }
  0x8a   :  { %276 = vmatpush1.msra.mxu0 %v220_v5  ;;  %428 = vmatpush1.msra.mxu1 %v404_v6  ;;  %v398_v18 = vld [vmem:[#allocation4 + $0x120] sm:$0xff]  ;;  %v213_v19 = vld [vmem:[#allocation4 + $0x30] sm:$0xff]  ;;  %v397_v20 = vld [vmem:[#allocation4 + $0x118] sm:$0xff] }
  0x8b   :  { %277 = vmatprep.subr.mxu0 %v9986_v0  ;;  %429 = vmatprep.subr.mxu1 %v9986_v0  ;;  %v212_v21 = vld [vmem:[#allocation4 + $0x28] sm:$0xff]  ;;  %v396_v22 = vld [vmem:[#allocation4 + $0x110] sm:$0xff]  ;;  %v211_v23 = vld [vmem:[#allocation4 + $0x20] sm:$0xff] }
  0x8c   :  { %278 = vmatpush1.msra.mxu0 %v219_v7  ;;  %430 = vmatpush1.msra.mxu1 %v403_v8  ;;  %v395_v24 = vld [vmem:[#allocation4 + $0x108] sm:$0xff]  ;;  %v210_v25 = vld [vmem:[#allocation4 + $0x18] sm:$0xff]  ;;  %v394_v26 = vld [vmem:[#allocation4 + $0x100] sm:$0xff] }
  0x8d   :  { %279 = vmatprep.subr.mxu0 %v9986_v0  ;;  %431 = vmatprep.subr.mxu1 %v9986_v0  ;;  %v209_v27 = vld [vmem:[#allocation4 + $0x10] sm:$0xff]  ;;  %v393_v28 = vld [vmem:[#allocation4 + $0xf8] sm:$0xff]  ;;  %v208_v29 = vld [vmem:[#allocation4 + $0x8] sm:$0xff] }
  0x8e   :  { %280 = vmatpush1.msra.mxu0 %v218_v9  ;;  %432 = vmatpush1.msra.mxu1 %v402_v10  ;;  %v392_v30 = vld [vmem:[#allocation4 + $0xf0] sm:$0xff]  ;;  %v207_v31 = vld [vmem:[#allocation4] sm:$0xff]  ;;  %v391_v32 = vld [vmem:[#allocation4 + $0xe8] sm:$0xff] }
  0x8f   :  { %281 = vmatprep.subr.mxu0 %v9986_v0  ;;  %433 = vmatprep.subr.mxu1 %v9986_v0  ;;  %v235_v33 = vld [vmem:[#allocation4 + $0xe0] sm:$0x1]  ;;  %v419_v34 = vld [vmem:[#allocation4 + $0x1c8] sm:$0x1]  ;;  %v234_v35 = vld [vmem:[#allocation4 + $0xd8] sm:$0xff] }
  0x90   :  { %282 = vmatpush1.msra.mxu0 %v217_v11  ;;  %434 = vmatpush1.msra.mxu1 %v401_v12  ;;  %v418_v36 = vld [vmem:[#allocation4 + $0x1c0] sm:$0xff]  ;;  %v233_v37 = vld [vmem:[#allocation4 + $0xd0] sm:$0xff]  ;;  %v417_v38 = vld [vmem:[#allocation4 + $0x1b8] sm:$0xff] }
  0x91   :  { %283 = vmatprep.subr.mxu0 %v9986_v0  ;;  %435 = vmatprep.subr.mxu1 %v9986_v0  ;;  %v232_v39 = vld [vmem:[#allocation4 + $0xc8] sm:$0xff]  ;;  %v416_v40 = vld [vmem:[#allocation4 + $0x1b0] sm:$0xff]  ;;  %v231_v41 = vld [vmem:[#allocation4 + $0xc0] sm:$0xff] }
  0x92   :  { %284 = vmatpush1.msra.mxu0 %v216_v13  ;;  %436 = vmatpush1.msra.mxu1 %v400_v14  ;;  %v415_v42 = vld [vmem:[#allocation4 + $0x1a8] sm:$0xff]  ;;  %v230_v43 = vld [vmem:[#allocation4 + $0xb8] sm:$0xff]  ;;  %v414_v44 = vld [vmem:[#allocation4 + $0x1a0] sm:$0xff] }
  0x93   :  { %285 = vmatprep.subr.mxu0 %v9986_v0  ;;  %437 = vmatprep.subr.mxu1 %v9986_v0  ;;  %v229_v45 = vld [vmem:[#allocation4 + $0xb0] sm:$0xff]  ;;  %v413_v46 = vld [vmem:[#allocation4 + $0x198] sm:$0xff]  ;;  %v228_v47 = vld [vmem:[#allocation4 + $0xa8] sm:$0xff] }
  0x94   :  { %286 = vmatpush1.msra.mxu0 %v215_v15  ;;  %438 = vmatpush1.msra.mxu1 %v399_v16  ;;  %v412_v48 = vld [vmem:[#allocation4 + $0x190] sm:$0xff]  ;;  %v227_v49 = vld [vmem:[#allocation4 + $0xa0] sm:$0xff]  ;;  %v411_v50 = vld [vmem:[#allocation4 + $0x188] sm:$0xff] }
  0x95   :  { %287 = vmatprep.subr.mxu0 %v9986_v0  ;;  %439 = vmatprep.subr.mxu1 %v9986_v0  ;;  %v226_v51 = vld [vmem:[#allocation4 + $0x98] sm:$0xff]  ;;  %v410_v52 = vld [vmem:[#allocation4 + $0x180] sm:$0xff]  ;;  %v225_v53 = vld [vmem:[#allocation4 + $0x90] sm:$0xff] }
  0x96   :  { %288 = vmatpush1.msra.mxu0 %v214_v17  ;;  %440 = vmatpush1.msra.mxu1 %v398_v18  ;;  %v409_v54 = vld [vmem:[#allocation4 + $0x178] sm:$0xff]  ;;  %v224_v55 = vld [vmem:[#allocation4 + $0x88] sm:$0xff]  ;;  %v408_v56 = vld [vmem:[#allocation4 + $0x170] sm:$0xff] }
  0x97   :  { %289 = vmatprep.subr.mxu0 %v9986_v0  ;;  %441 = vmatprep.subr.mxu1 %v9986_v0  ;;  %v223_v57 = vld [vmem:[#allocation4 + $0x80] sm:$0xff]  ;;  %v10166_v58 = vld [vmem:[%s11557_s0 + $0x8] sm:$0xff]  ;;  %v10180_v61 = vld [vmem:[%s11557_s0 + $0x18] sm:$0xff] }
  0x98   :  { %290 = vmatpush1.msra.mxu0 %v213_v19  ;;  %442 = vmatpush1.msra.mxu1 %v397_v20  ;;  %v407_v59 = vld [vmem:[#allocation4 + $0x168] sm:$0xff]  ;;  %v10173_v60 = vld [vmem:[%s11557_s0] sm:$0xff]  ;;  %v10193_v62 = vld [vmem:[%s11557_s0 + $0x10] sm:$0xff] }
  0x99   :  { %291 = vmatprep.subr.mxu0 %v9986_v0  ;;  %443 = vmatprep.subr.mxu1 %v9986_v0  ;;  %v10198_v63 = vld [vmem:[%s11557_s0 + $0x28] sm:$0xff]  ;;  %v10209_v1 = vld [vmem:[%s11557_s0 + $0x20] sm:$0xff]  ;;  %v10214_v2 = vld [vmem:[%s11557_s0 + $0x38] sm:$0xff] }
  0x9a   :  { %292 = vmatpush1.msra.mxu0 %v212_v21  ;;  %444 = vmatpush1.msra.mxu1 %v396_v22  ;;  %v10225_v3 = vld [vmem:[%s11557_s0 + $0x30] sm:$0xff]  ;;  %v10230_v4 = vld [vmem:[%s11557_s0 + $0x48] sm:$0xff]  ;;  %v10241_v5 = vld [vmem:[%s11557_s0 + $0x40] sm:$0xff] }
  0x9b   :  { %293 = vmatprep.subr.mxu0 %v9986_v0  ;;  %445 = vmatprep.subr.mxu1 %v9986_v0  ;;  %v10246_v6 = vld [vmem:[%s11557_s0 + $0x58] sm:$0xff]  ;;  %v10257_v7 = vld [vmem:[%s11557_s0 + $0x50] sm:$0xff]  ;;  %v10262_v8 = vld [vmem:[%s11557_s0 + $0x68] sm:$0xff] }
  0x9c   :  { %294 = vmatpush1.msra.mxu0 %v211_v23  ;;  %446 = vmatpush1.msra.mxu1 %v395_v24  ;;  %v10273_v9 = vld [vmem:[%s11557_s0 + $0x60] sm:$0xff]  ;;  %v10278_v10 = vld [vmem:[%s11557_s0 + $0x78] sm:$0xff]  ;;  %v10289_v11 = vld [vmem:[%s11557_s0 + $0x70] sm:$0xff] }
  0x9d   :  { %295 = vmatprep.subr.mxu0 %v9986_v0  ;;  %447 = vmatprep.subr.mxu1 %v9986_v0  ;;  %v10294_v12 = vld [vmem:[%s11557_s0 + $0x88] sm:$0xff]  ;;  %v10305_v13 = vld [vmem:[%s11557_s0 + $0x80] sm:$0xff]  ;;  %v10310_v14 = vld [vmem:[%s11557_s0 + $0x98] sm:$0x7] }
  0x9e   :  { %296 = vmatpush1.msra.mxu0 %v210_v25  ;;  %448 = vmatpush1.msra.mxu1 %v394_v26  ;;  %v10321_v15 = vld [vmem:[%s11557_s0 + $0x90] sm:$0x7]  ;;  %v539_v16 = vld [vmem:[#allocation2 + $0x20] sm:$0xff] }
  0x9f   :  { %297 = vmatprep.subr.mxu0 %v9986_v0  ;;  %449 = vmatprep.subr.mxu1 %v9986_v0  ;;  %v386_v17 = vld [vmem:[#allocation2] sm:$0xff] }
  0xa0   :  { %298 = vmatpush1.msra.mxu0 %v209_v27  ;;  %450 = vmatpush1.msra.mxu1 %v393_v28 }
  0xa1   :  { %299 = vmatprep.subr.mxu0 %v9986_v0  ;;  %451 = vmatprep.subr.mxu1 %v9986_v0 }
  0xa2   :  { %300 = vmatpush1.msra.mxu0 %v208_v29  ;;  %452 = vmatpush1.msra.mxu1 %v392_v30 }
  0xa3   :  { %301 = vmatprep.subr.mxu0 %v9986_v0  ;;  %453 = vmatprep.subr.mxu1 %v9986_v0 }
  0xa4   :  { %302 = vmatpush1.msra.mxu0 %v207_v31  ;;  %454 = vmatpush1.msra.mxu1 %v391_v32 }
  0xa5   :  { %309 = vmatprep.subr.mxu0 %v9986_v0  ;;  %461 = vmatprep.subr.mxu1 %v9986_v0 }
  0xa6   :  { %8904 = vmatpush2.msk.msra.mxu0 %vm267_vm0, %v235_v33  ;;  %8915 = vmatpush2.msk.msra.mxu1 %vm267_vm0, %v419_v34 }
  0xa7   :  { %311 = vmatprep.subr.mxu0 %v9986_v0  ;;  %463 = vmatprep.subr.mxu1 %v9986_v0 }
  0xa8   :  { %312 = vmatpush2.msra.mxu0 %v234_v35  ;;  %464 = vmatpush2.msra.mxu1 %v418_v36 }
  0xa9   :  { %313 = vmatprep.subr.mxu0 %v9986_v0  ;;  %465 = vmatprep.subr.mxu1 %v9986_v0 }
  0xaa   :  { %314 = vmatpush2.msra.mxu0 %v233_v37  ;;  %466 = vmatpush2.msra.mxu1 %v417_v38 }
  0xab   :  { %315 = vmatprep.subr.mxu0 %v9986_v0  ;;  %467 = vmatprep.subr.mxu1 %v9986_v0 }
  0xac   :  { %316 = vmatpush2.msra.mxu0 %v232_v39  ;;  %468 = vmatpush2.msra.mxu1 %v416_v40 }
  0xad   :  { %317 = vmatprep.subr.mxu0 %v9986_v0  ;;  %469 = vmatprep.subr.mxu1 %v9986_v0 }
  0xae   :  { %318 = vmatpush2.msra.mxu0 %v231_v41  ;;  %470 = vmatpush2.msra.mxu1 %v415_v42 }
  0xaf   :  { %319 = vmatprep.subr.mxu0 %v9986_v0  ;;  %471 = vmatprep.subr.mxu1 %v9986_v0 }
  0xb0   :  { %320 = vmatpush2.msra.mxu0 %v230_v43  ;;  %472 = vmatpush2.msra.mxu1 %v414_v44 }
  0xb1   :  { %321 = vmatprep.subr.mxu0 %v9986_v0  ;;  %473 = vmatprep.subr.mxu1 %v9986_v0 }
  0xb2   :  { %322 = vmatpush2.msra.mxu0 %v229_v45  ;;  %474 = vmatpush2.msra.mxu1 %v413_v46 }
  0xb3   :  { %323 = vmatprep.subr.mxu0 %v9986_v0  ;;  %475 = vmatprep.subr.mxu1 %v9986_v0 }
  0xb4   :  { %324 = vmatpush2.msra.mxu0 %v228_v47  ;;  %476 = vmatpush2.msra.mxu1 %v412_v48 }
  0xb5   :  { %325 = vmatprep.subr.mxu0 %v9986_v0  ;;  %477 = vmatprep.subr.mxu1 %v9986_v0 }
  0xb6   :  { %326 = vmatpush2.msra.mxu0 %v227_v49  ;;  %478 = vmatpush2.msra.mxu1 %v411_v50 }
  0xb7   :  { %327 = vmatprep.subr.mxu0 %v9986_v0  ;;  %479 = vmatprep.subr.mxu1 %v9986_v0 }
  0xb8   :  { %328 = vmatpush2.msra.mxu0 %v226_v51  ;;  %480 = vmatpush2.msra.mxu1 %v410_v52 }
  0xb9   :  { %329 = vmatprep.subr.mxu0 %v9986_v0  ;;  %481 = vmatprep.subr.mxu1 %v9986_v0 }
  0xba   :  { %330 = vmatpush2.msra.mxu0 %v225_v53  ;;  %482 = vmatpush2.msra.mxu1 %v409_v54 }
  0xbb   :  { %331 = vmatprep.subr.mxu0 %v9986_v0  ;;  %483 = vmatprep.subr.mxu1 %v9986_v0 }
  0xbc   :  { %332 = vmatpush2.msra.mxu0 %v224_v55  ;;  %484 = vmatpush2.msra.mxu1 %v408_v56 }
  0xbd   :  { %333 = vmatprep.subr.mxu0 %v9986_v0  ;;  %485 = vmatprep.subr.mxu1 %v9986_v0 }
  0xbe   :  { %334 = vmatpush2.msra.mxu0 %v223_v57  ;;  %8905 = vmatprep.mubr.msk.f32.mxu0 %vm236_vm1, %v10166_v58 }
  0xbf   :  { %486 = vmatpush2.msra.mxu1 %v407_v59  ;;  %8916 = vmatprep.mubr.msk.f32.mxu1 %vm236_vm1, %v10166_v58  ;;  %v540_v59 = vld [vmem:[#allocation2 + $0x28] sm:$0xff] }
  0xc0   :  { %336 = vmatmul.mubr.f32.vlgmr.msra.gmra.mxu0 %v10173_v60  ;;  %488 = vmatmul.mubr.f32.vlgmr.msra.gmra.mxu1 %v10173_v60 }
  0xc1   :  { %8906 = vmatprep.mubr.msk.f32.mxu0 %vm236_vm1, %v10180_v61  ;;  %8917 = vmatprep.mubr.msk.f32.mxu1 %vm236_vm1, %v10180_v61 }
  0xc4   :  { %341 = vmatmul.mubr.f32.gmra.mxu0 %v10193_v62  ;;  %493 = vmatmul.mubr.f32.gmra.mxu1 %v10193_v62 }
  0xc5   :  { %8907 = vmatprep.mubr.msk.f32.mxu0 %vm236_vm1, %v10198_v63  ;;  %8918 = vmatprep.mubr.msk.f32.mxu1 %vm236_vm1, %v10198_v63 }
  0xc8   :  { %346 = vmatmul.mubr.f32.gmra.mxu0 %v10209_v1  ;;  %498 = vmatmul.mubr.f32.gmra.mxu1 %v10209_v1 }
  0xc9   :  { %8908 = vmatprep.mubr.msk.f32.mxu0 %vm236_vm1, %v10214_v2  ;;  %8919 = vmatprep.mubr.msk.f32.mxu1 %vm236_vm1, %v10214_v2 }
  0xcc   :  { %351 = vmatmul.mubr.f32.gmra.mxu0 %v10225_v3  ;;  %503 = vmatmul.mubr.f32.gmra.mxu1 %v10225_v3 }
  0xcd   :  { %8909 = vmatprep.mubr.msk.f32.mxu0 %vm236_vm1, %v10230_v4  ;;  %8920 = vmatprep.mubr.msk.f32.mxu1 %vm236_vm1, %v10230_v4 }
  0xd0   :  { %356 = vmatmul.mubr.f32.gmra.mxu0 %v10241_v5  ;;  %508 = vmatmul.mubr.f32.gmra.mxu1 %v10241_v5 }
  0xd1   :  { %8910 = vmatprep.mubr.msk.f32.mxu0 %vm236_vm1, %v10246_v6  ;;  %8921 = vmatprep.mubr.msk.f32.mxu1 %vm236_vm1, %v10246_v6 }
  0xd4   :  { %361 = vmatmul.mubr.f32.gmra.mxu0 %v10257_v7  ;;  %513 = vmatmul.mubr.f32.gmra.mxu1 %v10257_v7 }
  0xd5   :  { %8911 = vmatprep.mubr.msk.f32.mxu0 %vm236_vm1, %v10262_v8  ;;  %8922 = vmatprep.mubr.msk.f32.mxu1 %vm236_vm1, %v10262_v8 }
  0xd8   :  { %366 = vmatmul.mubr.f32.gmra.mxu0 %v10273_v9  ;;  %518 = vmatmul.mubr.f32.gmra.mxu1 %v10273_v9 }
  0xd9   :  { %8912 = vmatprep.mubr.msk.f32.mxu0 %vm236_vm1, %v10278_v10  ;;  %8923 = vmatprep.mubr.msk.f32.mxu1 %vm236_vm1, %v10278_v10 }
  0xdc   :  { %371 = vmatmul.mubr.f32.gmra.mxu0 %v10289_v11  ;;  %523 = vmatmul.mubr.f32.gmra.mxu1 %v10289_v11 }
  0xdd   :  { %8913 = vmatprep.mubr.msk.f32.mxu0 %vm236_vm1, %v10294_v12  ;;  %8924 = vmatprep.mubr.msk.f32.mxu1 %vm236_vm1, %v10294_v12 }
  0xe0   :  { %376 = vmatmul.mubr.f32.gmra.mxu0 %v10305_v13  ;;  %528 = vmatmul.mubr.f32.gmra.mxu1 %v10305_v13 }
  0xe1   :  { %8914 = vmatprep.mubr.msk.f32.mxu0 %vm236_vm1, %v10310_v14  ;;  %8925 = vmatprep.mubr.msk.f32.mxu1 %vm236_vm1, %v10310_v14 }
  0xe4   :  { %381 = vmatmul.mubr.f32.gmra.mxu0 %v10321_v15  ;;  %533 = vmatmul.mubr.f32.gmra.mxu1 %v10321_v15 }
  0xe5   :  { %9425 = vmatprep.mubr.msk.f32.mxu0 %vm543_vm2, %v539_v16  ;;  %9451 = vmatprep.mubr.msk.f32.mxu1 %vm543_vm2, %v386_v17  ;;  %v387_v16 = vld [vmem:[#allocation2 + $0x8] sm:$0xff]  ;;  %v541_v17 = vld [vmem:[#allocation2 + $0x30] sm:$0xff] }
 0x180   :  { %v10327_v18 = vpop.f32.mrf.mxu0  ;;  %v10329_v19 = vpop.f32.mrf.mxu1 }
 0x182   :  { %v339_v20 = vpop.f32.mrf.mxu0  ;;  %v491_v21 = vpop.f32.mrf.mxu1 }
 0x183   :  { %v761_v20 = vld [vmem:[#allocation4 + $0x248] sm:$0xff]  ;;  %v388_v21 = vld [vmem:[#allocation2 + $0x10] sm:$0xff] }
 0x184   :  { %v10331_v22 = vpop.f32.mrf.mxu0  ;;  %v10333_v23 = vpop.f32.mrf.mxu1 }
 0x186   :  { %v344_v24 = vpop.f32.mrf.mxu0  ;;  %v496_v25 = vpop.f32.mrf.mxu1 }
 0x187   :  { %v542_v24 = vld [vmem:[#allocation2 + $0x38] sm:$0xff]  ;;  %v757_v25 = vld [vmem:[#allocation4 + $0x228] sm:$0xff] }
 0x188   :  { %v10335_v26 = vpop.f32.mrf.mxu0  ;;  %v499_v27 = vpop.f32.mrf.mxu1 }
 0x18a   :  { %v349_v28 = vpop.f32.mrf.mxu0  ;;  %v501_v29 = vpop.f32.mrf.mxu1 }
 0x18b   :  { %v754_v28 = vld [vmem:[#allocation4 + $0x210] sm:$0xff]  ;;  %v753_v29 = vld [vmem:[#allocation4 + $0x208] sm:$0xff] }
 0x18c   :  { %v352_v30 = vpop.f32.mrf.mxu0  ;;  %v504_v31 = vpop.f32.mrf.mxu1 }
 0x18e   :  { %v354_v32 = vpop.f32.mrf.mxu0  ;;  %v506_v33 = vpop.f32.mrf.mxu1 }
 0x18f   :  { %v750_v32 = vld [vmem:[#allocation4 + $0x1f0] sm:$0xff]  ;;  %v749_v33 = vld [vmem:[#allocation4 + $0x1e8] sm:$0xff] }
 0x190   :  { %v357_v34 = vpop.f32.mrf.mxu0  ;;  %v509_v35 = vpop.f32.mrf.mxu1 }
 0x192   :  { %v359_v36 = vpop.f32.mrf.mxu0  ;;  %v511_v37 = vpop.f32.mrf.mxu1 }
 0x193   :  { %v746_v36 = vld [vmem:[#allocation4 + $0x1d0] sm:$0xff] }
 0x194   :  { %v362_v38 = vpop.f32.mrf.mxu0  ;;  %v514_v39 = vpop.f32.mrf.mxu1  ;;  %v774_v37 = vld [vmem:[#allocation4 + $0x2b0] sm:$0x1] }
 0x196   :  { %v364_v40 = vpop.f32.mrf.mxu0  ;;  %v516_v41 = vpop.f32.mrf.mxu1 }
 0x197   :  { %v771_v40 = vld [vmem:[#allocation4 + $0x298] sm:$0xff]  ;;  %v770_v41 = vld [vmem:[#allocation4 + $0x290] sm:$0xff] }
 0x198   :  { %v367_v42 = vpop.f32.mrf.mxu0  ;;  %v519_v43 = vpop.f32.mrf.mxu1 }
 0x19a   :  { %v369_v44 = vpop.f32.mrf.mxu0  ;;  %v521_v45 = vpop.f32.mrf.mxu1 }
 0x19b   :  { %v767_v44 = vld [vmem:[#allocation4 + $0x278] sm:$0xff]  ;;  %v766_v45 = vld [vmem:[#allocation4 + $0x270] sm:$0xff] }
 0x19c   :  { %v372_v46 = vpop.f32.mrf.mxu0  ;;  %v524_v47 = vpop.f32.mrf.mxu1 }
 0x19e   :  { %v374_v48 = vpop.f32.mrf.mxu0  ;;  %v526_v49 = vpop.f32.mrf.mxu1 }
 0x19f   :  { %v763_v48 = vld [vmem:[#allocation4 + $0x258] sm:$0xff]  ;;  %v762_v49 = vld [vmem:[#allocation4 + $0x250] sm:$0xff] }
 0x1a0   :  { %v377_v50 = vpop.f32.mrf.mxu0  ;;  %v529_v51 = vpop.f32.mrf.mxu1 }
 0x1a2   :  { %v379_v52 = vpop.f32.mrf.mxu0  ;;  %v531_v53 = vpop.f32.mrf.mxu1 }
 0x1a4   :  { %v382_v54 = vpop.f32.mrf.mxu0  ;;  %v534_v55 = vpop.f32.mrf.mxu1 }
 0x1a5   :  { %9405 = vmatprep.subr.msk.mxu0 %vm556_vm3, %v534_v55  ;;  %9431 = vmatprep.subr.msk.mxu1 %vm556_vm3, %v382_v54 }
 0x1a6   :  { %v536_v56 = vpop.f32.mrf.mxu1  ;;  %9406 = vmatpush3.msk.msra.mxu0 %vm556_vm3, %v534_v55  ;;  %9432 = vmatpush3.msk.msra.mxu1 %vm556_vm3, %v382_v54  ;;  %v384_v57 = vpop.f32.mrf.mxu0 }
 0x1a7   :  { %9407 = vmatprep.subr.mxu0 %v529_v51  ;;  %9433 = vmatprep.subr.mxu1 %v377_v50 }
 0x1a8   :  { %9408 = vmatpush3.msra.mxu0 %v529_v51  ;;  %9434 = vmatpush3.msra.mxu1 %v377_v50  ;;  %v894_v50 = vld [vmem:[#allocation2 + $0x40] sm:$0xff] }
 0x1a9   :  { %9409 = vmatprep.subr.mxu0 %v524_v47  ;;  %9435 = vmatprep.subr.mxu1 %v372_v46 }
 0x1aa   :  { %9410 = vmatpush3.msra.mxu0 %v524_v47  ;;  %9436 = vmatpush3.msra.mxu1 %v372_v46  ;;  %v765_v46 = vld [vmem:[#allocation4 + $0x268] sm:$0xff]  ;;  %v764_v47 = vld [vmem:[#allocation4 + $0x260] sm:$0xff] }
 0x1ab   :  { %9411 = vmatprep.subr.mxu0 %v519_v43  ;;  %9437 = vmatprep.subr.mxu1 %v367_v42 }
 0x1ac   :  { %9412 = vmatpush3.msra.mxu0 %v519_v43  ;;  %9438 = vmatpush3.msra.mxu1 %v367_v42  ;;  %v769_v42 = vld [vmem:[#allocation4 + $0x288] sm:$0xff]  ;;  %v768_v43 = vld [vmem:[#allocation4 + $0x280] sm:$0xff] }
 0x1ad   :  { %9413 = vmatprep.subr.mxu0 %v514_v39  ;;  %9439 = vmatprep.subr.mxu1 %v362_v38 }
 0x1ae   :  { %9414 = vmatpush3.msra.mxu0 %v514_v39  ;;  %9440 = vmatpush3.msra.mxu1 %v362_v38  ;;  %v773_v38 = vld [vmem:[#allocation4 + $0x2a8] sm:$0xff]  ;;  %v772_v39 = vld [vmem:[#allocation4 + $0x2a0] sm:$0xff] }
 0x1af   :  { %9415 = vmatprep.subr.mxu0 %v509_v35  ;;  %9441 = vmatprep.subr.mxu1 %v357_v34 }
 0x1b0   :  { %9416 = vmatpush3.msra.mxu0 %v509_v35  ;;  %9442 = vmatpush3.msra.mxu1 %v357_v34  ;;  %v748_v34 = vld [vmem:[#allocation4 + $0x1e0] sm:$0xff]  ;;  %v747_v35 = vld [vmem:[#allocation4 + $0x1d8] sm:$0xff] }
 0x1b1   :  { %9417 = vmatprep.subr.mxu0 %v504_v31  ;;  %9443 = vmatprep.subr.mxu1 %v352_v30 }
 0x1b2   :  { %9418 = vmatpush3.msra.mxu0 %v504_v31  ;;  %9444 = vmatpush3.msra.mxu1 %v352_v30  ;;  %v752_v30 = vld [vmem:[#allocation4 + $0x200] sm:$0xff]  ;;  %v751_v31 = vld [vmem:[#allocation4 + $0x1f8] sm:$0xff] }
 0x1b3   :  { %9419 = vmatprep.subr.mxu0 %v499_v27  ;;  %9445 = vmatprep.subr.mxu1 %v10335_v26 }
 0x1b4   :  { %9420 = vmatpush3.msra.mxu0 %v499_v27  ;;  %9446 = vmatpush3.msra.mxu1 %v10335_v26  ;;  %v756_v26 = vld [vmem:[#allocation4 + $0x220] sm:$0xff]  ;;  %v755_v27 = vld [vmem:[#allocation4 + $0x218] sm:$0xff] }
 0x1b5   :  { %9421 = vmatprep.subr.mxu0 %v10333_v23  ;;  %9447 = vmatprep.subr.mxu1 %v10331_v22 }
 0x1b6   :  { %9422 = vmatpush3.msra.mxu0 %v10333_v23  ;;  %9448 = vmatpush3.msra.mxu1 %v10331_v22  ;;  %v760_v22 = vld [vmem:[#allocation4 + $0x240] sm:$0xff]  ;;  %v389_v23 = vld [vmem:[#allocation2 + $0x18] sm:$0xff] }
 0x1b7   :  { %9423 = vmatprep.subr.mxu0 %v10329_v19  ;;  %9449 = vmatprep.subr.mxu1 %v10327_v18 }
 0x1b8   :  { %9424 = vmatpush3.msra.mxu0 %v10329_v19  ;;  %9450 = vmatpush3.msra.mxu1 %v10327_v18  ;;  %v759_v19 = vld [vmem:[#allocation4 + $0x238] sm:$0xff]  ;;  %v758_v18 = vld [vmem:[#allocation4 + $0x230] sm:$0xff] }
 0x1b9   :  { %9426 = vmatmul.mubr.msk.f32.vlgmr.msra.gmra.mxu0 %vm543_vm2, %v540_v59  ;;  %9452 = vmatmul.mubr.msk.f32.vlgmr.msra.gmra.mxu1 %vm543_vm2, %v387_v16 }
 0x1ba   :  { %778 = vmatprep.subr.mxu0 %v9986_v0  ;;  %9428 = vmatprep.mubr.msk.f32.mxu0 %vm543_vm2, %v541_v17 }
 0x1bb   :  { %779 = vmatpush1.msra.mxu0 %v761_v20  ;;  %9454 = vmatprep.mubr.msk.f32.mxu1 %vm543_vm2, %v388_v21 }
 0x1bc   :  { %780 = vmatprep.subr.mxu0 %v9986_v0 }
 0x1bd   :  { %781 = vmatpush1.msra.mxu0 %v760_v22  ;;  %9455 = vmatmul.mubr.msk.f32.gmra.mxu1 %vm543_vm2, %v389_v23 }
 0x1be   :  { %782 = vmatprep.subr.mxu0 %v9986_v0  ;;  %9429 = vmatmul.mubr.msk.f32.gmra.mxu0 %vm543_vm2, %v542_v24 }
 0x1bf   :  { %783 = vmatpush1.msra.mxu0 %v759_v19  ;;  %8937 = vmatprep.mubr.msk.f32.mxu0 %vm236_vm1, %v10166_v58 }
 0x1c0   :  { %784 = vmatprep.subr.mxu0 %v9986_v0  ;;  %9477 = vmatprep.mubr.msk.f32.mxu1 %vm543_vm2, %v894_v50  ;;  %v1008_v50 = vld [vmem:[#allocation4 + $0x2e0] sm:$0xff] }
 0x1c1   :  { %785 = vmatpush1.msra.mxu0 %v758_v18 }
 0x1c2   :  { %786 = vmatprep.subr.mxu0 %v9986_v0 }
 0x1c3   :  { %787 = vmatpush1.msra.mxu0 %v757_v25 }
 0x1c4   :  { %788 = vmatprep.subr.mxu0 %v9986_v0 }
 0x1c5   :  { %789 = vmatpush1.msra.mxu0 %v756_v26 }
 0x1c6   :  { %790 = vmatprep.subr.mxu0 %v9986_v0 }
 0x1c7   :  { %791 = vmatpush1.msra.mxu0 %v755_v27 }
 0x1c8   :  { %792 = vmatprep.subr.mxu0 %v9986_v0 }
 0x1c9   :  { %793 = vmatpush1.msra.mxu0 %v754_v28 }
 0x1ca   :  { %794 = vmatprep.subr.mxu0 %v9986_v0 }
 0x1cb   :  { %795 = vmatpush1.msra.mxu0 %v753_v29 }
 0x1cc   :  { %796 = vmatprep.subr.mxu0 %v9986_v0 }
 0x1cd   :  { %797 = vmatpush1.msra.mxu0 %v752_v30 }
 0x1ce   :  { %798 = vmatprep.subr.mxu0 %v9986_v0 }
 0x1cf   :  { %799 = vmatpush1.msra.mxu0 %v751_v31 }
 0x1d0   :  { %800 = vmatprep.subr.mxu0 %v9986_v0 }
 0x1d1   :  { %801 = vmatpush1.msra.mxu0 %v750_v32 }
 0x1d2   :  { %802 = vmatprep.subr.mxu0 %v9986_v0 }
 0x1d3   :  { %803 = vmatpush1.msra.mxu0 %v749_v33 }
 0x1d4   :  { %804 = vmatprep.subr.mxu0 %v9986_v0 }
 0x1d5   :  { %805 = vmatpush1.msra.mxu0 %v748_v34 }
 0x1d6   :  { %806 = vmatprep.subr.mxu0 %v9986_v0 }
 0x1d7   :  { %807 = vmatpush1.msra.mxu0 %v747_v35 }
 0x1d8   :  { %808 = vmatprep.subr.mxu0 %v9986_v0 }
 0x1d9   :  { %809 = vmatpush1.msra.mxu0 %v746_v36 }
 0x1da   :  { %816 = vmatprep.subr.mxu0 %v9986_v0 }
 0x1db   :  { %8936 = vmatpush2.msk.msra.mxu0 %vm267_vm0, %v774_v37  ;;  %v895_v37 = vld [vmem:[#allocation2 + $0x48] sm:$0xff] }
 0x1dc   :  { %818 = vmatprep.subr.mxu0 %v9986_v0 }
 0x1dd   :  { %819 = vmatpush2.msra.mxu0 %v773_v38  ;;  %v1018_v38 = vld [vmem:[#allocation4 + $0x330] sm:$0xff] }
 0x1de   :  { %820 = vmatprep.subr.mxu0 %v9986_v0 }
 0x1df   :  { %821 = vmatpush2.msra.mxu0 %v772_v39  ;;  %v896_v39 = vld [vmem:[#allocation2 + $0x50] sm:$0xff] }
 0x1e0   :  { %822 = vmatprep.subr.mxu0 %v9986_v0 }
 0x1e1   :  { %823 = vmatpush2.msra.mxu0 %v771_v40  ;;  %v1017_v40 = vld [vmem:[#allocation4 + $0x328] sm:$0xff] }
 0x1e2   :  { %824 = vmatprep.subr.mxu0 %v9986_v0 }
 0x1e3   :  { %825 = vmatpush2.msra.mxu0 %v770_v41  ;;  %v897_v41 = vld [vmem:[#allocation2 + $0x58] sm:$0xff] }
 0x1e4   :  { %826 = vmatprep.subr.mxu0 %v9986_v0 }
 0x1e5   :  { %827 = vmatpush2.msra.mxu0 %v769_v42  ;;  %v1016_v42 = vld [vmem:[#allocation4 + $0x320] sm:$0xff] }
 0x1e6   :  { %828 = vmatprep.subr.mxu0 %v9986_v0 }
 0x1e7   :  { %829 = vmatpush2.msra.mxu0 %v768_v43  ;;  %v1015_v43 = vld [vmem:[#allocation4 + $0x318] sm:$0xff] }
 0x1e8   :  { %830 = vmatprep.subr.mxu0 %v9986_v0 }
 0x1e9   :  { %831 = vmatpush2.msra.mxu0 %v767_v44  ;;  %v1014_v44 = vld [vmem:[#allocation4 + $0x310] sm:$0xff] }
 0x1ea   :  { %832 = vmatprep.subr.mxu0 %v9986_v0 }
 0x1eb   :  { %833 = vmatpush2.msra.mxu0 %v766_v45  ;;  %v1013_v45 = vld [vmem:[#allocation4 + $0x308] sm:$0xff] }
 0x1ec   :  { %834 = vmatprep.subr.mxu0 %v9986_v0 }
 0x1ed   :  { %835 = vmatpush2.msra.mxu0 %v765_v46  ;;  %v1012_v46 = vld [vmem:[#allocation4 + $0x300] sm:$0xff] }
 0x1ee   :  { %836 = vmatprep.subr.mxu0 %v9986_v0 }
 0x1ef   :  { %837 = vmatpush2.msra.mxu0 %v764_v47  ;;  %v1011_v47 = vld [vmem:[#allocation4 + $0x2f8] sm:$0xff] }
 0x1f0   :  { %838 = vmatprep.subr.mxu0 %v9986_v0 }
 0x1f1   :  { %839 = vmatpush2.msra.mxu0 %v763_v48  ;;  %v1010_v48 = vld [vmem:[#allocation4 + $0x2f0] sm:$0xff] }
 0x1f2   :  { %840 = vmatprep.subr.mxu0 %v9986_v0 }
 0x1f3   :  { %841 = vmatpush2.msra.mxu0 %v762_v49  ;;  %v1009_v49 = vld [vmem:[#allocation4 + $0x2e8] sm:$0xff] }
 0x1f4   :  { %843 = vmatmul.mubr.f32.vlgmr.msra.gmra.mxu0 %v10173_v60 }
 0x1f5   :  { %8938 = vmatprep.mubr.msk.f32.mxu0 %vm236_vm1, %v10180_v61 }
 0x1f8   :  { %848 = vmatmul.mubr.f32.gmra.mxu0 %v10193_v62 }
 0x1f9   :  { %8939 = vmatprep.mubr.msk.f32.mxu0 %vm236_vm1, %v10198_v63 }
 0x1fc   :  { %853 = vmatmul.mubr.f32.gmra.mxu0 %v10209_v1 }
 0x1fd   :  { %8940 = vmatprep.mubr.msk.f32.mxu0 %vm236_vm1, %v10214_v2 }
 0x200   :  { %858 = vmatmul.mubr.f32.gmra.mxu0 %v10225_v3 }
 0x201   :  { %8941 = vmatprep.mubr.msk.f32.mxu0 %vm236_vm1, %v10230_v4 }
 0x204   :  { %863 = vmatmul.mubr.f32.gmra.mxu0 %v10241_v5 }
 0x205   :  { %8942 = vmatprep.mubr.msk.f32.mxu0 %vm236_vm1, %v10246_v6 }
 0x208   :  { %868 = vmatmul.mubr.f32.gmra.mxu0 %v10257_v7 }
 0x209   :  { %8943 = vmatprep.mubr.msk.f32.mxu0 %vm236_vm1, %v10262_v8 }
 0x20c   :  { %873 = vmatmul.mubr.f32.gmra.mxu0 %v10273_v9 }
 0x20d   :  { %8944 = vmatprep.mubr.msk.f32.mxu0 %vm236_vm1, %v10278_v10 }
 0x210   :  { %878 = vmatmul.mubr.f32.gmra.mxu0 %v10289_v11 }
 0x211   :  { %8945 = vmatprep.mubr.msk.f32.mxu0 %vm236_vm1, %v10294_v12 }
 0x214   :  { %883 = vmatmul.mubr.f32.gmra.mxu0 %v10305_v13 }
 0x215   :  { %8946 = vmatprep.mubr.msk.f32.mxu0 %vm236_vm1, %v10310_v14 }
 0x218   :  { %888 = vmatmul.mubr.f32.gmra.mxu0 %v10321_v15 }
 0x279   :  { %v9427_v51 = vpop.f32.mrf.mxu0  ;;  %v9453_v52 = vpop.f32.mrf.mxu1 }
 0x27a   :  { %v10418_v53 = vadd.f32 %v9453_v52, %v9427_v51  ;;  %v1007_v51 = vld [vmem:[#allocation4 + $0x2d8] sm:$0xff]  ;;  %v1006_v52 = vld [vmem:[#allocation4 + $0x2d0] sm:$0xff] }
 0x27b   :  { %v10420_v54 = vpop.f32.mrf.mxu0  ;;  %v10422_v55 = vpop.f32.mrf.mxu1 }
 0x27d   :  { %v9456_v57 = vpop.f32.mrf.mxu1 }
 0x27e   :  { %v9430_v56 = vpop.f32.mrf.mxu0 }
 0x27f   :  { %v10424_v59 = vadd.f32 %v9456_v57, %v9430_v56  ;;  %v1005_v56 = vld [vmem:[#allocation4 + $0x2c8] sm:$0xff]  ;;  %v1004_v57 = vld [vmem:[#allocation4 + $0x2c0] sm:$0xff] }
 0x280   :  { %v10426_v16 = vpop.f32.mrf.mxu0 }
 0x2b4   :  { %v844_v17 = vpop.f32.mrf.mxu0 }
 0x2b6   :  { %v846_v20 = vpop.f32.mrf.mxu0 }
 0x2b7   :  { %v1031_v20 = vld [vmem:[#allocation4 + $0x398] sm:$0x1] }
 0x2b8   :  { %v849_v21 = vpop.f32.mrf.mxu0 }
 0x2ba   :  { %v851_v22 = vpop.f32.mrf.mxu0 }
 0x2bb   :  { %v1029_v22 = vld [vmem:[#allocation4 + $0x388] sm:$0xff] }
 0x2bc   :  { %v854_v23 = vpop.f32.mrf.mxu0 }
 0x2be   :  { %v856_v24 = vpop.f32.mrf.mxu0 }
 0x2bf   :  { %v1027_v24 = vld [vmem:[#allocation4 + $0x378] sm:$0xff] }
 0x2c0   :  { %v859_v19 = vpop.f32.mrf.mxu0 }
 0x2c2   :  { %v861_v18 = vpop.f32.mrf.mxu0 }
 0x2c3   :  { %v1025_v18 = vld [vmem:[#allocation4 + $0x368] sm:$0xff] }
 0x2c4   :  { %v864_v25 = vpop.f32.mrf.mxu0 }
 0x2c6   :  { %v866_v26 = vpop.f32.mrf.mxu0 }
 0x2c7   :  { %v1023_v26 = vld [vmem:[#allocation4 + $0x358] sm:$0xff] }
 0x2c8   :  { %v869_v27 = vpop.f32.mrf.mxu0 }
 0x2ca   :  { %v871_v28 = vpop.f32.mrf.mxu0 }
 0x2cb   :  { %v1021_v28 = vld [vmem:[#allocation4 + $0x348] sm:$0xff] }
 0x2cc   :  { %v874_v29 = vpop.f32.mrf.mxu0 }
 0x2ce   :  { %v876_v30 = vpop.f32.mrf.mxu0 }
 0x2cf   :  { %v1019_v30 = vld [vmem:[#allocation4 + $0x338] sm:$0xff] }
 0x2d0   :  { %v879_v31 = vpop.f32.mrf.mxu0 }
 0x2d2   :  { %v881_v32 = vpop.f32.mrf.mxu0 }
 0x2d3   :  { %v1274_v32 = vld [vmem:[#allocation4 + $0x410] sm:$0xff] }
 0x2d4   :  { %v884_v33 = vpop.f32.mrf.mxu0 }
 0x2d6   :  { %v886_v34 = vpop.f32.mrf.mxu0 }
 0x2d7   :  { %v1272_v34 = vld [vmem:[#allocation4 + $0x400] sm:$0xff] }
 0x2d8   :  { %v889_v35 = vpop.f32.mrf.mxu0 }
 0x2d9   :  { %9457 = vmatprep.subr.msk.mxu1 %vm556_vm3, %v889_v35 }
 0x2da   :  { %v891_v36 = vpop.f32.mrf.mxu0  ;;  %9458 = vmatpush3.msk.msra.mxu1 %vm556_vm3, %v889_v35  ;;  %v1269_v35 = vld [vmem:[#allocation4 + $0x3e8] sm:$0xff] }
 0x2db   :  { %9459 = vmatprep.subr.mxu1 %v884_v33  ;;  %v1268_v36 = vld [vmem:[#allocation4 + $0x3e0] sm:$0xff] }
 0x2dc   :  { %9460 = vmatpush3.msra.mxu1 %v884_v33  ;;  %v1273_v33 = vld [vmem:[#allocation4 + $0x408] sm:$0xff] }
 0x2dd   :  { %9461 = vmatprep.subr.mxu1 %v879_v31 }
 0x2de   :  { %9462 = vmatpush3.msra.mxu1 %v879_v31  ;;  %v1275_v31 = vld [vmem:[#allocation4 + $0x418] sm:$0xff] }
 0x2df   :  { %9463 = vmatprep.subr.mxu1 %v874_v29 }
 0x2e0   :  { %9464 = vmatpush3.msra.mxu1 %v874_v29  ;;  %v1020_v29 = vld [vmem:[#allocation4 + $0x340] sm:$0xff] }
 0x2e1   :  { %9465 = vmatprep.subr.mxu1 %v869_v27 }
 0x2e2   :  { %9466 = vmatpush3.msra.mxu1 %v869_v27  ;;  %v1022_v27 = vld [vmem:[#allocation4 + $0x350] sm:$0xff] }
 0x2e3   :  { %9467 = vmatprep.subr.mxu1 %v864_v25 }
 0x2e4   :  { %9468 = vmatpush3.msra.mxu1 %v864_v25  ;;  %v1024_v25 = vld [vmem:[#allocation4 + $0x360] sm:$0xff] }
 0x2e5   :  { %9469 = vmatprep.subr.mxu1 %v859_v19 }
 0x2e6   :  { %9470 = vmatpush3.msra.mxu1 %v859_v19  ;;  %v1026_v19 = vld [vmem:[#allocation4 + $0x370] sm:$0xff] }
 0x2e7   :  { %9471 = vmatprep.subr.mxu1 %v854_v23 }
 0x2e8   :  { %9472 = vmatpush3.msra.mxu1 %v854_v23  ;;  %v1028_v23 = vld [vmem:[#allocation4 + $0x380] sm:$0xff] }
 0x2e9   :  { %9473 = vmatprep.subr.mxu1 %v849_v21 }
 0x2ea   :  { %9474 = vmatpush3.msra.mxu1 %v849_v21  ;;  %v1030_v21 = vld [vmem:[#allocation4 + $0x390] sm:$0xff] }
 0x2eb   :  { %9475 = vmatprep.subr.mxu1 %v844_v17 }
 0x2ec   :  { %9476 = vmatpush3.msra.mxu1 %v844_v17  ;;  %v1003_v17 = vld [vmem:[#allocation4 + $0x2b8] sm:$0xff] }
 0x2ed   :  { %9478 = vmatmul.mubr.msk.f32.vlgmr.msra.gmra.mxu1 %vm543_vm2, %v895_v37  ;;  %1035 = vmatprep.subr.mxu1 %v9986_v0  ;;  %v1267_v37 = vld [vmem:[#allocation4 + $0x3d8] sm:$0xff] }
 0x2ee   :  { %1036 = vmatpush1.msra.mxu1 %v1018_v38  ;;  %9480 = vmatprep.mubr.msk.f32.mxu1 %vm543_vm2, %v896_v39  ;;  %v1266_v38 = vld [vmem:[#allocation4 + $0x3d0] sm:$0xff]  ;;  %v1265_v39 = vld [vmem:[#allocation4 + $0x3c8] sm:$0xff] }
 0x2ef   :  { %1037 = vmatprep.subr.mxu1 %v9986_v0 }
 0x2f0   :  { %1038 = vmatpush1.msra.mxu1 %v1017_v40  ;;  %v1264_v40 = vld [vmem:[#allocation4 + $0x3c0] sm:$0xff] }
 0x2f1   :  { %9481 = vmatmul.mubr.msk.f32.gmra.mxu1 %vm543_vm2, %v897_v41  ;;  %1039 = vmatprep.subr.mxu1 %v9986_v0  ;;  %v1263_v41 = vld [vmem:[#allocation4 + $0x3b8] sm:$0xff] }
 0x2f2   :  { %1040 = vmatpush1.msra.mxu1 %v1016_v42  ;;  %8953 = vmatprep.mubr.msk.f32.mxu1 %vm236_vm1, %v10166_v58  ;;  %v1262_v42 = vld [vmem:[#allocation4 + $0x3b0] sm:$0xff] }
 0x2f3   :  { %1041 = vmatprep.subr.mxu1 %v9986_v0 }
 0x2f4   :  { %1042 = vmatpush1.msra.mxu1 %v1015_v43  ;;  %v1261_v43 = vld [vmem:[#allocation4 + $0x3a8] sm:$0xff] }
 0x2f5   :  { %1043 = vmatprep.subr.mxu1 %v9986_v0 }
 0x2f6   :  { %1044 = vmatpush1.msra.mxu1 %v1014_v44  ;;  %v1260_v44 = vld [vmem:[#allocation4 + $0x3a0] sm:$0xff] }
 0x2f7   :  { %1045 = vmatprep.subr.mxu1 %v9986_v0 }
 0x2f8   :  { %1046 = vmatpush1.msra.mxu1 %v1013_v45  ;;  %v1288_v45 = vld [vmem:[#allocation4 + $0x480] sm:$0x1] }
 0x2f9   :  { %1047 = vmatprep.subr.mxu1 %v9986_v0 }
 0x2fa   :  { %1048 = vmatpush1.msra.mxu1 %v1012_v46  ;;  %v1287_v46 = vld [vmem:[#allocation4 + $0x478] sm:$0xff] }
 0x2fb   :  { %1049 = vmatprep.subr.mxu1 %v9986_v0 }
 0x2fc   :  { %1050 = vmatpush1.msra.mxu1 %v1011_v47  ;;  %v1286_v47 = vld [vmem:[#allocation4 + $0x470] sm:$0xff] }
 0x2fd   :  { %1051 = vmatprep.subr.mxu1 %v9986_v0 }
 0x2fe   :  { %1052 = vmatpush1.msra.mxu1 %v1010_v48  ;;  %v1285_v48 = vld [vmem:[#allocation4 + $0x468] sm:$0xff] }
 0x2ff   :  { %1053 = vmatprep.subr.mxu1 %v9986_v0 }
 0x300   :  { %1054 = vmatpush1.msra.mxu1 %v1009_v49  ;;  %v1284_v49 = vld [vmem:[#allocation4 + $0x460] sm:$0xff] }
 0x301   :  { %1055 = vmatprep.subr.mxu1 %v9986_v0 }
 0x302   :  { %1056 = vmatpush1.msra.mxu1 %v1008_v50  ;;  %v1283_v50 = vld [vmem:[#allocation4 + $0x458] sm:$0xff] }
 0x303   :  { %1057 = vmatprep.subr.mxu1 %v9986_v0 }
 0x304   :  { %1058 = vmatpush1.msra.mxu1 %v1007_v51  ;;  %v1282_v51 = vld [vmem:[#allocation4 + $0x450] sm:$0xff] }
 0x305   :  { %1059 = vmatprep.subr.mxu1 %v9986_v0 }
 0x306   :  { %1060 = vmatpush1.msra.mxu1 %v1006_v52  ;;  %v1281_v52 = vld [vmem:[#allocation4 + $0x448] sm:$0xff] }
 0x307   :  { %1061 = vmatprep.subr.mxu1 %v9986_v0 }
 0x308   :  { %1062 = vmatpush1.msra.mxu1 %v1005_v56  ;;  %v1280_v56 = vld [vmem:[#allocation4 + $0x440] sm:$0xff] }
 0x309   :  { %1063 = vmatprep.subr.mxu1 %v9986_v0 }
 0x30a   :  { %1064 = vmatpush1.msra.mxu1 %v1004_v57  ;;  %v1278_v57 = vld [vmem:[#allocation4 + $0x430] sm:$0xff] }
 0x30b   :  { %1065 = vmatprep.subr.mxu1 %v9986_v0 }
 0x30c   :  { %1066 = vmatpush1.msra.mxu1 %v1003_v17  ;;  %v1277_v17 = vld [vmem:[#allocation4 + $0x428] sm:$0xff] }
 0x30d   :  { %1073 = vmatprep.subr.mxu1 %v9986_v0 }
 0x30e   :  { %8952 = vmatpush2.msk.msra.mxu1 %vm267_vm0, %v1031_v20  ;;  %v1276_v20 = vld [vmem:[#allocation4 + $0x420] sm:$0xff] }
 0x30f   :  { %1075 = vmatprep.subr.mxu1 %v9986_v0 }
 0x310   :  { %1076 = vmatpush2.msra.mxu1 %v1030_v21  ;;  %v10528_v21 = vld [vmem:[%s11557_s0] sm:$0xff] }
 0x311   :  { %1077 = vmatprep.subr.mxu1 %v9986_v0 }
 0x312   :  { %1078 = vmatpush2.msra.mxu1 %v1029_v22  ;;  %v10534_v22 = vld [vmem:[%s11557_s0 + $0x18] sm:$0xff] }
 0x313   :  { %1079 = vmatprep.subr.mxu1 %v9986_v0 }
 0x314   :  { %1080 = vmatpush2.msra.mxu1 %v1028_v23 }
 0x315   :  { %1081 = vmatprep.subr.mxu1 %v9986_v0 }
 0x316   :  { %1082 = vmatpush2.msra.mxu1 %v1027_v24 }
 0x317   :  { %1083 = vmatprep.subr.mxu1 %v9986_v0 }
 0x318   :  { %1084 = vmatpush2.msra.mxu1 %v1026_v19 }
 0x319   :  { %1085 = vmatprep.subr.mxu1 %v9986_v0 }
 0x31a   :  { %1086 = vmatpush2.msra.mxu1 %v1025_v18 }
 0x31b   :  { %1087 = vmatprep.subr.mxu1 %v9986_v0 }
 0x31c   :  { %1088 = vmatpush2.msra.mxu1 %v1024_v25 }
 0x31d   :  { %1089 = vmatprep.subr.mxu1 %v9986_v0 }
 0x31e   :  { %1090 = vmatpush2.msra.mxu1 %v1023_v26 }
 0x31f   :  { %1091 = vmatprep.subr.mxu1 %v9986_v0 }
 0x320   :  { %1092 = vmatpush2.msra.mxu1 %v1022_v27 }
 0x321   :  { %1093 = vmatprep.subr.mxu1 %v9986_v0 }
 0x322   :  { %1094 = vmatpush2.msra.mxu1 %v1021_v28 }
 0x323   :  { %1095 = vmatprep.subr.mxu1 %v9986_v0 }
 0x324   :  { %1096 = vmatpush2.msra.mxu1 %v1020_v29 }
 0x325   :  { %1097 = vmatprep.subr.mxu1 %v9986_v0 }
 0x326   :  { %1098 = vmatpush2.msra.mxu1 %v1019_v30  ;;  %v1152_v30 = vld [vmem:[#allocation2 + $0x68] sm:$0xff] }
 0x327   :  { %1100 = vmatmul.mubr.f32.vlgmr.msra.gmra.mxu1 %v10173_v60  ;;  %1292 = vmatprep.subr.mxu1 %v9986_v0  ;;  %v1271_v60 = vld [vmem:[#allocation4 + $0x3f8] sm:$0xff] }
 0x328   :  { %1293 = vmatpush1.msra.mxu1 %v1275_v31  ;;  %8954 = vmatprep.mubr.msk.f32.mxu1 %vm236_vm1, %v10180_v61  ;;  %v1270_v61 = vld [vmem:[#allocation4 + $0x3f0] sm:$0xff] }
 0x329   :  { %1294 = vmatprep.subr.mxu1 %v9986_v0  ;;  %v1153_v31 = vld [vmem:[#allocation2 + $0x70] sm:$0xff] }
 0x32a   :  { %1295 = vmatpush1.msra.mxu1 %v1274_v32 }
 0x32b   :  { %1105 = vmatmul.mubr.f32.gmra.mxu1 %v10193_v62  ;;  %1296 = vmatprep.subr.mxu1 %v9986_v0 }
 0x32c   :  { %1297 = vmatpush1.msra.mxu1 %v1273_v33  ;;  %8955 = vmatprep.mubr.msk.f32.mxu1 %vm236_vm1, %v10198_v63  ;;  %v1154_v33 = vld [vmem:[#allocation2 + $0x78] sm:$0xff] }
 0x32d   :  { %1298 = vmatprep.subr.mxu1 %v9986_v0 }
 0x32e   :  { %1299 = vmatpush1.msra.mxu1 %v1272_v34  ;;  %v1408_v34 = vld [vmem:[#allocation2 + $0x80] sm:$0xff] }
 0x32f   :  { %1110 = vmatmul.mubr.f32.gmra.mxu1 %v10209_v1  ;;  %1300 = vmatprep.subr.mxu1 %v9986_v0 }
 0x330   :  { %1301 = vmatpush1.msra.mxu1 %v1271_v60  ;;  %8956 = vmatprep.mubr.msk.f32.mxu1 %vm236_vm1, %v10214_v2 }
 0x331   :  { %1302 = vmatprep.subr.mxu1 %v9986_v0 }
 0x332   :  { %1303 = vmatpush1.msra.mxu1 %v1270_v61 }
 0x333   :  { %1115 = vmatmul.mubr.f32.gmra.mxu1 %v10225_v3  ;;  %1304 = vmatprep.subr.mxu1 %v9986_v0 }
 0x334   :  { %1305 = vmatpush1.msra.mxu1 %v1269_v35  ;;  %8957 = vmatprep.mubr.msk.f32.mxu1 %vm236_vm1, %v10230_v4 }
 0x335   :  { %1306 = vmatprep.subr.mxu1 %v9986_v0 }
 0x336   :  { %1307 = vmatpush1.msra.mxu1 %v1268_v36 }
 0x337   :  { %1120 = vmatmul.mubr.f32.gmra.mxu1 %v10241_v5  ;;  %1308 = vmatprep.subr.mxu1 %v9986_v0 }
 0x338   :  { %1309 = vmatpush1.msra.mxu1 %v1267_v37  ;;  %8958 = vmatprep.mubr.msk.f32.mxu1 %vm236_vm1, %v10246_v6 }
 0x339   :  { %1310 = vmatprep.subr.mxu1 %v9986_v0 }
 0x33a   :  { %1311 = vmatpush1.msra.mxu1 %v1266_v38 }
 0x33b   :  { %1125 = vmatmul.mubr.f32.gmra.mxu1 %v10257_v7  ;;  %1312 = vmatprep.subr.mxu1 %v9986_v0 }
 0x33c   :  { %1313 = vmatpush1.msra.mxu1 %v1265_v39  ;;  %8959 = vmatprep.mubr.msk.f32.mxu1 %vm236_vm1, %v10262_v8 }
 0x33d   :  { %1314 = vmatprep.subr.mxu1 %v9986_v0 }
 0x33e   :  { %1315 = vmatpush1.msra.mxu1 %v1264_v40 }
 0x33f   :  { %1130 = vmatmul.mubr.f32.gmra.mxu1 %v10273_v9  ;;  %1316 = vmatprep.subr.mxu1 %v9986_v0 }
 0x340   :  { %1317 = vmatpush1.msra.mxu1 %v1263_v41  ;;  %8960 = vmatprep.mubr.msk.f32.mxu1 %vm236_vm1, %v10278_v10 }
 0x341   :  { %1318 = vmatprep.subr.mxu1 %v9986_v0 }
 0x342   :  { %1319 = vmatpush1.msra.mxu1 %v1262_v42 }
 0x343   :  { %1135 = vmatmul.mubr.f32.gmra.mxu1 %v10289_v11  ;;  %1320 = vmatprep.subr.mxu1 %v9986_v0 }
 0x344   :  { %1321 = vmatpush1.msra.mxu1 %v1261_v43  ;;  %8961 = vmatprep.mubr.msk.f32.mxu1 %vm236_vm1, %v10294_v12 }
 0x345   :  { %1322 = vmatprep.subr.mxu1 %v9986_v0 }
 0x346   :  { %1323 = vmatpush1.msra.mxu1 %v1260_v44 }
 0x347   :  { %1140 = vmatmul.mubr.f32.gmra.mxu1 %v10305_v13  ;;  %1330 = vmatprep.subr.mxu1 %v9986_v0 }
 0x348   :  { %8968 = vmatpush2.msk.msra.mxu1 %vm267_vm0, %v1288_v45  ;;  %8962 = vmatprep.mubr.msk.f32.mxu1 %vm236_vm1, %v10310_v14 }
 0x349   :  { %1332 = vmatprep.subr.mxu1 %v9986_v0 }
 0x34a   :  { %1333 = vmatpush2.msra.mxu1 %v1287_v46 }
 0x34b   :  { %1145 = vmatmul.mubr.f32.gmra.mxu1 %v10321_v15  ;;  %1334 = vmatprep.subr.mxu1 %v9986_v0 }
 0x34c   :  { %1335 = vmatpush2.msra.mxu1 %v1286_v47  ;;  %8969 = vmatprep.mubr.msk.f32.mxu1 %vm236_vm1, %v10166_v58  ;;  %v1279_v58 = vld [vmem:[#allocation4 + $0x438] sm:$0xff] }
 0x34d   :  { %1336 = vmatprep.subr.mxu1 %v9986_v0 }
 0x34e   :  { %1337 = vmatpush2.msra.mxu1 %v1285_v48 }
 0x34f   :  { %1338 = vmatprep.subr.mxu1 %v9986_v0 }
 0x350   :  { %1339 = vmatpush2.msra.mxu1 %v1284_v49 }
 0x351   :  { %1340 = vmatprep.subr.mxu1 %v9986_v0 }
 0x352   :  { %1341 = vmatpush2.msra.mxu1 %v1283_v50 }
 0x353   :  { %1342 = vmatprep.subr.mxu1 %v9986_v0 }
 0x354   :  { %1343 = vmatpush2.msra.mxu1 %v1282_v51 }
 0x355   :  { %1344 = vmatprep.subr.mxu1 %v9986_v0 }
 0x356   :  { %1345 = vmatpush2.msra.mxu1 %v1281_v52  ;;  %v1409_v52 = vld [vmem:[#allocation2 + $0x88] sm:$0xff] }
 0x357   :  { %1346 = vmatprep.subr.mxu1 %v9986_v0 }
 0x358   :  { %1347 = vmatpush2.msra.mxu1 %v1280_v56  ;;  %v1532_v56 = vld [vmem:[#allocation4 + $0x500] sm:$0xff] }
 0x359   :  { %1348 = vmatprep.subr.mxu1 %v9986_v0 }
 0x35a   :  { %1349 = vmatpush2.msra.mxu1 %v1279_v58  ;;  %v1410_v58 = vld [vmem:[#allocation2 + $0x90] sm:$0xff] }
 0x35b   :  { %1350 = vmatprep.subr.mxu1 %v9986_v0 }
 0x35c   :  { %1351 = vmatpush2.msra.mxu1 %v1278_v57  ;;  %v1531_v57 = vld [vmem:[#allocation4 + $0x4f8] sm:$0xff] }
 0x35d   :  { %1352 = vmatprep.subr.mxu1 %v9986_v0 }
 0x35e   :  { %1353 = vmatpush2.msra.mxu1 %v1277_v17  ;;  %v1411_v17 = vld [vmem:[#allocation2 + $0x98] sm:$0xff] }
 0x35f   :  { %1354 = vmatprep.subr.mxu1 %v9986_v0 }
 0x360   :  { %1355 = vmatpush2.msra.mxu1 %v1276_v20  ;;  %v1530_v20 = vld [vmem:[#allocation4 + $0x4f0] sm:$0xff] }
 0x361   :  { %1357 = vmatmul.mubr.f32.vlgmr.msra.gmra.mxu1 %v10528_v21 }
 0x362   :  { %8970 = vmatprep.mubr.msk.f32.mxu1 %vm236_vm1, %v10534_v22 }
 0x365   :  { %1362 = vmatmul.mubr.f32.gmra.mxu1 %v10193_v62  ;;  %v1151_v62 = vld [vmem:[#allocation2 + $0x60] sm:$0xff] }
 0x366   :  { %8971 = vmatprep.mubr.msk.f32.mxu1 %vm236_vm1, %v10198_v63  ;;  %9503 = vmatprep.mubr.msk.f32.mxu0 %vm543_vm2, %v1151_v62  ;;  %v10564_v63 = vpop.f32.mrf.mxu1  ;;  %v1529_v62 = vld [vmem:[#allocation4 + $0x4e8] sm:$0xff] }
 0x369   :  { %1367 = vmatmul.mubr.f32.gmra.mxu1 %v10209_v1 }
 0x36a   :  { %8972 = vmatprep.mubr.msk.f32.mxu1 %vm236_vm1, %v10214_v2 }
 0x36d   :  { %1372 = vmatmul.mubr.f32.gmra.mxu1 %v10225_v3 }
 0x36e   :  { %8973 = vmatprep.mubr.msk.f32.mxu1 %vm236_vm1, %v10230_v4 }
 0x371   :  { %1377 = vmatmul.mubr.f32.gmra.mxu1 %v10241_v5 }
 0x372   :  { %8974 = vmatprep.mubr.msk.f32.mxu1 %vm236_vm1, %v10246_v6 }
 0x375   :  { %1382 = vmatmul.mubr.f32.gmra.mxu1 %v10257_v7 }
 0x376   :  { %8975 = vmatprep.mubr.msk.f32.mxu1 %vm236_vm1, %v10262_v8 }
 0x379   :  { %1387 = vmatmul.mubr.f32.gmra.mxu1 %v10273_v9 }
 0x37a   :  { %8976 = vmatprep.mubr.msk.f32.mxu1 %vm236_vm1, %v10278_v10 }
 0x37d   :  { %1392 = vmatmul.mubr.f32.gmra.mxu1 %v10289_v11 }
 0x37e   :  { %8977 = vmatprep.mubr.msk.f32.mxu1 %vm236_vm1, %v10294_v12 }
 0x381   :  { %1397 = vmatmul.mubr.f32.gmra.mxu1 %v10305_v13 }
 0x382   :  { %8978 = vmatprep.mubr.msk.f32.mxu1 %vm236_vm1, %v10310_v14 }
 0x385   :  { %1402 = vmatmul.mubr.f32.gmra.mxu1 %v10321_v15 }
 0x3ad   :  { %v9479_v1 = vpop.f32.mrf.mxu1 }
 0x3ae   :  { %v10567_v2 = vadd.f32 %v9479_v1, %v10418_v53  ;;  %v10593_v1 = vld [vmem:[%s11557_s0 + $0x8] sm:$0xff] }
 0x3af   :  { %v10569_v3 = vpop.f32.mrf.mxu1 }
 0x3b1   :  { %v9482_v4 = vpop.f32.mrf.mxu1 }
 0x3b2   :  { %v10572_v5 = vadd.f32 %v9482_v4, %v10424_v59  ;;  %v1528_v4 = vld [vmem:[#allocation4 + $0x4e0] sm:$0xff] }
 0x3b3   :  { %v10574_v6 = vpop.f32.mrf.mxu1 }
 0x3e7   :  { %v1101_v7 = vpop.f32.mrf.mxu1 }
 0x3e9   :  { %v1103_v8 = vpop.f32.mrf.mxu1 }
 0x3ea   :  { %v1526_v8 = vld [vmem:[#allocation4 + $0x4d0] sm:$0xff] }
 0x3eb   :  { %v1106_v9 = vpop.f32.mrf.mxu1 }
 0x3ed   :  { %v1108_v10 = vpop.f32.mrf.mxu1 }
 0x3ee   :  { %v1524_v10 = vld [vmem:[#allocation4 + $0x4c0] sm:$0xff] }
 0x3ef   :  { %v1111_v11 = vpop.f32.mrf.mxu1 }
 0x3f1   :  { %v1113_v12 = vpop.f32.mrf.mxu1 }
 0x3f2   :  { %v1522_v12 = vld [vmem:[#allocation4 + $0x4b0] sm:$0xff] }
 0x3f3   :  { %v1116_v13 = vpop.f32.mrf.mxu1 }
 0x3f5   :  { %v1118_v14 = vpop.f32.mrf.mxu1 }
 0x3f6   :  { %v1520_v14 = vld [vmem:[#allocation4 + $0x4a0] sm:$0xff] }
 0x3f7   :  { %v1121_v15 = vpop.f32.mrf.mxu1 }
 0x3f9   :  { %v1123_v23 = vpop.f32.mrf.mxu1 }
 0x3fa   :  { %v1518_v23 = vld [vmem:[#allocation4 + $0x490] sm:$0xff] }
 0x3fb   :  { %v1126_v53 = vpop.f32.mrf.mxu1 }
 0x3fd   :  { %v1128_v24 = vpop.f32.mrf.mxu1 }
 0x3fe   :  { %v1545_v24 = vld [vmem:[#allocation4 + $0x568] sm:$0x1] }
 0x3ff   :  { %v1131_v19 = vpop.f32.mrf.mxu1 }
 0x401   :  { %v1133_v18 = vpop.f32.mrf.mxu1 }
 0x402   :  { %v1543_v18 = vld [vmem:[#allocation4 + $0x558] sm:$0xff] }
 0x403   :  { %v1136_v25 = vpop.f32.mrf.mxu1 }
 0x405   :  { %v1138_v26 = vpop.f32.mrf.mxu1 }
 0x406   :  { %v1541_v26 = vld [vmem:[#allocation4 + $0x548] sm:$0xff] }
 0x407   :  { %v1141_v59 = vpop.f32.mrf.mxu1 }
 0x409   :  { %v1143_v27 = vpop.f32.mrf.mxu1 }
 0x40a   :  { %v1539_v27 = vld [vmem:[#allocation4 + $0x538] sm:$0xff] }
 0x40b   :  { %v1146_v28 = vpop.f32.mrf.mxu1 }
 0x40c   :  { %9483 = vmatprep.subr.msk.mxu0 %vm556_vm3, %v1146_v28 }
 0x40d   :  { %9484 = vmatpush3.msk.msra.mxu0 %vm556_vm3, %v1146_v28  ;;  %v1148_v29 = vpop.f32.mrf.mxu1  ;;  %v1538_v28 = vld [vmem:[#allocation4 + $0x530] sm:$0xff] }
 0x40e   :  { %9485 = vmatprep.subr.mxu0 %v1141_v59  ;;  %v1537_v29 = vld [vmem:[#allocation4 + $0x528] sm:$0xff] }
 0x40f   :  { %9486 = vmatpush3.msra.mxu0 %v1141_v59  ;;  %v1540_v59 = vld [vmem:[#allocation4 + $0x540] sm:$0xff] }
 0x410   :  { %9487 = vmatprep.subr.mxu0 %v1136_v25 }
 0x411   :  { %9488 = vmatpush3.msra.mxu0 %v1136_v25  ;;  %v1542_v25 = vld [vmem:[#allocation4 + $0x550] sm:$0xff] }
 0x412   :  { %9489 = vmatprep.subr.mxu0 %v1131_v19 }
 0x413   :  { %9490 = vmatpush3.msra.mxu0 %v1131_v19  ;;  %v1544_v19 = vld [vmem:[#allocation4 + $0x560] sm:$0xff] }
 0x414   :  { %9491 = vmatprep.subr.mxu0 %v1126_v53 }
 0x415   :  { %9492 = vmatpush3.msra.mxu0 %v1126_v53  ;;  %v1517_v53 = vld [vmem:[#allocation4 + $0x488] sm:$0xff] }
 0x416   :  { %9493 = vmatprep.subr.mxu0 %v1121_v15 }
 0x417   :  { %9494 = vmatpush3.msra.mxu0 %v1121_v15  ;;  %v1519_v15 = vld [vmem:[#allocation4 + $0x498] sm:$0xff] }
 0x418   :  { %9495 = vmatprep.subr.mxu0 %v1116_v13 }
 0x419   :  { %9496 = vmatpush3.msra.mxu0 %v1116_v13  ;;  %v1521_v13 = vld [vmem:[#allocation4 + $0x4a8] sm:$0xff] }
 0x41a   :  { %9497 = vmatprep.subr.mxu0 %v1111_v11 }
 0x41b   :  { %9498 = vmatpush3.msra.mxu0 %v1111_v11  ;;  %v1523_v11 = vld [vmem:[#allocation4 + $0x4b8] sm:$0xff] }
 0x41c   :  { %9499 = vmatprep.subr.mxu0 %v1106_v9 }
 0x41d   :  { %9500 = vmatpush3.msra.mxu0 %v1106_v9  ;;  %v1525_v9 = vld [vmem:[#allocation4 + $0x4c8] sm:$0xff] }
 0x41e   :  { %9501 = vmatprep.subr.mxu0 %v1101_v7 }
 0x41f   :  { %9502 = vmatpush3.msra.mxu0 %v1101_v7  ;;  %v1527_v7 = vld [vmem:[#allocation4 + $0x4d8] sm:$0xff] }
 0x420   :  { %9504 = vmatmul.mubr.msk.f32.vlgmr.msra.gmra.mxu0 %vm543_vm2, %v1152_v30  ;;  %v1536_v30 = vld [vmem:[#allocation4 + $0x520] sm:$0xff] }
 0x421   :  { %v1358_v32 = vpop.f32.mrf.mxu1  ;;  %9506 = vmatprep.mubr.msk.f32.mxu0 %vm543_vm2, %v1153_v31  ;;  %v1535_v31 = vld [vmem:[#allocation4 + $0x518] sm:$0xff] }
 0x423   :  { %v1360_v60 = vpop.f32.mrf.mxu1 }
 0x424   :  { %9507 = vmatmul.mubr.msk.f32.gmra.mxu0 %vm543_vm2, %v1154_v33  ;;  %v1533_v33 = vld [vmem:[#allocation4 + $0x508] sm:$0xff]  ;;  %v1788_v60 = vld [vmem:[#allocation4 + $0x5e0] sm:$0xff] }
 0x425   :  { %v1363_v61 = vpop.f32.mrf.mxu1  ;;  %9529 = vmatprep.mubr.msk.f32.mxu0 %vm543_vm2, %v1408_v34  ;;  %v1789_v34 = vld [vmem:[#allocation4 + $0x5e8] sm:$0xff] }
 0x427   :  { %v1365_v35 = vpop.f32.mrf.mxu1 }
 0x428   :  { %v10632_v35 = vld [vmem:[%s11557_s0 + $0x10] sm:$0xff] }
 0x429   :  { %v1368_v36 = vpop.f32.mrf.mxu1 }
 0x42b   :  { %v1370_v37 = vpop.f32.mrf.mxu1 }
 0x42c   :  { %v10639_v37 = vld [vmem:[%s11557_s0 + $0x28] sm:$0xff] }
 0x42d   :  { %v1373_v38 = vpop.f32.mrf.mxu1 }
 0x42f   :  { %v1375_v39 = vpop.f32.mrf.mxu1 }
 0x430   :  { %v10647_v39 = vld [vmem:[%s11557_s0 + $0x20] sm:$0xff] }
 0x431   :  { %v1378_v40 = vpop.f32.mrf.mxu1 }
 0x433   :  { %v1380_v41 = vpop.f32.mrf.mxu1 }
 0x434   :  { %v10654_v41 = vld [vmem:[%s11557_s0 + $0x38] sm:$0xff] }
 0x435   :  { %v1383_v42 = vpop.f32.mrf.mxu1 }
 0x437   :  { %v1385_v43 = vpop.f32.mrf.mxu1 }
 0x438   :  { %v10662_v43 = vld [vmem:[%s11557_s0 + $0x30] sm:$0xff] }
 0x439   :  { %v1388_v44 = vpop.f32.mrf.mxu1 }
 0x43b   :  { %v1390_v45 = vpop.f32.mrf.mxu1 }
 0x43c   :  { %v10669_v45 = vld [vmem:[%s11557_s0 + $0x48] sm:$0xff] }
 0x43d   :  { %v1393_v46 = vpop.f32.mrf.mxu1 }
 0x43f   :  { %v1395_v47 = vpop.f32.mrf.mxu1 }
 0x440   :  { %v10677_v47 = vld [vmem:[%s11557_s0 + $0x40] sm:$0xff] }
 0x441   :  { %v1398_v48 = vpop.f32.mrf.mxu1 }
 0x443   :  { %v1400_v49 = vpop.f32.mrf.mxu1 }
 0x444   :  { %v10684_v49 = vld [vmem:[%s11557_s0 + $0x58] sm:$0xff] }
 0x445   :  { %v1403_v50 = vpop.f32.mrf.mxu1 }
 0x446   :  { %9509 = vmatprep.subr.msk.mxu0 %vm556_vm3, %v1403_v50 }
 0x447   :  { %v1405_v51 = vpop.f32.mrf.mxu1  ;;  %9510 = vmatpush3.msk.msra.mxu0 %vm556_vm3, %v1403_v50  ;;  %v1779_v50 = vld [vmem:[#allocation4 + $0x598] sm:$0xff] }
 0x448   :  { %9511 = vmatprep.subr.mxu0 %v1398_v48  ;;  %v10692_v51 = vld [vmem:[%s11557_s0 + $0x50] sm:$0xff] }
 0x449   :  { %9512 = vmatpush3.msra.mxu0 %v1398_v48  ;;  %v1780_v48 = vld [vmem:[#allocation4 + $0x5a0] sm:$0xff] }
 0x44a   :  { %9513 = vmatprep.subr.mxu0 %v1393_v46 }
 0x44b   :  { %9514 = vmatpush3.msra.mxu0 %v1393_v46  ;;  %v1781_v46 = vld [vmem:[#allocation4 + $0x5a8] sm:$0xff] }
 0x44c   :  { %9515 = vmatprep.subr.mxu0 %v1388_v44 }
 0x44d   :  { %9516 = vmatpush3.msra.mxu0 %v1388_v44  ;;  %v1782_v44 = vld [vmem:[#allocation4 + $0x5b0] sm:$0xff] }
 0x44e   :  { %9517 = vmatprep.subr.mxu0 %v1383_v42 }
 0x44f   :  { %9518 = vmatpush3.msra.mxu0 %v1383_v42  ;;  %v1783_v42 = vld [vmem:[#allocation4 + $0x5b8] sm:$0xff] }
 0x450   :  { %9519 = vmatprep.subr.mxu0 %v1378_v40 }
 0x451   :  { %9520 = vmatpush3.msra.mxu0 %v1378_v40  ;;  %v1784_v40 = vld [vmem:[#allocation4 + $0x5c0] sm:$0xff] }
 0x452   :  { %9521 = vmatprep.subr.mxu0 %v1373_v38 }
 0x453   :  { %9522 = vmatpush3.msra.mxu0 %v1373_v38  ;;  %v1785_v38 = vld [vmem:[#allocation4 + $0x5c8] sm:$0xff] }
 0x454   :  { %9523 = vmatprep.subr.mxu0 %v1368_v36 }
 0x455   :  { %9524 = vmatpush3.msra.mxu0 %v1368_v36  ;;  %v1786_v36 = vld [vmem:[#allocation4 + $0x5d0] sm:$0xff] }
 0x456   :  { %9525 = vmatprep.subr.mxu0 %v1363_v61 }
 0x457   :  { %9526 = vmatpush3.msra.mxu0 %v1363_v61  ;;  %v1787_v61 = vld [vmem:[#allocation4 + $0x5d8] sm:$0xff] }
 0x458   :  { %9527 = vmatprep.subr.mxu0 %v1358_v32 }
 0x459   :  { %9528 = vmatpush3.msra.mxu0 %v1358_v32  ;;  %v1534_v32 = vld [vmem:[#allocation4 + $0x510] sm:$0xff] }
 0x45a   :  { %9530 = vmatmul.mubr.msk.f32.vlgmr.msra.gmra.mxu0 %vm543_vm2, %v1409_v52  ;;  %1549 = vmatprep.subr.mxu0 %v9986_v0  ;;  %v1778_v52 = vld [vmem:[#allocation4 + $0x590] sm:$0xff] }
 0x45b   :  { %1550 = vmatpush1.msra.mxu0 %v1532_v56  ;;  %9532 = vmatprep.mubr.msk.f32.mxu0 %vm543_vm2, %v1410_v58  ;;  %v10699_v56 = vld [vmem:[%s11557_s0 + $0x68] sm:$0xff] }
 0x45c   :  { %1551 = vmatprep.subr.mxu0 %v9986_v0  ;;  %v1777_v58 = vld [vmem:[#allocation4 + $0x588] sm:$0xff] }
 0x45d   :  { %1552 = vmatpush1.msra.mxu0 %v1531_v57  ;;  %v10707_v57 = vld [vmem:[%s11557_s0 + $0x60] sm:$0xff] }
 0x45e   :  { %9533 = vmatmul.mubr.msk.f32.gmra.mxu0 %vm543_vm2, %v1411_v17  ;;  %1553 = vmatprep.subr.mxu0 %v9986_v0  ;;  %v1776_v17 = vld [vmem:[#allocation4 + $0x580] sm:$0xff] }
 0x45f   :  { %1554 = vmatpush1.msra.mxu0 %v1530_v20  ;;  %8985 = vmatprep.mubr.msk.f32.mxu0 %vm236_vm1, %v10593_v1  ;;  %v10714_v20 = vld [vmem:[%s11557_s0 + $0x78] sm:$0xff] }
 0x460   :  { %1555 = vmatprep.subr.mxu0 %v9986_v0 }
 0x461   :  { %1556 = vmatpush1.msra.mxu0 %v1529_v62  ;;  %v1775_v62 = vld [vmem:[#allocation4 + $0x578] sm:$0xff] }
 0x462   :  { %1557 = vmatprep.subr.mxu0 %v9986_v0 }
 0x463   :  { %1558 = vmatpush1.msra.mxu0 %v1528_v4  ;;  %v10722_v4 = vld [vmem:[%s11557_s0 + $0x70] sm:$0xff] }
 0x464   :  { %1559 = vmatprep.subr.mxu0 %v9986_v0 }
 0x465   :  { %1560 = vmatpush1.msra.mxu0 %v1527_v7  ;;  %v1774_v7 = vld [vmem:[#allocation4 + $0x570] sm:$0xff] }
 0x466   :  { %1561 = vmatprep.subr.mxu0 %v9986_v0 }
 0x467   :  { %1562 = vmatpush1.msra.mxu0 %v1526_v8  ;;  %v10729_v8 = vld [vmem:[%s11557_s0 + $0x88] sm:$0xff] }
 0x468   :  { %1563 = vmatprep.subr.mxu0 %v9986_v0 }
 0x469   :  { %1564 = vmatpush1.msra.mxu0 %v1525_v9  ;;  %v1802_v9 = vld [vmem:[#allocation4 + $0x650] sm:$0x1] }
 0x46a   :  { %1565 = vmatprep.subr.mxu0 %v9986_v0 }
 0x46b   :  { %1566 = vmatpush1.msra.mxu0 %v1524_v10  ;;  %v10737_v10 = vld [vmem:[%s11557_s0 + $0x80] sm:$0xff] }
 0x46c   :  { %1567 = vmatprep.subr.mxu0 %v9986_v0 }
 0x46d   :  { %1568 = vmatpush1.msra.mxu0 %v1523_v11  ;;  %v1801_v11 = vld [vmem:[#allocation4 + $0x648] sm:$0xff] }
 0x46e   :  { %1569 = vmatprep.subr.mxu0 %v9986_v0 }
 0x46f   :  { %1570 = vmatpush1.msra.mxu0 %v1522_v12  ;;  %v10745_v12 = vld [vmem:[%s11557_s0 + $0x98] sm:$0x7] }
 0x470   :  { %1571 = vmatprep.subr.mxu0 %v9986_v0 }
 0x471   :  { %1572 = vmatpush1.msra.mxu0 %v1521_v13  ;;  %v1800_v13 = vld [vmem:[#allocation4 + $0x640] sm:$0xff] }
 0x472   :  { %1573 = vmatprep.subr.mxu0 %v9986_v0 }
 0x473   :  { %1574 = vmatpush1.msra.mxu0 %v1520_v14  ;;  %v10753_v14 = vld [vmem:[%s11557_s0 + $0x90] sm:$0x7] }
 0x474   :  { %1575 = vmatprep.subr.mxu0 %v9986_v0 }
 0x475   :  { %1576 = vmatpush1.msra.mxu0 %v1519_v15  ;;  %v1799_v15 = vld [vmem:[#allocation4 + $0x638] sm:$0xff] }
 0x476   :  { %1577 = vmatprep.subr.mxu0 %v9986_v0 }
 0x477   :  { %1578 = vmatpush1.msra.mxu0 %v1518_v23  ;;  %v1798_v23 = vld [vmem:[#allocation4 + $0x630] sm:$0xff] }
 0x478   :  { %1579 = vmatprep.subr.mxu0 %v9986_v0 }
 0x479   :  { %1580 = vmatpush1.msra.mxu0 %v1517_v53  ;;  %v1797_v53 = vld [vmem:[#allocation4 + $0x628] sm:$0xff] }
 0x47a   :  { %1587 = vmatprep.subr.mxu0 %v9986_v0 }
 0x47b   :  { %8984 = vmatpush2.msk.msra.mxu0 %vm267_vm0, %v1545_v24  ;;  %v1796_v24 = vld [vmem:[#allocation4 + $0x620] sm:$0xff] }
 0x47c   :  { %1589 = vmatprep.subr.mxu0 %v9986_v0 }
 0x47d   :  { %1590 = vmatpush2.msra.mxu0 %v1544_v19  ;;  %v1795_v19 = vld [vmem:[#allocation4 + $0x618] sm:$0xff] }
 0x47e   :  { %1591 = vmatprep.subr.mxu0 %v9986_v0 }
 0x47f   :  { %1592 = vmatpush2.msra.mxu0 %v1543_v18  ;;  %v1794_v18 = vld [vmem:[#allocation4 + $0x610] sm:$0xff] }
 0x480   :  { %1593 = vmatprep.subr.mxu0 %v9986_v0 }
 0x481   :  { %1594 = vmatpush2.msra.mxu0 %v1542_v25  ;;  %v1793_v25 = vld [vmem:[#allocation4 + $0x608] sm:$0xff] }
 0x482   :  { %1595 = vmatprep.subr.mxu0 %v9986_v0 }
 0x483   :  { %1596 = vmatpush2.msra.mxu0 %v1541_v26  ;;  %v1792_v26 = vld [vmem:[#allocation4 + $0x600] sm:$0xff] }
 0x484   :  { %1597 = vmatprep.subr.mxu0 %v9986_v0 }
 0x485   :  { %1598 = vmatpush2.msra.mxu0 %v1540_v59  ;;  %v1791_v59 = vld [vmem:[#allocation4 + $0x5f8] sm:$0xff] }
 0x486   :  { %1599 = vmatprep.subr.mxu0 %v9986_v0 }
 0x487   :  { %1600 = vmatpush2.msra.mxu0 %v1539_v27  ;;  %v1790_v27 = vld [vmem:[#allocation4 + $0x5f0] sm:$0xff] }
 0x488   :  { %1601 = vmatprep.subr.mxu0 %v9986_v0 }
 0x489   :  { %1602 = vmatpush2.msra.mxu0 %v1538_v28 }
 0x48a   :  { %1603 = vmatprep.subr.mxu0 %v9986_v0 }
 0x48b   :  { %1604 = vmatpush2.msra.mxu0 %v1537_v29 }
 0x48c   :  { %1605 = vmatprep.subr.mxu0 %v9986_v0 }
 0x48d   :  { %1606 = vmatpush2.msra.mxu0 %v1536_v30 }
 0x48e   :  { %1607 = vmatprep.subr.mxu0 %v9986_v0 }
 0x48f   :  { %1608 = vmatpush2.msra.mxu0 %v1535_v31 }
 0x490   :  { %1609 = vmatprep.subr.mxu0 %v9986_v0 }
 0x491   :  { %1610 = vmatpush2.msra.mxu0 %v1534_v32 }
 0x492   :  { %1611 = vmatprep.subr.mxu0 %v9986_v0 }
 0x493   :  { %1612 = vmatpush2.msra.mxu0 %v1533_v33 }
 0x494   :  { %1614 = vmatmul.mubr.f32.vlgmr.msra.gmra.mxu0 %v10528_v21  ;;  %1806 = vmatprep.subr.mxu0 %v9986_v0 }
 0x495   :  { %1807 = vmatpush1.msra.mxu0 %v1789_v34  ;;  %8986 = vmatprep.mubr.msk.f32.mxu0 %vm236_vm1, %v10534_v22 }
 0x496   :  { %1808 = vmatprep.subr.mxu0 %v9986_v0 }
 0x497   :  { %1809 = vmatpush1.msra.mxu0 %v1788_v60 }
 0x498   :  { %1619 = vmatmul.mubr.f32.gmra.mxu0 %v10632_v35  ;;  %1810 = vmatprep.subr.mxu0 %v9986_v0 }
 0x499   :  { %1811 = vmatpush1.msra.mxu0 %v1787_v61  ;;  %8987 = vmatprep.mubr.msk.f32.mxu0 %vm236_vm1, %v10639_v37 }
 0x49a   :  { %1812 = vmatprep.subr.mxu0 %v9986_v0 }
 0x49b   :  { %1813 = vmatpush1.msra.mxu0 %v1786_v36 }
 0x49c   :  { %1624 = vmatmul.mubr.f32.gmra.mxu0 %v10647_v39  ;;  %1814 = vmatprep.subr.mxu0 %v9986_v0 }
 0x49d   :  { %1815 = vmatpush1.msra.mxu0 %v1785_v38  ;;  %8988 = vmatprep.mubr.msk.f32.mxu0 %vm236_vm1, %v10654_v41 }
 0x49e   :  { %1816 = vmatprep.subr.mxu0 %v9986_v0 }
 0x49f   :  { %1817 = vmatpush1.msra.mxu0 %v1784_v40 }
 0x4a0   :  { %1629 = vmatmul.mubr.f32.gmra.mxu0 %v10662_v43  ;;  %1818 = vmatprep.subr.mxu0 %v9986_v0 }
 0x4a1   :  { %1819 = vmatpush1.msra.mxu0 %v1783_v42  ;;  %8989 = vmatprep.mubr.msk.f32.mxu0 %vm236_vm1, %v10669_v45 }
 0x4a2   :  { %1820 = vmatprep.subr.mxu0 %v9986_v0 }
 0x4a3   :  { %1821 = vmatpush1.msra.mxu0 %v1782_v44 }
 0x4a4   :  { %1634 = vmatmul.mubr.f32.gmra.mxu0 %v10677_v47  ;;  %1822 = vmatprep.subr.mxu0 %v9986_v0 }
 0x4a5   :  { %1823 = vmatpush1.msra.mxu0 %v1781_v46  ;;  %8990 = vmatprep.mubr.msk.f32.mxu0 %vm236_vm1, %v10684_v49 }
 0x4a6   :  { %1824 = vmatprep.subr.mxu0 %v9986_v0 }
 0x4a7   :  { %1825 = vmatpush1.msra.mxu0 %v1780_v48 }
 0x4a8   :  { %1639 = vmatmul.mubr.f32.gmra.mxu0 %v10692_v51  ;;  %1826 = vmatprep.subr.mxu0 %v9986_v0 }
 0x4a9   :  { %1827 = vmatpush1.msra.mxu0 %v1779_v50  ;;  %8991 = vmatprep.mubr.msk.f32.mxu0 %vm236_vm1, %v10699_v56 }
 0x4aa   :  { %1828 = vmatprep.subr.mxu0 %v9986_v0 }
 0x4ab   :  { %1829 = vmatpush1.msra.mxu0 %v1778_v52 }
 0x4ac   :  { %1644 = vmatmul.mubr.f32.gmra.mxu0 %v10707_v57  ;;  %1830 = vmatprep.subr.mxu0 %v9986_v0 }
 0x4ad   :  { %1831 = vmatpush1.msra.mxu0 %v1777_v58  ;;  %8992 = vmatprep.mubr.msk.f32.mxu0 %vm236_vm1, %v10714_v20 }
 0x4ae   :  { %1832 = vmatprep.subr.mxu0 %v9986_v0 }
 0x4af   :  { %1833 = vmatpush1.msra.mxu0 %v1776_v17 }
 0x4b0   :  { %1649 = vmatmul.mubr.f32.gmra.mxu0 %v10722_v4  ;;  %1834 = vmatprep.subr.mxu0 %v9986_v0 }
 0x4b1   :  { %1835 = vmatpush1.msra.mxu0 %v1775_v62  ;;  %8993 = vmatprep.mubr.msk.f32.mxu0 %vm236_vm1, %v10729_v8 }
 0x4b2   :  { %1836 = vmatprep.subr.mxu0 %v9986_v0 }
 0x4b3   :  { %1837 = vmatpush1.msra.mxu0 %v1774_v7 }
 0x4b4   :  { %1654 = vmatmul.mubr.f32.gmra.mxu0 %v10737_v10  ;;  %1844 = vmatprep.subr.mxu0 %v9986_v0 }
 0x4b5   :  { %9000 = vmatpush2.msk.msra.mxu0 %vm267_vm0, %v1802_v9  ;;  %8994 = vmatprep.mubr.msk.f32.mxu0 %vm236_vm1, %v10745_v12 }
 0x4b6   :  { %1846 = vmatprep.subr.mxu0 %v9986_v0 }
 0x4b7   :  { %1847 = vmatpush2.msra.mxu0 %v1801_v11 }
 0x4b8   :  { %1659 = vmatmul.mubr.f32.gmra.mxu0 %v10753_v14  ;;  %1848 = vmatprep.subr.mxu0 %v9986_v0 }
 0x4b9   :  { %1849 = vmatpush2.msra.mxu0 %v1800_v13  ;;  %9001 = vmatprep.mubr.msk.f32.mxu0 %vm236_vm1, %v10593_v1 }
 0x4ba   :  { %1850 = vmatprep.subr.mxu0 %v9986_v0 }
 0x4bb   :  { %1851 = vmatpush2.msra.mxu0 %v1799_v15 }
 0x4bc   :  { %1852 = vmatprep.subr.mxu0 %v9986_v0 }
 0x4bd   :  { %1853 = vmatpush2.msra.mxu0 %v1798_v23 }
 0x4be   :  { %1854 = vmatprep.subr.mxu0 %v9986_v0 }
 0x4bf   :  { %1855 = vmatpush2.msra.mxu0 %v1797_v53 }
 0x4c0   :  { %1856 = vmatprep.subr.mxu0 %v9986_v0 }
 0x4c1   :  { %1857 = vmatpush2.msra.mxu0 %v1796_v24 }
 0x4c2   :  { %1858 = vmatprep.subr.mxu0 %v9986_v0 }
 0x4c3   :  { %1859 = vmatpush2.msra.mxu0 %v1795_v19  ;;  %v1666_v19 = vld [vmem:[#allocation2 + $0xa8] sm:$0xff] }
 0x4c4   :  { %1860 = vmatprep.subr.mxu0 %v9986_v0 }
 0x4c5   :  { %1861 = vmatpush2.msra.mxu0 %v1794_v18  ;;  %v1667_v18 = vld [vmem:[#allocation2 + $0xb0] sm:$0xff] }
 0x4c6   :  { %1862 = vmatprep.subr.mxu0 %v9986_v0 }
 0x4c7   :  { %1863 = vmatpush2.msra.mxu0 %v1793_v25 }
 0x4c8   :  { %1864 = vmatprep.subr.mxu0 %v9986_v0 }
 0x4c9   :  { %1865 = vmatpush2.msra.mxu0 %v1792_v26  ;;  %v1668_v26 = vld [vmem:[#allocation2 + $0xb8] sm:$0xff] }
 0x4ca   :  { %1866 = vmatprep.subr.mxu0 %v9986_v0 }
 0x4cb   :  { %1867 = vmatpush2.msra.mxu0 %v1791_v59  ;;  %v1922_v59 = vld [vmem:[#allocation2 + $0xc0] sm:$0xff] }
 0x4cc   :  { %1868 = vmatprep.subr.mxu0 %v9986_v0 }
 0x4cd   :  { %1869 = vmatpush2.msra.mxu0 %v1790_v27 }
 0x4ce   :  { %1871 = vmatmul.mubr.f32.vlgmr.msra.gmra.mxu0 %v10528_v21 }
 0x4cf   :  { %9002 = vmatprep.mubr.msk.f32.mxu0 %vm236_vm1, %v10534_v22 }
 0x4d2   :  { %1876 = vmatmul.mubr.f32.gmra.mxu0 %v10632_v35 }
 0x4d3   :  { %9003 = vmatprep.mubr.msk.f32.mxu0 %vm236_vm1, %v10639_v37 }
 0x4d6   :  { %1881 = vmatmul.mubr.f32.gmra.mxu0 %v10647_v39 }
 0x4d7   :  { %9004 = vmatprep.mubr.msk.f32.mxu0 %vm236_vm1, %v10654_v41 }
 0x4da   :  { %1886 = vmatmul.mubr.f32.gmra.mxu0 %v10662_v43 }
 0x4db   :  { %9005 = vmatprep.mubr.msk.f32.mxu0 %vm236_vm1, %v10669_v45 }
 0x4de   :  { %1891 = vmatmul.mubr.f32.gmra.mxu0 %v10677_v47 }
 0x4df   :  { %9006 = vmatprep.mubr.msk.f32.mxu0 %vm236_vm1, %v10684_v49 }
 0x4e0   :  { %v9505_v21 = vpop.f32.mrf.mxu0 }
 0x4e1   :  { %v1256_v22 = vadd.f32 %v9505_v21, %v10567_v2  ;;  %v1665_v2 = vld [vmem:[#allocation2 + $0xa0] sm:$0xff] }
 0x4e2   :  { %v10785_v28 = vpop.f32.mrf.mxu0  ;;  %1896 = vmatmul.mubr.f32.gmra.mxu0 %v10692_v51  ;;  %9555 = vmatprep.mubr.msk.f32.mxu1 %vm543_vm2, %v1665_v2 }
 0x4e3   :  { %9007 = vmatprep.mubr.msk.f32.mxu0 %vm236_vm1, %v10699_v56 }
 0x4e4   :  { %v9508_v29 = vpop.f32.mrf.mxu0 }
 0x4e5   :  { %v1258_v30 = vadd.f32 %v9508_v29, %v10572_v5 }
 0x4e6   :  { %1901 = vmatmul.mubr.f32.gmra.mxu0 %v10707_v57  ;;  %v10802_v5 = vpop.f32.mrf.mxu0 }
 0x4e7   :  { %9008 = vmatprep.mubr.msk.f32.mxu0 %vm236_vm1, %v10714_v20 }
 0x4ea   :  { %1906 = vmatmul.mubr.f32.gmra.mxu0 %v10722_v4 }
 0x4eb   :  { %9009 = vmatprep.mubr.msk.f32.mxu0 %vm236_vm1, %v10729_v8 }
 0x4ee   :  { %1911 = vmatmul.mubr.f32.gmra.mxu0 %v10737_v10 }
 0x4ef   :  { %9010 = vmatprep.mubr.msk.f32.mxu0 %vm236_vm1, %v10745_v12 }
 0x4f2   :  { %1916 = vmatmul.mubr.f32.gmra.mxu0 %v10753_v14 }
 0x51a   :  { %v9531_v31 = vpop.f32.mrf.mxu0 }
 0x51b   :  { %v10804_v32 = vadd.f32 %v9531_v31, %v1256_v22 }
 0x51c   :  { %v10806_v33 = vpop.f32.mrf.mxu0 }
 0x51e   :  { %v9534_v34 = vpop.f32.mrf.mxu0 }
 0x51f   :  { %v10808_v60 = vadd.f32 %v9534_v34, %v1258_v30 }
 0x520   :  { %v10810_v61 = vpop.f32.mrf.mxu0 }
 0x554   :  { %v1615_v36 = vpop.f32.mrf.mxu0 }
 0x556   :  { %v1617_v38 = vpop.f32.mrf.mxu0 }
 0x558   :  { %v1620_v40 = vpop.f32.mrf.mxu0 }
 0x55a   :  { %v1622_v42 = vpop.f32.mrf.mxu0 }
 0x55c   :  { %v1625_v44 = vpop.f32.mrf.mxu0 }
 0x55e   :  { %v1627_v46 = vpop.f32.mrf.mxu0 }
 0x560   :  { %v1630_v48 = vpop.f32.mrf.mxu0 }
 0x562   :  { %v1632_v50 = vpop.f32.mrf.mxu0 }
 0x564   :  { %v1635_v52 = vpop.f32.mrf.mxu0 }
 0x566   :  { %v1637_v58 = vpop.f32.mrf.mxu0 }
 0x568   :  { %v1640_v17 = vpop.f32.mrf.mxu0 }
 0x56a   :  { %v1642_v62 = vpop.f32.mrf.mxu0 }
 0x56b   :  { %v1923_v62 = vld [vmem:[#allocation2 + $0xc8] sm:$0xff] }
 0x56c   :  { %v1645_v7 = vpop.f32.mrf.mxu0 }
 0x56e   :  { %v1647_v9 = vpop.f32.mrf.mxu0 }
 0x56f   :  { %v1924_v9 = vld [vmem:[#allocation2 + $0xd0] sm:$0xff] }
 0x570   :  { %v1650_v11 = vpop.f32.mrf.mxu0 }
 0x572   :  { %v1652_v13 = vpop.f32.mrf.mxu0 }
 0x573   :  { %v1925_v13 = vld [vmem:[#allocation2 + $0xd8] sm:$0xff] }
 0x574   :  { %v1655_v15 = vpop.f32.mrf.mxu0 }
 0x576   :  { %v1657_v23 = vpop.f32.mrf.mxu0 }
 0x577   :  { %v2043_v23 = vld [vmem:[#allocation4 + $0x6b8] sm:$0xff] }
 0x578   :  { %v1660_v53 = vpop.f32.mrf.mxu0 }
 0x579   :  { %9535 = vmatprep.subr.msk.mxu1 %vm556_vm3, %v1660_v53 }
 0x57a   :  { %9536 = vmatpush3.msk.msra.mxu1 %vm556_vm3, %v1660_v53  ;;  %v1662_v24 = vpop.f32.mrf.mxu0  ;;  %v2042_v53 = vld [vmem:[#allocation4 + $0x6b0] sm:$0xff] }
 0x57b   :  { %9537 = vmatprep.subr.mxu1 %v1655_v15  ;;  %v2041_v24 = vld [vmem:[#allocation4 + $0x6a8] sm:$0xff] }
 0x57c   :  { %9538 = vmatpush3.msra.mxu1 %v1655_v15  ;;  %v2044_v15 = vld [vmem:[#allocation4 + $0x6c0] sm:$0xff] }
 0x57d   :  { %9539 = vmatprep.subr.mxu1 %v1650_v11 }
 0x57e   :  { %9540 = vmatpush3.msra.mxu1 %v1650_v11  ;;  %v2045_v11 = vld [vmem:[#allocation4 + $0x6c8] sm:$0xff] }
 0x57f   :  { %9541 = vmatprep.subr.mxu1 %v1645_v7 }
 0x580   :  { %9542 = vmatpush3.msra.mxu1 %v1645_v7  ;;  %v2046_v7 = vld [vmem:[#allocation4 + $0x6d0] sm:$0xff] }
 0x581   :  { %9543 = vmatprep.subr.mxu1 %v1640_v17 }
 0x582   :  { %9544 = vmatpush3.msra.mxu1 %v1640_v17 }
 0x583   :  { %9545 = vmatprep.subr.mxu1 %v1635_v52 }
 0x584   :  { %9546 = vmatpush3.msra.mxu1 %v1635_v52 }
 0x585   :  { %9547 = vmatprep.subr.mxu1 %v1630_v48 }
 0x586   :  { %9548 = vmatpush3.msra.mxu1 %v1630_v48 }
 0x587   :  { %9549 = vmatprep.subr.mxu1 %v1625_v44 }
 0x588   :  { %9550 = vmatpush3.msra.mxu1 %v1625_v44 }
 0x589   :  { %9551 = vmatprep.subr.mxu1 %v1620_v40 }
 0x58a   :  { %9552 = vmatpush3.msra.mxu1 %v1620_v40 }
 0x58b   :  { %9553 = vmatprep.subr.mxu1 %v1615_v36 }
 0x58c   :  { %9554 = vmatpush3.msra.mxu1 %v1615_v36 }
 0x58d   :  { %9556 = vmatmul.mubr.msk.f32.vlgmr.msra.gmra.mxu1 %vm543_vm2, %v1666_v19  ;;  %v2040_v19 = vld [vmem:[#allocation4 + $0x6a0] sm:$0xff] }
 0x58e   :  { %v1872_v25 = vpop.f32.mrf.mxu0  ;;  %9558 = vmatprep.mubr.msk.f32.mxu1 %vm543_vm2, %v1667_v18  ;;  %v2039_v18 = vld [vmem:[#allocation4 + $0x698] sm:$0xff] }
 0x590   :  { %v1874_v27 = vpop.f32.mrf.mxu0 }
 0x591   :  { %9559 = vmatmul.mubr.msk.f32.gmra.mxu1 %vm543_vm2, %v1668_v26  ;;  %v2036_v26 = vld [vmem:[#allocation4 + $0x680] sm:$0xff]  ;;  %v2034_v27 = vld [vmem:[#allocation4 + $0x670] sm:$0xff] }
 0x592   :  { %v1877_v21 = vpop.f32.mrf.mxu0  ;;  %9581 = vmatprep.mubr.msk.f32.mxu1 %vm543_vm2, %v1922_v59  ;;  %v2035_v59 = vld [vmem:[#allocation4 + $0x678] sm:$0xff] }
 0x594   :  { %v1879_v22 = vpop.f32.mrf.mxu0 }
 0x595   :  { %v2032_v22 = vld [vmem:[#allocation4 + $0x660] sm:$0xff] }
 0x596   :  { %v1882_v29 = vpop.f32.mrf.mxu0 }
 0x598   :  { %v1884_v30 = vpop.f32.mrf.mxu0 }
 0x599   :  { %v2059_v30 = vld [vmem:[#allocation4 + $0x738] sm:$0x1] }
 0x59a   :  { %v1887_v2 = vpop.f32.mrf.mxu0 }
 0x59c   :  { %v1889_v31 = vpop.f32.mrf.mxu0 }
 0x59d   :  { %v2057_v31 = vld [vmem:[#allocation4 + $0x728] sm:$0xff] }
 0x59e   :  { %v1892_v34 = vpop.f32.mrf.mxu0 }
 0x5a0   :  { %v1894_v36 = vpop.f32.mrf.mxu0 }
 0x5a1   :  { %v2055_v36 = vld [vmem:[#allocation4 + $0x718] sm:$0xff] }
 0x5a2   :  { %v1897_v38 = vpop.f32.mrf.mxu0 }
 0x5a4   :  { %v1899_v40 = vpop.f32.mrf.mxu0 }
 0x5a5   :  { %v2053_v40 = vld [vmem:[#allocation4 + $0x708] sm:$0xff] }
 0x5a6   :  { %v1902_v42 = vpop.f32.mrf.mxu0 }
 0x5a8   :  { %v1904_v44 = vpop.f32.mrf.mxu0 }
 0x5a9   :  { %v2051_v44 = vld [vmem:[#allocation4 + $0x6f8] sm:$0xff] }
 0x5aa   :  { %v1907_v46 = vpop.f32.mrf.mxu0 }
 0x5ac   :  { %v1909_v48 = vpop.f32.mrf.mxu0 }
 0x5ad   :  { %v2049_v48 = vld [vmem:[#allocation4 + $0x6e8] sm:$0xff] }
 0x5ae   :  { %v1912_v50 = vpop.f32.mrf.mxu0 }
 0x5b0   :  { %v1914_v52 = vpop.f32.mrf.mxu0 }
 0x5b1   :  { %v2047_v52 = vld [vmem:[#allocation4 + $0x6d8] sm:$0xff] }
 0x5b2   :  { %v1917_v58 = vpop.f32.mrf.mxu0 }
 0x5b3   :  { %9561 = vmatprep.subr.msk.mxu1 %vm556_vm3, %v1917_v58 }
 0x5b4   :  { %v1919_v17 = vpop.f32.mrf.mxu0  ;;  %9562 = vmatpush3.msk.msra.mxu1 %vm556_vm3, %v1917_v58  ;;  %v9733_v58 = vld [vmem:[%s11557_s0] sm:$0xff] }
 0x5b5   :  { %9563 = vmatprep.subr.mxu1 %v1912_v50  ;;  %v9734_v17 = vld [vmem:[%s11557_s0 + $0x18] sm:$0xff] }
 0x5b6   :  { %9564 = vmatpush3.msra.mxu1 %v1912_v50  ;;  %v2048_v50 = vld [vmem:[#allocation4 + $0x6e0] sm:$0xff] }
 0x5b7   :  { %9565 = vmatprep.subr.mxu1 %v1907_v46 }
 0x5b8   :  { %9566 = vmatpush3.msra.mxu1 %v1907_v46  ;;  %v2050_v46 = vld [vmem:[#allocation4 + $0x6f0] sm:$0xff] }
 0x5b9   :  { %9567 = vmatprep.subr.mxu1 %v1902_v42 }
 0x5ba   :  { %9568 = vmatpush3.msra.mxu1 %v1902_v42  ;;  %v2052_v42 = vld [vmem:[#allocation4 + $0x700] sm:$0xff] }
 0x5bb   :  { %9569 = vmatprep.subr.mxu1 %v1897_v38 }
 0x5bc   :  { %9570 = vmatpush3.msra.mxu1 %v1897_v38  ;;  %v2054_v38 = vld [vmem:[#allocation4 + $0x710] sm:$0xff] }
 0x5bd   :  { %9571 = vmatprep.subr.mxu1 %v1892_v34 }
 0x5be   :  { %9572 = vmatpush3.msra.mxu1 %v1892_v34  ;;  %v2056_v34 = vld [vmem:[#allocation4 + $0x720] sm:$0xff] }
 0x5bf   :  { %9573 = vmatprep.subr.mxu1 %v1887_v2 }
 0x5c0   :  { %9574 = vmatpush3.msra.mxu1 %v1887_v2  ;;  %v2058_v2 = vld [vmem:[#allocation4 + $0x730] sm:$0xff] }
 0x5c1   :  { %9575 = vmatprep.subr.mxu1 %v1882_v29 }
 0x5c2   :  { %9576 = vmatpush3.msra.mxu1 %v1882_v29  ;;  %v2031_v29 = vld [vmem:[#allocation4 + $0x658] sm:$0xff] }
 0x5c3   :  { %9577 = vmatprep.subr.mxu1 %v1877_v21 }
 0x5c4   :  { %9578 = vmatpush3.msra.mxu1 %v1877_v21  ;;  %v2033_v21 = vld [vmem:[#allocation4 + $0x668] sm:$0xff] }
 0x5c5   :  { %9579 = vmatprep.subr.mxu1 %v1872_v25 }
 0x5c6   :  { %9580 = vmatpush3.msra.mxu1 %v1872_v25  ;;  %v2038_v25 = vld [vmem:[#allocation4 + $0x690] sm:$0xff] }
 0x5c7   :  { %9582 = vmatmul.mubr.msk.f32.vlgmr.msra.gmra.mxu1 %vm543_vm2, %v1923_v62  ;;  %2063 = vmatprep.subr.mxu1 %v9986_v0 }
 0x5c8   :  { %2064 = vmatpush1.msra.mxu1 %v2046_v7  ;;  %9584 = vmatprep.mubr.msk.f32.mxu1 %vm543_vm2, %v1924_v9 }
 0x5c9   :  { %2065 = vmatprep.subr.mxu1 %v9986_v0 }
 0x5ca   :  { %2066 = vmatpush1.msra.mxu1 %v2045_v11 }
 0x5cb   :  { %9585 = vmatmul.mubr.msk.f32.gmra.mxu1 %vm543_vm2, %v1925_v13  ;;  %2067 = vmatprep.subr.mxu1 %v9986_v0 }
 0x5cc   :  { %2068 = vmatpush1.msra.mxu1 %v2044_v15  ;;  %9017 = vmatprep.mubr.msk.f32.mxu1 %vm236_vm1, %v10593_v1  ;;  %v2037_v1 = vld [vmem:[#allocation4 + $0x688] sm:$0xff] }
 0x5cd   :  { %2069 = vmatprep.subr.mxu1 %v9986_v0 }
 0x5ce   :  { %2070 = vmatpush1.msra.mxu1 %v2043_v23 }
 0x5cf   :  { %2071 = vmatprep.subr.mxu1 %v9986_v0 }
 0x5d0   :  { %2072 = vmatpush1.msra.mxu1 %v2042_v53 }
 0x5d1   :  { %2073 = vmatprep.subr.mxu1 %v9986_v0 }
 0x5d2   :  { %2074 = vmatpush1.msra.mxu1 %v2041_v24 }
 0x5d3   :  { %2075 = vmatprep.subr.mxu1 %v9986_v0 }
 0x5d4   :  { %2076 = vmatpush1.msra.mxu1 %v2040_v19 }
 0x5d5   :  { %2077 = vmatprep.subr.mxu1 %v9986_v0 }
 0x5d6   :  { %2078 = vmatpush1.msra.mxu1 %v2039_v18 }
 0x5d7   :  { %2079 = vmatprep.subr.mxu1 %v9986_v0 }
 0x5d8   :  { %2080 = vmatpush1.msra.mxu1 %v2038_v25 }
 0x5d9   :  { %2081 = vmatprep.subr.mxu1 %v9986_v0 }
 0x5da   :  { %2082 = vmatpush1.msra.mxu1 %v2037_v1 }
 0x5db   :  { %2083 = vmatprep.subr.mxu1 %v9986_v0 }
 0x5dc   :  { %2084 = vmatpush1.msra.mxu1 %v2036_v26 }
 0x5dd   :  { %2085 = vmatprep.subr.mxu1 %v9986_v0 }
 0x5de   :  { %2086 = vmatpush1.msra.mxu1 %v2035_v59  ;;  %v2180_v59 = vld [vmem:[#allocation2 + $0xe8] sm:$0xff] }
 0x5df   :  { %2087 = vmatprep.subr.mxu1 %v9986_v0 }
 0x5e0   :  { %2088 = vmatpush1.msra.mxu1 %v2034_v27  ;;  %v2181_v27 = vld [vmem:[#allocation2 + $0xf0] sm:$0xff] }
 0x5e1   :  { %2089 = vmatprep.subr.mxu1 %v9986_v0 }
 0x5e2   :  { %2090 = vmatpush1.msra.mxu1 %v2033_v21  ;;  %v2182_v21 = vld [vmem:[#allocation2 + $0xf8] sm:$0xff] }
 0x5e3   :  { %2091 = vmatprep.subr.mxu1 %v9986_v0 }
 0x5e4   :  { %2092 = vmatpush1.msra.mxu1 %v2032_v22  ;;  %v2317_v22 = vld [vmem:[#allocation7 + $0x78] sm:$0xff] }
 0x5e5   :  { %2093 = vmatprep.subr.mxu1 %v9986_v0 }
 0x5e6   :  { %2094 = vmatpush1.msra.mxu1 %v2031_v29  ;;  %v2316_v29 = vld [vmem:[#allocation7 + $0x70] sm:$0xff] }
 0x5e7   :  { %2101 = vmatprep.subr.mxu1 %v9986_v0 }
 0x5e8   :  { %9016 = vmatpush2.msk.msra.mxu1 %vm267_vm0, %v2059_v30  ;;  %v2315_v30 = vld [vmem:[#allocation7 + $0x68] sm:$0xff] }
 0x5e9   :  { %2103 = vmatprep.subr.mxu1 %v9986_v0 }
 0x5ea   :  { %2104 = vmatpush2.msra.mxu1 %v2058_v2  ;;  %v2314_v2 = vld [vmem:[#allocation7 + $0x60] sm:$0xff] }
 0x5eb   :  { %2105 = vmatprep.subr.mxu1 %v9986_v0 }
 0x5ec   :  { %2106 = vmatpush2.msra.mxu1 %v2057_v31  ;;  %v2311_v31 = vld [vmem:[#allocation7 + $0x48] sm:$0xff] }
 0x5ed   :  { %2107 = vmatprep.subr.mxu1 %v9986_v0 }
 0x5ee   :  { %2108 = vmatpush2.msra.mxu1 %v2056_v34  ;;  %v2313_v34 = vld [vmem:[#allocation7 + $0x58] sm:$0xff] }
 0x5ef   :  { %2109 = vmatprep.subr.mxu1 %v9986_v0 }
 0x5f0   :  { %2110 = vmatpush2.msra.mxu1 %v2055_v36  ;;  %v2310_v36 = vld [vmem:[#allocation7 + $0x40] sm:$0xff] }
 0x5f1   :  { %2111 = vmatprep.subr.mxu1 %v9986_v0 }
 0x5f2   :  { %2112 = vmatpush2.msra.mxu1 %v2054_v38  ;;  %v2312_v38 = vld [vmem:[#allocation7 + $0x50] sm:$0xff] }
 0x5f3   :  { %2113 = vmatprep.subr.mxu1 %v9986_v0 }
 0x5f4   :  { %2114 = vmatpush2.msra.mxu1 %v2053_v40  ;;  %v2307_v40 = vld [vmem:[#allocation7 + $0x28] sm:$0xff] }
 0x5f5   :  { %2115 = vmatprep.subr.mxu1 %v9986_v0 }
 0x5f6   :  { %2116 = vmatpush2.msra.mxu1 %v2052_v42  ;;  %v2309_v42 = vld [vmem:[#allocation7 + $0x38] sm:$0xff] }
 0x5f7   :  { %2117 = vmatprep.subr.mxu1 %v9986_v0 }
 0x5f8   :  { %2118 = vmatpush2.msra.mxu1 %v2051_v44  ;;  %v2306_v44 = vld [vmem:[#allocation7 + $0x20] sm:$0xff] }
 0x5f9   :  { %2119 = vmatprep.subr.mxu1 %v9986_v0 }
 0x5fa   :  { %2120 = vmatpush2.msra.mxu1 %v2050_v46  ;;  %v2308_v46 = vld [vmem:[#allocation7 + $0x30] sm:$0xff] }
 0x5fb   :  { %2121 = vmatprep.subr.mxu1 %v9986_v0 }
 0x5fc   :  { %2122 = vmatpush2.msra.mxu1 %v2049_v48  ;;  %v2303_v48 = vld [vmem:[#allocation7 + $0x8] sm:$0xff] }
 0x5fd   :  { %2123 = vmatprep.subr.mxu1 %v9986_v0 }
 0x5fe   :  { %2124 = vmatpush2.msra.mxu1 %v2048_v50  ;;  %v2305_v50 = vld [vmem:[#allocation7 + $0x18] sm:$0xff] }
 0x5ff   :  { %2125 = vmatprep.subr.mxu1 %v9986_v0 }
 0x600   :  { %2126 = vmatpush2.msra.mxu1 %v2047_v52  ;;  %v2302_v52 = vld [vmem:[#allocation7] sm:$0xff] }
 0x601   :  { %2128 = vmatmul.mubr.f32.vlgmr.msra.gmra.mxu1 %v9733_v58  ;;  %2444 = vmatprep.subr.mxu1 %v2317_v22  ;;  %v2304_v58 = vld [vmem:[#allocation7 + $0x10] sm:$0xff] }
 0x602   :  { %9018 = vmatprep.mubr.msk.f32.mxu1 %vm236_vm1, %v9734_v17  ;;  %2445 = vmatpush1.msra.mxu1 %v2316_v29  ;;  %v2525_v17 = vld [vmem:[#allocation7 + $0xe8] sm:$0xff] }
 0x603   :  { %2446 = vmatprep.subr.mxu1 %v2313_v34 }
 0x604   :  { %2447 = vmatpush1.msra.mxu1 %v2312_v38 }
 0x605   :  { %2133 = vmatmul.mubr.f32.gmra.mxu1 %v10632_v35  ;;  %2448 = vmatprep.subr.mxu1 %v2309_v42 }
 0x606   :  { %9019 = vmatprep.mubr.msk.f32.mxu1 %vm236_vm1, %v10639_v37  ;;  %2449 = vmatpush1.msra.mxu1 %v2308_v46 }
 0x607   :  { %2450 = vmatprep.subr.mxu1 %v2305_v50 }
 0x608   :  { %2451 = vmatpush1.msra.mxu1 %v2304_v58 }
 0x609   :  { %2138 = vmatmul.mubr.f32.gmra.mxu1 %v10647_v39 }
 0x60a   :  { %9020 = vmatprep.mubr.msk.f32.mxu1 %vm236_vm1, %v10654_v41 }
 0x60d   :  { %2143 = vmatmul.mubr.f32.gmra.mxu1 %v10662_v43 }
 0x60e   :  { %9021 = vmatprep.mubr.msk.f32.mxu1 %vm236_vm1, %v10669_v45  ;;  %v2179_v45 = vld [vmem:[#allocation2 + $0xe0] sm:$0xff] }
 0x60f   :  { %9607 = vmatprep.mubr.msk.f32.mxu0 %vm543_vm2, %v2179_v45 }
 0x611   :  { %2148 = vmatmul.mubr.f32.gmra.mxu1 %v10677_v47 }
 0x612   :  { %9022 = vmatprep.mubr.msk.f32.mxu1 %vm236_vm1, %v10684_v49 }
 0x615   :  { %2153 = vmatmul.mubr.f32.gmra.mxu1 %v10692_v51 }
 0x616   :  { %9023 = vmatprep.mubr.msk.f32.mxu1 %vm236_vm1, %v10699_v56 }
 0x619   :  { %2158 = vmatmul.mubr.f32.gmra.mxu1 %v10707_v57 }
 0x61a   :  { %9024 = vmatprep.mubr.msk.f32.mxu1 %vm236_vm1, %v10714_v20 }
 0x61d   :  { %2163 = vmatmul.mubr.f32.gmra.mxu1 %v10722_v4 }
 0x61e   :  { %9025 = vmatprep.mubr.msk.f32.mxu1 %vm236_vm1, %v10729_v8 }
 0x621   :  { %2168 = vmatmul.mubr.f32.gmra.mxu1 %v10737_v10 }
 0x622   :  { %9026 = vmatprep.mubr.msk.f32.mxu1 %vm236_vm1, %v10745_v12 }
 0x625   :  { %2173 = vmatmul.mubr.f32.gmra.mxu1 %v10753_v14 }
 0x626   :  { %2484 = vmatprep.mubr.f32.mxu1 %v9986_v0 }
 0x64d   :  { %v9557_v35 = vpop.f32.mrf.mxu1 }
 0x64e   :  { %v1770_v37 = vadd.f32 %v9557_v35, %v10804_v32  ;;  %v2527_v35 = vld [vmem:[#allocation7 + $0xf8] sm:$0xff] }
 0x64f   :  { %v10889_v39 = vpop.f32.mrf.mxu1  ;;  %2641 = vmatprep.subr.mxu1 %v2527_v35 }
 0x651   :  { %v9560_v41 = vpop.f32.mrf.mxu1 }
 0x652   :  { %v1772_v43 = vadd.f32 %v9560_v41, %v10808_v60 }
 0x653   :  { %v10893_v47 = vpop.f32.mrf.mxu1 }
 0x687   :  { %v9583_v49 = vpop.f32.mrf.mxu1 }
 0x688   :  { %v10895_v51 = vadd.f32 %v9583_v49, %v1770_v37  ;;  %v727_v37 = vadd.f32 %v10422_v55, %v10420_v54 }
 0x689   :  { %v10897_v56 = vpop.f32.mrf.mxu1 }
 0x68a   :  { %v998_v41 = vadd.f32 %v10569_v3, %v727_v37 }
 0x68b   :  { %v9586_v57 = vpop.f32.mrf.mxu1 }
 0x68c   :  { %v10899_v20 = vadd.f32 %v9586_v57, %v1772_v43  ;;  %v737_v43 = vadd.f32 %v10564_v63, %v10426_v16  ;;  %v1255_v45 = vadd.f32 %v10785_v28, %v998_v41 }
 0x68d   :  { %v10901_v4 = vpop.f32.mrf.mxu1 }
 0x68e   :  { %v1000_v49 = vadd.f32 %v10574_v6, %v737_v43  ;;  %v1512_v57 = vadd.f32 %v10806_v33, %v1255_v45  ;;  %v9032_v6 = vld [vmem:[%s11560_s3] ss:$0 sm:$0xff]  ;;  %v3143_v45 = vld [vmem:[#allocation12 + $0x260] sm:$0xff] }
 0x68f   :  { %v10984_v43 = vld [vmem:[#allocation6] sm:$0xff] }
 0x6c1   :  { %v2129_v8 = vpop.f32.mrf.mxu1 }
 0x6c3   :  { %v2131_v10 = vpop.f32.mrf.mxu1 }
 0x6c4   :  { %v1769_v10 = vadd.f32 %v10889_v39, %v1512_v57 }
 0x6c5   :  { %v2134_v12 = vpop.f32.mrf.mxu1 }
 0x6c6   :  { %v2026_v54 = vadd.f32 %v10897_v56, %v1769_v10  ;;  %v3138_v10 = vld [vmem:[#allocation12 + $0x238] sm:$0xff] }
 0x6c7   :  { %v2136_v14 = vpop.f32.mrf.mxu1 }
 0x6c9   :  { %v2139_v32 = vpop.f32.mrf.mxu1 }
 0x6cb   :  { %v2141_v60 = vpop.f32.mrf.mxu1 }
 0x6cd   :  { %v2144_v62 = vpop.f32.mrf.mxu1 }
 0x6cf   :  { %v2146_v7 = vpop.f32.mrf.mxu1 }
 0x6d0   :  { %v2526_v7 = vld [vmem:[#allocation7 + $0xf0] sm:$0xff] }
 0x6d1   :  { %v2149_v9 = vpop.f32.mrf.mxu1 }
 0x6d3   :  { %v2151_v11 = vpop.f32.mrf.mxu1 }
 0x6d4   :  { %v2520_v11 = vld [vmem:[#allocation7 + $0xc0] sm:$0xff] }
 0x6d5   :  { %v2154_v13 = vpop.f32.mrf.mxu1 }
 0x6d7   :  { %v2156_v15 = vpop.f32.mrf.mxu1 }
 0x6d8   :  { %v2517_v15 = vld [vmem:[#allocation7 + $0xa8] sm:$0xff] }
 0x6d9   :  { %v2159_v23 = vpop.f32.mrf.mxu1 }
 0x6db   :  { %v2161_v53 = vpop.f32.mrf.mxu1 }
 0x6dd   :  { %v2164_v24 = vpop.f32.mrf.mxu1 }
 0x6df   :  { %v2166_v19 = vpop.f32.mrf.mxu1 }
 0x6e0   :  { %v2518_v19 = vld [vmem:[#allocation7 + $0xb0] sm:$0xff] }
 0x6e1   :  { %v2169_v18 = vpop.f32.mrf.mxu1 }
 0x6e3   :  { %v2171_v25 = vpop.f32.mrf.mxu1 }
 0x6e4   :  { %v2515_v25 = vld [vmem:[#allocation7 + $0x98] sm:$0xff] }
 0x6e5   :  { %v2174_v1 = vpop.f32.mrf.mxu1 }
 0x6e6   :  { %9587 = vmatprep.subr.msk.mxu0 %vm556_vm3, %v2174_v1 }
 0x6e7   :  { %v2176_v26 = vpop.f32.mrf.mxu1  ;;  %9588 = vmatpush3.msk.msra.mxu0 %vm556_vm3, %v2174_v1  ;;  %v2512_v1 = vld [vmem:[#allocation7 + $0x80] sm:$0xff] }
 0x6e8   :  { %9589 = vmatprep.subr.mxu0 %v2169_v18 }
 0x6e9   :  { %9590 = vmatpush3.msra.mxu0 %v2169_v18  ;;  %v2513_v18 = vld [vmem:[#allocation7 + $0x88] sm:$0xff] }
 0x6ea   :  { %9591 = vmatprep.subr.mxu0 %v2164_v24 }
 0x6eb   :  { %9592 = vmatpush3.msra.mxu0 %v2164_v24  ;;  %v2516_v24 = vld [vmem:[#allocation7 + $0xa0] sm:$0xff] }
 0x6ec   :  { %9593 = vmatprep.subr.mxu0 %v2159_v23 }
 0x6ed   :  { %9594 = vmatpush3.msra.mxu0 %v2159_v23  ;;  %v2519_v23 = vld [vmem:[#allocation7 + $0xb8] sm:$0xff] }
 0x6ee   :  { %9595 = vmatprep.subr.mxu0 %v2154_v13 }
 0x6ef   :  { %9596 = vmatpush3.msra.mxu0 %v2154_v13  ;;  %v2522_v13 = vld [vmem:[#allocation7 + $0xd0] sm:$0xff] }
 0x6f0   :  { %9597 = vmatprep.subr.mxu0 %v2149_v9 }
 0x6f1   :  { %9598 = vmatpush3.msra.mxu0 %v2149_v9  ;;  %v2523_v9 = vld [vmem:[#allocation7 + $0xd8] sm:$0xff] }
 0x6f2   :  { %9599 = vmatprep.subr.mxu0 %v2144_v62 }
 0x6f3   :  { %9600 = vmatpush3.msra.mxu0 %v2144_v62  ;;  %v2524_v62 = vld [vmem:[#allocation7 + $0xe0] sm:$0xff] }
 0x6f4   :  { %9601 = vmatprep.subr.mxu0 %v2139_v32 }
 0x6f5   :  { %9602 = vmatpush3.msra.mxu0 %v2139_v32 }
 0x6f6   :  { %9603 = vmatprep.subr.mxu0 %v2134_v12 }
 0x6f7   :  { %9604 = vmatpush3.msra.mxu0 %v2134_v12 }
 0x6f8   :  { %9605 = vmatprep.subr.mxu0 %v2129_v8 }
 0x6f9   :  { %9606 = vmatpush3.msra.mxu0 %v2129_v8  ;;  %v1257_v8 = vadd.f32 %v10802_v5, %v1000_v49  ;;  %v3142_v49 = vld [vmem:[#allocation12 + $0x258] sm:$0xff] }
 0x6fa   :  { %9608 = vmatmul.mubr.msk.f32.vlgmr.msra.gmra.mxu0 %vm543_vm2, %v2180_v59  ;;  %2355 = vmatprep.subr.mxu0 %v2315_v30  ;;  %v2514_v59 = vld [vmem:[#allocation7 + $0x90] sm:$0xff] }
 0x6fb   :  { %9610 = vmatprep.mubr.msk.f32.mxu0 %vm543_vm2, %v2181_v27  ;;  %2356 = vmatpush1.msra.mxu0 %v2314_v2  ;;  %v1514_v14 = vadd.f32 %v10810_v61, %v1257_v8 }
 0x6fc   :  { %2357 = vmatprep.subr.mxu0 %v2311_v31 }
 0x6fd   :  { %2358 = vmatpush1.msra.mxu0 %v2310_v36  ;;  %v1771_v3 = vadd.f32 %v10893_v47, %v1514_v14 }
 0x6fe   :  { %9611 = vmatmul.mubr.msk.f32.gmra.mxu0 %vm543_vm2, %v2182_v21  ;;  %2359 = vmatprep.subr.mxu0 %v2307_v40 }
 0x6ff   :  { %2395 = vmatprep.mubr.f32.mxu0 %v9986_v0  ;;  %2360 = vmatpush1.msra.mxu0 %v2306_v44  ;;  %v2028_v5 = vadd.f32 %v10901_v4, %v1771_v3  ;;  %v2521_v4 = vld [vmem:[#allocation7 + $0xc8] sm:$0xff] }
 0x700   :  { %2361 = vmatprep.subr.mxu0 %v2303_v48  ;;  %v3132_v3 = vld [vmem:[#allocation12 + $0x208] sm:$0xff] }
 0x701   :  { %2362 = vmatpush1.msra.mxu0 %v2302_v52 }
 0x702   :  { %2552 = vmatprep.subr.mxu0 %v2525_v17 }
 0x7ba   :  { %v9609_v12 = vpop.f32.mrf.mxu0 }
 0x7bb   :  { %v2284_v16 = vadd.f32 %v9609_v12, %v10895_v51  ;;  %v3137_v12 = vld [vmem:[#allocation12 + $0x230] sm:$0xff] }
 0x7bc   :  { %v2264_v55 = vpop.f32.mrf.mxu0 }
 0x7bd   :  { %v2283_v63 = vadd.f32 %v2264_v55, %v2026_v54  ;;  %v2295_v32 = vadd.f32 %v9032_v6, %v2284_v16  ;;  %v10991_v54 = vld [vmem:[#allocation6 + $0x8] sm:$0xff]  ;;  %v3133_v55 = vld [vmem:[#allocation12 + $0x210] sm:$0xff] }
 0x7be   :  { %v9612_v28 = vpop.f32.mrf.mxu0 }
 0x7bf   :  { %v2294_v33 = vadd.f32 %v9032_v6, %v2283_v63  ;;  %v2286_v56 = vadd.f32 %v9612_v28, %v10899_v20  ;;  %v3127_v28 = vld [vmem:[#allocation12 + $0x1e0] sm:$0xff] }
 0x7c0   :  { %v2274_v39 = vpop.f32.mrf.mxu0 }
 0x7c1   :  { %9665 = vtanh.f32 %v2294_v33  ;;  %v2285_v61 = vadd.f32 %v2274_v39, %v2028_v5  ;;  %v2297_v47 = vadd.f32 %v9032_v6, %v2286_v56  ;;  %v3123_v33 = vld [vmem:[#allocation12 + $0x1c0] sm:$0xff]  ;;  %v3122_v39 = vld [vmem:[#allocation12 + $0x1b8] sm:$0xff] }
 0x7c2   :  { %9667 = vtanh.f32 %v2295_v32  ;;  %v3118_v56 = vld [vmem:[#allocation12 + $0x198] sm:$0xff] }
 0x7c3   :  { %v2296_v60 = vadd.f32 %v9032_v6, %v2285_v61  ;;  %v3128_v6 = vld [vmem:[#allocation12 + $0x1e8] sm:$0xff] }
 0x7c5   :  { %9669 = vtanh.f32 %v2296_v60  ;;  %v3117_v60 = vld [vmem:[#allocation12 + $0x190] sm:$0xff] }
 0x7c6   :  { %9671 = vtanh.f32 %v2297_v47  ;;  %v3113_v47 = vld [vmem:[#allocation12 + $0x170] sm:$0xff] }
 0x7ce   :  { %v9666_v51 = vpop.eup %9665 }
 0x7cf   :  { %9033 = vmatmul.mubr.msk.f32.vlgmr.msra.gmra.mxu0 %vm2318_vm4, %v9666_v51  ;;  %9037 = vmatmul.mubr.msk.f32.vlgmr.msra.gmra.mxu1 %vm2318_vm4, %v9666_v51  ;;  %v9668_v20 = vpop.eup %9667 }
 0x7d0   :  { %2401 = vmatprep.mubr.f32.mxu0 %v9986_v0  ;;  %2490 = vmatprep.mubr.f32.mxu1 %v9986_v0 }
 0x7d1   :  { %2553 = vmatpush1.msra.mxu0 %v2524_v62  ;;  %2642 = vmatpush1.msra.mxu1 %v2526_v7  ;;  %v3108_v7 = vld [vmem:[#allocation12 + $0x148] sm:$0xff] }
 0x7d2   :  { %2554 = vmatprep.subr.mxu0 %v2521_v4  ;;  %2643 = vmatprep.subr.mxu1 %v2523_v9  ;;  %v9670_v53 = vpop.eup %9669  ;;  %v3107_v4 = vld [vmem:[#allocation12 + $0x140] sm:$0xff]  ;;  %v2707_v9 = vld [vmem:[#allocation6 + $0x10] sm:$0xff] }
 0x7d3   :  { %9034 = vmatmul.mubr.msk.f32.gmra.mxu0 %vm2318_vm4, %v9668_v20  ;;  %9038 = vmatmul.mubr.msk.f32.gmra.mxu1 %vm2318_vm4, %v9668_v20  ;;  %v9672_v26 = vpop.eup %9671 }
 0x7d4   :  { %2407 = vmatprep.mubr.f32.mxu0 %v9986_v0  ;;  %2496 = vmatprep.mubr.f32.mxu1 %v9986_v0 }
 0x7d5   :  { %2555 = vmatpush1.msra.mxu0 %v2520_v11  ;;  %2644 = vmatpush1.msra.mxu1 %v2522_v13  ;;  %v3103_v11 = vld [vmem:[#allocation12 + $0x120] sm:$0xff]  ;;  %v3102_v13 = vld [vmem:[#allocation12 + $0x118] sm:$0xff] }
 0x7d6   :  { %2556 = vmatprep.subr.mxu0 %v2517_v15  ;;  %2645 = vmatprep.subr.mxu1 %v2519_v23  ;;  %v2708_v15 = vld [vmem:[#allocation6 + $0x18] sm:$0xff] }
 0x7d7   :  { %9035 = vmatmul.mubr.msk.f32.gmra.mxu0 %vm2318_vm4, %v9670_v53  ;;  %9039 = vmatmul.mubr.msk.f32.gmra.mxu1 %vm2318_vm4, %v9670_v53  ;;  %v3098_v23 = vld [vmem:[#allocation12 + $0xf8] sm:$0xff] }
 0x7d8   :  { %2413 = vmatprep.mubr.f32.mxu0 %v9986_v0  ;;  %2502 = vmatprep.mubr.f32.mxu1 %v9986_v0 }
 0x7d9   :  { %2557 = vmatpush1.msra.mxu0 %v2516_v24  ;;  %2646 = vmatpush1.msra.mxu1 %v2518_v19  ;;  %v3093_v24 = vld [vmem:[#allocation12 + $0xd0] sm:$0xff]  ;;  %v3092_v19 = vld [vmem:[#allocation12 + $0xc8] sm:$0xff] }
 0x7da   :  { %2558 = vmatprep.subr.mxu0 %v2513_v18  ;;  %2647 = vmatprep.subr.mxu1 %v2515_v25  ;;  %v3088_v18 = vld [vmem:[#allocation12 + $0xa8] sm:$0xff]  ;;  %v3087_v25 = vld [vmem:[#allocation12 + $0xa0] sm:$0xff] }
 0x7db   :  { %9036 = vmatmul.mubr.msk.f32.gmra.mxu0 %vm2318_vm4, %v9672_v26  ;;  %9040 = vmatmul.mubr.msk.f32.gmra.mxu1 %vm2318_vm4, %v9672_v26 }
 0x7dc   :  { %2559 = vmatpush1.msra.mxu0 %v2512_v1  ;;  %2592 = vmatprep.mubr.f32.mxu0 %v9986_v0  ;;  %v3083_v1 = vld [vmem:[#allocation12 + $0x80] sm:$0xff] }
 0x7dd   :  { %2648 = vmatpush1.msra.mxu1 %v2514_v59  ;;  %2681 = vmatprep.mubr.f32.mxu1 %v9986_v0  ;;  %v3078_v59 = vld [vmem:[#allocation12 + $0x58] sm:$0xff] }
 0x7df   :  { %9041 = vmatmul.mubr.msk.f32.vlgmr.msra.gmra.mxu0 %vm2318_vm4, %v9666_v51  ;;  %9045 = vmatmul.mubr.msk.f32.vlgmr.msra.gmra.mxu1 %vm2318_vm4, %v9666_v51  ;;  %v3112_v51 = vld [vmem:[#allocation12 + $0x168] sm:$0xff] }
 0x7e0   :  { %2598 = vmatprep.mubr.f32.mxu0 %v9986_v0  ;;  %2687 = vmatprep.mubr.f32.mxu1 %v9986_v0 }
 0x7e3   :  { %9042 = vmatmul.mubr.msk.f32.gmra.mxu0 %vm2318_vm4, %v9668_v20  ;;  %9046 = vmatmul.mubr.msk.f32.gmra.mxu1 %vm2318_vm4, %v9668_v20 }
 0x7e4   :  { %2604 = vmatprep.mubr.f32.mxu0 %v9986_v0  ;;  %2693 = vmatprep.mubr.f32.mxu1 %v9986_v0 }
 0x7e7   :  { %9043 = vmatmul.mubr.msk.f32.gmra.mxu0 %vm2318_vm4, %v9670_v53  ;;  %9047 = vmatmul.mubr.msk.f32.gmra.mxu1 %vm2318_vm4, %v9670_v53  ;;  %v3097_v53 = vld [vmem:[#allocation12 + $0xf0] sm:$0xff] }
 0x7e8   :  { %2610 = vmatprep.mubr.f32.mxu0 %v9986_v0  ;;  %2699 = vmatprep.mubr.f32.mxu1 %v9986_v0 }
 0x7eb   :  { %9044 = vmatmul.mubr.msk.f32.gmra.mxu0 %vm2318_vm4, %v9672_v26  ;;  %9048 = vmatmul.mubr.msk.f32.gmra.mxu1 %vm2318_vm4, %v9672_v26  ;;  %v3082_v26 = vld [vmem:[#allocation12 + $0x78] sm:$0xff] }
 0x7ec   :  { %2779 = vmatprep.mubr.f32.mxu0 %v9986_v0  ;;  %2939 = vmatprep.mubr.f32.mxu1 %v9986_v0 }
 0x88f   :  { %v2397_v27 = vpop.f32.mrf.mxu0  ;;  %v10960_v21 = vpop.f32.mrf.mxu1 }
 0x891   :  { %v2399_v22 = vpop.f32.mrf.mxu0  ;;  %v10962_v29 = vpop.f32.mrf.mxu1 }
 0x893   :  { %v2403_v30 = vpop.f32.mrf.mxu0  ;;  %v10964_v2 = vpop.f32.mrf.mxu1 }
 0x895   :  { %v2405_v31 = vpop.f32.mrf.mxu0  ;;  %v10966_v34 = vpop.f32.mrf.mxu1 }
 0x897   :  { %v2409_v36 = vpop.f32.mrf.mxu0  ;;  %v10968_v38 = vpop.f32.mrf.mxu1 }
 0x899   :  { %v2411_v40 = vpop.f32.mrf.mxu0  ;;  %v10970_v42 = vpop.f32.mrf.mxu1 }
 0x89b   :  { %v2415_v44 = vpop.f32.mrf.mxu0  ;;  %v10972_v46 = vpop.f32.mrf.mxu1 }
 0x89d   :  { %v2417_v48 = vpop.f32.mrf.mxu0  ;;  %v10974_v50 = vpop.f32.mrf.mxu1 }
 0x89e   :  { %2899 = vmatprep.subr.mxu1 %v2417_v48  ;;  %v3218_v48 = vld [vmem:[#allocation12 + $0x4b8] sm:$0xff] }
 0x89f   :  { %v10976_v52 = vpop.f32.mrf.mxu0  ;;  %v10978_v58 = vpop.f32.mrf.mxu1  ;;  %2900 = vmatpush1.msra.mxu1 %v2415_v44  ;;  %v3222_v44 = vld [vmem:[#allocation12 + $0x4d8] sm:$0xff] }
 0x8a0   :  { %2901 = vmatprep.subr.mxu1 %v2411_v40  ;;  %v3223_v40 = vld [vmem:[#allocation12 + $0x4e0] sm:$0xff] }
 0x8a1   :  { %v2596_v17 = vpop.f32.mrf.mxu0  ;;  %v10980_v35 = vpop.f32.mrf.mxu1  ;;  %2902 = vmatpush1.msra.mxu1 %v2409_v36  ;;  %v3067_v36 = vld [vmem:[#allocation12] sm:$0xff] }
 0x8a2   :  { %2903 = vmatprep.subr.mxu1 %v2405_v31  ;;  %v3072_v31 = vld [vmem:[#allocation12 + $0x28] sm:$0xff] }
 0x8a3   :  { %v2600_v37 = vpop.f32.mrf.mxu0  ;;  %v10982_v41 = vpop.f32.mrf.mxu1  ;;  %2904 = vmatpush1.msra.mxu1 %v2403_v30  ;;  %v3302_v30 = vld [vmem:[#allocation12 + $0x758] sm:$0xff] }
 0x8a4   :  { %2905 = vmatprep.subr.mxu1 %v2399_v22  ;;  %v3077_v22 = vld [vmem:[#allocation12 + $0x50] sm:$0xff] }
 0x8a5   :  { %v2602_v57 = vpop.f32.mrf.mxu0  ;;  %v10986_v8 = vpop.f32.mrf.mxu1  ;;  %2906 = vmatpush1.msra.mxu1 %v2397_v27  ;;  %v3303_v27 = vld [vmem:[#allocation12 + $0x760] sm:$0xff] }
 0x8a6   :  { %9053 = vmatmul.mubr.msk.f32.vlgmr.msra.gmra.mxu1 %vm2318_vm4, %v10984_v43  ;;  %3344 = vmatprep.subr.mxu1 %v3143_v45  ;;  %v3197_v45 = vld [vmem:[#allocation12 + $0x410] sm:$0xff] }
 0x8a7   :  { %v2606_v14 = vpop.f32.mrf.mxu0  ;;  %2945 = vmatprep.mubr.f32.mxu1 %v9986_v0  ;;  %3345 = vmatpush1.msra.mxu1 %v3142_v49  ;;  %v2695_v16 = vpop.f32.mrf.mxu1  ;;  %v3287_v49 = vld [vmem:[#allocation12 + $0x6e0] sm:$0xff] }
 0x8a8   :  { %3346 = vmatprep.subr.mxu1 %v3138_v10  ;;  %v3192_v10 = vld [vmem:[#allocation12 + $0x3e8] sm:$0xff] }
 0x8a9   :  { %v2608_v63 = vpop.f32.mrf.mxu0  ;;  %3347 = vmatpush1.msra.mxu1 %v3137_v12  ;;  %v2697_v32 = vpop.f32.mrf.mxu1  ;;  %v3282_v12 = vld [vmem:[#allocation12 + $0x6b8] sm:$0xff] }
 0x8aa   :  { %9054 = vmatmul.mubr.msk.f32.gmra.mxu1 %vm2318_vm4, %v10991_v54  ;;  %3348 = vmatprep.subr.mxu1 %v3133_v55  ;;  %v3187_v55 = vld [vmem:[#allocation12 + $0x3c0] sm:$0xff] }
 0x8ab   :  { %v2612_v5 = vpop.f32.mrf.mxu0  ;;  %3349 = vmatpush1.msra.mxu1 %v3132_v3  ;;  %v2701_v62 = vpop.f32.mrf.mxu1  ;;  %v3277_v3 = vld [vmem:[#allocation12 + $0x690] sm:$0xff] }
 0x8ac   :  { %3350 = vmatprep.subr.mxu1 %v3128_v6  ;;  %v3182_v6 = vld [vmem:[#allocation12 + $0x398] sm:$0xff] }
 0x8ad   :  { %v2614_v61 = vpop.f32.mrf.mxu0  ;;  %3351 = vmatpush1.msra.mxu1 %v3127_v28  ;;  %v2703_v20 = vpop.f32.mrf.mxu1  ;;  %v3272_v28 = vld [vmem:[#allocation12 + $0x668] sm:$0xff] }
 0x8ae   :  { %2739 = vmatprep.subr.mxu0 %v2614_v61  ;;  %3352 = vmatprep.subr.mxu1 %v3123_v33  ;;  %v3268_v33 = vld [vmem:[#allocation12 + $0x648] sm:$0xff]  ;;  %v3173_v61 = vld [vmem:[#allocation12 + $0x350] sm:$0xff] }
 0x8af   :  { %2740 = vmatpush1.msra.mxu0 %v2612_v5  ;;  %3353 = vmatpush1.msra.mxu1 %v3122_v39  ;;  %v3178_v5 = vld [vmem:[#allocation12 + $0x378] sm:$0xff]  ;;  %v3177_v39 = vld [vmem:[#allocation12 + $0x370] sm:$0xff] }
 0x8b0   :  { %2741 = vmatprep.subr.mxu0 %v2608_v63  ;;  %3354 = vmatprep.subr.mxu1 %v3118_v56  ;;  %v3273_v63 = vld [vmem:[#allocation12 + $0x670] sm:$0xff]  ;;  %v3263_v56 = vld [vmem:[#allocation12 + $0x620] sm:$0xff] }
 0x8b1   :  { %2742 = vmatpush1.msra.mxu0 %v2606_v14  ;;  %3355 = vmatpush1.msra.mxu1 %v3117_v60  ;;  %v3188_v14 = vld [vmem:[#allocation12 + $0x3c8] sm:$0xff] }
 0x8b2   :  { %2743 = vmatprep.subr.mxu0 %v2602_v57  ;;  %3356 = vmatprep.subr.mxu1 %v3113_v47  ;;  %v3193_v57 = vld [vmem:[#allocation12 + $0x3f0] sm:$0xff]  ;;  %v3172_v60 = vld [vmem:[#allocation12 + $0x348] sm:$0xff]  ;;  %v3262_v47 = vld [vmem:[#allocation12 + $0x618] sm:$0xff] }
 0x8b3   :  { %2744 = vmatpush1.msra.mxu0 %v2600_v37  ;;  %3357 = vmatpush1.msra.mxu1 %v3112_v51  ;;  %v3203_v37 = vld [vmem:[#allocation12 + $0x440] sm:$0xff]  ;;  %v3168_v51 = vld [vmem:[#allocation12 + $0x328] sm:$0xff] }
 0x8b4   :  { %2745 = vmatprep.subr.mxu0 %v2596_v17  ;;  %3358 = vmatprep.subr.mxu1 %v3108_v7  ;;  %v3208_v17 = vld [vmem:[#allocation12 + $0x468] sm:$0xff]  ;;  %v3167_v7 = vld [vmem:[#allocation12 + $0x320] sm:$0xff] }
 0x8b5   :  { %2746 = vmatpush1.msra.mxu0 %v10976_v52  ;;  %3359 = vmatpush1.msra.mxu1 %v3107_v4  ;;  %v3213_v52 = vld [vmem:[#allocation12 + $0x490] sm:$0xff] }
 0x8b6   :  { %9049 = vmatmul.mubr.msk.f32.vlgmr.msra.gmra.mxu0 %vm2318_vm4, %v2707_v9  ;;  %2816 = vmatprep.subr.mxu0 %v2703_v20  ;;  %v3257_v4 = vld [vmem:[#allocation12 + $0x5f0] sm:$0xff] }
 0x8b7   :  { %2817 = vmatpush1.msra.mxu0 %v2701_v62  ;;  %2785 = vmatprep.mubr.f32.mxu0 %v9986_v0  ;;  %v3258_v62 = vld [vmem:[#allocation12 + $0x5f8] sm:$0xff]  ;;  %v3253_v20 = vld [vmem:[#allocation12 + $0x5d0] sm:$0xff] }
 0x8b8   :  { %2818 = vmatprep.subr.mxu0 %v2697_v32  ;;  %3360 = vmatprep.subr.mxu1 %v3103_v11  ;;  %v3267_v32 = vld [vmem:[#allocation12 + $0x640] sm:$0xff]  ;;  %v3162_v11 = vld [vmem:[#allocation12 + $0x2f8] sm:$0xff] }
 0x8b9   :  { %2819 = vmatpush1.msra.mxu0 %v2695_v16  ;;  %3361 = vmatpush1.msra.mxu1 %v3102_v13  ;;  %v3183_v16 = vld [vmem:[#allocation12 + $0x3a0] sm:$0xff]  ;;  %v3252_v13 = vld [vmem:[#allocation12 + $0x5c8] sm:$0xff] }
 0x8ba   :  { %9050 = vmatmul.mubr.msk.f32.gmra.mxu0 %vm2318_vm4, %v2708_v15  ;;  %2820 = vmatprep.subr.mxu0 %v10986_v8  ;;  %v3283_v8 = vld [vmem:[#allocation12 + $0x6c0] sm:$0xff] }
 0x8bb   :  { %2821 = vmatpush1.msra.mxu0 %v10982_v41  ;;  %2856 = vmatprep.mubr.f32.mxu0 %v9986_v0  ;;  %v3202_v41 = vld [vmem:[#allocation12 + $0x438] sm:$0xff] }
 0x8bc   :  { %2822 = vmatprep.subr.mxu0 %v10980_v35  ;;  %3362 = vmatprep.subr.mxu1 %v3098_v23  ;;  %v3207_v35 = vld [vmem:[#allocation12 + $0x460] sm:$0xff]  ;;  %v3248_v23 = vld [vmem:[#allocation12 + $0x5a8] sm:$0xff] }
 0x8bd   :  { %2823 = vmatpush1.msra.mxu0 %v10978_v58  ;;  %3363 = vmatpush1.msra.mxu1 %v3097_v53  ;;  %v3212_v58 = vld [vmem:[#allocation12 + $0x488] sm:$0xff]  ;;  %v3157_v53 = vld [vmem:[#allocation12 + $0x2d0] sm:$0xff] }
 0x8be   :  { %9051 = vmatmul.mubr.msk.f32.vlgmr.msra.gmra.mxu0 %vm2318_vm4, %v2707_v9  ;;  %2976 = vmatprep.subr.mxu0 %v10974_v50  ;;  %v3217_v50 = vld [vmem:[#allocation12 + $0x4b0] sm:$0xff]  ;;  %v3163_v9 = vld [vmem:[#allocation12 + $0x300] sm:$0xff] }
 0x8bf   :  { %2977 = vmatpush1.msra.mxu0 %v10972_v46  ;;  %2862 = vmatprep.mubr.f32.mxu0 %v9986_v0  ;;  %v3288_v46 = vld [vmem:[#allocation12 + $0x6e8] sm:$0xff] }
 0x8c0   :  { %2978 = vmatprep.subr.mxu0 %v10970_v42  ;;  %3364 = vmatprep.subr.mxu1 %v3093_v24  ;;  %v3292_v42 = vld [vmem:[#allocation12 + $0x708] sm:$0xff]  ;;  %v3247_v24 = vld [vmem:[#allocation12 + $0x5a0] sm:$0xff] }
 0x8c1   :  { %2979 = vmatpush1.msra.mxu0 %v10968_v38  ;;  %3365 = vmatpush1.msra.mxu1 %v3092_v19  ;;  %v3293_v38 = vld [vmem:[#allocation12 + $0x710] sm:$0xff] }
 0x8c2   :  { %9052 = vmatmul.mubr.msk.f32.gmra.mxu0 %vm2318_vm4, %v2708_v15  ;;  %2980 = vmatprep.subr.mxu0 %v10966_v34  ;;  %v3068_v34 = vld [vmem:[#allocation12 + $0x8] sm:$0xff]  ;;  %v3158_v15 = vld [vmem:[#allocation12 + $0x2d8] sm:$0xff]  ;;  %v3153_v19 = vld [vmem:[#allocation12 + $0x2b0] sm:$0xff] }
 0x8c3   :  { %2981 = vmatpush1.msra.mxu0 %v10964_v2  ;;  %3016 = vmatprep.mubr.f32.mxu0 %v9986_v0  ;;  %v3073_v2 = vld [vmem:[#allocation12 + $0x30] sm:$0xff] }
 0x8c4   :  { %2982 = vmatprep.subr.mxu0 %v10962_v29  ;;  %3366 = vmatprep.subr.mxu1 %v3088_v18  ;;  %v3298_v29 = vld [vmem:[#allocation12 + $0x738] sm:$0xff]  ;;  %v3243_v18 = vld [vmem:[#allocation12 + $0x580] sm:$0xff] }
 0x8c5   :  { %2983 = vmatpush1.msra.mxu0 %v10960_v21  ;;  %3367 = vmatpush1.msra.mxu1 %v3087_v25  ;;  %v3297_v21 = vld [vmem:[#allocation12 + $0x730] sm:$0xff]  ;;  %v3152_v25 = vld [vmem:[#allocation12 + $0x2a8] sm:$0xff] }
 0x8c6   :  { %9055 = vmatmul.mubr.msk.f32.vlgmr.msra.gmra.mxu0 %vm2318_vm4, %v10984_v43  ;;  %3368 = vmatprep.subr.mxu1 %v3083_v1  ;;  %v3198_v43 = vld [vmem:[#allocation12 + $0x418] sm:$0xff] }
 0x8c7   :  { %3022 = vmatprep.mubr.f32.mxu0 %v9986_v0  ;;  %3369 = vmatpush1.msra.mxu1 %v3082_v26  ;;  %v3242_v1 = vld [vmem:[#allocation12 + $0x578] sm:$0xff]  ;;  %v3148_v26 = vld [vmem:[#allocation12 + $0x288] sm:$0xff] }
 0x8c8   :  { %3370 = vmatprep.subr.mxu1 %v3078_v59  ;;  %3421 = vmatprep.subr.mxu0 %v3303_v27  ;;  %v3238_v59 = vld [vmem:[#allocation12 + $0x558] sm:$0xff]  ;;  %v3147_v27 = vld [vmem:[#allocation12 + $0x280] sm:$0xff] }
 0x8c9   :  { %3371 = vmatpush1.msra.mxu1 %v3077_v22  ;;  %3422 = vmatpush1.msra.mxu0 %v3302_v30  ;;  %v3237_v22 = vld [vmem:[#allocation12 + $0x550] sm:$0xff] }
 0x8ca   :  { %9056 = vmatmul.mubr.msk.f32.gmra.mxu0 %vm2318_vm4, %v10991_v54  ;;  %3372 = vmatprep.subr.mxu1 %v3073_v2  ;;  %v3278_v54 = vld [vmem:[#allocation12 + $0x698] sm:$0xff]  ;;  %v3233_v30 = vld [vmem:[#allocation12 + $0x530] sm:$0xff] }
 0x8cb   :  { %3373 = vmatpush1.msra.mxu1 %v3072_v31  ;;  %3423 = vmatprep.subr.mxu0 %v3298_v29  ;;  %v3305_v2 = vld [vmem:[#allocation12 + $0x770] sm:$0xff]  ;;  %v3232_v31 = vld [vmem:[#allocation12 + $0x528] sm:$0xff] }
 0x8cc   :  { %3374 = vmatprep.subr.mxu1 %v3068_v34  ;;  %3424 = vmatpush1.msra.mxu0 %v3297_v21  ;;  %v3228_v29 = vld [vmem:[#allocation12 + $0x508] sm:$0xff]  ;;  %v3227_v34 = vld [vmem:[#allocation12 + $0x500] sm:$0xff]  ;;  %v3333_v21 = vld [vmem:[#allocation12 + $0x850] sm:$0xff] }
 0x8cd   :  { %3375 = vmatpush1.msra.mxu1 %v3067_v36  ;;  %3425 = vmatprep.subr.mxu0 %v3293_v38  ;;  %v3332_v36 = vld [vmem:[#allocation12 + $0x848] sm:$0xff] }
 0x8ce   :  { %3376 = vmatprep.subr.mxu1 %v3223_v40  ;;  %3426 = vmatpush1.msra.mxu0 %v3292_v42  ;;  %v3328_v38 = vld [vmem:[#allocation12 + $0x828] sm:$0xff]  ;;  %v3327_v40 = vld [vmem:[#allocation12 + $0x820] sm:$0xff] }
 0x8cf   :  { %3377 = vmatpush2.msra.mxu1 %v3222_v44  ;;  %3427 = vmatprep.subr.mxu0 %v3288_v46  ;;  %v3323_v42 = vld [vmem:[#allocation12 + $0x800] sm:$0xff]  ;;  %v3322_v44 = vld [vmem:[#allocation12 + $0x7f8] sm:$0xff] }
 0x8d0   :  { %3378 = vmatprep.subr.mxu1 %v3218_v48  ;;  %3428 = vmatpush1.msra.mxu0 %v3287_v49  ;;  %v3318_v46 = vld [vmem:[#allocation12 + $0x7d8] sm:$0xff]  ;;  %v3317_v48 = vld [vmem:[#allocation12 + $0x7d0] sm:$0xff] }
 0x8d1   :  { %3379 = vmatpush2.msra.mxu1 %v3217_v50  ;;  %3429 = vmatprep.subr.mxu0 %v3283_v8  ;;  %v3313_v50 = vld [vmem:[#allocation12 + $0x7b0] sm:$0xff] }
 0x8d2   :  { %3380 = vmatprep.subr.mxu1 %v3213_v52  ;;  %3430 = vmatpush1.msra.mxu0 %v3282_v12  ;;  %v3312_v52 = vld [vmem:[#allocation12 + $0x7a8] sm:$0xff] }
 0x8d3   :  { %3381 = vmatpush2.msra.mxu1 %v3212_v58  ;;  %3431 = vmatprep.subr.mxu0 %v3278_v54  ;;  %v3308_v58 = vld [vmem:[#allocation12 + $0x788] sm:$0xff] }
 0x8d4   :  { %3382 = vmatprep.subr.mxu1 %v3208_v17  ;;  %3432 = vmatpush1.msra.mxu0 %v3277_v3  ;;  %v3307_v17 = vld [vmem:[#allocation12 + $0x780] sm:$0xff] }
 0x8d5   :  { %3383 = vmatpush2.msra.mxu1 %v3207_v35  ;;  %3433 = vmatprep.subr.mxu0 %v3273_v63  ;;  %v3145_v35 = vld [vmem:[#allocation12 + $0x270] sm:$0xff] }
 0x8d6   :  { %3384 = vmatprep.subr.mxu1 %v3203_v37  ;;  %3434 = vmatpush1.msra.mxu0 %v3272_v28  ;;  %v3031_v37 = vlaneseq }
 0x8d7   :  { %3385 = vmatpush2.msra.mxu1 %v3202_v41  ;;  %3435 = vmatprep.subr.mxu0 %v3268_v33 }
 0x8d8   :  { %3386 = vmatprep.subr.mxu1 %v3198_v43  ;;  %3436 = vmatpush1.msra.mxu0 %v3267_v32  ;;  %v11021_v43 = vshrl.u32 %v3031_v37, 7 }
 0x8d9   :  { %3387 = vmatpush2.msra.mxu1 %v3197_v45  ;;  %3437 = vmatprep.subr.mxu0 %v3263_v56 }
 0x8da   :  { %3388 = vmatprep.subr.mxu1 %v3193_v57  ;;  %3438 = vmatpush1.msra.mxu0 %v3262_v47  ;;  %v11024_v45 = vsub.s32 0, %v11021_v43  ;;  %v3029_v57 = vld [vmem:[#allocation9] sm:$0xf]  ;;  %v11027_v8 = vsub.s32 1, %v11021_v43 }
 0x8db   :  { %3389 = vmatpush2.msra.mxu1 %v3192_v10  ;;  %3439 = vmatprep.subr.mxu0 %v3258_v62  ;;  %v3041_v62 = vsub.s32 2, %v11021_v43 }
 0x8dc   :  { %3390 = vmatprep.subr.mxu1 %v3188_v14  ;;  %3440 = vmatpush1.msra.mxu0 %v3257_v4  ;;  %v3034_v12 = vrot.slane %v3029_v57, %v11024_v45 }
 0x8dd   :  { %3391 = vmatpush2.msra.mxu1 %v3187_v55  ;;  %3441 = vmatprep.subr.mxu0 %v3253_v20  ;;  %v3038_v55 = vrot.slane %v3029_v57, %v11027_v8  ;;  %v3042_v20 = vrot.slane %v3029_v57, %v3041_v62 }
 0x8de   :  { %3392 = vmatprep.subr.mxu1 %v3183_v16  ;;  %3442 = vmatpush1.msra.mxu0 %v3252_v13 }
 0x8df   :  { %3393 = vmatpush2.msra.mxu1 %v3182_v6  ;;  %3443 = vmatprep.subr.mxu0 %v3248_v23 }
 0x8e0   :  { %3394 = vmatprep.subr.mxu1 %v3178_v5  ;;  %3444 = vmatpush1.msra.mxu0 %v3247_v24 }
 0x8e1   :  { %3395 = vmatpush2.msra.mxu1 %v3177_v39  ;;  %3445 = vmatprep.subr.mxu0 %v3243_v18  ;;  %v3304_v18 = vld [vmem:[#allocation12 + $0x768] sm:$0xff] }
 0x8e2   :  { %3396 = vmatprep.subr.mxu1 %v3173_v61  ;;  %3446 = vmatpush1.msra.mxu0 %v3242_v1 }
 0x8e3   :  { %3397 = vmatpush2.msra.mxu1 %v3172_v60  ;;  %3447 = vmatprep.subr.mxu0 %v3238_v59  ;;  %v3300_v59 = vld [vmem:[#allocation12 + $0x748] sm:$0xff] }
 0x8e4   :  { %3398 = vmatprep.subr.mxu1 %v3168_v51  ;;  %3448 = vmatpush1.msra.mxu0 %v3237_v22  ;;  %v3299_v22 = vld [vmem:[#allocation12 + $0x740] sm:$0xff] }
 0x8e5   :  { %3399 = vmatpush2.msra.mxu1 %v3167_v7  ;;  %3449 = vmatprep.subr.mxu0 %v3233_v30  ;;  %v3045_v7 = vsub.s32 3, %v11021_v43 }
 0x8e6   :  { %3400 = vmatprep.subr.mxu1 %v3163_v9  ;;  %3450 = vmatpush1.msra.mxu0 %v3232_v31 }
 0x8e7   :  { %3401 = vmatpush2.msra.mxu1 %v3162_v11  ;;  %3451 = vmatprep.subr.mxu0 %v3228_v29  ;;  %v3046_v13 = vrot.slane %v3029_v57, %v3045_v7  ;;  %v3294_v29 = vld [vmem:[#allocation12 + $0x718] sm:$0xff] }
 0x8e8   :  { %3402 = vmatprep.subr.mxu1 %v3158_v15  ;;  %3452 = vmatpush1.msra.mxu0 %v3227_v34 }
 0x8e9   :  { %3403 = vmatpush2.msra.mxu1 %v3157_v53  ;;  %3473 = vmatprep.subr.mxu0 %v3333_v21 }
 0x8ea   :  { %3404 = vmatprep.subr.mxu1 %v3153_v19  ;;  %3474 = vmatpush2.msra.mxu0 %v3332_v36 }
 0x8eb   :  { %3405 = vmatpush2.msra.mxu1 %v3152_v25  ;;  %3475 = vmatprep.subr.mxu0 %v3328_v38  ;;  %v3290_v38 = vld [vmem:[#allocation12 + $0x6f8] sm:$0xff] }
 0x8ec   :  { %3406 = vmatprep.subr.mxu1 %v3148_v26  ;;  %3476 = vmatpush2.msra.mxu0 %v3327_v40  ;;  %v3289_v40 = vld [vmem:[#allocation12 + $0x6f0] sm:$0xff] }
 0x8ed   :  { %3407 = vmatpush2.msra.mxu1 %v3147_v27  ;;  %3477 = vmatprep.subr.mxu0 %v3323_v42  ;;  %v3285_v42 = vld [vmem:[#allocation12 + $0x6d0] sm:$0xff] }
 0x8ee   :  { %3575 = vmatprep.subr.mxu1 %v3305_v2  ;;  %3478 = vmatpush2.msra.mxu0 %v3322_v44  ;;  %v3295_v2 = vld [vmem:[#allocation12 + $0x720] sm:$0xff]  ;;  %v3284_v44 = vld [vmem:[#allocation12 + $0x6c8] sm:$0xff] }
 0x8ef   :  { %3479 = vmatprep.subr.mxu0 %v3318_v46  ;;  %v3280_v46 = vld [vmem:[#allocation12 + $0x6a8] sm:$0xff] }
 0x8f0   :  { %3480 = vmatpush2.msra.mxu0 %v3317_v48  ;;  %v3279_v48 = vld [vmem:[#allocation12 + $0x6a0] sm:$0xff] }
 0x8f1   :  { %3481 = vmatprep.subr.mxu0 %v3313_v50  ;;  %v3275_v50 = vld [vmem:[#allocation12 + $0x680] sm:$0xff] }
 0x8f2   :  { %3482 = vmatpush2.msra.mxu0 %v3312_v52  ;;  %v3274_v52 = vld [vmem:[#allocation12 + $0x678] sm:$0xff] }
 0x8f3   :  { %3483 = vmatprep.subr.mxu0 %v3308_v58  ;;  %v3270_v58 = vld [vmem:[#allocation12 + $0x658] sm:$0xff] }
 0x8f4   :  { %3484 = vmatpush2.msra.mxu0 %v3307_v17  ;;  %v3269_v17 = vld [vmem:[#allocation12 + $0x650] sm:$0xff] }
 0x8f5   :  { %3498 = vmatprep.subr.mxu0 %v3145_v35  ;;  %v3265_v35 = vld [vmem:[#allocation12 + $0x630] sm:$0xff] }
 0x966   :  { %v2941_v41 = vpop.f32.mrf.mxu1 }
 0x968   :  { %v2943_v49 = vpop.f32.mrf.mxu1 }
 0x96a   :  { %v2947_v14 = vpop.f32.mrf.mxu1 }
 0x96c   :  { %v2949_v28 = vpop.f32.mrf.mxu1 }
 0x976   :  { %v2781_v10 = vpop.f32.mrf.mxu0 }
 0x977   :  { %v2942_v54 = vadd.f32 %v2941_v41, %v2781_v10  ;;  %v3144_v41 = vld [vmem:[#allocation12 + $0x268] sm:$0xff] }
 0x978   :  { %v2783_v3 = vpop.f32.mrf.mxu0  ;;  %v3140_v10 = vld [vmem:[#allocation12 + $0x248] sm:$0xff] }
 0x979   :  { %v2944_v16 = vadd.f32 %v2943_v49, %v2783_v3  ;;  %v3051_v63 = vadd.f32 %v3034_v12, %v2942_v54  ;;  %v3264_v49 = vld [vmem:[#allocation12 + $0x628] sm:$0xff]  ;;  %v3259_v54 = vld [vmem:[#allocation12 + $0x600] sm:$0xff] }
 0x97a   :  { %v2787_v6 = vpop.f32.mrf.mxu0 }
 0x97b   :  { %v3052_v5 = vadd.f32 %v3038_v55, %v2944_v16  ;;  %v2948_v33 = vadd.f32 %v2947_v14, %v2787_v6  ;;  %v3139_v14 = vld [vmem:[#allocation12 + $0x240] sm:$0xff]  ;;  %v3254_v6 = vld [vmem:[#allocation12 + $0x5d8] sm:$0xff] }
 0x97c   :  { %v2789_v39 = vpop.f32.mrf.mxu0  ;;  %v3255_v16 = vld [vmem:[#allocation12 + $0x5e0] sm:$0xff] }
 0x97d   :  { %9673 = vtanh.f32 %v3052_v5  ;;  %v2950_v32 = vadd.f32 %v2949_v28, %v2789_v39  ;;  %v3055_v56 = vadd.f32 %v3034_v12, %v2948_v33  ;;  %v3260_v12 = vld [vmem:[#allocation12 + $0x608] sm:$0xff]  ;;  %v3130_v5 = vld [vmem:[#allocation12 + $0x1f8] sm:$0xff]  ;;  %v3129_v39 = vld [vmem:[#allocation12 + $0x1f0] sm:$0xff] }
 0x97e   :  { %9675 = vtanh.f32 %v3051_v63  ;;  %v2858_v61 = vpop.f32.mrf.mxu0  ;;  %v3134_v63 = vld [vmem:[#allocation12 + $0x218] sm:$0xff] }
 0x97f   :  { %v3056_v60 = vadd.f32 %v3038_v55, %v2950_v32  ;;  %v3135_v55 = vld [vmem:[#allocation12 + $0x220] sm:$0xff]  ;;  %v3250_v33 = vld [vmem:[#allocation12 + $0x5b8] sm:$0xff]  ;;  %v3249_v32 = vld [vmem:[#allocation12 + $0x5b0] sm:$0xff] }
 0x980   :  { %v2860_v47 = vpop.f32.mrf.mxu0 }
 0x981   :  { %9677 = vtanh.f32 %v3056_v60  ;;  %v3124_v60 = vld [vmem:[#allocation12 + $0x1c8] sm:$0xff] }
 0x982   :  { %v2864_v51 = vpop.f32.mrf.mxu0  ;;  %9679 = vtanh.f32 %v3055_v56  ;;  %v3245_v56 = vld [vmem:[#allocation12 + $0x590] sm:$0xff] }
 0x984   :  { %v2866_v4 = vpop.f32.mrf.mxu0 }
 0x986   :  { %v3018_v9 = vpop.f32.mrf.mxu0 }
 0x987   :  { %v3019_v11 = vadd.f32 %v3018_v9, %v2858_v61  ;;  %v3125_v61 = vld [vmem:[#allocation12 + $0x1d0] sm:$0xff]  ;;  %v3119_v9 = vld [vmem:[#allocation12 + $0x1a0] sm:$0xff] }
 0x988   :  { %v3020_v15 = vpop.f32.mrf.mxu0 }
 0x989   :  { %v3021_v23 = vadd.f32 %v3020_v15, %v2860_v47  ;;  %v3053_v24 = vadd.f32 %v3042_v20, %v3019_v11  ;;  %v3244_v47 = vld [vmem:[#allocation12 + $0x588] sm:$0xff]  ;;  %v3115_v11 = vld [vmem:[#allocation12 + $0x180] sm:$0xff]  ;;  %v3114_v15 = vld [vmem:[#allocation12 + $0x178] sm:$0xff] }
 0x98a   :  { %v11037_v53 = vpop.eup %9673  ;;  %v3024_v19 = vpop.f32.mrf.mxu0 }
 0x98b   :  { %v11039_v25 = vpop.eup %9675  ;;  %v3054_v1 = vadd.f32 %v3046_v13, %v3021_v23  ;;  %v3025_v26 = vadd.f32 %v3024_v19, %v2864_v51  ;;  %3408 = vmatprep.mubr.f32.mxu1 %v11037_v53  ;;  %v3120_v51 = vld [vmem:[#allocation12 + $0x1a8] sm:$0xff]  ;;  %v3234_v23 = vld [vmem:[#allocation12 + $0x538] sm:$0xff] }
 0x98c   :  { %v3026_v27 = vpop.f32.mrf.mxu0  ;;  %3409 = vmatmul.mubr.f32.vlgmr.msra.gmra.mxu1 %v11039_v25  ;;  %v3230_v19 = vld [vmem:[#allocation12 + $0x518] sm:$0xff] }
 0x98d   :  { %9681 = vtanh.f32 %v3054_v1  ;;  %v3027_v30 = vadd.f32 %v3026_v27, %v2866_v4  ;;  %3576 = vmatpush1.msra.mxu1 %v3304_v18  ;;  %v3057_v21 = vadd.f32 %v3042_v20, %v3025_v26  ;;  %v3240_v4 = vld [vmem:[#allocation12 + $0x568] sm:$0xff]  ;;  %v3239_v20 = vld [vmem:[#allocation12 + $0x560] sm:$0xff]  ;;  %v3109_v18 = vld [vmem:[#allocation12 + $0x150] sm:$0xff] }
 0x98e   :  { %v11043_v31 = vpop.eup %9677  ;;  %9683 = vtanh.f32 %v3053_v24  ;;  %3577 = vmatprep.subr.mxu1 %v3300_v59  ;;  %v3110_v24 = vld [vmem:[#allocation12 + $0x158] sm:$0xff]  ;;  %v3229_v1 = vld [vmem:[#allocation12 + $0x510] sm:$0xff]  ;;  %v3335_v59 = vld [vmem:[#allocation12 + $0x860] sm:$0xff] }
 0x98f   :  { %v11045_v34 = vpop.eup %9679  ;;  %v3058_v36 = vadd.f32 %v3046_v13, %v3027_v30  ;;  %3578 = vmatpush1.msra.mxu1 %v3299_v22  ;;  %3414 = vmatprep.mubr.f32.mxu1 %v11043_v31  ;;  %v3235_v13 = vld [vmem:[#allocation12 + $0x540] sm:$0xff]  ;;  %v3105_v26 = vld [vmem:[#allocation12 + $0x130] sm:$0xff]  ;;  %v3104_v27 = vld [vmem:[#allocation12 + $0x128] sm:$0xff] }
 0x990   :  { %3579 = vmatprep.subr.mxu1 %v3295_v2  ;;  %3415 = vmatmul.mubr.f32.gmra.mxu1 %v11045_v34  ;;  %v3334_v22 = vld [vmem:[#allocation12 + $0x858] sm:$0xff]  ;;  %v3100_v30 = vld [vmem:[#allocation12 + $0x108] sm:$0xff] }
 0x991   :  { %9685 = vtanh.f32 %v3058_v36  ;;  %3580 = vmatpush1.msra.mxu1 %v3294_v29  ;;  %v3330_v2 = vld [vmem:[#allocation12 + $0x838] sm:$0xff]  ;;  %v3099_v29 = vld [vmem:[#allocation12 + $0x100] sm:$0xff] }
 0x992   :  { %3581 = vmatprep.subr.mxu1 %v3290_v38  ;;  %9687 = vtanh.f32 %v3057_v21  ;;  %v3329_v21 = vld [vmem:[#allocation12 + $0x830] sm:$0xff]  ;;  %v3095_v36 = vld [vmem:[#allocation12 + $0xe0] sm:$0xff] }
 0x993   :  { %3582 = vmatpush1.msra.mxu1 %v3289_v40  ;;  %v3325_v38 = vld [vmem:[#allocation12 + $0x810] sm:$0xff]  ;;  %v3094_v40 = vld [vmem:[#allocation12 + $0xd8] sm:$0xff] }
 0x994   :  { %3583 = vmatprep.subr.mxu1 %v3285_v42  ;;  %v3324_v42 = vld [vmem:[#allocation12 + $0x808] sm:$0xff] }
 0x995   :  { %3584 = vmatpush1.msra.mxu1 %v3284_v44  ;;  %v3090_v44 = vld [vmem:[#allocation12 + $0xb8] sm:$0xff] }
 0x996   :  { %3585 = vmatprep.subr.mxu1 %v3280_v46  ;;  %v3320_v46 = vld [vmem:[#allocation12 + $0x7e8] sm:$0xff] }
 0x997   :  { %3586 = vmatpush1.msra.mxu1 %v3279_v48  ;;  %v3089_v48 = vld [vmem:[#allocation12 + $0xb0] sm:$0xff] }
 0x998   :  { %3587 = vmatprep.subr.mxu1 %v3275_v50  ;;  %v3319_v50 = vld [vmem:[#allocation12 + $0x7e0] sm:$0xff] }
 0x999   :  { %3588 = vmatpush1.msra.mxu1 %v3274_v52  ;;  %v3085_v52 = vld [vmem:[#allocation12 + $0x90] sm:$0xff] }
 0x99a   :  { %v11049_v37 = vpop.eup %9681  ;;  %3589 = vmatprep.subr.mxu1 %v3270_v58  ;;  %v3315_v58 = vld [vmem:[#allocation12 + $0x7c0] sm:$0xff] }
 0x99b   :  { %v11051_v57 = vpop.eup %9683  ;;  %3590 = vmatpush1.msra.mxu1 %v3269_v17  ;;  %9057 = vmatprep.mubr.msk.f32.mxu0 %vm3337_vm5, %v11049_v37  ;;  %v3084_v17 = vld [vmem:[#allocation12 + $0x88] sm:$0xff] }
 0x99c   :  { %3591 = vmatprep.subr.mxu1 %v3265_v35  ;;  %3486 = vmatmul.mubr.f32.vlgmr.msra.gmra.mxu0 %v11051_v57  ;;  %v3314_v35 = vld [vmem:[#allocation12 + $0x7b8] sm:$0xff] }
 0x99d   :  { %3499 = vmatpush1.msra.mxu0 %v3144_v41  ;;  %3592 = vmatpush1.msra.mxu1 %v3264_v49  ;;  %v3080_v41 = vld [vmem:[#allocation12 + $0x68] sm:$0xff]  ;;  %v3310_v49 = vld [vmem:[#allocation12 + $0x798] sm:$0xff] }
 0x99e   :  { %v11056_v3 = vpop.eup %9685  ;;  %3500 = vmatprep.subr.mxu0 %v3140_v10  ;;  %3593 = vmatprep.subr.mxu1 %v3260_v12  ;;  %v3079_v10 = vld [vmem:[#allocation12 + $0x60] sm:$0xff]  ;;  %v3309_v12 = vld [vmem:[#allocation12 + $0x790] sm:$0xff] }
 0x99f   :  { %3501 = vmatpush1.msra.mxu0 %v3139_v14  ;;  %3594 = vmatpush1.msra.mxu1 %v3259_v54  ;;  %v11058_v28 = vpop.eup %9687  ;;  %v3075_v14 = vld [vmem:[#allocation12 + $0x40] sm:$0xff]  ;;  %v3226_v54 = vld [vmem:[#allocation12 + $0x4f8] sm:$0xff] }
 0x9a0   :  { %9058 = vmatprep.mubr.msk.f32.mxu0 %vm3337_vm5, %v11056_v3  ;;  %3502 = vmatprep.subr.mxu0 %v3135_v55  ;;  %v3074_v55 = vld [vmem:[#allocation12 + $0x38] sm:$0xff] }
 0x9a1   :  { %3595 = vmatprep.subr.mxu1 %v3255_v16  ;;  %3492 = vmatmul.mubr.f32.gmra.mxu0 %v11058_v28  ;;  %v3146_v16 = vld [vmem:[#allocation12 + $0x278] sm:$0xff] }
 0x9a2   :  { %3503 = vmatpush1.msra.mxu0 %v3134_v63  ;;  %3596 = vmatpush1.msra.mxu1 %v3254_v6  ;;  %v3070_v63 = vld [vmem:[#allocation12 + $0x18] sm:$0xff]  ;;  %v3221_v6 = vld [vmem:[#allocation12 + $0x4d0] sm:$0xff] }
 0x9a3   :  { %3504 = vmatprep.subr.mxu0 %v3130_v5  ;;  %3562 = vmatprep.mubr.f32.mxu0 %v11037_v53  ;;  %v3069_v5 = vld [vmem:[#allocation12 + $0x10] sm:$0xff] }
 0x9a4   :  { %3597 = vmatprep.subr.mxu1 %v3250_v33  ;;  %9059 = vmatprep.mubr.msk.f32.mxu1 %vm3337_vm5, %v11049_v37  ;;  %v3141_v33 = vld [vmem:[#allocation12 + $0x250] sm:$0xff] }
 0x9a5   :  { %3505 = vmatpush1.msra.mxu0 %v3129_v39  ;;  %3598 = vmatpush1.msra.mxu1 %v3249_v32  ;;  %v3225_v39 = vld [vmem:[#allocation12 + $0x4f0] sm:$0xff]  ;;  %v3216_v32 = vld [vmem:[#allocation12 + $0x4a8] sm:$0xff] }
 0x9a6   :  { %3506 = vmatprep.subr.mxu0 %v3125_v61  ;;  %3599 = vmatprep.subr.mxu1 %v3245_v56  ;;  %v3224_v61 = vld [vmem:[#allocation12 + $0x4e8] sm:$0xff] }
 0x9a7   :  { %3507 = vmatpush1.msra.mxu0 %v3124_v60  ;;  %3600 = vmatpush1.msra.mxu1 %v3244_v47  ;;  %v3136_v56 = vld [vmem:[#allocation12 + $0x228] sm:$0xff]  ;;  %v3211_v47 = vld [vmem:[#allocation12 + $0x480] sm:$0xff] }
 0x9a8   :  { %3508 = vmatprep.subr.mxu0 %v3120_v51  ;;  %3601 = vmatprep.subr.mxu1 %v3240_v4  ;;  %v3220_v60 = vld [vmem:[#allocation12 + $0x4c8] sm:$0xff]  ;;  %v3219_v51 = vld [vmem:[#allocation12 + $0x4c0] sm:$0xff] }
 0x9a9   :  { %3509 = vmatpush1.msra.mxu0 %v3119_v9  ;;  %3602 = vmatpush1.msra.mxu1 %v3239_v20  ;;  %v3131_v4 = vld [vmem:[#allocation12 + $0x200] sm:$0xff]  ;;  %v3206_v20 = vld [vmem:[#allocation12 + $0x458] sm:$0xff] }
 0x9aa   :  { %3510 = vmatprep.subr.mxu0 %v3115_v11  ;;  %3603 = vmatprep.subr.mxu1 %v3235_v13  ;;  %v3215_v9 = vld [vmem:[#allocation12 + $0x4a0] sm:$0xff]  ;;  %v3214_v11 = vld [vmem:[#allocation12 + $0x498] sm:$0xff] }
 0x9ab   :  { %3511 = vmatpush1.msra.mxu0 %v3114_v15  ;;  %3604 = vmatpush1.msra.mxu1 %v3234_v23  ;;  %v3126_v13 = vld [vmem:[#allocation12 + $0x1d8] sm:$0xff]  ;;  %v3201_v23 = vld [vmem:[#allocation12 + $0x430] sm:$0xff] }
 0x9ac   :  { %3512 = vmatprep.subr.mxu0 %v3110_v24  ;;  %3605 = vmatprep.subr.mxu1 %v3230_v19  ;;  %v3210_v15 = vld [vmem:[#allocation12 + $0x478] sm:$0xff]  ;;  %v3209_v24 = vld [vmem:[#allocation12 + $0x470] sm:$0xff] }
 0x9ad   :  { %3513 = vmatpush1.msra.mxu0 %v3109_v18  ;;  %3606 = vmatpush1.msra.mxu1 %v3229_v1  ;;  %v3121_v19 = vld [vmem:[#allocation12 + $0x1b0] sm:$0xff]  ;;  %v3196_v1 = vld [vmem:[#allocation12 + $0x408] sm:$0xff] }
 0x9ae   :  { %3514 = vmatprep.subr.mxu0 %v3105_v26  ;;  %3627 = vmatprep.subr.mxu1 %v3335_v59  ;;  %v3205_v18 = vld [vmem:[#allocation12 + $0x450] sm:$0xff]  ;;  %v3204_v26 = vld [vmem:[#allocation12 + $0x448] sm:$0xff] }
 0x9af   :  { %3515 = vmatpush1.msra.mxu0 %v3104_v27  ;;  %3628 = vmatpush2.msra.mxu1 %v3334_v22  ;;  %v3116_v59 = vld [vmem:[#allocation12 + $0x188] sm:$0xff]  ;;  %v3191_v22 = vld [vmem:[#allocation12 + $0x3e0] sm:$0xff] }
 0x9b0   :  { %3516 = vmatprep.subr.mxu0 %v3100_v30  ;;  %3629 = vmatprep.subr.mxu1 %v3330_v2  ;;  %v3200_v27 = vld [vmem:[#allocation12 + $0x428] sm:$0xff]  ;;  %v3199_v30 = vld [vmem:[#allocation12 + $0x420] sm:$0xff] }
 0x9b1   :  { %3517 = vmatpush1.msra.mxu0 %v3099_v29  ;;  %3630 = vmatpush2.msra.mxu1 %v3329_v21  ;;  %v3111_v2 = vld [vmem:[#allocation12 + $0x160] sm:$0xff]  ;;  %v3186_v21 = vld [vmem:[#allocation12 + $0x3b8] sm:$0xff] }
 0x9b2   :  { %3518 = vmatprep.subr.mxu0 %v3095_v36  ;;  %3631 = vmatprep.subr.mxu1 %v3325_v38  ;;  %v3195_v29 = vld [vmem:[#allocation12 + $0x400] sm:$0xff]  ;;  %v3194_v36 = vld [vmem:[#allocation12 + $0x3f8] sm:$0xff] }
 0x9b3   :  { %3519 = vmatpush1.msra.mxu0 %v3094_v40  ;;  %3632 = vmatpush2.msra.mxu1 %v3324_v42  ;;  %v3106_v38 = vld [vmem:[#allocation12 + $0x138] sm:$0xff]  ;;  %v3181_v42 = vld [vmem:[#allocation12 + $0x390] sm:$0xff] }
 0x9b4   :  { %3520 = vmatprep.subr.mxu0 %v3090_v44  ;;  %3633 = vmatprep.subr.mxu1 %v3320_v46  ;;  %v3190_v40 = vld [vmem:[#allocation12 + $0x3d8] sm:$0xff]  ;;  %v3189_v44 = vld [vmem:[#allocation12 + $0x3d0] sm:$0xff] }
 0x9b5   :  { %3521 = vmatpush1.msra.mxu0 %v3089_v48  ;;  %3634 = vmatpush2.msra.mxu1 %v3319_v50  ;;  %v3101_v46 = vld [vmem:[#allocation12 + $0x110] sm:$0xff]  ;;  %v3176_v50 = vld [vmem:[#allocation12 + $0x368] sm:$0xff] }
 0x9b6   :  { %3522 = vmatprep.subr.mxu0 %v3085_v52  ;;  %3635 = vmatprep.subr.mxu1 %v3315_v58  ;;  %v3185_v48 = vld [vmem:[#allocation12 + $0x3b0] sm:$0xff]  ;;  %v3184_v52 = vld [vmem:[#allocation12 + $0x3a8] sm:$0xff] }
 0x9b7   :  { %3523 = vmatpush1.msra.mxu0 %v3084_v17  ;;  %3636 = vmatpush2.msra.mxu1 %v3314_v35  ;;  %v3096_v58 = vld [vmem:[#allocation12 + $0xe8] sm:$0xff]  ;;  %v3171_v35 = vld [vmem:[#allocation12 + $0x340] sm:$0xff] }
 0x9b8   :  { %3524 = vmatprep.subr.mxu0 %v3080_v41  ;;  %3637 = vmatprep.subr.mxu1 %v3310_v49  ;;  %v3180_v17 = vld [vmem:[#allocation12 + $0x388] sm:$0xff]  ;;  %v3179_v41 = vld [vmem:[#allocation12 + $0x380] sm:$0xff] }
 0x9b9   :  { %3525 = vmatpush1.msra.mxu0 %v3079_v10  ;;  %3638 = vmatpush2.msra.mxu1 %v3309_v12  ;;  %v3091_v49 = vld [vmem:[#allocation12 + $0xc0] sm:$0xff]  ;;  %v3166_v12 = vld [vmem:[#allocation12 + $0x318] sm:$0xff] }
 0x9ba   :  { %3526 = vmatprep.subr.mxu0 %v3075_v14  ;;  %3640 = vmatmul.mubr.f32.vlgmr.msra.gmra.mxu1 %v11051_v57  ;;  %v3175_v10 = vld [vmem:[#allocation12 + $0x360] sm:$0xff]  ;;  %v3174_v14 = vld [vmem:[#allocation12 + $0x358] sm:$0xff] }
 0x9bb   :  { %9237 = vmatprep.subr.mxu1 %v3226_v54  ;;  %3527 = vmatpush1.msra.mxu0 %v3074_v55  ;;  %v3086_v54 = vld [vmem:[#allocation12 + $0x98] sm:$0xff] }
 0x9bc   :  { %9060 = vmatprep.mubr.msk.f32.mxu1 %vm3337_vm5, %v11056_v3  ;;  %9238 = vmatpush3.msra.mxu1 %v3146_v16  ;;  %v3170_v55 = vld [vmem:[#allocation12 + $0x338] sm:$0xff]  ;;  %v3161_v16 = vld [vmem:[#allocation12 + $0x2f0] sm:$0xff] }
 0x9bd   :  { %3528 = vmatprep.subr.mxu0 %v3070_v63  ;;  %9239 = vmatprep.subr.mxu1 %v3221_v6  ;;  %v3169_v63 = vld [vmem:[#allocation12 + $0x330] sm:$0xff] }
 0x9be   :  { %3529 = vmatpush1.msra.mxu0 %v3069_v5  ;;  %9240 = vmatpush3.msra.mxu1 %v3141_v33  ;;  %v3081_v6 = vld [vmem:[#allocation12 + $0x70] sm:$0xff]  ;;  %v3156_v33 = vld [vmem:[#allocation12 + $0x2c8] sm:$0xff] }
 0x9bf   :  { %3530 = vmatprep.subr.mxu0 %v3225_v39  ;;  %3646 = vmatmul.mubr.f32.gmra.mxu1 %v11058_v28  ;;  %v3165_v5 = vld [vmem:[#allocation12 + $0x310] sm:$0xff]  ;;  %v3164_v39 = vld [vmem:[#allocation12 + $0x308] sm:$0xff] }
 0x9c0   :  { %9241 = vmatprep.subr.mxu1 %v3216_v32  ;;  %3531 = vmatpush2.msra.mxu0 %v3224_v61  ;;  %v3076_v32 = vld [vmem:[#allocation12 + $0x48] sm:$0xff] }
 0x9c1   :  { %9242 = vmatpush3.msra.mxu1 %v3136_v56  ;;  %3716 = vmatprep.mubr.f32.mxu1 %v11037_v53  ;;  %v3160_v61 = vld [vmem:[#allocation12 + $0x2e8] sm:$0xff]  ;;  %v3151_v56 = vld [vmem:[#allocation12 + $0x2a0] sm:$0xff] }
 0x9c2   :  { %3532 = vmatprep.subr.mxu0 %v3220_v60  ;;  %9243 = vmatprep.subr.mxu1 %v3211_v47  ;;  %v3159_v60 = vld [vmem:[#allocation12 + $0x2e0] sm:$0xff] }
 0x9c3   :  { %3533 = vmatpush2.msra.mxu0 %v3219_v51  ;;  %9244 = vmatpush3.msra.mxu1 %v3131_v4  ;;  %v3071_v47 = vld [vmem:[#allocation12 + $0x20] sm:$0xff]  ;;  %v3881_v4 = vld [vmem:[#allocation12 + $0xad0] sm:$0xff] }
 0x9c4   :  { %3534 = vmatprep.subr.mxu0 %v3215_v9  ;;  %9245 = vmatprep.subr.mxu1 %v3206_v20  ;;  %v3155_v51 = vld [vmem:[#allocation12 + $0x2c0] sm:$0xff]  ;;  %v3154_v9 = vld [vmem:[#allocation12 + $0x2b8] sm:$0xff]  ;;  %v3880_v20 = vld [vmem:[#allocation12 + $0xac8] sm:$0xff] }
 0x9c5   :  { %3535 = vmatpush2.msra.mxu0 %v3214_v11  ;;  %9246 = vmatpush3.msra.mxu1 %v3126_v13  ;;  %v3150_v11 = vld [vmem:[#allocation12 + $0x298] sm:$0xff]  ;;  %v3876_v13 = vld [vmem:[#allocation12 + $0xaa8] sm:$0xff] }
 0x9c6   :  { %3536 = vmatprep.subr.mxu0 %v3210_v15  ;;  %9247 = vmatprep.subr.mxu1 %v3201_v23  ;;  %v3149_v15 = vld [vmem:[#allocation12 + $0x290] sm:$0xff]  ;;  %v3875_v23 = vld [vmem:[#allocation12 + $0xaa0] sm:$0xff] }
 0x9c7   :  { %3537 = vmatpush2.msra.mxu0 %v3209_v24  ;;  %9248 = vmatpush3.msra.mxu1 %v3121_v19  ;;  %v3871_v24 = vld [vmem:[#allocation12 + $0xa80] sm:$0xff]  ;;  %v3306_v19 = vld [vmem:[#allocation12 + $0x778] sm:$0xff] }
 0x9c8   :  { %3538 = vmatprep.subr.mxu0 %v3205_v18  ;;  %9249 = vmatprep.subr.mxu1 %v3196_v1  ;;  %v3870_v18 = vld [vmem:[#allocation12 + $0xa78] sm:$0xff] }
 0x9c9   :  { %3539 = vmatpush2.msra.mxu0 %v3204_v26  ;;  %9250 = vmatpush3.msra.mxu1 %v3116_v59  ;;  %v3866_v1 = vld [vmem:[#allocation12 + $0xa58] sm:$0xff]  ;;  %v3301_v26 = vld [vmem:[#allocation12 + $0x750] sm:$0xff] }
 0x9ca   :  { %3540 = vmatprep.subr.mxu0 %v3200_v27  ;;  %9251 = vmatprep.subr.mxu1 %v3191_v22  ;;  %v3865_v59 = vld [vmem:[#allocation12 + $0xa50] sm:$0xff]  ;;  %v3296_v22 = vld [vmem:[#allocation12 + $0x728] sm:$0xff] }
 0x9cb   :  { %3541 = vmatpush2.msra.mxu0 %v3199_v30  ;;  %9252 = vmatpush3.msra.mxu1 %v3111_v2  ;;  %v3861_v27 = vld [vmem:[#allocation12 + $0xa30] sm:$0xff]  ;;  %v3860_v30 = vld [vmem:[#allocation12 + $0xa28] sm:$0xff] }
 0x9cc   :  { %3542 = vmatprep.subr.mxu0 %v3195_v29  ;;  %9253 = vmatprep.subr.mxu1 %v3186_v21  ;;  %v3856_v2 = vld [vmem:[#allocation12 + $0xa08] sm:$0xff]  ;;  %v3291_v29 = vld [vmem:[#allocation12 + $0x700] sm:$0xff] }
 0x9cd   :  { %3543 = vmatpush2.msra.mxu0 %v3194_v36  ;;  %9254 = vmatpush3.msra.mxu1 %v3106_v38  ;;  %v3855_v21 = vld [vmem:[#allocation12 + $0xa00] sm:$0xff]  ;;  %v3286_v38 = vld [vmem:[#allocation12 + $0x6d8] sm:$0xff] }
 0x9ce   :  { %3544 = vmatprep.subr.mxu0 %v3190_v40  ;;  %9255 = vmatprep.subr.mxu1 %v3181_v42  ;;  %v3851_v36 = vld [vmem:[#allocation12 + $0x9e0] sm:$0xff]  ;;  %v3850_v40 = vld [vmem:[#allocation12 + $0x9d8] sm:$0xff] }
 0x9cf   :  { %3545 = vmatpush2.msra.mxu0 %v3189_v44  ;;  %9256 = vmatpush3.msra.mxu1 %v3101_v46  ;;  %v3846_v42 = vld [vmem:[#allocation12 + $0x9b8] sm:$0xff]  ;;  %v3281_v44 = vld [vmem:[#allocation12 + $0x6b0] sm:$0xff] }
 0x9d0   :  { %3546 = vmatprep.subr.mxu0 %v3185_v48  ;;  %9257 = vmatprep.subr.mxu1 %v3176_v50  ;;  %v3845_v46 = vld [vmem:[#allocation12 + $0x9b0] sm:$0xff]  ;;  %v3276_v50 = vld [vmem:[#allocation12 + $0x688] sm:$0xff] }
 0x9d1   :  { %3547 = vmatpush2.msra.mxu0 %v3184_v52  ;;  %9258 = vmatpush3.msra.mxu1 %v3096_v58  ;;  %v3841_v48 = vld [vmem:[#allocation12 + $0x990] sm:$0xff]  ;;  %v3840_v52 = vld [vmem:[#allocation12 + $0x988] sm:$0xff] }
 0x9d2   :  { %3548 = vmatprep.subr.mxu0 %v3180_v17  ;;  %9259 = vmatprep.subr.mxu1 %v3171_v35  ;;  %v3836_v58 = vld [vmem:[#allocation12 + $0x968] sm:$0xff]  ;;  %v3271_v17 = vld [vmem:[#allocation12 + $0x660] sm:$0xff] }
 0x9d3   :  { %3549 = vmatpush2.msra.mxu0 %v3179_v41  ;;  %9260 = vmatpush3.msra.mxu1 %v3091_v49  ;;  %v3835_v35 = vld [vmem:[#allocation12 + $0x960] sm:$0xff]  ;;  %v3266_v49 = vld [vmem:[#allocation12 + $0x638] sm:$0xff] }
 0x9d4   :  { %3550 = vmatprep.subr.mxu0 %v3175_v10  ;;  %9261 = vmatprep.subr.mxu1 %v3166_v12  ;;  %v3831_v41 = vld [vmem:[#allocation12 + $0x940] sm:$0xff]  ;;  %v3830_v10 = vld [vmem:[#allocation12 + $0x938] sm:$0xff] }
 0x9d5   :  { %3551 = vmatpush2.msra.mxu0 %v3174_v14  ;;  %9262 = vmatpush3.msra.mxu1 %v3086_v54  ;;  %v3826_v12 = vld [vmem:[#allocation12 + $0x918] sm:$0xff]  ;;  %v3261_v14 = vld [vmem:[#allocation12 + $0x610] sm:$0xff] }
 0x9d6   :  { %3552 = vmatprep.subr.mxu0 %v3170_v55  ;;  %9263 = vmatprep.subr.mxu1 %v3161_v16  ;;  %v3825_v54 = vld [vmem:[#allocation12 + $0x910] sm:$0xff]  ;;  %v3256_v16 = vld [vmem:[#allocation12 + $0x5e8] sm:$0xff] }
 0x9d7   :  { %3553 = vmatpush2.msra.mxu0 %v3169_v63  ;;  %9264 = vmatpush3.msra.mxu1 %v3081_v6  ;;  %v3821_v55 = vld [vmem:[#allocation12 + $0x8f0] sm:$0xff]  ;;  %v3820_v63 = vld [vmem:[#allocation12 + $0x8e8] sm:$0xff] }
 0x9d8   :  { %3554 = vmatprep.subr.mxu0 %v3165_v5  ;;  %9265 = vmatprep.subr.mxu1 %v3156_v33  ;;  %v3816_v6 = vld [vmem:[#allocation12 + $0x8c8] sm:$0xff]  ;;  %v3251_v5 = vld [vmem:[#allocation12 + $0x5c0] sm:$0xff] }
 0x9d9   :  { %3555 = vmatpush2.msra.mxu0 %v3164_v39  ;;  %9266 = vmatpush3.msra.mxu1 %v3076_v32  ;;  %v3815_v33 = vld [vmem:[#allocation12 + $0x8c0] sm:$0xff]  ;;  %v3246_v32 = vld [vmem:[#allocation12 + $0x598] sm:$0xff] }
 0x9da   :  { %3556 = vmatprep.subr.mxu0 %v3160_v61  ;;  %9267 = vmatprep.subr.mxu1 %v3151_v56  ;;  %v3811_v39 = vld [vmem:[#allocation12 + $0x8a0] sm:$0xff]  ;;  %v3810_v61 = vld [vmem:[#allocation12 + $0x898] sm:$0xff] }
 0x9db   :  { %3557 = vmatpush2.msra.mxu0 %v3159_v60  ;;  %9268 = vmatpush3.msra.mxu1 %v3071_v47  ;;  %v3806_v56 = vld [vmem:[#allocation12 + $0x878] sm:$0xff]  ;;  %v3241_v60 = vld [vmem:[#allocation12 + $0x570] sm:$0xff] }
 0x9dc   :  { %3558 = vmatprep.subr.mxu0 %v3155_v51  ;;  %3717 = vmatmul.mubr.f32.vlgmr.msra.gmra.mxu1 %v11039_v25  ;;  %v3805_v47 = vld [vmem:[#allocation12 + $0x870] sm:$0xff] }
 0x9dd   :  { %4075 = vmatprep.subr.mxu1 %v3881_v4  ;;  %3559 = vmatpush2.msra.mxu0 %v3154_v9  ;;  %v3961_v51 = vld [vmem:[#allocation12 + $0xd50] sm:$0xff]  ;;  %v3236_v4 = vld [vmem:[#allocation12 + $0x548] sm:$0xff] }
 0x9de   :  { %3721 = vmatprep.mubr.f32.mxu1 %v11043_v31  ;;  %4076 = vmatpush1.msra.mxu1 %v3880_v20  ;;  %v3960_v9 = vld [vmem:[#allocation12 + $0xd48] sm:$0xff] }
 0x9df   :  { %3560 = vmatprep.subr.mxu0 %v3150_v11  ;;  %4077 = vmatprep.subr.mxu1 %v3876_v13  ;;  %v3956_v20 = vld [vmem:[#allocation12 + $0xd28] sm:$0xff]  ;;  %v3231_v11 = vld [vmem:[#allocation12 + $0x520] sm:$0xff] }
 0x9e0   :  { %3561 = vmatpush2.msra.mxu0 %v3149_v15  ;;  %4078 = vmatpush1.msra.mxu1 %v3875_v23  ;;  %v3955_v13 = vld [vmem:[#allocation12 + $0xd20] sm:$0xff]  ;;  %v3336_v23 = vld [vmem:[#allocation12 + $0x868] sm:$0xff] }
 0x9e1   :  { %3563 = vmatmul.mubr.f32.vlgmr.msra.gmra.mxu0 %v11039_v25  ;;  %3722 = vmatmul.mubr.f32.gmra.mxu1 %v11045_v34  ;;  %v3951_v15 = vld [vmem:[#allocation12 + $0xd00] sm:$0xff] }
 0x9e2   :  { %3727 = vmatprep.subr.mxu0 %v9986_v0  ;;  %4079 = vmatprep.subr.mxu1 %v3871_v24  ;;  %v3950_v24 = vld [vmem:[#allocation12 + $0xcf8] sm:$0xff] }
 0x9e3   :  { %3568 = vmatprep.mubr.f32.mxu0 %v11043_v31  ;;  %3728 = vmatpush1.msra.mxu0 %v3306_v19  ;;  %v3946_v19 = vld [vmem:[#allocation12 + $0xcd8] sm:$0xff] }
 0x9e4   :  { %4080 = vmatpush1.msra.mxu1 %v3870_v18  ;;  %4139 = vmatprep.mubr.f32.mxu1 %v11037_v53  ;;  %v3331_v18 = vld [vmem:[#allocation12 + $0x840] sm:$0xff] }
 0x9e5   :  { %3729 = vmatprep.subr.mxu0 %v9986_v0  ;;  %4081 = vmatprep.subr.mxu1 %v3866_v1  ;;  %v3945_v1 = vld [vmem:[#allocation12 + $0xcd0] sm:$0xff] }
 0x9e6   :  { %3730 = vmatpush1.msra.mxu0 %v3301_v26  ;;  %4082 = vmatpush1.msra.mxu1 %v3865_v59  ;;  %v3941_v26 = vld [vmem:[#allocation12 + $0xcb0] sm:$0xff]  ;;  %v3326_v59 = vld [vmem:[#allocation12 + $0x818] sm:$0xff] }
 0x9e7   :  { %3569 = vmatmul.mubr.f32.gmra.mxu0 %v11045_v34  ;;  %3731 = vmatprep.subr.mxu0 %v9986_v0 }
 0x9e8   :  { %4083 = vmatprep.subr.mxu1 %v3861_v27  ;;  %3732 = vmatpush1.msra.mxu0 %v3296_v22  ;;  %v3940_v27 = vld [vmem:[#allocation12 + $0xca8] sm:$0xff] }
 0x9e9   :  { %9061 = vmatprep.mubr.msk.f32.mxu0 %vm3337_vm5, %v11049_v37  ;;  %4084 = vmatpush1.msra.mxu1 %v3860_v30  ;;  %v3936_v22 = vld [vmem:[#allocation12 + $0xc88] sm:$0xff]  ;;  %v3321_v30 = vld [vmem:[#allocation12 + $0x7f0] sm:$0xff] }
 0x9ea   :  { %3733 = vmatprep.subr.mxu0 %v9986_v0  ;;  %4085 = vmatprep.subr.mxu1 %v3856_v2  ;;  %v3935_v2 = vld [vmem:[#allocation12 + $0xc80] sm:$0xff] }
 0x9eb   :  { %3734 = vmatpush1.msra.mxu0 %v3291_v29  ;;  %4086 = vmatpush1.msra.mxu1 %v3855_v21  ;;  %v3931_v29 = vld [vmem:[#allocation12 + $0xc60] sm:$0xff]  ;;  %v3316_v21 = vld [vmem:[#allocation12 + $0x7c8] sm:$0xff] }
 0x9ec   :  { %3735 = vmatprep.subr.mxu0 %v9986_v0  ;;  %4087 = vmatprep.subr.mxu1 %v3851_v36  ;;  %v3930_v36 = vld [vmem:[#allocation12 + $0xc58] sm:$0xff] }
 0x9ed   :  { %3736 = vmatpush1.msra.mxu0 %v3286_v38  ;;  %4088 = vmatpush1.msra.mxu1 %v3850_v40  ;;  %v3926_v38 = vld [vmem:[#allocation12 + $0xc38] sm:$0xff]  ;;  %v3311_v40 = vld [vmem:[#allocation12 + $0x7a0] sm:$0xff] }
 0x9ee   :  { %3737 = vmatprep.subr.mxu0 %v9986_v0  ;;  %4089 = vmatprep.subr.mxu1 %v3846_v42  ;;  %v3925_v42 = vld [vmem:[#allocation12 + $0xc30] sm:$0xff] }
 0x9ef   :  { %3738 = vmatpush1.msra.mxu0 %v3281_v44  ;;  %4090 = vmatpush1.msra.mxu1 %v3845_v46  ;;  %v3921_v44 = vld [vmem:[#allocation12 + $0xc10] sm:$0xff] }
 0x9f0   :  { %3739 = vmatprep.subr.mxu0 %v9986_v0  ;;  %4091 = vmatprep.subr.mxu1 %v3841_v48  ;;  %v4041_v46 = vld [vmem:[#allocation12 + $0xfd0] sm:$0xff]  ;;  %v3920_v48 = vld [vmem:[#allocation12 + $0xc08] sm:$0xff] }
 0x9f1   :  { %3740 = vmatpush1.msra.mxu0 %v3276_v50  ;;  %4092 = vmatpush1.msra.mxu1 %v3840_v52  ;;  %v4040_v50 = vld [vmem:[#allocation12 + $0xfc8] sm:$0xff] }
 0x9f2   :  { %3741 = vmatprep.subr.mxu0 %v9986_v0  ;;  %4093 = vmatprep.subr.mxu1 %v3836_v58  ;;  %v3916_v52 = vld [vmem:[#allocation12 + $0xbe8] sm:$0xff] }
 0x9f3   :  { %3742 = vmatpush1.msra.mxu0 %v3271_v17  ;;  %4094 = vmatpush1.msra.mxu1 %v3835_v35  ;;  %v4036_v58 = vld [vmem:[#allocation12 + $0xfa8] sm:$0xff]  ;;  %v3915_v17 = vld [vmem:[#allocation12 + $0xbe0] sm:$0xff] }
 0x9f4   :  { %3743 = vmatprep.subr.mxu0 %v9986_v0  ;;  %4095 = vmatprep.subr.mxu1 %v3831_v41  ;;  %v4035_v35 = vld [vmem:[#allocation12 + $0xfa0] sm:$0xff] }
 0x9f5   :  { %3744 = vmatpush1.msra.mxu0 %v3266_v49  ;;  %4096 = vmatpush1.msra.mxu1 %v3830_v10  ;;  %v3911_v41 = vld [vmem:[#allocation12 + $0xbc0] sm:$0xff]  ;;  %v3910_v10 = vld [vmem:[#allocation12 + $0xbb8] sm:$0xff] }
 0x9f6   :  { %3745 = vmatprep.subr.mxu0 %v9986_v0  ;;  %4097 = vmatprep.subr.mxu1 %v3826_v12  ;;  %v4031_v49 = vld [vmem:[#allocation12 + $0xf80] sm:$0xff]  ;;  %v4030_v12 = vld [vmem:[#allocation12 + $0xf78] sm:$0xff] }
 0x9f7   :  { %3746 = vmatpush1.msra.mxu0 %v3261_v14  ;;  %4098 = vmatpush1.msra.mxu1 %v3825_v54  ;;  %v3906_v14 = vld [vmem:[#allocation12 + $0xb98] sm:$0xff] }
 0x9f8   :  { %3747 = vmatprep.subr.mxu0 %v9986_v0  ;;  %4099 = vmatprep.subr.mxu1 %v3821_v55  ;;  %v4026_v54 = vld [vmem:[#allocation12 + $0xf58] sm:$0xff]  ;;  %v3905_v55 = vld [vmem:[#allocation12 + $0xb90] sm:$0xff] }
 0x9f9   :  { %3748 = vmatpush1.msra.mxu0 %v3256_v16  ;;  %4100 = vmatpush1.msra.mxu1 %v3820_v63  ;;  %v4025_v16 = vld [vmem:[#allocation12 + $0xf50] sm:$0xff] }
 0x9fa   :  { %3749 = vmatprep.subr.mxu0 %v9986_v0  ;;  %4101 = vmatprep.subr.mxu1 %v3816_v6  ;;  %v3901_v63 = vld [vmem:[#allocation12 + $0xb70] sm:$0xff] }
 0x9fb   :  { %3750 = vmatpush1.msra.mxu0 %v3251_v5  ;;  %4102 = vmatpush1.msra.mxu1 %v3815_v33  ;;  %v4021_v6 = vld [vmem:[#allocation12 + $0xf30] sm:$0xff]  ;;  %v3900_v5 = vld [vmem:[#allocation12 + $0xb68] sm:$0xff] }
 0x9fc   :  { %3751 = vmatprep.subr.mxu0 %v9986_v0  ;;  %4103 = vmatprep.subr.mxu1 %v3811_v39  ;;  %v4020_v33 = vld [vmem:[#allocation12 + $0xf28] sm:$0xff] }
 0x9fd   :  { %3752 = vmatpush1.msra.mxu0 %v3246_v32  ;;  %4104 = vmatpush1.msra.mxu1 %v3810_v61  ;;  %v3896_v39 = vld [vmem:[#allocation12 + $0xb48] sm:$0xff]  ;;  %v3895_v61 = vld [vmem:[#allocation12 + $0xb40] sm:$0xff] }
 0x9fe   :  { %3753 = vmatprep.subr.mxu0 %v9986_v0  ;;  %4105 = vmatprep.subr.mxu1 %v3806_v56  ;;  %v4016_v32 = vld [vmem:[#allocation12 + $0xf08] sm:$0xff]  ;;  %v4015_v56 = vld [vmem:[#allocation12 + $0xf00] sm:$0xff] }
 0x9ff   :  { %3754 = vmatpush1.msra.mxu0 %v3241_v60  ;;  %4106 = vmatpush1.msra.mxu1 %v3805_v47  ;;  %v3891_v60 = vld [vmem:[#allocation12 + $0xb20] sm:$0xff] }
 0xa00   :  { %3755 = vmatprep.subr.mxu0 %v9986_v0  ;;  %4107 = vmatprep.subr.mxu1 %v3961_v51  ;;  %v4011_v47 = vld [vmem:[#allocation12 + $0xee0] sm:$0xff]  ;;  %v3890_v51 = vld [vmem:[#allocation12 + $0xb18] sm:$0xff] }
 0xa01   :  { %3756 = vmatpush1.msra.mxu0 %v3236_v4  ;;  %4108 = vmatpush2.msra.mxu1 %v3960_v9  ;;  %v4010_v4 = vld [vmem:[#allocation12 + $0xed8] sm:$0xff] }
 0xa02   :  { %3757 = vmatprep.subr.mxu0 %v9986_v0  ;;  %4109 = vmatprep.subr.mxu1 %v3956_v20  ;;  %v3886_v9 = vld [vmem:[#allocation12 + $0xaf8] sm:$0xff] }
 0xa03   :  { %3758 = vmatpush1.msra.mxu0 %v3231_v11  ;;  %4110 = vmatpush2.msra.mxu1 %v3955_v13  ;;  %v4006_v20 = vld [vmem:[#allocation12 + $0xeb8] sm:$0xff]  ;;  %v3885_v11 = vld [vmem:[#allocation12 + $0xaf0] sm:$0xff] }
 0xa04   :  { %3779 = vmatprep.subr.mxu0 %v9986_v0  ;;  %4111 = vmatprep.subr.mxu1 %v3951_v15  ;;  %v4005_v13 = vld [vmem:[#allocation12 + $0xeb0] sm:$0xff] }
 0xa05   :  { %3780 = vmatpush2.msra.mxu0 %v3336_v23  ;;  %4112 = vmatpush2.msra.mxu1 %v3950_v24  ;;  %v4001_v15 = vld [vmem:[#allocation12 + $0xe90] sm:$0xff]  ;;  %v4043_v23 = vld [vmem:[#allocation12 + $0xfe0] sm:$0xff]  ;;  %v4000_v24 = vld [vmem:[#allocation12 + $0xe88] sm:$0xff] }
 0xa06   :  { %3781 = vmatprep.subr.mxu0 %v9986_v0  ;;  %4113 = vmatprep.subr.mxu1 %v3946_v19  ;;  %v4042_v19 = vld [vmem:[#allocation12 + $0xfd8] sm:$0xff] }
 0xa07   :  { %3782 = vmatpush2.msra.mxu0 %v3331_v18  ;;  %4114 = vmatpush2.msra.mxu1 %v3945_v1  ;;  %v3996_v18 = vld [vmem:[#allocation12 + $0xe68] sm:$0xff]  ;;  %v4038_v1 = vld [vmem:[#allocation12 + $0xfb8] sm:$0xff] }
 0xa08   :  { %3783 = vmatprep.subr.mxu0 %v9986_v0  ;;  %4115 = vmatprep.subr.mxu1 %v3941_v26  ;;  %v3995_v26 = vld [vmem:[#allocation12 + $0xe60] sm:$0xff] }
 0xa09   :  { %3784 = vmatpush2.msra.mxu0 %v3326_v59  ;;  %4116 = vmatpush2.msra.mxu1 %v3940_v27  ;;  %v4037_v59 = vld [vmem:[#allocation12 + $0xfb0] sm:$0xff]  ;;  %v3991_v27 = vld [vmem:[#allocation12 + $0xe40] sm:$0xff] }
 0xa0a   :  { %3785 = vmatprep.subr.mxu0 %v9986_v0  ;;  %4117 = vmatprep.subr.mxu1 %v3936_v22  ;;  %v4033_v22 = vld [vmem:[#allocation12 + $0xf90] sm:$0xff] }
 0xa0b   :  { %3786 = vmatpush2.msra.mxu0 %v3321_v30  ;;  %4118 = vmatpush2.msra.mxu1 %v3935_v2  ;;  %v3990_v30 = vld [vmem:[#allocation12 + $0xe38] sm:$0xff]  ;;  %v4032_v2 = vld [vmem:[#allocation12 + $0xf88] sm:$0xff] }
 0xa0c   :  { %3787 = vmatprep.subr.mxu0 %v9986_v0  ;;  %4119 = vmatprep.subr.mxu1 %v3931_v29  ;;  %v3986_v29 = vld [vmem:[#allocation12 + $0xe18] sm:$0xff] }
 0xa0d   :  { %3788 = vmatpush2.msra.mxu0 %v3316_v21  ;;  %4120 = vmatpush2.msra.mxu1 %v3930_v36  ;;  %v4028_v21 = vld [vmem:[#allocation12 + $0xf68] sm:$0xff]  ;;  %v3985_v36 = vld [vmem:[#allocation12 + $0xe10] sm:$0xff] }
 0xa0e   :  { %3789 = vmatprep.subr.mxu0 %v9986_v0  ;;  %4121 = vmatprep.subr.mxu1 %v3926_v38  ;;  %v4027_v38 = vld [vmem:[#allocation12 + $0xf60] sm:$0xff] }
 0xa0f   :  { %3790 = vmatpush2.msra.mxu0 %v3311_v40  ;;  %4122 = vmatpush2.msra.mxu1 %v3925_v42  ;;  %v3981_v40 = vld [vmem:[#allocation12 + $0xdf0] sm:$0xff]  ;;  %v4023_v42 = vld [vmem:[#allocation12 + $0xf40] sm:$0xff] }
 0xa10   :  { %3792 = vmatmul.mubr.f32.vlgmr.msra.gmra.mxu0 %v11051_v57  ;;  %4123 = vmatprep.subr.mxu1 %v3921_v44  ;;  %v3980_v44 = vld [vmem:[#allocation12 + $0xde8] sm:$0xff] }
 0xa11   :  { %4152 = vmatprep.subr.mxu0 %v4041_v46  ;;  %9062 = vmatprep.mubr.msk.f32.mxu0 %vm3337_vm5, %v11056_v3  ;;  %v4022_v46 = vld [vmem:[#allocation12 + $0xf38] sm:$0xff] }
 0xa12   :  { %4124 = vmatpush2.msra.mxu1 %v3920_v48  ;;  %4153 = vmatpush1.msra.mxu0 %v4040_v50  ;;  %v3976_v48 = vld [vmem:[#allocation12 + $0xdc8] sm:$0xff]  ;;  %v4018_v50 = vld [vmem:[#allocation12 + $0xf18] sm:$0xff] }
 0xa13   :  { %4125 = vmatprep.subr.mxu1 %v3916_v52  ;;  %4154 = vmatprep.subr.mxu0 %v4036_v58  ;;  %v3975_v52 = vld [vmem:[#allocation12 + $0xdc0] sm:$0xff]  ;;  %v4017_v58 = vld [vmem:[#allocation12 + $0xf10] sm:$0xff] }
 0xa14   :  { %4126 = vmatpush2.msra.mxu1 %v3915_v17  ;;  %4155 = vmatpush1.msra.mxu0 %v4035_v35  ;;  %v3971_v17 = vld [vmem:[#allocation12 + $0xda0] sm:$0xff]  ;;  %v4013_v35 = vld [vmem:[#allocation12 + $0xef0] sm:$0xff] }
 0xa15   :  { %3797 = vmatmul.mubr.f32.gmra.mxu0 %v11058_v28  ;;  %4127 = vmatprep.subr.mxu1 %v3911_v41  ;;  %v3970_v41 = vld [vmem:[#allocation12 + $0xd98] sm:$0xff] }
 0xa16   :  { %4156 = vmatprep.subr.mxu0 %v4031_v49  ;;  %4128 = vmatpush2.msra.mxu1 %v3910_v10  ;;  %v4012_v49 = vld [vmem:[#allocation12 + $0xee8] sm:$0xff]  ;;  %v3966_v10 = vld [vmem:[#allocation12 + $0xd78] sm:$0xff] }
 0xa17   :  { %4157 = vmatpush1.msra.mxu0 %v4030_v12  ;;  %9063 = vmatprep.mubr.msk.f32.mxu0 %vm3337_vm5, %v11049_v37  ;;  %v4008_v12 = vld [vmem:[#allocation12 + $0xec8] sm:$0xff] }
 0xa18   :  { %4129 = vmatprep.subr.mxu1 %v3906_v14  ;;  %4158 = vmatprep.subr.mxu0 %v4026_v54  ;;  %v3965_v14 = vld [vmem:[#allocation12 + $0xd70] sm:$0xff]  ;;  %v4007_v54 = vld [vmem:[#allocation12 + $0xec0] sm:$0xff] }
 0xa19   :  { %4130 = vmatpush2.msra.mxu1 %v3905_v55  ;;  %4159 = vmatpush1.msra.mxu0 %v4025_v16  ;;  %v4071_v55 = vld [vmem:[#allocation12 + $0x10c0] sm:$0xff] }
 0xa1a   :  { %4131 = vmatprep.subr.mxu1 %v3901_v63  ;;  %4160 = vmatprep.subr.mxu0 %v4021_v6  ;;  %v4003_v16 = vld [vmem:[#allocation12 + $0xea0] sm:$0xff]  ;;  %v4070_v63 = vld [vmem:[#allocation12 + $0x10b8] sm:$0xff] }
 0xa1b   :  { %4132 = vmatpush2.msra.mxu1 %v3900_v5  ;;  %4161 = vmatpush1.msra.mxu0 %v4020_v33  ;;  %v4002_v6 = vld [vmem:[#allocation12 + $0xe98] sm:$0xff] }
 0xa1c   :  { %4133 = vmatprep.subr.mxu1 %v3896_v39  ;;  %4162 = vmatprep.subr.mxu0 %v4016_v32  ;;  %v4066_v5 = vld [vmem:[#allocation12 + $0x1098] sm:$0xff]  ;;  %v4065_v39 = vld [vmem:[#allocation12 + $0x1090] sm:$0xff] }
 0xa1d   :  { %4134 = vmatpush2.msra.mxu1 %v3895_v61  ;;  %4163 = vmatpush1.msra.mxu0 %v4015_v56  ;;  %v3998_v33 = vld [vmem:[#allocation12 + $0xe78] sm:$0xff]  ;;  %v3997_v32 = vld [vmem:[#allocation12 + $0xe70] sm:$0xff] }
 0xa1e   :  { %4135 = vmatprep.subr.mxu1 %v3891_v60  ;;  %4164 = vmatprep.subr.mxu0 %v4011_v47  ;;  %v4061_v61 = vld [vmem:[#allocation12 + $0x1070] sm:$0xff]  ;;  %v4060_v60 = vld [vmem:[#allocation12 + $0x1068] sm:$0xff] }
 0xa1f   :  { %4136 = vmatpush2.msra.mxu1 %v3890_v51  ;;  %4165 = vmatpush1.msra.mxu0 %v4010_v4  ;;  %v3993_v56 = vld [vmem:[#allocation12 + $0xe50] sm:$0xff]  ;;  %v3992_v47 = vld [vmem:[#allocation12 + $0xe48] sm:$0xff] }
 0xa20   :  { %4137 = vmatprep.subr.mxu1 %v3886_v9  ;;  %4166 = vmatprep.subr.mxu0 %v4006_v20  ;;  %v4056_v51 = vld [vmem:[#allocation12 + $0x1048] sm:$0xff]  ;;  %v4055_v9 = vld [vmem:[#allocation12 + $0x1040] sm:$0xff] }
 0xa21   :  { %4138 = vmatpush2.msra.mxu1 %v3885_v11  ;;  %4167 = vmatpush1.msra.mxu0 %v4005_v13  ;;  %v3988_v4 = vld [vmem:[#allocation12 + $0xe28] sm:$0xff]  ;;  %v3987_v20 = vld [vmem:[#allocation12 + $0xe20] sm:$0xff] }
 0xa22   :  { %4140 = vmatmul.mubr.f32.vlgmr.msra.gmra.mxu1 %v11039_v25  ;;  %4168 = vmatprep.subr.mxu0 %v4001_v15  ;;  %v4051_v11 = vld [vmem:[#allocation12 + $0x1020] sm:$0xff]  ;;  %v4050_v15 = vld [vmem:[#allocation12 + $0x1018] sm:$0xff] }
 0xa23   :  { %4306 = vmatprep.subr.mxu1 %v4043_v23  ;;  %4145 = vmatprep.mubr.f32.mxu1 %v11043_v31  ;;  %v3983_v13 = vld [vmem:[#allocation12 + $0xe00] sm:$0xff]  ;;  %v3982_v23 = vld [vmem:[#allocation12 + $0xdf8] sm:$0xff] }
 0xa24   :  { %4169 = vmatpush1.msra.mxu0 %v4000_v24  ;;  %4307 = vmatpush1.msra.mxu1 %v4042_v19  ;;  %v4046_v24 = vld [vmem:[#allocation12 + $0xff8] sm:$0xff] }
 0xa25   :  { %4170 = vmatprep.subr.mxu0 %v3996_v18  ;;  %4308 = vmatprep.subr.mxu1 %v4038_v1  ;;  %v3978_v19 = vld [vmem:[#allocation12 + $0xdd8] sm:$0xff]  ;;  %v4045_v18 = vld [vmem:[#allocation12 + $0xff0] sm:$0xff] }
 0xa26   :  { %4171 = vmatpush1.msra.mxu0 %v3995_v26  ;;  %4309 = vmatpush1.msra.mxu1 %v4037_v59  ;;  %v3977_v1 = vld [vmem:[#allocation12 + $0xdd0] sm:$0xff]  ;;  %v3883_v26 = vld [vmem:[#allocation12 + $0xae0] sm:$0xff] }
 0xa27   :  { %4146 = vmatmul.mubr.f32.gmra.mxu1 %v11045_v34  ;;  %4172 = vmatprep.subr.mxu0 %v3991_v27  ;;  %v3973_v59 = vld [vmem:[#allocation12 + $0xdb0] sm:$0xff]  ;;  %v3882_v27 = vld [vmem:[#allocation12 + $0xad8] sm:$0xff] }
 0xa28   :  { %4310 = vmatprep.subr.mxu1 %v4033_v22  ;;  %4173 = vmatpush1.msra.mxu0 %v3990_v30  ;;  %v3972_v22 = vld [vmem:[#allocation12 + $0xda8] sm:$0xff]  ;;  %v3878_v30 = vld [vmem:[#allocation12 + $0xab8] sm:$0xff] }
 0xa29   :  { %4311 = vmatpush1.msra.mxu1 %v4032_v2  ;;  %9065 = vmatprep.mubr.msk.f32.mxu1 %vm3337_vm5, %v11049_v37  ;;  %v3968_v2 = vld [vmem:[#allocation12 + $0xd88] sm:$0xff] }
 0xa2a   :  { %4174 = vmatprep.subr.mxu0 %v3986_v29  ;;  %4312 = vmatprep.subr.mxu1 %v4028_v21  ;;  %v3877_v29 = vld [vmem:[#allocation12 + $0xab0] sm:$0xff]  ;;  %v3967_v21 = vld [vmem:[#allocation12 + $0xd80] sm:$0xff] }
 0xa2b   :  { %4175 = vmatpush1.msra.mxu0 %v3985_v36  ;;  %4313 = vmatpush1.msra.mxu1 %v4027_v38  ;;  %v3873_v36 = vld [vmem:[#allocation12 + $0xa90] sm:$0xff] }
 0xa2c   :  { %4176 = vmatprep.subr.mxu0 %v3981_v40  ;;  %4314 = vmatprep.subr.mxu1 %v4023_v42  ;;  %v4073_v38 = vld [vmem:[#allocation12 + $0x10d0] sm:$0xff]  ;;  %v3872_v40 = vld [vmem:[#allocation12 + $0xa88] sm:$0xff] }
 0xa2d   :  { %4177 = vmatpush1.msra.mxu0 %v3980_v44  ;;  %4315 = vmatpush1.msra.mxu1 %v4022_v46  ;;  %v4072_v42 = vld [vmem:[#allocation12 + $0x10c8] sm:$0xff] }
 0xa2e   :  { %4178 = vmatprep.subr.mxu0 %v3976_v48  ;;  %4316 = vmatprep.subr.mxu1 %v4018_v50  ;;  %v3868_v44 = vld [vmem:[#allocation12 + $0xa68] sm:$0xff]  ;;  %v3867_v48 = vld [vmem:[#allocation12 + $0xa60] sm:$0xff] }
 0xa2f   :  { %4179 = vmatpush1.msra.mxu0 %v3975_v52  ;;  %4317 = vmatpush1.msra.mxu1 %v4017_v58  ;;  %v4068_v46 = vld [vmem:[#allocation12 + $0x10a8] sm:$0xff]  ;;  %v4067_v50 = vld [vmem:[#allocation12 + $0x10a0] sm:$0xff] }
 0xa30   :  { %4180 = vmatprep.subr.mxu0 %v3971_v17  ;;  %4318 = vmatprep.subr.mxu1 %v4013_v35  ;;  %v3863_v52 = vld [vmem:[#allocation12 + $0xa40] sm:$0xff]  ;;  %v3862_v17 = vld [vmem:[#allocation12 + $0xa38] sm:$0xff] }
 0xa31   :  { %4181 = vmatpush1.msra.mxu0 %v3970_v41  ;;  %4319 = vmatpush1.msra.mxu1 %v4012_v49  ;;  %v4063_v58 = vld [vmem:[#allocation12 + $0x1080] sm:$0xff]  ;;  %v4062_v35 = vld [vmem:[#allocation12 + $0x1078] sm:$0xff] }
 0xa32   :  { %4182 = vmatprep.subr.mxu0 %v3966_v10  ;;  %4320 = vmatprep.subr.mxu1 %v4008_v12  ;;  %v3858_v41 = vld [vmem:[#allocation12 + $0xa18] sm:$0xff]  ;;  %v3857_v10 = vld [vmem:[#allocation12 + $0xa10] sm:$0xff] }
 0xa33   :  { %4183 = vmatpush1.msra.mxu0 %v3965_v14  ;;  %4321 = vmatpush1.msra.mxu1 %v4007_v54  ;;  %v4058_v49 = vld [vmem:[#allocation12 + $0x1058] sm:$0xff]  ;;  %v4057_v12 = vld [vmem:[#allocation12 + $0x1050] sm:$0xff] }
 0xa34   :  { %4204 = vmatprep.subr.mxu0 %v4071_v55  ;;  %4322 = vmatprep.subr.mxu1 %v4003_v16  ;;  %v3853_v14 = vld [vmem:[#allocation12 + $0x9f0] sm:$0xff]  ;;  %v3852_v55 = vld [vmem:[#allocation12 + $0x9e8] sm:$0xff] }
 0xa35   :  { %4205 = vmatpush2.msra.mxu0 %v4070_v63  ;;  %4323 = vmatpush1.msra.mxu1 %v4002_v6  ;;  %v4053_v54 = vld [vmem:[#allocation12 + $0x1030] sm:$0xff]  ;;  %v4052_v16 = vld [vmem:[#allocation12 + $0x1028] sm:$0xff] }
 0xa36   :  { %4206 = vmatprep.subr.mxu0 %v4066_v5  ;;  %4324 = vmatprep.subr.mxu1 %v3998_v33  ;;  %v3848_v63 = vld [vmem:[#allocation12 + $0x9c8] sm:$0xff]  ;;  %v3847_v5 = vld [vmem:[#allocation12 + $0x9c0] sm:$0xff] }
 0xa37   :  { %4207 = vmatpush2.msra.mxu0 %v4065_v39  ;;  %4325 = vmatpush1.msra.mxu1 %v3997_v32  ;;  %v4048_v6 = vld [vmem:[#allocation12 + $0x1008] sm:$0xff]  ;;  %v4047_v33 = vld [vmem:[#allocation12 + $0x1000] sm:$0xff] }
 0xa38   :  { %4208 = vmatprep.subr.mxu0 %v4061_v61  ;;  %4326 = vmatprep.subr.mxu1 %v3993_v56  ;;  %v3843_v39 = vld [vmem:[#allocation12 + $0x9a0] sm:$0xff]  ;;  %v3964_v32 = vld [vmem:[#allocation12 + $0xd68] sm:$0xff]  ;;  %v3842_v61 = vld [vmem:[#allocation12 + $0x998] sm:$0xff] }
 0xa39   :  { %4209 = vmatpush2.msra.mxu0 %v4060_v60  ;;  %4327 = vmatpush1.msra.mxu1 %v3992_v47  ;;  %v3884_v56 = vld [vmem:[#allocation12 + $0xae8] sm:$0xff]  ;;  %v3838_v60 = vld [vmem:[#allocation12 + $0x978] sm:$0xff]  ;;  %v3959_v47 = vld [vmem:[#allocation12 + $0xd40] sm:$0xff] }
 0xa3a   :  { %4210 = vmatprep.subr.mxu0 %v4056_v51  ;;  %4328 = vmatprep.subr.mxu1 %v3988_v4  ;;  %v3837_v51 = vld [vmem:[#allocation12 + $0x970] sm:$0xff]  ;;  %v3879_v4 = vld [vmem:[#allocation12 + $0xac0] sm:$0xff] }
 0xa3b   :  { %4211 = vmatpush2.msra.mxu0 %v4055_v9  ;;  %4329 = vmatpush1.msra.mxu1 %v3987_v20  ;;  %v3833_v9 = vld [vmem:[#allocation12 + $0x950] sm:$0xff]  ;;  %v3954_v20 = vld [vmem:[#allocation12 + $0xd18] sm:$0xff] }
 0xa3c   :  { %4212 = vmatprep.subr.mxu0 %v4051_v11  ;;  %4330 = vmatprep.subr.mxu1 %v3983_v13  ;;  %v3832_v11 = vld [vmem:[#allocation12 + $0x948] sm:$0xff]  ;;  %v3874_v13 = vld [vmem:[#allocation12 + $0xa98] sm:$0xff] }
 0xa3d   :  { %4213 = vmatpush2.msra.mxu0 %v4050_v15  ;;  %4331 = vmatpush1.msra.mxu1 %v3982_v23  ;;  %v3828_v15 = vld [vmem:[#allocation12 + $0x928] sm:$0xff]  ;;  %v3949_v23 = vld [vmem:[#allocation12 + $0xcf0] sm:$0xff] }
 0xa3e   :  { %4214 = vmatprep.subr.mxu0 %v4046_v24  ;;  %4332 = vmatprep.subr.mxu1 %v3978_v19  ;;  %v3827_v19 = vld [vmem:[#allocation12 + $0x920] sm:$0xff] }
 0xa3f   :  { %4215 = vmatpush2.msra.mxu0 %v4045_v18  ;;  %4333 = vmatpush1.msra.mxu1 %v3977_v1  ;;  %v3869_v18 = vld [vmem:[#allocation12 + $0xa70] sm:$0xff]  ;;  %v3823_v1 = vld [vmem:[#allocation12 + $0x900] sm:$0xff] }
 0xa40   :  { %4217 = vmatmul.mubr.f32.vlgmr.msra.gmra.mxu0 %v11051_v57  ;;  %4229 = vmatprep.subr.mxu0 %v3883_v26  ;;  %v3944_v26 = vld [vmem:[#allocation12 + $0xcc8] sm:$0xff] }
 0xa41   :  { %4334 = vmatprep.subr.mxu1 %v3973_v59  ;;  %9064 = vmatprep.mubr.msk.f32.mxu0 %vm3337_vm5, %v11056_v3  ;;  %v3822_v59 = vld [vmem:[#allocation12 + $0x8f8] sm:$0xff] }
 0xa42   :  { %4230 = vmatpush1.msra.mxu0 %v3882_v27  ;;  %4335 = vmatpush1.msra.mxu1 %v3972_v22  ;;  %v3864_v27 = vld [vmem:[#allocation12 + $0xa48] sm:$0xff]  ;;  %v3818_v22 = vld [vmem:[#allocation12 + $0x8d8] sm:$0xff] }
 0xa43   :  { %4231 = vmatprep.subr.mxu0 %v3878_v30  ;;  %4336 = vmatprep.subr.mxu1 %v3968_v2  ;;  %v3939_v30 = vld [vmem:[#allocation12 + $0xca0] sm:$0xff] }
 0xa44   :  { %4232 = vmatpush1.msra.mxu0 %v3877_v29  ;;  %4337 = vmatpush1.msra.mxu1 %v3967_v21  ;;  %v3817_v29 = vld [vmem:[#allocation12 + $0x8d0] sm:$0xff]  ;;  %v3859_v21 = vld [vmem:[#allocation12 + $0xa20] sm:$0xff] }
 0xa45   :  { %4223 = vmatmul.mubr.f32.gmra.mxu0 %v11058_v28  ;;  %4233 = vmatprep.subr.mxu0 %v3873_v36 }
 0xa46   :  { %4358 = vmatprep.subr.mxu1 %v4073_v38  ;;  %4234 = vmatpush1.msra.mxu0 %v3872_v40  ;;  %v3813_v38 = vld [vmem:[#allocation12 + $0x8b0] sm:$0xff]  ;;  %v3934_v40 = vld [vmem:[#allocation12 + $0xc78] sm:$0xff] }
 0xa47   :  { %4293 = vmatprep.mubr.f32.mxu0 %v11037_v53  ;;  %4359 = vmatpush2.msra.mxu1 %v4072_v42 }
 0xa48   :  { %4235 = vmatprep.subr.mxu0 %v3868_v44  ;;  %4360 = vmatprep.subr.mxu1 %v4068_v46  ;;  %v3812_v44 = vld [vmem:[#allocation12 + $0x8a8] sm:$0xff]  ;;  %v3854_v46 = vld [vmem:[#allocation12 + $0x9f8] sm:$0xff] }
 0xa49   :  { %4236 = vmatpush1.msra.mxu0 %v3867_v48  ;;  %4361 = vmatpush2.msra.mxu1 %v4067_v50  ;;  %v3808_v50 = vld [vmem:[#allocation12 + $0x888] sm:$0xff] }
 0xa4a   :  { %4237 = vmatprep.subr.mxu0 %v3863_v52  ;;  %4362 = vmatprep.subr.mxu1 %v4063_v58  ;;  %v3929_v52 = vld [vmem:[#allocation12 + $0xc50] sm:$0xff] }
 0xa4b   :  { %4238 = vmatpush1.msra.mxu0 %v3862_v17  ;;  %4363 = vmatpush2.msra.mxu1 %v4062_v35  ;;  %v3807_v35 = vld [vmem:[#allocation12 + $0x880] sm:$0xff] }
 0xa4c   :  { %4239 = vmatprep.subr.mxu0 %v3858_v41  ;;  %4364 = vmatprep.subr.mxu1 %v4058_v49  ;;  %v3410_v24 = vpop.f32.mrf.mxu1  ;;  %v3849_v41 = vld [vmem:[#allocation12 + $0x9d0] sm:$0xff]  ;;  %v3963_v49 = vld [vmem:[#allocation12 + $0xd60] sm:$0xff] }
 0xa4d   :  { %4240 = vmatpush1.msra.mxu0 %v3857_v10  ;;  %4365 = vmatpush2.msra.mxu1 %v4057_v12  ;;  %v3924_v10 = vld [vmem:[#allocation12 + $0xc28] sm:$0xff] }
 0xa4e   :  { %4241 = vmatprep.subr.mxu0 %v3853_v14  ;;  %4366 = vmatprep.subr.mxu1 %v4053_v54  ;;  %v3412_v2 = vpop.f32.mrf.mxu1  ;;  %v3962_v14 = vld [vmem:[#allocation12 + $0xd58] sm:$0xff]  ;;  %v3844_v54 = vld [vmem:[#allocation12 + $0x9a8] sm:$0xff] }
 0xa4f   :  { %4242 = vmatpush1.msra.mxu0 %v3852_v55  ;;  %4367 = vmatpush2.msra.mxu1 %v4052_v16  ;;  %v3958_v16 = vld [vmem:[#allocation12 + $0xd38] sm:$0xff] }
 0xa50   :  { %4243 = vmatprep.subr.mxu0 %v3848_v63  ;;  %4368 = vmatprep.subr.mxu1 %v4048_v6  ;;  %v3416_v58 = vpop.f32.mrf.mxu1  ;;  %v3919_v63 = vld [vmem:[#allocation12 + $0xc00] sm:$0xff] }
 0xa51   :  { %4244 = vmatpush1.msra.mxu0 %v3847_v5  ;;  %4369 = vmatpush2.msra.mxu1 %v4047_v33  ;;  %v3957_v33 = vld [vmem:[#allocation12 + $0xd30] sm:$0xff] }
 0xa52   :  { %4245 = vmatprep.subr.mxu0 %v3843_v39  ;;  %4371 = vmatmul.mubr.f32.vlgmr.msra.gmra.mxu1 %v11051_v57  ;;  %v3418_v6 = vpop.f32.mrf.mxu1  ;;  %v3839_v39 = vld [vmem:[#allocation12 + $0x980] sm:$0xff] }
 0xa53   :  { %9275 = vmatprep.subr.mxu1 %v3964_v32  ;;  %4246 = vmatpush1.msra.mxu0 %v3842_v61  ;;  %v3953_v61 = vld [vmem:[#allocation12 + $0xd10] sm:$0xff] }
 0xa54   :  { %9066 = vmatprep.mubr.msk.f32.mxu1 %vm3337_vm5, %v11056_v3  ;;  %9276 = vmatpush3.msra.mxu1 %v3884_v56  ;;  %v3914_v56 = vld [vmem:[#allocation12 + $0xbd8] sm:$0xff] }
 0xa55   :  { %4247 = vmatprep.subr.mxu0 %v3838_v60  ;;  %9277 = vmatprep.subr.mxu1 %v3959_v47  ;;  %v3952_v60 = vld [vmem:[#allocation12 + $0xd08] sm:$0xff]  ;;  %v3834_v47 = vld [vmem:[#allocation12 + $0x958] sm:$0xff] }
 0xa56   :  { %4248 = vmatpush1.msra.mxu0 %v3837_v51  ;;  %9278 = vmatpush3.msra.mxu1 %v3879_v4  ;;  %v3948_v51 = vld [vmem:[#allocation12 + $0xce8] sm:$0xff]  ;;  %v3909_v4 = vld [vmem:[#allocation12 + $0xbb0] sm:$0xff] }
 0xa57   :  { %4249 = vmatprep.subr.mxu0 %v3833_v9  ;;  %4377 = vmatmul.mubr.f32.gmra.mxu1 %v11058_v28  ;;  %v3947_v9 = vld [vmem:[#allocation12 + $0xce0] sm:$0xff] }
 0xa58   :  { %9279 = vmatprep.subr.mxu1 %v3954_v20  ;;  %4250 = vmatpush1.msra.mxu0 %v3832_v11  ;;  %v3829_v20 = vld [vmem:[#allocation12 + $0x930] sm:$0xff]  ;;  %v3943_v11 = vld [vmem:[#allocation12 + $0xcc0] sm:$0xff] }
 0xa59   :  { %9280 = vmatpush3.msra.mxu1 %v3874_v13  ;;  %4447 = vmatprep.mubr.f32.mxu1 %v11037_v53  ;;  %v3904_v13 = vld [vmem:[#allocation12 + $0xb88] sm:$0xff] }
 0xa5a   :  { %4251 = vmatprep.subr.mxu0 %v3828_v15  ;;  %9281 = vmatprep.subr.mxu1 %v3949_v23  ;;  %v3942_v15 = vld [vmem:[#allocation12 + $0xcb8] sm:$0xff]  ;;  %v3824_v23 = vld [vmem:[#allocation12 + $0x908] sm:$0xff] }
 0xa5b   :  { %4252 = vmatpush1.msra.mxu0 %v3827_v19  ;;  %9282 = vmatpush3.msra.mxu1 %v3869_v18  ;;  %v3899_v19 = vld [vmem:[#allocation12 + $0xb60] sm:$0xff]  ;;  %v3937_v18 = vld [vmem:[#allocation12 + $0xc90] sm:$0xff] }
 0xa5c   :  { %4253 = vmatprep.subr.mxu0 %v3823_v1  ;;  %9283 = vmatprep.subr.mxu1 %v3944_v26  ;;  %v3487_v36 = vpop.f32.mrf.mxu0  ;;  %v3819_v1 = vld [vmem:[#allocation12 + $0x8e0] sm:$0xff]  ;;  %v3933_v26 = vld [vmem:[#allocation12 + $0xc70] sm:$0xff] }
 0xa5d   :  { %4254 = vmatpush1.msra.mxu0 %v3822_v59  ;;  %9284 = vmatpush3.msra.mxu1 %v3864_v27  ;;  %v11123_v42 = vadd.f32 %v3487_v36, %v3410_v24  ;;  %v3938_v24 = vld [vmem:[#allocation12 + $0xc98] sm:$0xff]  ;;  %v3932_v27 = vld [vmem:[#allocation12 + $0xc68] sm:$0xff]  ;;  %v3923_v36 = vld [vmem:[#allocation12 + $0xc20] sm:$0xff] }
 0xa5e   :  { %4255 = vmatprep.subr.mxu0 %v3818_v22  ;;  %9285 = vmatprep.subr.mxu1 %v3939_v30  ;;  %v3489_v48 = vpop.f32.mrf.mxu0  ;;  %v3894_v59 = vld [vmem:[#allocation12 + $0xb38] sm:$0xff]  ;;  %v3928_v30 = vld [vmem:[#allocation12 + $0xc48] sm:$0xff] }
 0xa5f   :  { %4256 = vmatpush1.msra.mxu0 %v3817_v29  ;;  %9286 = vmatpush3.msra.mxu1 %v3859_v21  ;;  %v11125_v17 = vadd.f32 %v3489_v48, %v3412_v2  ;;  %v3814_v22 = vld [vmem:[#allocation12 + $0x8b8] sm:$0xff]  ;;  %v3889_v2 = vld [vmem:[#allocation12 + $0xb10] sm:$0xff]  ;;  %v3927_v29 = vld [vmem:[#allocation12 + $0xc40] sm:$0xff] }
 0xa60   :  { %4257 = vmatprep.subr.mxu0 %v3813_v38  ;;  %9287 = vmatprep.subr.mxu1 %v3934_v40  ;;  %v3809_v21 = vld [vmem:[#allocation12 + $0x890] sm:$0xff]  ;;  %v3922_v38 = vld [vmem:[#allocation12 + $0xc18] sm:$0xff]  ;;  %v3912_v48 = vld [vmem:[#allocation12 + $0xbc8] sm:$0xff] }
 0xa61   :  { %4258 = vmatpush1.msra.mxu0 %v3812_v44  ;;  %9288 = vmatpush3.msra.mxu1 %v3854_v46  ;;  %v3493_v12 = vpop.f32.mrf.mxu0  ;;  %v3918_v40 = vld [vmem:[#allocation12 + $0xbf8] sm:$0xff]  ;;  %v3917_v44 = vld [vmem:[#allocation12 + $0xbf0] sm:$0xff] }
 0xa62   :  { %4259 = vmatprep.subr.mxu0 %v3808_v50  ;;  %9289 = vmatprep.subr.mxu1 %v3929_v52  ;;  %v11127_v55 = vadd.f32 %v3493_v12, %v3416_v58  ;;  %v3913_v46 = vld [vmem:[#allocation12 + $0xbd0] sm:$0xff]  ;;  %v3908_v50 = vld [vmem:[#allocation12 + $0xba8] sm:$0xff]  ;;  %v3907_v52 = vld [vmem:[#allocation12 + $0xba0] sm:$0xff] }
 0xa63   :  { %4260 = vmatpush1.msra.mxu0 %v3807_v35  ;;  %9290 = vmatpush3.msra.mxu1 %v3849_v41  ;;  %v3495_v5 = vpop.f32.mrf.mxu0  ;;  %v3903_v58 = vld [vmem:[#allocation12 + $0xb80] sm:$0xff]  ;;  %v3902_v35 = vld [vmem:[#allocation12 + $0xb78] sm:$0xff]  ;;  %v3892_v12 = vld [vmem:[#allocation12 + $0xb28] sm:$0xff] }
 0xa64   :  { %4261 = vmatprep.subr.mxu0 %v3963_v49  ;;  %9291 = vmatprep.subr.mxu1 %v3924_v10  ;;  %v11129_v32 = vadd.f32 %v3495_v5, %v3418_v6  ;;  %v3898_v41 = vld [vmem:[#allocation12 + $0xb58] sm:$0xff]  ;;  %v3897_v49 = vld [vmem:[#allocation12 + $0xb50] sm:$0xff] }
 0xa65   :  { %4262 = vmatpush2.msra.mxu0 %v3962_v14  ;;  %9292 = vmatpush3.msra.mxu1 %v3844_v54  ;;  %v3893_v10 = vld [vmem:[#allocation12 + $0xb30] sm:$0xff]  ;;  %v3888_v14 = vld [vmem:[#allocation12 + $0xb08] sm:$0xff]  ;;  %v3887_v54 = vld [vmem:[#allocation12 + $0xb00] sm:$0xff] }
 0xa66   :  { %4263 = vmatprep.subr.mxu0 %v3958_v16  ;;  %9293 = vmatprep.subr.mxu1 %v3919_v63  ;;  %v4044_v16 = vld [vmem:[#allocation12 + $0xfe8] sm:$0xff]  ;;  %v4039_v63 = vld [vmem:[#allocation12 + $0xfc0] sm:$0xff]  ;;  %v4034_v6 = vld [vmem:[#allocation12 + $0xf98] sm:$0xff] }
 0xa67   :  { %4264 = vmatpush2.msra.mxu0 %v3957_v33  ;;  %9294 = vmatpush3.msra.mxu1 %v3839_v39  ;;  %v4029_v5 = vld [vmem:[#allocation12 + $0xf70] sm:$0xff]  ;;  %v4024_v33 = vld [vmem:[#allocation12 + $0xf48] sm:$0xff]  ;;  %v4019_v39 = vld [vmem:[#allocation12 + $0xf20] sm:$0xff] }
 0xa68   :  { %4265 = vmatprep.subr.mxu0 %v3953_v61  ;;  %9295 = vmatprep.subr.mxu1 %v3914_v56  ;;  %v4014_v56 = vld [vmem:[#allocation12 + $0xef8] sm:$0xff] }
 0xa69   :  { %4266 = vmatpush2.msra.mxu0 %v3952_v60  ;;  %9296 = vmatpush3.msra.mxu1 %v3834_v47  ;;  %v4009_v60 = vld [vmem:[#allocation12 + $0xed0] sm:$0xff] }
 0xa6a   :  { %4267 = vmatprep.subr.mxu0 %v3948_v51  ;;  %9297 = vmatprep.subr.mxu1 %v3909_v4  ;;  %v4004_v51 = vld [vmem:[#allocation12 + $0xea8] sm:$0xff]  ;;  %v3999_v4 = vld [vmem:[#allocation12 + $0xe80] sm:$0xff] }
 0xa6b   :  { %4268 = vmatpush2.msra.mxu0 %v3947_v9  ;;  %9298 = vmatpush3.msra.mxu1 %v3829_v20  ;;  %v3994_v20 = vld [vmem:[#allocation12 + $0xe58] sm:$0xff] }
 0xa6c   :  { %4269 = vmatprep.subr.mxu0 %v3943_v11  ;;  %9299 = vmatprep.subr.mxu1 %v3904_v13  ;;  %v3989_v11 = vld [vmem:[#allocation12 + $0xe30] sm:$0xff] }
 0xa6d   :  { %4270 = vmatpush2.msra.mxu0 %v3942_v15  ;;  %9300 = vmatpush3.msra.mxu1 %v3824_v23  ;;  %v3984_v15 = vld [vmem:[#allocation12 + $0xe08] sm:$0xff]  ;;  %v3979_v23 = vld [vmem:[#allocation12 + $0xde0] sm:$0xff] }
 0xa6e   :  { %4271 = vmatprep.subr.mxu0 %v3938_v24  ;;  %9301 = vmatprep.subr.mxu1 %v3899_v19  ;;  %v3974_v19 = vld [vmem:[#allocation12 + $0xdb8] sm:$0xff] }
 0xa6f   :  { %4272 = vmatpush2.msra.mxu0 %v3937_v18  ;;  %9302 = vmatpush3.msra.mxu1 %v3819_v1 }
 0xa70   :  { %4273 = vmatprep.subr.mxu0 %v3933_v26  ;;  %9303 = vmatprep.subr.mxu1 %v3894_v59  ;;  %v3969_v26 = vld [vmem:[#allocation12 + $0xd90] sm:$0xff] }
 0xa71   :  { %4274 = vmatpush2.msra.mxu0 %v3932_v27  ;;  %9304 = vmatpush3.msra.mxu1 %v3814_v22  ;;  %v4074_v27 = vld [vmem:[#allocation12 + $0x10d8] sm:$0xff] }
 0xa72   :  { %4275 = vmatprep.subr.mxu0 %v3928_v30  ;;  %9305 = vmatprep.subr.mxu1 %v3889_v2  ;;  %v4069_v30 = vld [vmem:[#allocation12 + $0x10b0] sm:$0xff] }
 0xa73   :  { %4276 = vmatpush2.msra.mxu0 %v3927_v29  ;;  %9306 = vmatpush3.msra.mxu1 %v3809_v21  ;;  %v4064_v29 = vld [vmem:[#allocation12 + $0x1088] sm:$0xff]  ;;  %v4059_v21 = vld [vmem:[#allocation12 + $0x1060] sm:$0xff] }
 0xa74   :  { %4277 = vmatprep.subr.mxu0 %v3923_v36  ;;  %4448 = vmatmul.mubr.f32.vlgmr.msra.gmra.mxu1 %v11039_v25  ;;  %v4054_v36 = vld [vmem:[#allocation12 + $0x1038] sm:$0xff] }
 0xa75   :  { %4278 = vmatpush2.msra.mxu0 %v3922_v38  ;;  %4452 = vmatprep.mubr.f32.mxu1 %v11043_v31  ;;  %v4049_v38 = vld [vmem:[#allocation12 + $0x1010] sm:$0xff] }
 0xa76   :  { %4279 = vmatprep.subr.mxu0 %v3918_v40 }
 0xa77   :  { %4280 = vmatpush2.msra.mxu0 %v3917_v44 }
 0xa78   :  { %4281 = vmatprep.subr.mxu0 %v3913_v46  ;;  %4453 = vmatmul.mubr.f32.gmra.mxu1 %v11045_v34 }
 0xa79   :  { %4282 = vmatpush2.msra.mxu0 %v3912_v48  ;;  %4613 = vmatprep.mubr.f32.mxu1 %v9986_v0 }
 0xa7a   :  { %4283 = vmatprep.subr.mxu0 %v3908_v50  ;;  %v11145_v61 = vpop.f32.mrf.mxu1 }
 0xa7b   :  { %4284 = vmatpush2.msra.mxu0 %v3907_v52 }
 0xa7c   :  { %4285 = vmatprep.subr.mxu0 %v3903_v58  ;;  %v11149_v47 = vpop.f32.mrf.mxu1 }
 0xa7d   :  { %4286 = vmatpush2.msra.mxu0 %v3902_v35 }
 0xa7e   :  { %4287 = vmatprep.subr.mxu0 %v3898_v41 }
 0xa7f   :  { %4288 = vmatpush2.msra.mxu0 %v3897_v49  ;;  %v11153_v9 = vpop.f32.mrf.mxu1 }
 0xa80   :  { %4289 = vmatprep.subr.mxu0 %v3893_v10 }
 0xa81   :  { %4290 = vmatpush2.msra.mxu0 %v3892_v12  ;;  %v11157_v13 = vpop.f32.mrf.mxu1 }
 0xa82   :  { %4291 = vmatprep.subr.mxu0 %v3888_v14 }
 0xa83   :  { %4292 = vmatpush2.msra.mxu0 %v3887_v54 }
 0xa84   :  { %4294 = vmatmul.mubr.f32.vlgmr.msra.gmra.mxu0 %v11039_v25  ;;  %4458 = vmatprep.subr.mxu0 %v9986_v0 }
 0xa85   :  { %4299 = vmatprep.mubr.f32.mxu0 %v11043_v31  ;;  %4459 = vmatpush1.msra.mxu0 %v4044_v16 }
 0xa86   :  { %4460 = vmatprep.subr.mxu0 %v9986_v0 }
 0xa87   :  { %4461 = vmatpush1.msra.mxu0 %v4039_v63 }
 0xa88   :  { %4300 = vmatmul.mubr.f32.gmra.mxu0 %v11045_v34  ;;  %4462 = vmatprep.subr.mxu0 %v9986_v0 }
 0xa89   :  { %4463 = vmatpush1.msra.mxu0 %v4034_v6  ;;  %9067 = vmatprep.mubr.msk.f32.mxu0 %vm3337_vm5, %v11049_v37 }
 0xa8a   :  { %4464 = vmatprep.subr.mxu0 %v9986_v0 }
 0xa8b   :  { %4465 = vmatpush1.msra.mxu0 %v4029_v5 }
 0xa8c   :  { %4466 = vmatprep.subr.mxu0 %v9986_v0 }
 0xa8d   :  { %4467 = vmatpush1.msra.mxu0 %v4024_v33 }
 0xa8e   :  { %4468 = vmatprep.subr.mxu0 %v9986_v0 }
 0xa8f   :  { %4469 = vmatpush1.msra.mxu0 %v4019_v39 }
 0xa90   :  { %4470 = vmatprep.subr.mxu0 %v9986_v0 }
 0xa91   :  { %4471 = vmatpush1.msra.mxu0 %v4014_v56 }
 0xa92   :  { %4472 = vmatprep.subr.mxu0 %v9986_v0 }
 0xa93   :  { %4473 = vmatpush1.msra.mxu0 %v4009_v60 }
 0xa94   :  { %4474 = vmatprep.subr.mxu0 %v9986_v0 }
 0xa95   :  { %4475 = vmatpush1.msra.mxu0 %v4004_v51  ;;  %v11179_v51 = vld [vmem:[#allocation10 + $0x10] sm:$0xff] }
 0xa96   :  { %4476 = vmatprep.subr.mxu0 %v9986_v0 }
 0xa97   :  { %4477 = vmatpush1.msra.mxu0 %v3999_v4 }
 0xa98   :  { %4478 = vmatprep.subr.mxu0 %v9986_v0 }
 0xa99   :  { %4479 = vmatpush1.msra.mxu0 %v3994_v20 }
 0xa9a   :  { %4480 = vmatprep.subr.mxu0 %v9986_v0 }
 0xa9b   :  { %4481 = vmatpush1.msra.mxu0 %v3989_v11  ;;  %v11183_v11 = vld [vmem:[#allocation10 + $0x18] sm:$0x7f] }
 0xa9c   :  { %4482 = vmatprep.subr.mxu0 %v9986_v0  ;;  %v9269_v24 = vpop.f32.mrf.mxu1 }
 0xa9d   :  { %4483 = vmatpush1.msra.mxu0 %v3984_v15 }
 0xa9e   :  { %4484 = vmatprep.subr.mxu0 %v9986_v0  ;;  %v9270_v18 = vpop.f32.mrf.mxu1 }
 0xa9f   :  { %4485 = vmatpush1.msra.mxu0 %v3979_v23  ;;  %v9271_v1 = vadd.f32 %v9270_v18, %v9269_v24  ;;  %v5084_v24 = vld [vmem:[#allocation12 + $0x1340] sm:$0xff]  ;;  %v5074_v18 = vld [vmem:[#allocation12 + $0x12f0] sm:$0xff] }
 0xaa0   :  { %4486 = vmatprep.subr.mxu0 %v9986_v0 }
 0xaa1   :  { %4487 = vmatpush1.msra.mxu0 %v3974_v19  ;;  %v9272_v59 = vpop.f32.mrf.mxu1  ;;  %v3564_v40 = vpop.f32.mrf.mxu0  ;;  %v5079_v19 = vld [vmem:[#allocation12 + $0x1318] sm:$0xff] }
 0xaa2   :  { %4488 = vmatprep.subr.mxu0 %v9986_v0  ;;  %v3642_v23 = vadd.f32 %v11145_v61, %v3564_v40  ;;  %v5078_v61 = vld [vmem:[#allocation12 + $0x1310] sm:$0xff]  ;;  %v5044_v40 = vld [vmem:[#allocation12 + $0x1200] sm:$0xff] }
 0xaa3   :  { %4489 = vmatpush1.msra.mxu0 %v3969_v26  ;;  %v9273_v22 = vpop.f32.mrf.mxu1  ;;  %v3566_v44 = vpop.f32.mrf.mxu0  ;;  %v5069_v26 = vld [vmem:[#allocation12 + $0x12c8] sm:$0xff] }
 0xaa4   :  { %4510 = vmatprep.subr.mxu0 %v9986_v0  ;;  %v9274_v2 = vadd.f32 %v9273_v22, %v9272_v59  ;;  %v3644_v15 = vadd.f32 %v11149_v47, %v3566_v44  ;;  %v11198_v47 = vld [vmem:[#allocation10 + $0x8] sm:$0x7f]  ;;  %v5068_v59 = vld [vmem:[#allocation12 + $0x12c0] sm:$0xff]  ;;  %v5063_v22 = vld [vmem:[#allocation12 + $0x1298] sm:$0xff] }
 0xaa5   :  { %4511 = vmatpush2.msra.mxu0 %v4074_v27  ;;  %v5064_v27 = vld [vmem:[#allocation12 + $0x12a0] sm:$0xff]  ;;  %v5043_v44 = vld [vmem:[#allocation12 + $0x11f8] sm:$0xff] }
 0xaa6   :  { %4512 = vmatprep.subr.mxu0 %v9986_v0 }
 0xaa7   :  { %4513 = vmatpush2.msra.mxu0 %v4069_v30  ;;  %v3570_v46 = vpop.f32.mrf.mxu0  ;;  %v5059_v30 = vld [vmem:[#allocation12 + $0x1278] sm:$0xff] }
 0xaa8   :  { %4514 = vmatprep.subr.mxu0 %v9986_v0  ;;  %v3648_v20 = vadd.f32 %v11153_v9, %v3570_v46  ;;  %v5083_v9 = vld [vmem:[#allocation12 + $0x1338] sm:$0xff] }
 0xaa9   :  { %4515 = vmatpush2.msra.mxu0 %v4064_v29  ;;  %v3572_v48 = vpop.f32.mrf.mxu0  ;;  %v5054_v29 = vld [vmem:[#allocation12 + $0x1250] sm:$0xff]  ;;  %v5039_v46 = vld [vmem:[#allocation12 + $0x11d8] sm:$0xff] }
 0xaaa   :  { %4516 = vmatprep.subr.mxu0 %v9986_v0  ;;  %v3650_v4 = vadd.f32 %v11157_v13, %v3572_v48  ;;  %v11190_v13 = vld [vmem:[#allocation10] sm:$0xff]  ;;  %v5038_v48 = vld [vmem:[#allocation12 + $0x11d0] sm:$0xff] }
 0xaab   :  { %4517 = vmatpush2.msra.mxu0 %v4059_v21  ;;  %v5053_v21 = vld [vmem:[#allocation12 + $0x1248] sm:$0xff] }
 0xaac   :  { %4518 = vmatprep.subr.mxu0 %v9986_v0 }
 0xaad   :  { %4519 = vmatpush2.msra.mxu0 %v4054_v36  ;;  %v5049_v36 = vld [vmem:[#allocation12 + $0x1228] sm:$0xff] }
 0xaae   :  { %4520 = vmatprep.subr.mxu0 %v9986_v0 }
 0xaaf   :  { %4521 = vmatpush2.msra.mxu0 %v4049_v38  ;;  %v5048_v38 = vld [vmem:[#allocation12 + $0x1220] sm:$0xff] }
 0xab0   :  { %4523 = vmatmul.mubr.f32.vlgmr.msra.gmra.mxu0 %v11051_v57 }
 0xab1   :  { %9068 = vmatprep.mubr.msk.f32.mxu0 %vm3337_vm5, %v11056_v3 }
 0xab4   :  { %4528 = vmatmul.mubr.f32.gmra.mxu0 %v11058_v28 }
 0xab5   :  { %4607 = vmatprep.mubr.f32.mxu0 %v9986_v0 }
 0xad0   :  { %v3793_v50 = vpop.f32.mrf.mxu0 }
 0xad1   :  { %v11175_v52 = vadd.f32 %v9271_v1, %v3793_v50  ;;  %v5073_v1 = vld [vmem:[#allocation12 + $0x12e8] sm:$0xff]  ;;  %v5034_v50 = vld [vmem:[#allocation12 + $0x11b0] sm:$0xff] }
 0xad2   :  { %v3795_v58 = vpop.f32.mrf.mxu0 }
 0xad3   :  { %v5033_v58 = vld [vmem:[#allocation12 + $0x11a8] sm:$0xff] }
 0xad5   :  { %v3798_v35 = vpop.f32.mrf.mxu0 }
 0xad6   :  { %v11177_v41 = vadd.f32 %v9274_v2, %v3798_v35  ;;  %v5058_v2 = vld [vmem:[#allocation12 + $0x1270] sm:$0xff]  ;;  %v5029_v35 = vld [vmem:[#allocation12 + $0x1188] sm:$0xff] }
 0xad7   :  { %v3800_v49 = vpop.f32.mrf.mxu0 }
 0xad8   :  { %v5028_v49 = vld [vmem:[#allocation12 + $0x1180] sm:$0xff] }
 0xae2   :  { %v4141_v10 = vpop.f32.mrf.mxu1 }
 0xae4   :  { %v4143_v12 = vpop.f32.mrf.mxu1 }
 0xae7   :  { %v4147_v16 = vpop.f32.mrf.mxu1 }
 0xae9   :  { %v4149_v6 = vpop.f32.mrf.mxu1 }
 0xb00   :  { %v4218_v14 = vpop.f32.mrf.mxu0 }
 0xb01   :  { %v4219_v60 = vadd.f32 %v4218_v14, %v4141_v10  ;;  %v5024_v10 = vld [vmem:[#allocation12 + $0x1160] sm:$0xff]  ;;  %v5019_v14 = vld [vmem:[#allocation12 + $0x1138] sm:$0xff] }
 0xb02   :  { %v4220_v54 = vpop.f32.mrf.mxu0 }
 0xb03   :  { %v4221_v56 = vadd.f32 %v4220_v54, %v4143_v12  ;;  %v5023_v12 = vld [vmem:[#allocation12 + $0x1158] sm:$0xff]  ;;  %v5018_v54 = vld [vmem:[#allocation12 + $0x1130] sm:$0xff] }
 0xb05   :  { %v4224_v63 = vpop.f32.mrf.mxu0 }
 0xb06   :  { %v4225_v39 = vadd.f32 %v4224_v63, %v4147_v16  ;;  %v5014_v16 = vld [vmem:[#allocation12 + $0x1110] sm:$0xff]  ;;  %v5013_v63 = vld [vmem:[#allocation12 + $0x1108] sm:$0xff] }
 0xb07   :  { %v4226_v5 = vpop.f32.mrf.mxu0 }
 0xb08   :  { %v4227_v33 = vadd.f32 %v4226_v5, %v4149_v6  ;;  %v5009_v6 = vld [vmem:[#allocation12 + $0x10e8] sm:$0xff]  ;;  %v5008_v5 = vld [vmem:[#allocation12 + $0x10e0] sm:$0xff] }
 0xb0a   :  { %4571 = vmatprep.subr.mxu0 %v4227_v33  ;;  %9641 = vmatprep.subr.mxu1 %v4227_v33  ;;  %v5164_v33 = vld [vmem:[#allocation12 + $0x15c0] sm:$0xff] }
 0xb0b   :  { %4572 = vmatpush1.msra.mxu0 %v4225_v39  ;;  %9643 = vmatpush1.msra.mxu1 %v4225_v39  ;;  %v5163_v39 = vld [vmem:[#allocation12 + $0x15b8] sm:$0xff] }
 0xb0c   :  { %4573 = vmatprep.subr.mxu0 %v4221_v56  ;;  %9642 = vmatprep.subr.mxu1 %v4221_v56  ;;  %v5159_v56 = vld [vmem:[#allocation12 + $0x1598] sm:$0xff] }
 0xb0d   :  { %4574 = vmatpush1.msra.mxu0 %v4219_v60  ;;  %9644 = vmatpush1.msra.mxu1 %v4219_v60  ;;  %v5158_v60 = vld [vmem:[#allocation12 + $0x1590] sm:$0xff] }
 0xb0e   :  { %9069 = vmatmul.mubr.msk.f32.vlgmr.msra.gmra.mxu0 %vm4536_vm6, %v11179_v51  ;;  %4883 = vmatprep.subr.mxu0 %v3650_v4  ;;  %v5154_v4 = vld [vmem:[#allocation12 + $0x1570] sm:$0xff] }
 0xb0f   :  { %4884 = vmatpush1.msra.mxu0 %v3648_v20  ;;  %4919 = vmatprep.mubr.f32.mxu0 %v9986_v0  ;;  %v5153_v20 = vld [vmem:[#allocation12 + $0x1568] sm:$0xff] }
 0xb10   :  { %4885 = vmatprep.subr.mxu0 %v3644_v15  ;;  %9070 = vmatmul.mubr.msk.f32.vlgmr.msra.gmra.mxu1 %vm4536_vm6, %v11183_v11  ;;  %v5149_v15 = vld [vmem:[#allocation12 + $0x1548] sm:$0xff] }
 0xb11   :  { %4886 = vmatpush1.msra.mxu0 %v3642_v23  ;;  %4684 = vmatprep.mubr.f32.mxu1 %v9986_v0  ;;  %v5148_v23 = vld [vmem:[#allocation12 + $0x1540] sm:$0xff] }
 0xb12   :  { %9077 = vmatmul.mubr.msk.f32.vlgmr.msra.gmra.mxu0 %vm4536_vm6, %v11190_v13  ;;  %5278 = vmatprep.subr.mxu0 %v5084_v24  ;;  %v5144_v24 = vld [vmem:[#allocation12 + $0x1520] sm:$0xff] }
 0xb13   :  { %5279 = vmatpush1.msra.mxu0 %v5083_v9  ;;  %4925 = vmatprep.mubr.f32.mxu0 %v9986_v0  ;;  %v5143_v9 = vld [vmem:[#allocation12 + $0x1518] sm:$0xff] }
 0xb14   :  { %5280 = vmatprep.subr.mxu0 %v5079_v19  ;;  %v5139_v19 = vld [vmem:[#allocation12 + $0x14f8] sm:$0xff] }
 0xb15   :  { %5281 = vmatpush1.msra.mxu0 %v5078_v61  ;;  %v5138_v61 = vld [vmem:[#allocation12 + $0x14f0] sm:$0xff] }
 0xb16   :  { %9078 = vmatmul.mubr.msk.f32.gmra.mxu0 %vm4536_vm6, %v11198_v47  ;;  %5282 = vmatprep.subr.mxu0 %v5074_v18  ;;  %v5134_v18 = vld [vmem:[#allocation12 + $0x14d0] sm:$0xff] }
 0xb17   :  { %5283 = vmatpush1.msra.mxu0 %v5073_v1  ;;  %5342 = vmatprep.mubr.f32.mxu0 %v11037_v53  ;;  %v5133_v1 = vld [vmem:[#allocation12 + $0x14c8] sm:$0xff] }
 0xb18   :  { %5284 = vmatprep.subr.mxu0 %v5069_v26  ;;  %v5129_v26 = vld [vmem:[#allocation12 + $0x14a8] sm:$0xff] }
 0xb19   :  { %5285 = vmatpush1.msra.mxu0 %v5068_v59  ;;  %v4372_v59 = vpop.f32.mrf.mxu1 }
 0xb1a   :  { %5286 = vmatprep.subr.mxu0 %v5064_v27  ;;  %v5128_v27 = vld [vmem:[#allocation12 + $0x14a0] sm:$0xff] }
 0xb1b   :  { %5287 = vmatpush1.msra.mxu0 %v5063_v22  ;;  %v5124_v22 = vld [vmem:[#allocation12 + $0x1480] sm:$0xff] }
 0xb1c   :  { %5288 = vmatprep.subr.mxu0 %v5059_v30  ;;  %v5123_v30 = vld [vmem:[#allocation12 + $0x1478] sm:$0xff] }
 0xb1d   :  { %5289 = vmatpush1.msra.mxu0 %v5058_v2  ;;  %v5119_v2 = vld [vmem:[#allocation12 + $0x1458] sm:$0xff] }
 0xb1e   :  { %5290 = vmatprep.subr.mxu0 %v5054_v29  ;;  %v4374_v29 = vpop.f32.mrf.mxu1 }
 0xb1f   :  { %5291 = vmatpush1.msra.mxu0 %v5053_v21  ;;  %v5118_v21 = vld [vmem:[#allocation12 + $0x1450] sm:$0xff] }
 0xb20   :  { %5292 = vmatprep.subr.mxu0 %v5049_v36  ;;  %v5114_v36 = vld [vmem:[#allocation12 + $0x1430] sm:$0xff] }
 0xb21   :  { %5293 = vmatpush1.msra.mxu0 %v5048_v38 }
 0xb22   :  { %5294 = vmatprep.subr.mxu0 %v5044_v40  ;;  %v5113_v40 = vld [vmem:[#allocation12 + $0x1428] sm:$0xff] }
 0xb23   :  { %5295 = vmatpush1.msra.mxu0 %v5043_v44  ;;  %v5109_v44 = vld [vmem:[#allocation12 + $0x1408] sm:$0xff] }
 0xb24   :  { %5296 = vmatprep.subr.mxu0 %v5039_v46  ;;  %v4378_v46 = vpop.f32.mrf.mxu1 }
 0xb25   :  { %5297 = vmatpush1.msra.mxu0 %v5038_v48 }
 0xb26   :  { %5298 = vmatprep.subr.mxu0 %v5034_v50  ;;  %v5108_v50 = vld [vmem:[#allocation12 + $0x1400] sm:$0xff] }
 0xb27   :  { %5299 = vmatpush1.msra.mxu0 %v5033_v58  ;;  %v5104_v58 = vld [vmem:[#allocation12 + $0x13e0] sm:$0xff] }
 0xb28   :  { %5300 = vmatprep.subr.mxu0 %v5029_v35 }
 0xb29   :  { %5301 = vmatpush1.msra.mxu0 %v5028_v49  ;;  %v5103_v49 = vld [vmem:[#allocation12 + $0x13d8] sm:$0xff] }
 0xb2a   :  { %5302 = vmatprep.subr.mxu0 %v5024_v10  ;;  %v5099_v10 = vld [vmem:[#allocation12 + $0x13b8] sm:$0xff] }
 0xb2b   :  { %5303 = vmatpush1.msra.mxu0 %v5023_v12  ;;  %v4380_v12 = vpop.f32.mrf.mxu1 }
 0xb2c   :  { %5304 = vmatprep.subr.mxu0 %v5019_v14 }
 0xb2d   :  { %5305 = vmatpush1.msra.mxu0 %v5018_v54  ;;  %v5098_v54 = vld [vmem:[#allocation12 + $0x13b0] sm:$0xff] }
 0xb2e   :  { %5306 = vmatprep.subr.mxu0 %v5014_v16 }
 0xb2f   :  { %5307 = vmatpush1.msra.mxu0 %v5013_v63  ;;  %v5094_v63 = vld [vmem:[#allocation12 + $0x1390] sm:$0xff] }
 0xb30   :  { %5308 = vmatprep.subr.mxu0 %v5009_v6 }
 0xb31   :  { %5309 = vmatpush1.msra.mxu0 %v5008_v5  ;;  %v5093_v5 = vld [vmem:[#allocation12 + $0x1388] sm:$0xff] }
 0xb32   :  { %5310 = vmatprep.subr.mxu0 %v5164_v33 }
 0xb33   :  { %5311 = vmatpush2.msra.mxu0 %v5163_v39  ;;  %v5089_v39 = vld [vmem:[#allocation12 + $0x1368] sm:$0xff] }
 0xb34   :  { %5312 = vmatprep.subr.mxu0 %v5159_v56 }
 0xb35   :  { %5313 = vmatpush2.msra.mxu0 %v5158_v60  ;;  %v5088_v60 = vld [vmem:[#allocation12 + $0x1360] sm:$0xff] }
 0xb36   :  { %5314 = vmatprep.subr.mxu0 %v5154_v4  ;;  %v5246_v4 = vld [vmem:[#allocation12 + $0x1850] sm:$0xff] }
 0xb37   :  { %5315 = vmatpush2.msra.mxu0 %v5153_v20  ;;  %v5245_v20 = vld [vmem:[#allocation12 + $0x1848] sm:$0xff] }
 0xb38   :  { %5316 = vmatprep.subr.mxu0 %v5149_v15  ;;  %v5241_v15 = vld [vmem:[#allocation12 + $0x1828] sm:$0xff] }
 0xb39   :  { %5317 = vmatpush2.msra.mxu0 %v5148_v23  ;;  %v5240_v23 = vld [vmem:[#allocation12 + $0x1820] sm:$0xff] }
 0xb3a   :  { %5318 = vmatprep.subr.mxu0 %v5144_v24  ;;  %v5236_v24 = vld [vmem:[#allocation12 + $0x1800] sm:$0xff] }
 0xb3b   :  { %5319 = vmatpush2.msra.mxu0 %v5143_v9  ;;  %v5235_v9 = vld [vmem:[#allocation12 + $0x17f8] sm:$0xff] }
 0xb3c   :  { %5320 = vmatprep.subr.mxu0 %v5139_v19  ;;  %v5231_v19 = vld [vmem:[#allocation12 + $0x17d8] sm:$0xff] }
 0xb3d   :  { %5321 = vmatpush2.msra.mxu0 %v5138_v61  ;;  %v5230_v61 = vld [vmem:[#allocation12 + $0x17d0] sm:$0xff] }
 0xb3e   :  { %5322 = vmatprep.subr.mxu0 %v5134_v18  ;;  %v5226_v18 = vld [vmem:[#allocation12 + $0x17b0] sm:$0xff] }
 0xb3f   :  { %5323 = vmatpush2.msra.mxu0 %v5133_v1  ;;  %v5225_v1 = vld [vmem:[#allocation12 + $0x17a8] sm:$0xff] }
 0xb40   :  { %5324 = vmatprep.subr.mxu0 %v5129_v26  ;;  %v5221_v26 = vld [vmem:[#allocation12 + $0x1788] sm:$0xff] }
 0xb41   :  { %5325 = vmatpush2.msra.mxu0 %v5128_v27  ;;  %v5216_v27 = vld [vmem:[#allocation12 + $0x1760] sm:$0xff] }
 0xb42   :  { %5326 = vmatprep.subr.mxu0 %v5124_v22  ;;  %v5215_v22 = vld [vmem:[#allocation12 + $0x1758] sm:$0xff] }
 0xb43   :  { %5327 = vmatpush2.msra.mxu0 %v5123_v30  ;;  %v5211_v30 = vld [vmem:[#allocation12 + $0x1738] sm:$0xff] }
 0xb44   :  { %v4295_v38 = vpop.f32.mrf.mxu0  ;;  %5328 = vmatprep.subr.mxu0 %v5119_v2  ;;  %v5210_v2 = vld [vmem:[#allocation12 + $0x1730] sm:$0xff] }
 0xb45   :  { %5329 = vmatpush2.msra.mxu0 %v5118_v21  ;;  %v4373_v56 = vadd.f32 %v4372_v59, %v4295_v38  ;;  %v5220_v59 = vld [vmem:[#allocation12 + $0x1780] sm:$0xff]  ;;  %v5205_v21 = vld [vmem:[#allocation12 + $0x1708] sm:$0xff] }
 0xb46   :  { %v4297_v48 = vpop.f32.mrf.mxu0  ;;  %5330 = vmatprep.subr.mxu0 %v5114_v36  ;;  %v5201_v36 = vld [vmem:[#allocation12 + $0x16e8] sm:$0xff]  ;;  %v5196_v38 = vld [vmem:[#allocation12 + $0x16c0] sm:$0xff] }
 0xb47   :  { %5331 = vmatpush2.msra.mxu0 %v5113_v40  ;;  %v4375_v33 = vadd.f32 %v4374_v29, %v4297_v48  ;;  %v5206_v29 = vld [vmem:[#allocation12 + $0x1710] sm:$0xff]  ;;  %v9307_v40 = vpop.f32.mrf.mxu1 }
 0xb48   :  { %v4301_v35 = vpop.f32.mrf.mxu0  ;;  %5332 = vmatprep.subr.mxu0 %v5109_v44  ;;  %v5195_v44 = vld [vmem:[#allocation12 + $0x16b8] sm:$0xff]  ;;  %v5190_v48 = vld [vmem:[#allocation12 + $0x1690] sm:$0xff] }
 0xb49   :  { %5333 = vmatpush2.msra.mxu0 %v5108_v50  ;;  %v4379_v6 = vadd.f32 %v4378_v46, %v4301_v35  ;;  %v5191_v46 = vld [vmem:[#allocation12 + $0x1698] sm:$0xff]  ;;  %v5186_v50 = vld [vmem:[#allocation12 + $0x1670] sm:$0xff]  ;;  %v5185_v35 = vld [vmem:[#allocation12 + $0x1668] sm:$0xff] }
 0xb4a   :  { %v4303_v14 = vpop.f32.mrf.mxu0  ;;  %5334 = vmatprep.subr.mxu0 %v5104_v58  ;;  %v9308_v58 = vpop.f32.mrf.mxu1 }
 0xb4b   :  { %v4381_v16 = vadd.f32 %v4380_v12, %v4303_v14  ;;  %5335 = vmatpush2.msra.mxu0 %v5103_v49  ;;  %v5181_v49 = vld [vmem:[#allocation12 + $0x1648] sm:$0xff]  ;;  %v5176_v12 = vld [vmem:[#allocation12 + $0x1620] sm:$0xff] }
 0xb4c   :  { %5336 = vmatprep.subr.mxu0 %v5099_v10  ;;  %v5180_v10 = vld [vmem:[#allocation12 + $0x1640] sm:$0xff]  ;;  %v9310_v14 = vpop.f32.mrf.mxu1 }
 0xb4d   :  { %4648 = vmatprep.subr.mxu1 %v4381_v16  ;;  %5337 = vmatpush2.msra.mxu0 %v5098_v54  ;;  %v5175_v54 = vld [vmem:[#allocation12 + $0x1618] sm:$0xff] }
 0xb4e   :  { %4649 = vmatpush1.msra.mxu1 %v4379_v6  ;;  %5338 = vmatprep.subr.mxu0 %v5094_v63  ;;  %v5171_v16 = vld [vmem:[#allocation12 + $0x15f8] sm:$0xff]  ;;  %v5170_v63 = vld [vmem:[#allocation12 + $0x15f0] sm:$0xff]  ;;  %v5276_v6 = vld [vmem:[#allocation12 + $0x1940] sm:$0xff] }
 0xb4f   :  { %4650 = vmatprep.subr.mxu1 %v4375_v33  ;;  %5339 = vmatpush2.msra.mxu0 %v5093_v5  ;;  %v9311_v5 = vpop.f32.mrf.mxu1 }
 0xb50   :  { %4651 = vmatpush1.msra.mxu1 %v4373_v56  ;;  %5340 = vmatprep.subr.mxu0 %v5089_v39  ;;  %v5275_v39 = vld [vmem:[#allocation12 + $0x1938] sm:$0xff] }
 0xb51   :  { %5341 = vmatpush2.msra.mxu0 %v5088_v60  ;;  %9071 = vmatmul.mubr.msk.f32.vlgmr.msra.gmra.mxu1 %vm4536_vm6, %v11179_v51  ;;  %v5271_v56 = vld [vmem:[#allocation12 + $0x1918] sm:$0xff] }
 0xb52   :  { %5343 = vmatmul.mubr.f32.vlgmr.msra.gmra.mxu0 %v11039_v25  ;;  %5509 = vmatprep.subr.mxu0 %v5246_v4  ;;  %v5270_v4 = vld [vmem:[#allocation12 + $0x1910] sm:$0xff] }
 0xb53   :  { %5348 = vmatprep.mubr.f32.mxu0 %v11043_v31  ;;  %5510 = vmatpush1.msra.mxu0 %v5245_v20  ;;  %v9312_v20 = vadd.f32 %v9311_v5, %v9310_v14  ;;  %v5219_v14 = vld [vmem:[#allocation12 + $0x1778] sm:$0xff] }
 0xb54   :  { %5511 = vmatprep.subr.mxu0 %v5241_v15  ;;  %4690 = vmatprep.mubr.f32.mxu1 %v9986_v0  ;;  %v5266_v15 = vld [vmem:[#allocation12 + $0x18f0] sm:$0xff]  ;;  %v5047_v5 = vld [vmem:[#allocation12 + $0x1218] sm:$0xff] }
 0xb55   :  { %5512 = vmatpush1.msra.mxu0 %v5240_v23  ;;  %9072 = vmatmul.mubr.msk.f32.gmra.mxu1 %vm4536_vm6, %v11183_v11 }
 0xb56   :  { %5349 = vmatmul.mubr.f32.gmra.mxu0 %v11045_v34  ;;  %5513 = vmatprep.subr.mxu0 %v5236_v24  ;;  %v5265_v24 = vld [vmem:[#allocation12 + $0x18e8] sm:$0xff] }
 0xb57   :  { %5514 = vmatpush1.msra.mxu0 %v5235_v9  ;;  %9083 = vmatprep.mubr.msk.f32.mxu0 %vm3337_vm5, %v11049_v37  ;;  %v9309_v9 = vadd.f32 %v9308_v58, %v9307_v40  ;;  %v5067_v40 = vld [vmem:[#allocation12 + $0x12b8] sm:$0xff]  ;;  %v5137_v58 = vld [vmem:[#allocation12 + $0x14e8] sm:$0xff] }
 0xb58   :  { %5515 = vmatprep.subr.mxu0 %v5231_v19  ;;  %9617 = vmatprep.mubr.msk.f32.mxu1 %vm4536_vm6, %v11179_v51  ;;  %v5200_v51 = vld [vmem:[#allocation12 + $0x16e0] sm:$0xff] }
 0xb59   :  { %5516 = vmatpush1.msra.mxu0 %v5230_v61  ;;  %v5261_v61 = vld [vmem:[#allocation12 + $0x18c8] sm:$0xff] }
 0xb5a   :  { %5517 = vmatprep.subr.mxu0 %v5226_v18 }
 0xb5b   :  { %5518 = vmatpush1.msra.mxu0 %v5225_v1  ;;  %v5260_v1 = vld [vmem:[#allocation12 + $0x18c0] sm:$0xff] }
 0xb5c   :  { %5519 = vmatprep.subr.mxu0 %v5221_v26 }
 0xb5d   :  { %5520 = vmatpush1.msra.mxu0 %v5220_v59  ;;  %v5256_v59 = vld [vmem:[#allocation12 + $0x18a0] sm:$0xff] }
 0xb5e   :  { %5521 = vmatprep.subr.mxu0 %v5216_v27  ;;  %v5255_v27 = vld [vmem:[#allocation12 + $0x1898] sm:$0xff] }
 0xb5f   :  { %5522 = vmatpush1.msra.mxu0 %v5215_v22  ;;  %v5251_v22 = vld [vmem:[#allocation12 + $0x1878] sm:$0xff] }
 0xb60   :  { %5523 = vmatprep.subr.mxu0 %v5211_v30  ;;  %v5250_v30 = vld [vmem:[#allocation12 + $0x1870] sm:$0xff] }
 0xb61   :  { %5524 = vmatpush1.msra.mxu0 %v5210_v2  ;;  %v5077_v2 = vld [vmem:[#allocation12 + $0x1308] sm:$0xff] }
 0xb62   :  { %5525 = vmatprep.subr.mxu0 %v5206_v29  ;;  %v5152_v29 = vld [vmem:[#allocation12 + $0x1560] sm:$0xff] }
 0xb63   :  { %5526 = vmatpush1.msra.mxu0 %v5205_v21  ;;  %v5239_v21 = vld [vmem:[#allocation12 + $0x1818] sm:$0xff] }
 0xb64   :  { %5527 = vmatprep.subr.mxu0 %v5201_v36  ;;  %v5072_v36 = vld [vmem:[#allocation12 + $0x12e0] sm:$0xff] }
 0xb65   :  { %5528 = vmatpush1.msra.mxu0 %v5200_v51  ;;  %v5238_v51 = vld [vmem:[#allocation12 + $0x1810] sm:$0xff] }
 0xb66   :  { %5529 = vmatprep.subr.mxu0 %v5196_v38  ;;  %v5147_v38 = vld [vmem:[#allocation12 + $0x1538] sm:$0xff] }
 0xb67   :  { %5530 = vmatpush1.msra.mxu0 %v5195_v44  ;;  %v5233_v44 = vld [vmem:[#allocation12 + $0x17e8] sm:$0xff] }
 0xb68   :  { %5531 = vmatprep.subr.mxu0 %v5191_v46  ;;  %v5142_v46 = vld [vmem:[#allocation12 + $0x1510] sm:$0xff] }
 0xb69   :  { %5532 = vmatpush1.msra.mxu0 %v5190_v48  ;;  %v5229_v48 = vld [vmem:[#allocation12 + $0x17c8] sm:$0xff] }
 0xb6a   :  { %5533 = vmatprep.subr.mxu0 %v5186_v50  ;;  %v5062_v50 = vld [vmem:[#allocation12 + $0x1290] sm:$0xff] }
 0xb6b   :  { %5534 = vmatpush1.msra.mxu0 %v5185_v35  ;;  %v5224_v35 = vld [vmem:[#allocation12 + $0x17a0] sm:$0xff] }
 0xb6c   :  { %5535 = vmatprep.subr.mxu0 %v5181_v49  ;;  %v5057_v49 = vld [vmem:[#allocation12 + $0x1268] sm:$0xff] }
 0xb6d   :  { %5536 = vmatpush1.msra.mxu0 %v5180_v10  ;;  %v5223_v10 = vld [vmem:[#allocation12 + $0x1798] sm:$0xff] }
 0xb6e   :  { %5537 = vmatprep.subr.mxu0 %v5176_v12  ;;  %v5132_v12 = vld [vmem:[#allocation12 + $0x14c0] sm:$0xff] }
 0xb6f   :  { %5538 = vmatpush1.msra.mxu0 %v5175_v54  ;;  %v5052_v54 = vld [vmem:[#allocation12 + $0x1240] sm:$0xff] }
 0xb70   :  { %v4524_v33 = vpop.f32.mrf.mxu0  ;;  %5539 = vmatprep.subr.mxu0 %v5171_v16  ;;  %v5218_v16 = vld [vmem:[#allocation12 + $0x1770] sm:$0xff] }
 0xb71   :  { %5540 = vmatpush1.msra.mxu0 %v5170_v63  ;;  %v4525_v26 = vadd.f32 %v9309_v9, %v4524_v33  ;;  %v5127_v63 = vld [vmem:[#allocation12 + $0x1498] sm:$0xff]  ;;  %v5213_v33 = vld [vmem:[#allocation12 + $0x1748] sm:$0xff]  ;;  %v5112_v9 = vld [vmem:[#allocation12 + $0x1420] sm:$0xff] }
 0xb72   :  { %v4526_v60 = vpop.f32.mrf.mxu0  ;;  %5561 = vmatprep.subr.mxu0 %v5276_v6  ;;  %v5214_v6 = vld [vmem:[#allocation12 + $0x1750] sm:$0xff] }
 0xb73   :  { %5562 = vmatpush2.msra.mxu0 %v5275_v39  ;;  %v5122_v39 = vld [vmem:[#allocation12 + $0x1470] sm:$0xff] }
 0xb74   :  { %v4529_v23 = vpop.f32.mrf.mxu0  ;;  %5563 = vmatprep.subr.mxu0 %v5271_v56  ;;  %v5209_v56 = vld [vmem:[#allocation12 + $0x1728] sm:$0xff]  ;;  %v5042_v60 = vld [vmem:[#allocation12 + $0x11f0] sm:$0xff] }
 0xb75   :  { %v4530_v19 = vadd.f32 %v9312_v20, %v4529_v23  ;;  %5564 = vmatpush2.msra.mxu0 %v5270_v4  ;;  %v5208_v4 = vld [vmem:[#allocation12 + $0x1720] sm:$0xff]  ;;  %v5117_v20 = vld [vmem:[#allocation12 + $0x1448] sm:$0xff] }
 0xb76   :  { %v4531_v18 = vpop.f32.mrf.mxu0  ;;  %5565 = vmatprep.subr.mxu0 %v5266_v15  ;;  %v5204_v15 = vld [vmem:[#allocation12 + $0x1700] sm:$0xff]  ;;  %v5037_v23 = vld [vmem:[#allocation12 + $0x11c8] sm:$0xff] }
 0xb77   :  { %9613 = vmatprep.subr.mxu1 %v4530_v19  ;;  %5566 = vmatpush2.msra.mxu0 %v5265_v24  ;;  %v5203_v24 = vld [vmem:[#allocation12 + $0x16f8] sm:$0xff]  ;;  %v5198_v18 = vld [vmem:[#allocation12 + $0x16d0] sm:$0xff] }
 0xb78   :  { %9614 = vmatpush3.msra.mxu1 %v4530_v19  ;;  %5567 = vmatprep.subr.mxu0 %v5261_v61  ;;  %v5199_v19 = vld [vmem:[#allocation12 + $0x16d8] sm:$0xff]  ;;  %v5032_v61 = vld [vmem:[#allocation12 + $0x11a0] sm:$0xff] }
 0xb79   :  { %9615 = vmatprep.subr.mxu1 %v4525_v26  ;;  %5568 = vmatpush2.msra.mxu0 %v5260_v1  ;;  %v5107_v1 = vld [vmem:[#allocation12 + $0x13f8] sm:$0xff] }
 0xb7a   :  { %9616 = vmatpush3.msra.mxu1 %v4525_v26  ;;  %5569 = vmatprep.subr.mxu0 %v5256_v59  ;;  %v5194_v26 = vld [vmem:[#allocation12 + $0x16b0] sm:$0xff]  ;;  %v5027_v59 = vld [vmem:[#allocation12 + $0x1178] sm:$0xff] }
 0xb7b   :  { %9618 = vmatmul.mubr.msk.f32.vlgmr.msra.gmra.mxu1 %vm4536_vm6, %v11183_v11  ;;  %4806 = vmatprep.subr.mxu1 %v11129_v32  ;;  %v5167_v11 = vld [vmem:[#allocation12 + $0x15d8] sm:$0xff]  ;;  %v5157_v32 = vld [vmem:[#allocation12 + $0x1588] sm:$0xff] }
 0xb7c   :  { %4807 = vmatpush1.msra.mxu1 %v11127_v55  ;;  %4842 = vmatprep.mubr.f32.mxu1 %v9986_v0  ;;  %v5087_v55 = vld [vmem:[#allocation12 + $0x1358] sm:$0xff] }
 0xb7d   :  { %4808 = vmatprep.subr.mxu1 %v11125_v17  ;;  %5570 = vmatpush2.msra.mxu0 %v5255_v27  ;;  %v5162_v17 = vld [vmem:[#allocation12 + $0x15b0] sm:$0xff]  ;;  %v5193_v27 = vld [vmem:[#allocation12 + $0x16a8] sm:$0xff] }
 0xb7e   :  { %4809 = vmatpush1.msra.mxu1 %v11123_v42  ;;  %5571 = vmatprep.subr.mxu0 %v5251_v22  ;;  %v5082_v42 = vld [vmem:[#allocation12 + $0x1330] sm:$0xff] }
 0xb7f   :  { %9075 = vmatmul.mubr.msk.f32.vlgmr.msra.gmra.mxu1 %vm4536_vm6, %v11190_v13  ;;  %9620 = vmatprep.subr.mxu1 %v11177_v41  ;;  %v5102_v22 = vld [vmem:[#allocation12 + $0x13d0] sm:$0xff] }
 0xb80   :  { %9621 = vmatpush3.msra.mxu1 %v11177_v41  ;;  %5572 = vmatpush2.msra.mxu0 %v5250_v30  ;;  %v5244_v41 = vld [vmem:[#allocation12 + $0x1840] sm:$0xff]  ;;  %v5189_v30 = vld [vmem:[#allocation12 + $0x1688] sm:$0xff] }
 0xb81   :  { %9622 = vmatprep.subr.mxu1 %v11175_v52  ;;  %5574 = vmatmul.mubr.f32.vlgmr.msra.gmra.mxu0 %v11051_v57 }
 0xb82   :  { %9321 = vmatprep.subr.mxu0 %v5167_v11  ;;  %4848 = vmatprep.mubr.f32.mxu1 %v9986_v0  ;;  %v5022_v11 = vld [vmem:[#allocation12 + $0x1150] sm:$0xff] }
 0xb83   :  { %9623 = vmatpush3.msra.mxu1 %v11175_v52  ;;  %9084 = vmatprep.mubr.msk.f32.mxu0 %vm3337_vm5, %v11056_v3  ;;  %v5243_v52 = vld [vmem:[#allocation12 + $0x1838] sm:$0xff] }
 0xb84   :  { %9322 = vmatpush3.msra.mxu0 %v5087_v55  ;;  %9076 = vmatmul.mubr.msk.f32.gmra.mxu1 %vm4536_vm6, %v11198_v47  ;;  %v5188_v55 = vld [vmem:[#allocation12 + $0x1680] sm:$0xff] }
 0xb85   :  { %9323 = vmatprep.subr.mxu0 %v5162_v17  ;;  %5580 = vmatmul.mubr.f32.gmra.mxu0 %v11058_v28  ;;  %v5097_v17 = vld [vmem:[#allocation12 + $0x13a8] sm:$0xff] }
 0xb86   :  { %9324 = vmatpush3.msra.mxu0 %v5082_v42  ;;  %9624 = vmatprep.mubr.msk.f32.mxu1 %vm4536_vm6, %v11190_v13  ;;  %v5234_v13 = vld [vmem:[#allocation12 + $0x17f0] sm:$0xff]  ;;  %v5184_v42 = vld [vmem:[#allocation12 + $0x1660] sm:$0xff] }
 0xb87   :  { %9325 = vmatprep.subr.mxu0 %v5157_v32  ;;  %5355 = vmatprep.subr.mxu1 %v5244_v41  ;;  %v5017_v32 = vld [vmem:[#allocation12 + $0x1128] sm:$0xff]  ;;  %v5183_v41 = vld [vmem:[#allocation12 + $0x1658] sm:$0xff] }
 0xb88   :  { %9326 = vmatpush3.msra.mxu0 %v5077_v2  ;;  %5650 = vmatprep.mubr.f32.mxu0 %v11037_v53  ;;  %v5092_v2 = vld [vmem:[#allocation12 + $0x1380] sm:$0xff] }
 0xb89   :  { %9625 = vmatmul.mubr.msk.f32.vlgmr.msra.gmra.mxu1 %vm4536_vm6, %v11198_v47  ;;  %9327 = vmatprep.subr.mxu0 %v5152_v29  ;;  %v5228_v47 = vld [vmem:[#allocation12 + $0x17c0] sm:$0xff]  ;;  %v5179_v29 = vld [vmem:[#allocation12 + $0x1638] sm:$0xff] }
 0xb8a   :  { %5356 = vmatpush1.msra.mxu1 %v5243_v52  ;;  %9081 = vmatprep.mubr.msk.f32.mxu1 %vm3337_vm5, %v11049_v37  ;;  %v5012_v52 = vld [vmem:[#allocation12 + $0x1100] sm:$0xff] }
 0xb8b   :  { %5357 = vmatprep.subr.mxu1 %v5239_v21  ;;  %9328 = vmatpush3.msra.mxu0 %v5072_v36  ;;  %v5178_v21 = vld [vmem:[#allocation12 + $0x1630] sm:$0xff] }
 0xb8c   :  { %5358 = vmatpush1.msra.mxu1 %v5238_v51  ;;  %9329 = vmatprep.subr.mxu0 %v5147_v38  ;;  %v5174_v36 = vld [vmem:[#allocation12 + $0x1610] sm:$0xff]  ;;  %v5173_v51 = vld [vmem:[#allocation12 + $0x1608] sm:$0xff] }
 0xb8d   :  { %5359 = vmatprep.subr.mxu1 %v5234_v13  ;;  %9330 = vmatpush3.msra.mxu0 %v5067_v40  ;;  %v5169_v38 = vld [vmem:[#allocation12 + $0x15e8] sm:$0xff]  ;;  %v5168_v13 = vld [vmem:[#allocation12 + $0x15e0] sm:$0xff]  ;;  %v5274_v40 = vld [vmem:[#allocation12 + $0x1930] sm:$0xff] }
 0xb8e   :  { %5360 = vmatpush1.msra.mxu1 %v5233_v44  ;;  %9331 = vmatprep.subr.mxu0 %v5142_v46  ;;  %v5273_v44 = vld [vmem:[#allocation12 + $0x1928] sm:$0xff] }
 0xb8f   :  { %5361 = vmatprep.subr.mxu1 %v5229_v48  ;;  %9332 = vmatpush3.msra.mxu0 %v5062_v50  ;;  %v5269_v46 = vld [vmem:[#allocation12 + $0x1908] sm:$0xff]  ;;  %v5268_v48 = vld [vmem:[#allocation12 + $0x1900] sm:$0xff] }
 0xb90   :  { %5362 = vmatpush1.msra.mxu1 %v5228_v47  ;;  %9333 = vmatprep.subr.mxu0 %v5137_v58  ;;  %v5264_v50 = vld [vmem:[#allocation12 + $0x18e0] sm:$0xff]  ;;  %v5263_v47 = vld [vmem:[#allocation12 + $0x18d8] sm:$0xff] }
 0xb91   :  { %5363 = vmatprep.subr.mxu1 %v5224_v35  ;;  %9334 = vmatpush3.msra.mxu0 %v5057_v49  ;;  %v5259_v58 = vld [vmem:[#allocation12 + $0x18b8] sm:$0xff]  ;;  %v5258_v35 = vld [vmem:[#allocation12 + $0x18b0] sm:$0xff] }
 0xb92   :  { %5364 = vmatpush1.msra.mxu1 %v5223_v10  ;;  %9335 = vmatprep.subr.mxu0 %v5132_v12  ;;  %v5254_v49 = vld [vmem:[#allocation12 + $0x1890] sm:$0xff]  ;;  %v5253_v10 = vld [vmem:[#allocation12 + $0x1888] sm:$0xff] }
 0xb93   :  { %5365 = vmatprep.subr.mxu1 %v5219_v14  ;;  %9336 = vmatpush3.msra.mxu0 %v5052_v54  ;;  %v5249_v12 = vld [vmem:[#allocation12 + $0x1868] sm:$0xff]  ;;  %v5248_v14 = vld [vmem:[#allocation12 + $0x1860] sm:$0xff]  ;;  %v5086_v54 = vld [vmem:[#allocation12 + $0x1350] sm:$0xff] }
 0xb94   :  { %5366 = vmatpush1.msra.mxu1 %v5218_v16  ;;  %9337 = vmatprep.subr.mxu0 %v5127_v63  ;;  %v5085_v16 = vld [vmem:[#allocation12 + $0x1348] sm:$0xff] }
 0xb95   :  { %5367 = vmatprep.subr.mxu1 %v5214_v6  ;;  %9338 = vmatpush3.msra.mxu0 %v5047_v5  ;;  %v5081_v63 = vld [vmem:[#allocation12 + $0x1328] sm:$0xff]  ;;  %v5080_v6 = vld [vmem:[#allocation12 + $0x1320] sm:$0xff] }
 0xb96   :  { %5368 = vmatpush1.msra.mxu1 %v5213_v33  ;;  %9339 = vmatprep.subr.mxu0 %v5122_v39  ;;  %v5076_v5 = vld [vmem:[#allocation12 + $0x1300] sm:$0xff]  ;;  %v5075_v33 = vld [vmem:[#allocation12 + $0x12f8] sm:$0xff] }
 0xb97   :  { %5369 = vmatprep.subr.mxu1 %v5209_v56  ;;  %9340 = vmatpush3.msra.mxu0 %v5042_v60  ;;  %v5071_v39 = vld [vmem:[#allocation12 + $0x12d8] sm:$0xff]  ;;  %v5070_v56 = vld [vmem:[#allocation12 + $0x12d0] sm:$0xff] }
 0xb98   :  { %5370 = vmatpush1.msra.mxu1 %v5208_v4  ;;  %9341 = vmatprep.subr.mxu0 %v5117_v20  ;;  %v5066_v60 = vld [vmem:[#allocation12 + $0x12b0] sm:$0xff]  ;;  %v5065_v4 = vld [vmem:[#allocation12 + $0x12a8] sm:$0xff] }
 0xb99   :  { %5371 = vmatprep.subr.mxu1 %v5204_v15  ;;  %9342 = vmatpush3.msra.mxu0 %v5037_v23  ;;  %v5061_v20 = vld [vmem:[#allocation12 + $0x1288] sm:$0xff]  ;;  %v5060_v15 = vld [vmem:[#allocation12 + $0x1280] sm:$0xff] }
 0xb9a   :  { %5372 = vmatpush1.msra.mxu1 %v5203_v24  ;;  %9343 = vmatprep.subr.mxu0 %v5112_v9  ;;  %v5056_v23 = vld [vmem:[#allocation12 + $0x1260] sm:$0xff]  ;;  %v5055_v24 = vld [vmem:[#allocation12 + $0x1258] sm:$0xff] }
 0xb9b   :  { %5373 = vmatprep.subr.mxu1 %v5199_v19  ;;  %9344 = vmatpush3.msra.mxu0 %v5032_v61  ;;  %v5051_v9 = vld [vmem:[#allocation12 + $0x1238] sm:$0xff]  ;;  %v5050_v19 = vld [vmem:[#allocation12 + $0x1230] sm:$0xff] }
 0xb9c   :  { %5374 = vmatpush1.msra.mxu1 %v5198_v18  ;;  %9345 = vmatprep.subr.mxu0 %v5107_v1  ;;  %v5046_v61 = vld [vmem:[#allocation12 + $0x1210] sm:$0xff]  ;;  %v5045_v18 = vld [vmem:[#allocation12 + $0x1208] sm:$0xff] }
 0xb9d   :  { %5375 = vmatprep.subr.mxu1 %v5194_v26  ;;  %9346 = vmatpush3.msra.mxu0 %v5027_v59  ;;  %v5041_v1 = vld [vmem:[#allocation12 + $0x11e8] sm:$0xff]  ;;  %v5040_v26 = vld [vmem:[#allocation12 + $0x11e0] sm:$0xff] }
 0xb9e   :  { %5376 = vmatpush1.msra.mxu1 %v5193_v27  ;;  %9347 = vmatprep.subr.mxu0 %v5102_v22  ;;  %v5036_v59 = vld [vmem:[#allocation12 + $0x11c0] sm:$0xff]  ;;  %v5035_v27 = vld [vmem:[#allocation12 + $0x11b8] sm:$0xff] }
 0xb9f   :  { %5377 = vmatprep.subr.mxu1 %v5189_v30  ;;  %9348 = vmatpush3.msra.mxu0 %v5022_v11  ;;  %v5031_v22 = vld [vmem:[#allocation12 + $0x1198] sm:$0xff]  ;;  %v5030_v30 = vld [vmem:[#allocation12 + $0x1190] sm:$0xff] }
 0xba0   :  { %5378 = vmatpush1.msra.mxu1 %v5188_v55  ;;  %9349 = vmatprep.subr.mxu0 %v5097_v17  ;;  %v5026_v11 = vld [vmem:[#allocation12 + $0x1170] sm:$0xff]  ;;  %v5025_v55 = vld [vmem:[#allocation12 + $0x1168] sm:$0xff] }
 0xba1   :  { %5379 = vmatprep.subr.mxu1 %v5184_v42  ;;  %9350 = vmatpush3.msra.mxu0 %v5017_v32  ;;  %v5021_v17 = vld [vmem:[#allocation12 + $0x1148] sm:$0xff]  ;;  %v5020_v42 = vld [vmem:[#allocation12 + $0x1140] sm:$0xff] }
 0xba2   :  { %5380 = vmatpush1.msra.mxu1 %v5183_v41  ;;  %9351 = vmatprep.subr.mxu0 %v5092_v2  ;;  %v5016_v32 = vld [vmem:[#allocation12 + $0x1120] sm:$0xff]  ;;  %v5015_v41 = vld [vmem:[#allocation12 + $0x1118] sm:$0xff] }
 0xba3   :  { %5381 = vmatprep.subr.mxu1 %v5179_v29  ;;  %9352 = vmatpush3.msra.mxu0 %v5012_v52  ;;  %v5011_v2 = vld [vmem:[#allocation12 + $0x10f8] sm:$0xff]  ;;  %v5010_v29 = vld [vmem:[#allocation12 + $0x10f0] sm:$0xff] }
 0xba4   :  { %5382 = vmatpush1.msra.mxu1 %v5178_v21  ;;  %5651 = vmatmul.mubr.f32.vlgmr.msra.gmra.mxu0 %v11039_v25  ;;  %v5166_v52 = vld [vmem:[#allocation12 + $0x15d0] sm:$0xff]  ;;  %v5165_v21 = vld [vmem:[#allocation12 + $0x15c8] sm:$0xff] }
 0xba5   :  { %5383 = vmatprep.subr.mxu1 %v5174_v36  ;;  %5655 = vmatprep.mubr.f32.mxu0 %v11043_v31  ;;  %v5161_v36 = vld [vmem:[#allocation12 + $0x15a8] sm:$0xff] }
 0xba6   :  { %5384 = vmatpush1.msra.mxu1 %v5173_v51  ;;  %v5160_v51 = vld [vmem:[#allocation12 + $0x15a0] sm:$0xff] }
 0xba7   :  { %5385 = vmatprep.subr.mxu1 %v5169_v38  ;;  %v5156_v38 = vld [vmem:[#allocation12 + $0x1580] sm:$0xff] }
 0xba8   :  { %5386 = vmatpush1.msra.mxu1 %v5168_v13  ;;  %5656 = vmatmul.mubr.f32.gmra.mxu0 %v11045_v34  ;;  %v5155_v13 = vld [vmem:[#allocation12 + $0x1578] sm:$0xff] }
 0xba9   :  { %5407 = vmatprep.subr.mxu1 %v5274_v40  ;;  %5809 = vmatprep.mubr.f32.mxu0 %v9986_v0  ;;  %v5151_v40 = vld [vmem:[#allocation12 + $0x1558] sm:$0xff] }
 0xbaa   :  { %5408 = vmatpush2.msra.mxu1 %v5273_v44  ;;  %v5150_v44 = vld [vmem:[#allocation12 + $0x1550] sm:$0xff] }
 0xbab   :  { %5409 = vmatprep.subr.mxu1 %v5269_v46  ;;  %v5146_v46 = vld [vmem:[#allocation12 + $0x1530] sm:$0xff] }
 0xbac   :  { %5410 = vmatpush2.msra.mxu1 %v5268_v48  ;;  %v5145_v48 = vld [vmem:[#allocation12 + $0x1528] sm:$0xff] }
 0xbad   :  { %5411 = vmatprep.subr.mxu1 %v5264_v50  ;;  %v5141_v50 = vld [vmem:[#allocation12 + $0x1508] sm:$0xff] }
 0xbae   :  { %5412 = vmatpush2.msra.mxu1 %v5263_v47  ;;  %v5140_v47 = vld [vmem:[#allocation12 + $0x1500] sm:$0xff] }
 0xbaf   :  { %5413 = vmatprep.subr.mxu1 %v5259_v58  ;;  %v5136_v58 = vld [vmem:[#allocation12 + $0x14e0] sm:$0xff] }
 0xbb0   :  { %5414 = vmatpush2.msra.mxu1 %v5258_v35  ;;  %v5135_v35 = vld [vmem:[#allocation12 + $0x14d8] sm:$0xff] }
 0xbb1   :  { %5415 = vmatprep.subr.mxu1 %v5254_v49  ;;  %v5131_v49 = vld [vmem:[#allocation12 + $0x14b8] sm:$0xff] }
 0xbb2   :  { %5416 = vmatpush2.msra.mxu1 %v5253_v10  ;;  %v5130_v10 = vld [vmem:[#allocation12 + $0x14b0] sm:$0xff] }
 0xbb3   :  { %5417 = vmatprep.subr.mxu1 %v5249_v12  ;;  %v5126_v12 = vld [vmem:[#allocation12 + $0x1490] sm:$0xff] }
 0xbb4   :  { %5418 = vmatpush2.msra.mxu1 %v5248_v14  ;;  %v5125_v14 = vld [vmem:[#allocation12 + $0x1488] sm:$0xff] }
 0xbb5   :  { %5420 = vmatmul.mubr.f32.vlgmr.msra.gmra.mxu1 %v11051_v57  ;;  %5432 = vmatprep.subr.mxu1 %v5086_v54  ;;  %v5121_v54 = vld [vmem:[#allocation12 + $0x1468] sm:$0xff] }
 0xbb6   :  { %9082 = vmatprep.mubr.msk.f32.mxu1 %vm3337_vm5, %v11056_v3  ;;  %5433 = vmatpush1.msra.mxu1 %v5085_v16  ;;  %v5120_v16 = vld [vmem:[#allocation12 + $0x1460] sm:$0xff] }
 0xbb7   :  { %5434 = vmatprep.subr.mxu1 %v5081_v63  ;;  %v5116_v63 = vld [vmem:[#allocation12 + $0x1440] sm:$0xff] }
 0xbb8   :  { %5435 = vmatpush1.msra.mxu1 %v5080_v6  ;;  %v5115_v6 = vld [vmem:[#allocation12 + $0x1438] sm:$0xff] }
 0xbb9   :  { %5426 = vmatmul.mubr.f32.gmra.mxu1 %v11058_v28  ;;  %5436 = vmatprep.subr.mxu1 %v5076_v5  ;;  %v5111_v5 = vld [vmem:[#allocation12 + $0x1418] sm:$0xff] }
 0xbba   :  { %5437 = vmatpush1.msra.mxu1 %v5075_v33  ;;  %5496 = vmatprep.mubr.f32.mxu1 %v11037_v53  ;;  %v5110_v33 = vld [vmem:[#allocation12 + $0x1410] sm:$0xff] }
 0xbbb   :  { %5438 = vmatprep.subr.mxu1 %v5071_v39  ;;  %v5106_v39 = vld [vmem:[#allocation12 + $0x13f0] sm:$0xff] }
 0xbbc   :  { %5439 = vmatpush1.msra.mxu1 %v5070_v56  ;;  %v5105_v56 = vld [vmem:[#allocation12 + $0x13e8] sm:$0xff] }
 0xbbd   :  { %5440 = vmatprep.subr.mxu1 %v5066_v60  ;;  %v5101_v60 = vld [vmem:[#allocation12 + $0x13c8] sm:$0xff] }
 0xbbe   :  { %5441 = vmatpush1.msra.mxu1 %v5065_v4  ;;  %v5100_v4 = vld [vmem:[#allocation12 + $0x13c0] sm:$0xff] }
 0xbbf   :  { %5442 = vmatprep.subr.mxu1 %v5061_v20  ;;  %v5096_v20 = vld [vmem:[#allocation12 + $0x13a0] sm:$0xff] }
 0xbc0   :  { %5443 = vmatpush1.msra.mxu1 %v5060_v15  ;;  %v5095_v15 = vld [vmem:[#allocation12 + $0x1398] sm:$0xff] }
 0xbc1   :  { %5444 = vmatprep.subr.mxu1 %v5056_v23  ;;  %v5091_v23 = vld [vmem:[#allocation12 + $0x1378] sm:$0xff] }
 0xbc2   :  { %5445 = vmatpush1.msra.mxu1 %v5055_v24  ;;  %v5090_v24 = vld [vmem:[#allocation12 + $0x1370] sm:$0xff] }
 0xbc3   :  { %5446 = vmatprep.subr.mxu1 %v5051_v9  ;;  %v5247_v9 = vld [vmem:[#allocation12 + $0x1858] sm:$0xff] }
 0xbc4   :  { %5447 = vmatpush1.msra.mxu1 %v5050_v19  ;;  %v5242_v19 = vld [vmem:[#allocation12 + $0x1830] sm:$0xff] }
 0xbc5   :  { %5448 = vmatprep.subr.mxu1 %v5046_v61  ;;  %v5237_v61 = vld [vmem:[#allocation12 + $0x1808] sm:$0xff] }
 0xbc6   :  { %5449 = vmatpush1.msra.mxu1 %v5045_v18  ;;  %v5232_v18 = vld [vmem:[#allocation12 + $0x17e0] sm:$0xff] }
 0xbc7   :  { %5450 = vmatprep.subr.mxu1 %v5041_v1  ;;  %v5227_v1 = vld [vmem:[#allocation12 + $0x17b8] sm:$0xff] }
 0xbc8   :  { %5451 = vmatpush1.msra.mxu1 %v5040_v26  ;;  %v5222_v26 = vld [vmem:[#allocation12 + $0x1790] sm:$0xff] }
 0xbc9   :  { %5452 = vmatprep.subr.mxu1 %v5036_v59  ;;  %v5217_v59 = vld [vmem:[#allocation12 + $0x1768] sm:$0xff] }
 0xbca   :  { %5453 = vmatpush1.msra.mxu1 %v5035_v27  ;;  %v5212_v27 = vld [vmem:[#allocation12 + $0x1740] sm:$0xff] }
 0xbcb   :  { %5454 = vmatprep.subr.mxu1 %v5031_v22  ;;  %v5207_v22 = vld [vmem:[#allocation12 + $0x1718] sm:$0xff] }
 0xbcc   :  { %5455 = vmatpush1.msra.mxu1 %v5030_v30 }
 0xbcd   :  { %5456 = vmatprep.subr.mxu1 %v5026_v11  ;;  %v5202_v11 = vld [vmem:[#allocation12 + $0x16f0] sm:$0xff] }
 0xbce   :  { %5457 = vmatpush1.msra.mxu1 %v5025_v55  ;;  %v11264_v30 = vpop.f32.mrf.mxu0  ;;  %v5197_v55 = vld [vmem:[#allocation12 + $0x16c8] sm:$0xff] }
 0xbcf   :  { %5458 = vmatprep.subr.mxu1 %v5021_v17 }
 0xbd0   :  { %5459 = vmatpush1.msra.mxu1 %v5020_v42  ;;  %v11268_v17 = vpop.f32.mrf.mxu0  ;;  %v5192_v42 = vld [vmem:[#allocation12 + $0x16a0] sm:$0xff] }
 0xbd1   :  { %5460 = vmatprep.subr.mxu1 %v5016_v32  ;;  %v11271_v32 = vpop.f32.mrf.mxu1 }
 0xbd2   :  { %5461 = vmatpush1.msra.mxu1 %v5015_v41  ;;  %v5187_v41 = vld [vmem:[#allocation12 + $0x1678] sm:$0xff] }
 0xbd3   :  { %5462 = vmatprep.subr.mxu1 %v5011_v2  ;;  %v4921_v2 = vpop.f32.mrf.mxu0 }
 0xbd4   :  { %5463 = vmatpush1.msra.mxu1 %v5010_v29  ;;  %v5182_v29 = vld [vmem:[#allocation12 + $0x1650] sm:$0xff] }
 0xbd5   :  { %5464 = vmatprep.subr.mxu1 %v5166_v52  ;;  %v4617_v52 = vpop.f32.mrf.mxu1 }
 0xbd6   :  { %5465 = vmatpush2.msra.mxu1 %v5165_v21  ;;  %v4923_v21 = vpop.f32.mrf.mxu0 }
 0xbd7   :  { %5466 = vmatprep.subr.mxu1 %v5161_v36  ;;  %v5177_v36 = vld [vmem:[#allocation12 + $0x1628] sm:$0xff] }
 0xbd8   :  { %5467 = vmatpush2.msra.mxu1 %v5160_v51  ;;  %v5172_v51 = vld [vmem:[#allocation12 + $0x1600] sm:$0xff] }
 0xbd9   :  { %5468 = vmatprep.subr.mxu1 %v5156_v38 }
 0xbda   :  { %5469 = vmatpush2.msra.mxu1 %v5155_v13 }
 0xbdb   :  { %5470 = vmatprep.subr.mxu1 %v5151_v40  ;;  %v4927_v40 = vpop.f32.mrf.mxu0 }
 0xbdc   :  { %5471 = vmatpush2.msra.mxu1 %v5150_v44  ;;  %v5277_v44 = vld [vmem:[#allocation12 + $0x1948] sm:$0xff] }
 0xbdd   :  { %5472 = vmatprep.subr.mxu1 %v5146_v46 }
 0xbde   :  { %5473 = vmatpush2.msra.mxu1 %v5145_v48 }
 0xbdf   :  { %5474 = vmatprep.subr.mxu1 %v5141_v50  ;;  %v5272_v50 = vld [vmem:[#allocation12 + $0x1920] sm:$0xff] }
 0xbe0   :  { %5475 = vmatpush2.msra.mxu1 %v5140_v47 }
 0xbe1   :  { %5476 = vmatprep.subr.mxu1 %v5136_v58 }
 0xbe2   :  { %5477 = vmatpush2.msra.mxu1 %v5135_v35  ;;  %v4929_v35 = vpop.f32.mrf.mxu0 }
 0xbe3   :  { %5478 = vmatprep.subr.mxu1 %v5131_v49  ;;  %v5267_v49 = vld [vmem:[#allocation12 + $0x18f8] sm:$0xff] }
 0xbe4   :  { %5479 = vmatpush2.msra.mxu1 %v5130_v10 }
 0xbe5   :  { %5480 = vmatprep.subr.mxu1 %v5126_v12 }
 0xbe6   :  { %5481 = vmatpush2.msra.mxu1 %v5125_v14  ;;  %v5262_v14 = vld [vmem:[#allocation12 + $0x18d0] sm:$0xff] }
 0xbe7   :  { %5482 = vmatprep.subr.mxu1 %v5121_v54  ;;  %v5257_v54 = vld [vmem:[#allocation12 + $0x18a8] sm:$0xff] }
 0xbe8   :  { %5483 = vmatpush2.msra.mxu1 %v5120_v16  ;;  %v5252_v16 = vld [vmem:[#allocation12 + $0x1880] sm:$0xff] }
 0xbe9   :  { %5484 = vmatprep.subr.mxu1 %v5116_v63  ;;  %v5737_v63 = vld [vmem:[#allocation10 + $0x20] sm:$0xff] }
 0xbea   :  { %5485 = vmatpush2.msra.mxu1 %v5115_v6 }
 0xbeb   :  { %5486 = vmatprep.subr.mxu1 %v5111_v5 }
 0xbec   :  { %5487 = vmatpush2.msra.mxu1 %v5110_v33 }
 0xbed   :  { %5488 = vmatprep.subr.mxu1 %v5106_v39 }
 0xbee   :  { %5489 = vmatpush2.msra.mxu1 %v5105_v56 }
 0xbef   :  { %5490 = vmatprep.subr.mxu1 %v5101_v60 }
 0xbf0   :  { %5491 = vmatpush2.msra.mxu1 %v5100_v4 }
 0xbf1   :  { %5492 = vmatprep.subr.mxu1 %v5096_v20 }
 0xbf2   :  { %5493 = vmatpush2.msra.mxu1 %v5095_v15 }
 0xbf3   :  { %5494 = vmatprep.subr.mxu1 %v5091_v23 }
 0xbf4   :  { %5495 = vmatpush2.msra.mxu1 %v5090_v24 }
 0xbf5   :  { %5497 = vmatmul.mubr.f32.vlgmr.msra.gmra.mxu1 %v11039_v25  ;;  %5661 = vmatprep.subr.mxu1 %v9986_v0 }
 0xbf6   :  { %5502 = vmatprep.mubr.f32.mxu1 %v11043_v31  ;;  %5662 = vmatpush1.msra.mxu1 %v5247_v9 }
 0xbf7   :  { %5663 = vmatprep.subr.mxu1 %v9986_v0 }
 0xbf8   :  { %5664 = vmatpush1.msra.mxu1 %v5242_v19 }
 0xbf9   :  { %5503 = vmatmul.mubr.f32.gmra.mxu1 %v11045_v34  ;;  %5665 = vmatprep.subr.mxu1 %v9986_v0 }
 0xbfa   :  { %5666 = vmatpush1.msra.mxu1 %v5237_v61  ;;  %9085 = vmatprep.mubr.msk.f32.mxu1 %vm3337_vm5, %v11049_v37 }
 0xbfb   :  { %5667 = vmatprep.subr.mxu1 %v9986_v0 }
 0xbfc   :  { %5668 = vmatpush1.msra.mxu1 %v5232_v18 }
 0xbfd   :  { %5669 = vmatprep.subr.mxu1 %v9986_v0 }
 0xbfe   :  { %5670 = vmatpush1.msra.mxu1 %v5227_v1 }
 0xbff   :  { %5671 = vmatprep.subr.mxu1 %v9986_v0 }
 0xc00   :  { %5672 = vmatpush1.msra.mxu1 %v5222_v26 }
 0xc01   :  { %5673 = vmatprep.subr.mxu1 %v9986_v0 }
 0xc02   :  { %5674 = vmatpush1.msra.mxu1 %v5217_v59 }
 0xc03   :  { %5675 = vmatprep.subr.mxu1 %v9986_v0 }
 0xc04   :  { %5676 = vmatpush1.msra.mxu1 %v5212_v27 }
 0xc05   :  { %5677 = vmatprep.subr.mxu1 %v9986_v0 }
 0xc06   :  { %5678 = vmatpush1.msra.mxu1 %v5207_v22 }
 0xc07   :  { %5679 = vmatprep.subr.mxu1 %v9986_v0 }
 0xc08   :  { %5680 = vmatpush1.msra.mxu1 %v5202_v11 }
 0xc09   :  { %5681 = vmatprep.subr.mxu1 %v9986_v0 }
 0xc0a   :  { %5682 = vmatpush1.msra.mxu1 %v5197_v55 }
 0xc0b   :  { %5683 = vmatprep.subr.mxu1 %v9986_v0 }
 0xc0c   :  { %5684 = vmatpush1.msra.mxu1 %v5192_v42 }
 0xc0d   :  { %5685 = vmatprep.subr.mxu1 %v9986_v0 }
 0xc0e   :  { %5686 = vmatpush1.msra.mxu1 %v5187_v41  ;;  %v11311_v41 = vld [vmem:[#allocation10 + $0x28] sm:$0x7f] }
 0xc0f   :  { %5687 = vmatprep.subr.mxu1 %v9986_v0 }
 0xc10   :  { %5688 = vmatpush1.msra.mxu1 %v5182_v29 }
 0xc11   :  { %5689 = vmatprep.subr.mxu1 %v9986_v0  ;;  %v4686_v38 = vpop.f32.mrf.mxu1 }
 0xc12   :  { %5690 = vmatpush1.msra.mxu1 %v5177_v36  ;;  %v11277_v13 = vadd.f32 %v4921_v2, %v4686_v38  ;;  %v5344_v9 = vpop.f32.mrf.mxu0 }
 0xc13   :  { %5691 = vmatprep.subr.mxu1 %v9986_v0  ;;  %v4688_v46 = vpop.f32.mrf.mxu1 }
 0xc14   :  { %5692 = vmatpush1.msra.mxu1 %v5172_v51  ;;  %v11280_v48 = vadd.f32 %v4923_v21, %v4688_v46  ;;  %v5346_v19 = vpop.f32.mrf.mxu0 }
 0xc15   :  { %5713 = vmatprep.subr.mxu1 %v9986_v0  ;;  %v4692_v47 = vpop.f32.mrf.mxu1 }
 0xc16   :  { %5714 = vmatpush2.msra.mxu1 %v5277_v44  ;;  %v11283_v58 = vadd.f32 %v4927_v40, %v4692_v47  ;;  %v5350_v18 = vpop.f32.mrf.mxu0 }
 0xc17   :  { %5715 = vmatprep.subr.mxu1 %v9986_v0  ;;  %v4694_v10 = vpop.f32.mrf.mxu1 }
 0xc18   :  { %5716 = vmatpush2.msra.mxu1 %v5272_v50  ;;  %v11286_v12 = vadd.f32 %v4929_v35, %v4694_v10  ;;  %v5352_v59 = vpop.f32.mrf.mxu0  ;;  %v6061_v35 = vld [vmem:[#allocation12 + $0x1bb0] sm:$0xff]  ;;  %v6056_v10 = vld [vmem:[#allocation12 + $0x1b88] sm:$0xff] }
 0xc19   :  { %5717 = vmatprep.subr.mxu1 %v9986_v0 }
 0xc1a   :  { %5718 = vmatpush2.msra.mxu1 %v5267_v49  ;;  %v6060_v49 = vld [vmem:[#allocation12 + $0x1ba8] sm:$0xff] }
 0xc1b   :  { %5719 = vmatprep.subr.mxu1 %v9986_v0 }
 0xc1c   :  { %5720 = vmatpush2.msra.mxu1 %v5262_v14  ;;  %v6055_v14 = vld [vmem:[#allocation12 + $0x1b80] sm:$0xff] }
 0xc1d   :  { %5721 = vmatprep.subr.mxu1 %v9986_v0 }
 0xc1e   :  { %5722 = vmatpush2.msra.mxu1 %v5257_v54  ;;  %v6051_v54 = vld [vmem:[#allocation12 + $0x1b60] sm:$0xff] }
 0xc1f   :  { %5723 = vmatprep.subr.mxu1 %v9986_v0 }
 0xc20   :  { %5724 = vmatpush2.msra.mxu1 %v5252_v16  ;;  %v6050_v16 = vld [vmem:[#allocation12 + $0x1b58] sm:$0xff] }
 0xc21   :  { %5726 = vmatmul.mubr.f32.vlgmr.msra.gmra.mxu1 %v11051_v57 }
 0xc22   :  { %9086 = vmatprep.mubr.msk.f32.mxu1 %vm3337_vm5, %v11056_v3 }
 0xc25   :  { %5731 = vmatmul.mubr.f32.gmra.mxu1 %v11058_v28 }
 0xc26   :  { %9631 = vmatprep.mubr.msk.f32.mxu1 %vm4536_vm6, %v5737_v63 }
 0xc3b   :  { %v9619_v6 = vpop.f32.mrf.mxu1 }
 0xc3d   :  { %v4763_v5 = vpop.f32.mrf.mxu1 }
 0xc3f   :  { %v11297_v33 = vpop.f32.mrf.mxu1 }
 0xc41   :  { %v11299_v39 = vpop.f32.mrf.mxu1  ;;  %v5575_v2 = vpop.f32.mrf.mxu0 }
 0xc43   :  { %v5577_v29 = vpop.f32.mrf.mxu0 }
 0xc44   :  { %v11301_v56 = vpop.f32.mrf.mxu1 }
 0xc45   :  { %v5581_v21 = vpop.f32.mrf.mxu0 }
 0xc46   :  { %v4852_v60 = vpop.f32.mrf.mxu1 }
 0xc47   :  { %v11303_v4 = vadd.f32 %v4852_v60, %v4617_v52  ;;  %v5583_v38 = vpop.f32.mrf.mxu0  ;;  %v6041_v60 = vld [vmem:[#allocation12 + $0x1b10] sm:$0xff] }
 0xc49   :  { %v9626_v20 = vpop.f32.mrf.mxu1 }
 0xc4a   :  { %v11305_v15 = vadd.f32 %v9626_v20, %v9619_v6  ;;  %v6046_v6 = vld [vmem:[#allocation12 + $0x1b38] sm:$0xff]  ;;  %v6036_v20 = vld [vmem:[#allocation12 + $0x1ae8] sm:$0xff] }
 0xc4b   :  { %v4998_v23 = vpop.f32.mrf.mxu1 }
 0xc4c   :  { %v11307_v24 = vadd.f32 %v4998_v23, %v4763_v5  ;;  %v6045_v5 = vld [vmem:[#allocation12 + $0x1b30] sm:$0xff]  ;;  %v6035_v23 = vld [vmem:[#allocation12 + $0x1ae0] sm:$0xff] }
 0xc75   :  { %v5421_v61 = vpop.f32.mrf.mxu1 }
 0xc76   :  { %v5422_v42 = vadd.f32 %v5421_v61, %v5344_v9  ;;  %v6031_v9 = vld [vmem:[#allocation12 + $0x1ac0] sm:$0xff]  ;;  %v6026_v61 = vld [vmem:[#allocation12 + $0x1a98] sm:$0xff] }
 0xc77   :  { %v5423_v1 = vpop.f32.mrf.mxu1 }
 0xc78   :  { %v5424_v55 = vadd.f32 %v5423_v1, %v5346_v19  ;;  %v6030_v19 = vld [vmem:[#allocation12 + $0x1ab8] sm:$0xff]  ;;  %v6021_v1 = vld [vmem:[#allocation12 + $0x1a70] sm:$0xff] }
 0xc79   :  { %v5427_v26 = vpop.f32.mrf.mxu1 }
 0xc7a   :  { %v5428_v11 = vadd.f32 %v5427_v26, %v5350_v18  ;;  %v6025_v18 = vld [vmem:[#allocation12 + $0x1a90] sm:$0xff]  ;;  %v6020_v26 = vld [vmem:[#allocation12 + $0x1a68] sm:$0xff] }
 0xc7b   :  { %v5429_v27 = vpop.f32.mrf.mxu1 }
 0xc7c   :  { %v5430_v22 = vadd.f32 %v5429_v27, %v5352_v59  ;;  %v6016_v59 = vld [vmem:[#allocation12 + $0x1a48] sm:$0xff]  ;;  %v6015_v27 = vld [vmem:[#allocation12 + $0x1a40] sm:$0xff] }
 0xc7e   :  { %5773 = vmatprep.subr.mxu0 %v5430_v22  ;;  %v6011_v22 = vld [vmem:[#allocation12 + $0x1a20] sm:$0xff] }
 0xc7f   :  { %5774 = vmatpush1.msra.mxu0 %v5428_v11  ;;  %v6010_v11 = vld [vmem:[#allocation12 + $0x1a18] sm:$0xff] }
 0xc80   :  { %5775 = vmatprep.subr.mxu0 %v5424_v55  ;;  %v9353_v55 = vpop.f32.mrf.mxu0 }
 0xc81   :  { %5776 = vmatpush1.msra.mxu0 %v5422_v42  ;;  %v6006_v42 = vld [vmem:[#allocation12 + $0x19f8] sm:$0xff] }
 0xc82   :  { %9087 = vmatmul.mubr.msk.f32.vlgmr.msra.gmra.mxu0 %vm4536_vm6, %v5737_v63 }
 0xc83   :  { %5815 = vmatprep.mubr.f32.mxu0 %v9986_v0 }
 0xc86   :  { %9088 = vmatmul.mubr.msk.f32.gmra.mxu0 %vm4536_vm6, %v11311_v41 }
 0xc87   :  { %5886 = vmatprep.mubr.f32.mxu0 %v9986_v0 }
 0xcb5   :  { %v5498_v52 = vpop.f32.mrf.mxu1 }
 0xcb6   :  { %v5576_v47 = vadd.f32 %v5575_v2, %v5498_v52  ;;  %v6005_v2 = vld [vmem:[#allocation12 + $0x19f0] sm:$0xff]  ;;  %v6000_v52 = vld [vmem:[#allocation12 + $0x19c8] sm:$0xff] }
 0xcb7   :  { %v5500_v36 = vpop.f32.mrf.mxu1 }
 0xcb8   :  { %v5578_v50 = vadd.f32 %v5577_v29, %v5500_v36  ;;  %v6001_v29 = vld [vmem:[#allocation12 + $0x19d0] sm:$0xff]  ;;  %v5996_v36 = vld [vmem:[#allocation12 + $0x19a8] sm:$0xff] }
 0xcb9   :  { %v5504_v51 = vpop.f32.mrf.mxu1 }
 0xcba   :  { %v5582_v46 = vadd.f32 %v5581_v21, %v5504_v51  ;;  %v9354_v21 = vpop.f32.mrf.mxu0  ;;  %v5995_v51 = vld [vmem:[#allocation12 + $0x19a0] sm:$0xff] }
 0xcbb   :  { %v5506_v40 = vpop.f32.mrf.mxu1 }
 0xcbc   :  { %v5584_v44 = vadd.f32 %v5583_v38, %v5506_v40  ;;  %v5991_v38 = vld [vmem:[#allocation12 + $0x1980] sm:$0xff]  ;;  %v5990_v40 = vld [vmem:[#allocation12 + $0x1978] sm:$0xff] }
 0xcbe   :  { %5850 = vmatprep.subr.mxu0 %v5584_v44  ;;  %v9356_v44 = vpop.f32.mrf.mxu0 }
 0xcbf   :  { %5851 = vmatpush1.msra.mxu0 %v5582_v46  ;;  %v5986_v46 = vld [vmem:[#allocation12 + $0x1958] sm:$0xff] }
 0xcc0   :  { %5852 = vmatprep.subr.mxu0 %v5578_v50  ;;  %v5985_v50 = vld [vmem:[#allocation12 + $0x1950] sm:$0xff] }
 0xcc1   :  { %5853 = vmatpush1.msra.mxu0 %v5576_v47  ;;  %v6141_v47 = vld [vmem:[#allocation12 + $0x1e30] sm:$0xff] }
 0xcc2   :  { %9089 = vmatmul.mubr.msk.f32.vlgmr.msra.gmra.mxu0 %vm4536_vm6, %v5737_v63  ;;  %6255 = vmatprep.subr.mxu0 %v6061_v35  ;;  %v6040_v63 = vld [vmem:[#allocation12 + $0x1b08] sm:$0xff] }
 0xcc3   :  { %6256 = vmatpush1.msra.mxu0 %v6060_v49  ;;  %5892 = vmatprep.mubr.f32.mxu0 %v9986_v0  ;;  %v6140_v35 = vld [vmem:[#allocation12 + $0x1e28] sm:$0xff]  ;;  %v9357_v49 = vpop.f32.mrf.mxu0 }
 0xcc4   :  { %6257 = vmatprep.subr.mxu0 %v6056_v10 }
 0xcc5   :  { %6258 = vmatpush1.msra.mxu0 %v6055_v14  ;;  %v6136_v14 = vld [vmem:[#allocation12 + $0x1e08] sm:$0xff] }
 0xcc6   :  { %9090 = vmatmul.mubr.msk.f32.gmra.mxu0 %vm4536_vm6, %v11311_v41  ;;  %6259 = vmatprep.subr.mxu0 %v6051_v54  ;;  %v6135_v54 = vld [vmem:[#allocation12 + $0x1e00] sm:$0xff] }
 0xcc7   :  { %6260 = vmatpush1.msra.mxu0 %v6050_v16  ;;  %6319 = vmatprep.mubr.f32.mxu0 %v11037_v53 }
 0xcc8   :  { %6261 = vmatprep.subr.mxu0 %v6046_v6  ;;  %v6131_v6 = vld [vmem:[#allocation12 + $0x1de0] sm:$0xff] }
 0xcc9   :  { %6262 = vmatpush1.msra.mxu0 %v6045_v5  ;;  %v9358_v5 = vadd.f32 %v9357_v49, %v9356_v44  ;;  %v6205_v44 = vld [vmem:[#allocation12 + $0x2030] sm:$0xff]  ;;  %v6091_v49 = vld [vmem:[#allocation12 + $0x1ca0] sm:$0xff] }
 0xcca   :  { %6263 = vmatprep.subr.mxu0 %v6041_v60  ;;  %v6130_v60 = vld [vmem:[#allocation12 + $0x1dd8] sm:$0xff] }
 0xccb   :  { %6264 = vmatpush1.msra.mxu0 %v6040_v63 }
 0xccc   :  { %6265 = vmatprep.subr.mxu0 %v6036_v20  ;;  %v6126_v20 = vld [vmem:[#allocation12 + $0x1db8] sm:$0xff] }
 0xccd   :  { %6266 = vmatpush1.msra.mxu0 %v6035_v23  ;;  %v9355_v23 = vadd.f32 %v9354_v21, %v9353_v55  ;;  %v6111_v55 = vld [vmem:[#allocation12 + $0x1d40] sm:$0xff] }
 0xcce   :  { %6267 = vmatprep.subr.mxu0 %v6031_v9  ;;  %v6211_v21 = vld [vmem:[#allocation12 + $0x2060] sm:$0xff] }
 0xccf   :  { %6268 = vmatpush1.msra.mxu0 %v6030_v19  ;;  %v6125_v19 = vld [vmem:[#allocation12 + $0x1db0] sm:$0xff] }
 0xcd0   :  { %6269 = vmatprep.subr.mxu0 %v6026_v61 }
 0xcd1   :  { %6270 = vmatpush1.msra.mxu0 %v6025_v18  ;;  %v6121_v18 = vld [vmem:[#allocation12 + $0x1d90] sm:$0xff] }
 0xcd2   :  { %6271 = vmatprep.subr.mxu0 %v6021_v1 }
 0xcd3   :  { %6272 = vmatpush1.msra.mxu0 %v6020_v26  ;;  %v6120_v26 = vld [vmem:[#allocation12 + $0x1d88] sm:$0xff] }
 0xcd4   :  { %6273 = vmatprep.subr.mxu0 %v6016_v59  ;;  %v6116_v59 = vld [vmem:[#allocation12 + $0x1d68] sm:$0xff] }
 0xcd5   :  { %6274 = vmatpush1.msra.mxu0 %v6015_v27  ;;  %v6221_v27 = vld [vmem:[#allocation12 + $0x20b0] sm:$0xff] }
 0xcd6   :  { %6275 = vmatprep.subr.mxu0 %v6011_v22  ;;  %v6115_v22 = vld [vmem:[#allocation12 + $0x1d60] sm:$0xff] }
 0xcd7   :  { %6276 = vmatpush1.msra.mxu0 %v6010_v11  ;;  %v6220_v11 = vld [vmem:[#allocation12 + $0x20a8] sm:$0xff] }
 0xcd8   :  { %6277 = vmatprep.subr.mxu0 %v6006_v42  ;;  %v6216_v42 = vld [vmem:[#allocation12 + $0x2088] sm:$0xff] }
 0xcd9   :  { %6278 = vmatpush1.msra.mxu0 %v6005_v2  ;;  %v6110_v2 = vld [vmem:[#allocation12 + $0x1d38] sm:$0xff] }
 0xcda   :  { %6279 = vmatprep.subr.mxu0 %v6001_v29  ;;  %v6215_v29 = vld [vmem:[#allocation12 + $0x2080] sm:$0xff] }
 0xcdb   :  { %6280 = vmatpush1.msra.mxu0 %v6000_v52  ;;  %v6106_v52 = vld [vmem:[#allocation12 + $0x1d18] sm:$0xff] }
 0xcdc   :  { %6281 = vmatprep.subr.mxu0 %v5996_v36  ;;  %v6105_v36 = vld [vmem:[#allocation12 + $0x1d10] sm:$0xff] }
 0xcdd   :  { %6282 = vmatpush1.msra.mxu0 %v5995_v51  ;;  %v6210_v51 = vld [vmem:[#allocation12 + $0x2058] sm:$0xff] }
 0xcde   :  { %6283 = vmatprep.subr.mxu0 %v5991_v38  ;;  %v6206_v38 = vld [vmem:[#allocation12 + $0x2038] sm:$0xff] }
 0xcdf   :  { %6284 = vmatpush1.msra.mxu0 %v5990_v40  ;;  %v6100_v40 = vld [vmem:[#allocation12 + $0x1ce8] sm:$0xff] }
 0xce0   :  { %6285 = vmatprep.subr.mxu0 %v5986_v46  ;;  %v6096_v46 = vld [vmem:[#allocation12 + $0x1cc8] sm:$0xff] }
 0xce1   :  { %v5727_v10 = vpop.f32.mrf.mxu1  ;;  %6286 = vmatpush1.msra.mxu0 %v5985_v50  ;;  %v6201_v50 = vld [vmem:[#allocation12 + $0x2010] sm:$0xff] }
 0xce2   :  { %6287 = vmatprep.subr.mxu0 %v6141_v47  ;;  %v5728_v1 = vadd.f32 %v9355_v23, %v5727_v10  ;;  %v6095_v47 = vld [vmem:[#allocation12 + $0x1cc0] sm:$0xff]  ;;  %v6196_v10 = vld [vmem:[#allocation12 + $0x1fe8] sm:$0xff] }
 0xce3   :  { %v5729_v16 = vpop.f32.mrf.mxu1  ;;  %6288 = vmatpush2.msra.mxu0 %v6140_v35  ;;  %v6200_v35 = vld [vmem:[#allocation12 + $0x2008] sm:$0xff] }
 0xce4   :  { %6289 = vmatprep.subr.mxu0 %v6136_v14  ;;  %v6090_v14 = vld [vmem:[#allocation12 + $0x1c98] sm:$0xff]  ;;  %v6080_v23 = vld [vmem:[#allocation12 + $0x1c48] sm:$0xff] }
 0xce5   :  { %v5732_v63 = vpop.f32.mrf.mxu1  ;;  %6290 = vmatpush2.msra.mxu0 %v6135_v54  ;;  %v6195_v54 = vld [vmem:[#allocation12 + $0x1fe0] sm:$0xff]  ;;  %v6086_v16 = vld [vmem:[#allocation12 + $0x1c78] sm:$0xff] }
 0xce6   :  { %v5733_v9 = vadd.f32 %v9358_v5, %v5732_v63  ;;  %6291 = vmatprep.subr.mxu0 %v6131_v6  ;;  %v6191_v6 = vld [vmem:[#allocation12 + $0x1fc0] sm:$0xff]  ;;  %v6085_v5 = vld [vmem:[#allocation12 + $0x1c70] sm:$0xff] }
 0xce7   :  { %v5734_v61 = vpop.f32.mrf.mxu1  ;;  %6292 = vmatpush2.msra.mxu0 %v6130_v60  ;;  %v6190_v60 = vld [vmem:[#allocation12 + $0x1fb8] sm:$0xff]  ;;  %v6081_v63 = vld [vmem:[#allocation12 + $0x1c50] sm:$0xff] }
 0xce8   :  { %9627 = vmatprep.subr.mxu1 %v5733_v9  ;;  %6293 = vmatprep.subr.mxu0 %v6126_v20  ;;  %v6186_v20 = vld [vmem:[#allocation12 + $0x1f98] sm:$0xff]  ;;  %v6181_v61 = vld [vmem:[#allocation12 + $0x1f70] sm:$0xff] }
 0xce9   :  { %9628 = vmatpush3.msra.mxu1 %v5733_v9  ;;  %6294 = vmatpush2.msra.mxu0 %v6125_v19  ;;  %v6185_v9 = vld [vmem:[#allocation12 + $0x1f90] sm:$0xff]  ;;  %v6076_v19 = vld [vmem:[#allocation12 + $0x1c28] sm:$0xff] }
 0xcea   :  { %9629 = vmatprep.subr.mxu1 %v5728_v1  ;;  %6295 = vmatprep.subr.mxu0 %v6121_v18  ;;  %v6075_v18 = vld [vmem:[#allocation12 + $0x1c20] sm:$0xff] }
 0xceb   :  { %9630 = vmatpush3.msra.mxu1 %v5728_v1  ;;  %6296 = vmatpush2.msra.mxu0 %v6120_v26  ;;  %v6180_v1 = vld [vmem:[#allocation12 + $0x1f68] sm:$0xff]  ;;  %v6071_v26 = vld [vmem:[#allocation12 + $0x1c00] sm:$0xff] }
 0xcec   :  { %9632 = vmatmul.mubr.msk.f32.vlgmr.msra.gmra.mxu1 %vm4536_vm6, %v11311_v41  ;;  %6297 = vmatprep.subr.mxu0 %v6116_v59  ;;  %v6101_v41 = vld [vmem:[#allocation12 + $0x1cf0] sm:$0xff]  ;;  %v6176_v59 = vld [vmem:[#allocation12 + $0x1f48] sm:$0xff] }
 0xced   :  { %6332 = vmatprep.subr.mxu1 %v6221_v27  ;;  %6298 = vmatpush2.msra.mxu0 %v6115_v22  ;;  %v6070_v27 = vld [vmem:[#allocation12 + $0x1bf8] sm:$0xff]  ;;  %v6175_v22 = vld [vmem:[#allocation12 + $0x1f40] sm:$0xff] }
 0xcee   :  { %6333 = vmatpush1.msra.mxu1 %v6220_v11  ;;  %9093 = vmatprep.mubr.msk.f32.mxu1 %vm3337_vm5, %v11049_v37  ;;  %v6066_v11 = vld [vmem:[#allocation12 + $0x1bd8] sm:$0xff] }
 0xcef   :  { %6299 = vmatprep.subr.mxu0 %v6111_v55  ;;  %6334 = vmatprep.subr.mxu1 %v6216_v42  ;;  %v6171_v55 = vld [vmem:[#allocation12 + $0x1f20] sm:$0xff]  ;;  %v6065_v42 = vld [vmem:[#allocation12 + $0x1bd0] sm:$0xff] }
 0xcf0   :  { %6300 = vmatpush2.msra.mxu0 %v6110_v2  ;;  %6335 = vmatpush1.msra.mxu1 %v6215_v29  ;;  %v6170_v2 = vld [vmem:[#allocation12 + $0x1f18] sm:$0xff] }
 0xcf1   :  { %6301 = vmatprep.subr.mxu0 %v6106_v52  ;;  %6336 = vmatprep.subr.mxu1 %v6211_v21  ;;  %v6166_v29 = vld [vmem:[#allocation12 + $0x1ef8] sm:$0xff]  ;;  %v6223_v52 = vld [vmem:[#allocation12 + $0x20c0] sm:$0xff]  ;;  %v6165_v21 = vld [vmem:[#allocation12 + $0x1ef0] sm:$0xff] }
 0xcf2   :  { %6302 = vmatpush2.msra.mxu0 %v6105_v36  ;;  %6337 = vmatpush1.msra.mxu1 %v6210_v51  ;;  %v6222_v36 = vld [vmem:[#allocation12 + $0x20b8] sm:$0xff]  ;;  %v6161_v51 = vld [vmem:[#allocation12 + $0x1ed0] sm:$0xff] }
 0xcf3   :  { %6303 = vmatprep.subr.mxu0 %v6101_v41  ;;  %6338 = vmatprep.subr.mxu1 %v6206_v38  ;;  %v6218_v41 = vld [vmem:[#allocation12 + $0x2098] sm:$0xff]  ;;  %v6160_v38 = vld [vmem:[#allocation12 + $0x1ec8] sm:$0xff] }
 0xcf4   :  { %6304 = vmatpush2.msra.mxu0 %v6100_v40  ;;  %6339 = vmatpush1.msra.mxu1 %v6205_v44  ;;  %v6217_v40 = vld [vmem:[#allocation12 + $0x2090] sm:$0xff]  ;;  %v6156_v44 = vld [vmem:[#allocation12 + $0x1ea8] sm:$0xff] }
 0xcf5   :  { %6305 = vmatprep.subr.mxu0 %v6096_v46  ;;  %6340 = vmatprep.subr.mxu1 %v6201_v50  ;;  %v6213_v46 = vld [vmem:[#allocation12 + $0x2070] sm:$0xff]  ;;  %v6155_v50 = vld [vmem:[#allocation12 + $0x1ea0] sm:$0xff] }
 0xcf6   :  { %6306 = vmatpush2.msra.mxu0 %v6095_v47  ;;  %6341 = vmatpush1.msra.mxu1 %v6200_v35  ;;  %v6212_v47 = vld [vmem:[#allocation12 + $0x2068] sm:$0xff]  ;;  %v6151_v35 = vld [vmem:[#allocation12 + $0x1e80] sm:$0xff] }
 0xcf7   :  { %6307 = vmatprep.subr.mxu0 %v6091_v49  ;;  %6342 = vmatprep.subr.mxu1 %v6196_v10  ;;  %v6208_v49 = vld [vmem:[#allocation12 + $0x2048] sm:$0xff]  ;;  %v6150_v10 = vld [vmem:[#allocation12 + $0x1e78] sm:$0xff] }
 0xcf8   :  { %6308 = vmatpush2.msra.mxu0 %v6090_v14  ;;  %6343 = vmatpush1.msra.mxu1 %v6195_v54  ;;  %v6207_v14 = vld [vmem:[#allocation12 + $0x2040] sm:$0xff]  ;;  %v6146_v54 = vld [vmem:[#allocation12 + $0x1e58] sm:$0xff] }
 0xcf9   :  { %6309 = vmatprep.subr.mxu0 %v6086_v16  ;;  %6344 = vmatprep.subr.mxu1 %v6191_v6  ;;  %v6203_v16 = vld [vmem:[#allocation12 + $0x2020] sm:$0xff]  ;;  %v6145_v6 = vld [vmem:[#allocation12 + $0x1e50] sm:$0xff] }
 0xcfa   :  { %6310 = vmatpush2.msra.mxu0 %v6085_v5  ;;  %6345 = vmatpush1.msra.mxu1 %v6190_v60  ;;  %v6202_v5 = vld [vmem:[#allocation12 + $0x2018] sm:$0xff]  ;;  %v6251_v60 = vld [vmem:[#allocation12 + $0x21a0] sm:$0xff] }
 0xcfb   :  { %6311 = vmatprep.subr.mxu0 %v6081_v63  ;;  %6346 = vmatprep.subr.mxu1 %v6186_v20  ;;  %v6198_v63 = vld [vmem:[#allocation12 + $0x1ff8] sm:$0xff] }
 0xcfc   :  { %6312 = vmatpush2.msra.mxu0 %v6080_v23  ;;  %6347 = vmatpush1.msra.mxu1 %v6185_v9  ;;  %v6250_v20 = vld [vmem:[#allocation12 + $0x2198] sm:$0xff]  ;;  %v6197_v23 = vld [vmem:[#allocation12 + $0x1ff0] sm:$0xff] }
 0xcfd   :  { %6313 = vmatprep.subr.mxu0 %v6076_v19  ;;  %6348 = vmatprep.subr.mxu1 %v6181_v61  ;;  %v6246_v9 = vld [vmem:[#allocation12 + $0x2178] sm:$0xff]  ;;  %v6193_v19 = vld [vmem:[#allocation12 + $0x1fd0] sm:$0xff] }
 0xcfe   :  { %6314 = vmatpush2.msra.mxu0 %v6075_v18  ;;  %6349 = vmatpush1.msra.mxu1 %v6180_v1  ;;  %v6245_v61 = vld [vmem:[#allocation12 + $0x2170] sm:$0xff]  ;;  %v6192_v18 = vld [vmem:[#allocation12 + $0x1fc8] sm:$0xff] }
 0xcff   :  { %6315 = vmatprep.subr.mxu0 %v6071_v26  ;;  %6350 = vmatprep.subr.mxu1 %v6176_v59  ;;  %v6241_v1 = vld [vmem:[#allocation12 + $0x2150] sm:$0xff]  ;;  %v6188_v26 = vld [vmem:[#allocation12 + $0x1fa8] sm:$0xff] }
 0xd00   :  { %6316 = vmatpush2.msra.mxu0 %v6070_v27  ;;  %6351 = vmatpush1.msra.mxu1 %v6175_v22  ;;  %v6240_v59 = vld [vmem:[#allocation12 + $0x2148] sm:$0xff]  ;;  %v6187_v27 = vld [vmem:[#allocation12 + $0x1fa0] sm:$0xff] }
 0xd01   :  { %6317 = vmatprep.subr.mxu0 %v6066_v11  ;;  %6352 = vmatprep.subr.mxu1 %v6171_v55  ;;  %v6236_v22 = vld [vmem:[#allocation12 + $0x2128] sm:$0xff]  ;;  %v6183_v11 = vld [vmem:[#allocation12 + $0x1f80] sm:$0xff] }
 0xd02   :  { %6318 = vmatpush2.msra.mxu0 %v6065_v42  ;;  %6353 = vmatpush1.msra.mxu1 %v6170_v2  ;;  %v6235_v55 = vld [vmem:[#allocation12 + $0x2120] sm:$0xff]  ;;  %v6182_v42 = vld [vmem:[#allocation12 + $0x1f78] sm:$0xff] }
 0xd03   :  { %6320 = vmatmul.mubr.f32.vlgmr.msra.gmra.mxu0 %v11039_v25  ;;  %6354 = vmatprep.subr.mxu1 %v6166_v29  ;;  %v6231_v2 = vld [vmem:[#allocation12 + $0x2100] sm:$0xff]  ;;  %v6178_v29 = vld [vmem:[#allocation12 + $0x1f58] sm:$0xff] }
 0xd04   :  { %6486 = vmatprep.subr.mxu0 %v6223_v52  ;;  %6325 = vmatprep.mubr.f32.mxu0 %v11043_v31  ;;  %v6230_v52 = vld [vmem:[#allocation12 + $0x20f8] sm:$0xff] }
 0xd05   :  { %6355 = vmatpush1.msra.mxu1 %v6165_v21  ;;  %6487 = vmatpush1.msra.mxu0 %v6222_v36  ;;  %v6177_v21 = vld [vmem:[#allocation12 + $0x1f50] sm:$0xff]  ;;  %v6226_v36 = vld [vmem:[#allocation12 + $0x20d8] sm:$0xff] }
 0xd06   :  { %6356 = vmatprep.subr.mxu1 %v6161_v51  ;;  %6488 = vmatprep.subr.mxu0 %v6218_v41  ;;  %v6173_v51 = vld [vmem:[#allocation12 + $0x1f30] sm:$0xff] }
 0xd07   :  { %6357 = vmatpush1.msra.mxu1 %v6160_v38  ;;  %6489 = vmatpush1.msra.mxu0 %v6217_v40  ;;  %v6225_v41 = vld [vmem:[#allocation12 + $0x20d0] sm:$0xff]  ;;  %v6172_v38 = vld [vmem:[#allocation12 + $0x1f28] sm:$0xff]  ;;  %v6063_v40 = vld [vmem:[#allocation12 + $0x1bc0] sm:$0xff] }
 0xd08   :  { %6326 = vmatmul.mubr.f32.gmra.mxu0 %v11045_v34  ;;  %6358 = vmatprep.subr.mxu1 %v6156_v44  ;;  %v6168_v44 = vld [vmem:[#allocation12 + $0x1f08] sm:$0xff] }
 0xd09   :  { %6490 = vmatprep.subr.mxu0 %v6213_v46  ;;  %6359 = vmatpush1.msra.mxu1 %v6155_v50  ;;  %v6062_v46 = vld [vmem:[#allocation12 + $0x1bb8] sm:$0xff]  ;;  %v6167_v50 = vld [vmem:[#allocation12 + $0x1f00] sm:$0xff] }
 0xd0a   :  { %6491 = vmatpush1.msra.mxu0 %v6212_v47  ;;  %9095 = vmatprep.mubr.msk.f32.mxu0 %vm3337_vm5, %v11049_v37  ;;  %v6058_v47 = vld [vmem:[#allocation12 + $0x1b98] sm:$0xff] }
 0xd0b   :  { %6360 = vmatprep.subr.mxu1 %v6151_v35  ;;  %6492 = vmatprep.subr.mxu0 %v6208_v49  ;;  %v6163_v35 = vld [vmem:[#allocation12 + $0x1ee0] sm:$0xff]  ;;  %v6057_v49 = vld [vmem:[#allocation12 + $0x1b90] sm:$0xff] }
 0xd0c   :  { %6361 = vmatpush1.msra.mxu1 %v6150_v10  ;;  %6493 = vmatpush1.msra.mxu0 %v6207_v14  ;;  %v6162_v10 = vld [vmem:[#allocation12 + $0x1ed8] sm:$0xff]  ;;  %v6053_v14 = vld [vmem:[#allocation12 + $0x1b70] sm:$0xff] }
 0xd0d   :  { %6362 = vmatprep.subr.mxu1 %v6146_v54  ;;  %6494 = vmatprep.subr.mxu0 %v6203_v16  ;;  %v6158_v54 = vld [vmem:[#allocation12 + $0x1eb8] sm:$0xff]  ;;  %v6052_v16 = vld [vmem:[#allocation12 + $0x1b68] sm:$0xff] }
 0xd0e   :  { %6363 = vmatpush1.msra.mxu1 %v6145_v6  ;;  %6495 = vmatpush1.msra.mxu0 %v6202_v5  ;;  %v6157_v6 = vld [vmem:[#allocation12 + $0x1eb0] sm:$0xff]  ;;  %v6048_v5 = vld [vmem:[#allocation12 + $0x1b48] sm:$0xff] }
 0xd0f   :  { %6384 = vmatprep.subr.mxu1 %v6251_v60  ;;  %6496 = vmatprep.subr.mxu0 %v6198_v63  ;;  %v6153_v60 = vld [vmem:[#allocation12 + $0x1e90] sm:$0xff]  ;;  %v6047_v63 = vld [vmem:[#allocation12 + $0x1b40] sm:$0xff] }
 0xd10   :  { %6385 = vmatpush2.msra.mxu1 %v6250_v20  ;;  %6497 = vmatpush1.msra.mxu0 %v6197_v23  ;;  %v6152_v20 = vld [vmem:[#allocation12 + $0x1e88] sm:$0xff]  ;;  %v6043_v23 = vld [vmem:[#allocation12 + $0x1b20] sm:$0xff] }
 0xd11   :  { %6386 = vmatprep.subr.mxu1 %v6246_v9  ;;  %6498 = vmatprep.subr.mxu0 %v6193_v19  ;;  %v6148_v9 = vld [vmem:[#allocation12 + $0x1e68] sm:$0xff]  ;;  %v6042_v19 = vld [vmem:[#allocation12 + $0x1b18] sm:$0xff] }
 0xd12   :  { %6387 = vmatpush2.msra.mxu1 %v6245_v61  ;;  %6499 = vmatpush1.msra.mxu0 %v6192_v18  ;;  %v6147_v61 = vld [vmem:[#allocation12 + $0x1e60] sm:$0xff]  ;;  %v6038_v18 = vld [vmem:[#allocation12 + $0x1af8] sm:$0xff] }
 0xd13   :  { %6388 = vmatprep.subr.mxu1 %v6241_v1  ;;  %6500 = vmatprep.subr.mxu0 %v6188_v26  ;;  %v6253_v1 = vld [vmem:[#allocation12 + $0x21b0] sm:$0xff] }
 0xd14   :  { %6389 = vmatpush2.msra.mxu1 %v6240_v59  ;;  %6501 = vmatpush1.msra.mxu0 %v6187_v27  ;;  %v6037_v26 = vld [vmem:[#allocation12 + $0x1af0] sm:$0xff]  ;;  %v6252_v59 = vld [vmem:[#allocation12 + $0x21a8] sm:$0xff] }
 0xd15   :  { %6390 = vmatprep.subr.mxu1 %v6236_v22  ;;  %6502 = vmatprep.subr.mxu0 %v6183_v11  ;;  %v6033_v27 = vld [vmem:[#allocation12 + $0x1ad0] sm:$0xff]  ;;  %v6248_v22 = vld [vmem:[#allocation12 + $0x2188] sm:$0xff] }
 0xd16   :  { %6391 = vmatpush2.msra.mxu1 %v6235_v55  ;;  %6503 = vmatpush1.msra.mxu0 %v6182_v42  ;;  %v6032_v11 = vld [vmem:[#allocation12 + $0x1ac8] sm:$0xff]  ;;  %v6247_v55 = vld [vmem:[#allocation12 + $0x2180] sm:$0xff] }
 0xd17   :  { %6392 = vmatprep.subr.mxu1 %v6231_v2  ;;  %6504 = vmatprep.subr.mxu0 %v6178_v29  ;;  %v6028_v42 = vld [vmem:[#allocation12 + $0x1aa8] sm:$0xff]  ;;  %v6243_v2 = vld [vmem:[#allocation12 + $0x2160] sm:$0xff] }
 0xd18   :  { %6393 = vmatpush2.msra.mxu1 %v6230_v52  ;;  %6505 = vmatpush1.msra.mxu0 %v6177_v21  ;;  %v6027_v29 = vld [vmem:[#allocation12 + $0x1aa0] sm:$0xff]  ;;  %v6242_v52 = vld [vmem:[#allocation12 + $0x2158] sm:$0xff] }
 0xd19   :  { %6394 = vmatprep.subr.mxu1 %v6226_v36  ;;  %6506 = vmatprep.subr.mxu0 %v6173_v51  ;;  %v6023_v21 = vld [vmem:[#allocation12 + $0x1a80] sm:$0xff]  ;;  %v6238_v36 = vld [vmem:[#allocation12 + $0x2138] sm:$0xff] }
 0xd1a   :  { %6395 = vmatpush2.msra.mxu1 %v6225_v41  ;;  %6507 = vmatpush1.msra.mxu0 %v6172_v38  ;;  %v6022_v51 = vld [vmem:[#allocation12 + $0x1a78] sm:$0xff]  ;;  %v6237_v41 = vld [vmem:[#allocation12 + $0x2130] sm:$0xff] }
 0xd1b   :  { %6397 = vmatmul.mubr.f32.vlgmr.msra.gmra.mxu1 %v11051_v57  ;;  %6409 = vmatprep.subr.mxu1 %v6063_v40  ;;  %v6018_v38 = vld [vmem:[#allocation12 + $0x1a58] sm:$0xff]  ;;  %v6233_v40 = vld [vmem:[#allocation12 + $0x2110] sm:$0xff] }
 0xd1c   :  { %6508 = vmatprep.subr.mxu0 %v6168_v44  ;;  %9094 = vmatprep.mubr.msk.f32.mxu1 %vm3337_vm5, %v11056_v3  ;;  %v6017_v44 = vld [vmem:[#allocation12 + $0x1a50] sm:$0xff] }
 0xd1d   :  { %6410 = vmatpush1.msra.mxu1 %v6062_v46  ;;  %6509 = vmatpush1.msra.mxu0 %v6167_v50  ;;  %v6232_v46 = vld [vmem:[#allocation12 + $0x2108] sm:$0xff]  ;;  %v6013_v50 = vld [vmem:[#allocation12 + $0x1a30] sm:$0xff] }
 0xd1e   :  { %6411 = vmatprep.subr.mxu1 %v6058_v47  ;;  %6510 = vmatprep.subr.mxu0 %v6163_v35  ;;  %v6228_v47 = vld [vmem:[#allocation12 + $0x20e8] sm:$0xff] }
 0xd1f   :  { %6412 = vmatpush1.msra.mxu1 %v6057_v49  ;;  %6511 = vmatpush1.msra.mxu0 %v6162_v10  ;;  %v6012_v35 = vld [vmem:[#allocation12 + $0x1a28] sm:$0xff]  ;;  %v6227_v49 = vld [vmem:[#allocation12 + $0x20e0] sm:$0xff] }
 0xd20   :  { %6403 = vmatmul.mubr.f32.gmra.mxu1 %v11058_v28  ;;  %6413 = vmatprep.subr.mxu1 %v6053_v14  ;;  %v6008_v10 = vld [vmem:[#allocation12 + $0x1a08] sm:$0xff] }
 0xd21   :  { %6512 = vmatprep.subr.mxu0 %v6158_v54  ;;  %6414 = vmatpush1.msra.mxu1 %v6052_v16  ;;  %v6144_v14 = vld [vmem:[#allocation12 + $0x1e48] sm:$0xff]  ;;  %v6007_v54 = vld [vmem:[#allocation12 + $0x1a00] sm:$0xff] }
 0xd22   :  { %6473 = vmatprep.mubr.f32.mxu1 %v11037_v53  ;;  %6513 = vmatpush1.msra.mxu0 %v6157_v6  ;;  %v6064_v16 = vld [vmem:[#allocation12 + $0x1bc8] sm:$0xff]  ;;  %v6003_v6 = vld [vmem:[#allocation12 + $0x19e0] sm:$0xff] }
 0xd23   :  { %6415 = vmatprep.subr.mxu1 %v6048_v5  ;;  %6514 = vmatprep.subr.mxu0 %v6153_v60  ;;  %v6139_v5 = vld [vmem:[#allocation12 + $0x1e20] sm:$0xff]  ;;  %v6002_v60 = vld [vmem:[#allocation12 + $0x19d8] sm:$0xff] }
 0xd24   :  { %6416 = vmatpush1.msra.mxu1 %v6047_v63  ;;  %6515 = vmatpush1.msra.mxu0 %v6152_v20  ;;  %v6059_v63 = vld [vmem:[#allocation12 + $0x1ba0] sm:$0xff]  ;;  %v5998_v20 = vld [vmem:[#allocation12 + $0x19b8] sm:$0xff] }
 0xd25   :  { %6417 = vmatprep.subr.mxu1 %v6043_v23  ;;  %6516 = vmatprep.subr.mxu0 %v6148_v9  ;;  %v6134_v23 = vld [vmem:[#allocation12 + $0x1df8] sm:$0xff]  ;;  %v5997_v9 = vld [vmem:[#allocation12 + $0x19b0] sm:$0xff] }
 0xd26   :  { %6418 = vmatpush1.msra.mxu1 %v6042_v19  ;;  %6517 = vmatpush1.msra.mxu0 %v6147_v61  ;;  %v6054_v19 = vld [vmem:[#allocation12 + $0x1b78] sm:$0xff]  ;;  %v5993_v61 = vld [vmem:[#allocation12 + $0x1990] sm:$0xff] }
 0xd27   :  { %6419 = vmatprep.subr.mxu1 %v6038_v18  ;;  %6538 = vmatprep.subr.mxu0 %v6253_v1  ;;  %v6129_v18 = vld [vmem:[#allocation12 + $0x1dd0] sm:$0xff]  ;;  %v5992_v1 = vld [vmem:[#allocation12 + $0x1988] sm:$0xff] }
 0xd28   :  { %6420 = vmatpush1.msra.mxu1 %v6037_v26  ;;  %6539 = vmatpush2.msra.mxu0 %v6252_v59  ;;  %v6049_v26 = vld [vmem:[#allocation12 + $0x1b50] sm:$0xff]  ;;  %v5988_v59 = vld [vmem:[#allocation12 + $0x1968] sm:$0xff] }
 0xd29   :  { %6421 = vmatprep.subr.mxu1 %v6033_v27  ;;  %6540 = vmatprep.subr.mxu0 %v6248_v22  ;;  %v6124_v27 = vld [vmem:[#allocation12 + $0x1da8] sm:$0xff]  ;;  %v5987_v22 = vld [vmem:[#allocation12 + $0x1960] sm:$0xff] }
 0xd2a   :  { %6422 = vmatpush1.msra.mxu1 %v6032_v11  ;;  %6541 = vmatpush2.msra.mxu0 %v6247_v55  ;;  %v6044_v11 = vld [vmem:[#allocation12 + $0x1b28] sm:$0xff]  ;;  %v6143_v55 = vld [vmem:[#allocation12 + $0x1e40] sm:$0xff] }
 0xd2b   :  { %6423 = vmatprep.subr.mxu1 %v6028_v42  ;;  %6542 = vmatprep.subr.mxu0 %v6243_v2  ;;  %v6119_v42 = vld [vmem:[#allocation12 + $0x1d80] sm:$0xff]  ;;  %v6142_v2 = vld [vmem:[#allocation12 + $0x1e38] sm:$0xff] }
 0xd2c   :  { %6424 = vmatpush1.msra.mxu1 %v6027_v29  ;;  %6543 = vmatpush2.msra.mxu0 %v6242_v52  ;;  %v6039_v29 = vld [vmem:[#allocation12 + $0x1b00] sm:$0xff]  ;;  %v6138_v52 = vld [vmem:[#allocation12 + $0x1e18] sm:$0xff] }
 0xd2d   :  { %6425 = vmatprep.subr.mxu1 %v6023_v21  ;;  %6544 = vmatprep.subr.mxu0 %v6238_v36  ;;  %v6114_v21 = vld [vmem:[#allocation12 + $0x1d58] sm:$0xff] }
 0xd2e   :  { %6426 = vmatpush1.msra.mxu1 %v6022_v51  ;;  %6545 = vmatpush2.msra.mxu0 %v6237_v41  ;;  %v6034_v36 = vld [vmem:[#allocation12 + $0x1ad8] sm:$0xff]  ;;  %v6133_v51 = vld [vmem:[#allocation12 + $0x1df0] sm:$0xff] }
 0xd2f   :  { %6427 = vmatprep.subr.mxu1 %v6018_v38  ;;  %6546 = vmatprep.subr.mxu0 %v6233_v40  ;;  %v6109_v41 = vld [vmem:[#allocation12 + $0x1d30] sm:$0xff]  ;;  %v4845_v38 = vadd.f32 %v11297_v33, %v11264_v30  ;;  %v6132_v40 = vld [vmem:[#allocation12 + $0x1de8] sm:$0xff]  ;;  %v6123_v30 = vld [vmem:[#allocation12 + $0x1da0] sm:$0xff] }
 0xd30   :  { %6428 = vmatpush1.msra.mxu1 %v6017_v44  ;;  %6547 = vmatpush2.msra.mxu0 %v6232_v46  ;;  %v6029_v44 = vld [vmem:[#allocation12 + $0x1ab0] sm:$0xff]  ;;  %v6128_v46 = vld [vmem:[#allocation12 + $0x1dc8] sm:$0xff]  ;;  %v6099_v33 = vld [vmem:[#allocation12 + $0x1ce0] sm:$0xff] }
 0xd31   :  { %6429 = vmatprep.subr.mxu1 %v6013_v50  ;;  %6548 = vmatprep.subr.mxu0 %v6228_v47  ;;  %v6104_v50 = vld [vmem:[#allocation12 + $0x1d08] sm:$0xff] }
 0xd32   :  { %6430 = vmatpush1.msra.mxu1 %v6012_v35  ;;  %6549 = vmatpush2.msra.mxu0 %v6227_v49  ;;  %v4847_v35 = vadd.f32 %v11299_v39, %v11268_v17  ;;  %v6127_v49 = vld [vmem:[#allocation12 + $0x1dc0] sm:$0xff]  ;;  %v6118_v17 = vld [vmem:[#allocation12 + $0x1d78] sm:$0xff] }
 0xd33   :  { %6431 = vmatprep.subr.mxu1 %v6008_v10  ;;  %6551 = vmatmul.mubr.f32.vlgmr.msra.gmra.mxu0 %v11051_v57  ;;  %v6024_v10 = vld [vmem:[#allocation12 + $0x1a88] sm:$0xff]  ;;  %v6094_v39 = vld [vmem:[#allocation12 + $0x1cb8] sm:$0xff] }
 0xd34   :  { %9363 = vmatprep.subr.mxu0 %v6144_v14  ;;  %6432 = vmatpush1.msra.mxu1 %v6007_v54 }
 0xd35   :  { %9096 = vmatprep.mubr.msk.f32.mxu0 %vm3337_vm5, %v11056_v3  ;;  %9364 = vmatpush3.msra.mxu0 %v6064_v16  ;;  %v4851_v16 = vadd.f32 %v11301_v56, %v11271_v32  ;;  %v6113_v32 = vld [vmem:[#allocation12 + $0x1d50] sm:$0xff] }
 0xd36   :  { %6433 = vmatprep.subr.mxu1 %v6003_v6  ;;  %9365 = vmatprep.subr.mxu0 %v6139_v5  ;;  %v6122_v6 = vld [vmem:[#allocation12 + $0x1d98] sm:$0xff]  ;;  %v6019_v5 = vld [vmem:[#allocation12 + $0x1a60] sm:$0xff]  ;;  %v6089_v56 = vld [vmem:[#allocation12 + $0x1c90] sm:$0xff] }
 0xd37   :  { %6434 = vmatpush1.msra.mxu1 %v6002_v60  ;;  %9366 = vmatpush3.msra.mxu0 %v6059_v63 }
 0xd38   :  { %6435 = vmatprep.subr.mxu1 %v5998_v20  ;;  %6557 = vmatmul.mubr.f32.gmra.mxu0 %v11058_v28  ;;  %v6117_v20 = vld [vmem:[#allocation12 + $0x1d70] sm:$0xff] }
 0xd39   :  { %9367 = vmatprep.subr.mxu0 %v6134_v23  ;;  %6436 = vmatpush1.msra.mxu1 %v5997_v9  ;;  %v6014_v23 = vld [vmem:[#allocation12 + $0x1a38] sm:$0xff] }
 0xd3a   :  { %9368 = vmatpush3.msra.mxu0 %v6054_v19  ;;  %6627 = vmatprep.mubr.f32.mxu0 %v11037_v53  ;;  %v6137_v53 = vld [vmem:[#allocation12 + $0x1e10] sm:$0xff] }
 0xd3b   :  { %6437 = vmatprep.subr.mxu1 %v5993_v61  ;;  %9369 = vmatprep.subr.mxu0 %v6129_v18  ;;  %v6112_v61 = vld [vmem:[#allocation12 + $0x1d48] sm:$0xff]  ;;  %v6009_v18 = vld [vmem:[#allocation12 + $0x1a10] sm:$0xff] }
 0xd3c   :  { %6438 = vmatpush1.msra.mxu1 %v5992_v1  ;;  %9370 = vmatpush3.msra.mxu0 %v6049_v26  ;;  %v6108_v26 = vld [vmem:[#allocation12 + $0x1d28] sm:$0xff] }
 0xd3d   :  { %6439 = vmatprep.subr.mxu1 %v5988_v59  ;;  %9371 = vmatprep.subr.mxu0 %v6124_v27  ;;  %v6084_v59 = vld [vmem:[#allocation12 + $0x1c68] sm:$0xff]  ;;  %v6107_v27 = vld [vmem:[#allocation12 + $0x1d20] sm:$0xff] }
 0xd3e   :  { %6440 = vmatpush1.msra.mxu1 %v5987_v22  ;;  %9372 = vmatpush3.msra.mxu0 %v6044_v11  ;;  %v6004_v22 = vld [vmem:[#allocation12 + $0x19e8] sm:$0xff]  ;;  %v6103_v11 = vld [vmem:[#allocation12 + $0x1d00] sm:$0xff] }
 0xd3f   :  { %6441 = vmatprep.subr.mxu1 %v6143_v55  ;;  %9373 = vmatprep.subr.mxu0 %v6119_v42  ;;  %v6079_v55 = vld [vmem:[#allocation12 + $0x1c40] sm:$0xff]  ;;  %v6102_v42 = vld [vmem:[#allocation12 + $0x1cf8] sm:$0xff] }
 0xd40   :  { %6442 = vmatpush2.msra.mxu1 %v6142_v2  ;;  %9374 = vmatpush3.msra.mxu0 %v6039_v29  ;;  %v5999_v2 = vld [vmem:[#allocation12 + $0x19c0] sm:$0xff]  ;;  %v6074_v29 = vld [vmem:[#allocation12 + $0x1c18] sm:$0xff] }
 0xd41   :  { %6443 = vmatprep.subr.mxu1 %v6138_v52  ;;  %9375 = vmatprep.subr.mxu0 %v6114_v21  ;;  %v6097_v52 = vld [vmem:[#allocation12 + $0x1cd0] sm:$0xff]  ;;  %v5994_v21 = vld [vmem:[#allocation12 + $0x1998] sm:$0xff] }
 0xd42   :  { %6444 = vmatpush2.msra.mxu1 %v6137_v53  ;;  %9376 = vmatpush3.msra.mxu0 %v6034_v36  ;;  %v5811_v47 = vpop.f32.mrf.mxu0  ;;  %v6093_v53 = vld [vmem:[#allocation12 + $0x1cb0] sm:$0xff] }
 0xd43   :  { %6445 = vmatprep.subr.mxu1 %v6133_v51  ;;  %9377 = vmatprep.subr.mxu0 %v6109_v41  ;;  %v11344_v14 = vadd.f32 %v5811_v47, %v4845_v38  ;;  %v6069_v36 = vld [vmem:[#allocation12 + $0x1bf0] sm:$0xff]  ;;  %v6092_v51 = vld [vmem:[#allocation12 + $0x1ca8] sm:$0xff] }
 0xd44   :  { %6446 = vmatpush2.msra.mxu1 %v6132_v40  ;;  %9378 = vmatpush3.msra.mxu0 %v6029_v44  ;;  %v5813_v54 = vpop.f32.mrf.mxu0  ;;  %v5989_v41 = vld [vmem:[#allocation12 + $0x1970] sm:$0xff]  ;;  %v6088_v38 = vld [vmem:[#allocation12 + $0x1c88] sm:$0xff]  ;;  %v6087_v40 = vld [vmem:[#allocation12 + $0x1c80] sm:$0xff] }
 0xd45   :  { %6447 = vmatprep.subr.mxu1 %v6128_v46  ;;  %9379 = vmatprep.subr.mxu0 %v6104_v50  ;;  %v11348_v60 = vadd.f32 %v5813_v54, %v4847_v35  ;;  %v6083_v44 = vld [vmem:[#allocation12 + $0x1c60] sm:$0xff]  ;;  %v6082_v46 = vld [vmem:[#allocation12 + $0x1c58] sm:$0xff]  ;;  %v6077_v47 = vld [vmem:[#allocation12 + $0x1c30] sm:$0xff] }
 0xd46   :  { %6448 = vmatpush2.msra.mxu1 %v6127_v49  ;;  %9380 = vmatpush3.msra.mxu0 %v6024_v10  ;;  %v5817_v63 = vpop.f32.mrf.mxu0  ;;  %v6078_v50 = vld [vmem:[#allocation12 + $0x1c38] sm:$0xff]  ;;  %v6073_v35 = vld [vmem:[#allocation12 + $0x1c10] sm:$0xff]  ;;  %v6072_v49 = vld [vmem:[#allocation12 + $0x1c08] sm:$0xff] }
 0xd47   :  { %6449 = vmatprep.subr.mxu1 %v6123_v30  ;;  %9381 = vmatprep.subr.mxu0 %v6099_v33  ;;  %v11350_v9 = vadd.f32 %v5817_v63, %v4851_v16  ;;  %v6068_v10 = vld [vmem:[#allocation12 + $0x1be8] sm:$0xff]  ;;  %v6067_v30 = vld [vmem:[#allocation12 + $0x1be0] sm:$0xff]  ;;  %v6214_v16 = vld [vmem:[#allocation12 + $0x2078] sm:$0xff] }
 0xd48   :  { %6450 = vmatpush2.msra.mxu1 %v6122_v6  ;;  %9382 = vmatpush3.msra.mxu0 %v6019_v5  ;;  %v5819_v19 = vpop.f32.mrf.mxu0  ;;  %v6224_v33 = vld [vmem:[#allocation12 + $0x20c8] sm:$0xff]  ;;  %v6219_v54 = vld [vmem:[#allocation12 + $0x20a0] sm:$0xff]  ;;  %v6209_v6 = vld [vmem:[#allocation12 + $0x2050] sm:$0xff] }
 0xd49   :  { %6451 = vmatprep.subr.mxu1 %v6118_v17  ;;  %9383 = vmatprep.subr.mxu0 %v6094_v39  ;;  %v11353_v1 = vadd.f32 %v5819_v19, %v11303_v4  ;;  %v6098_v4 = vld [vmem:[#allocation12 + $0x1cd8] sm:$0xff]  ;;  %v6184_v17 = vld [vmem:[#allocation12 + $0x1f88] sm:$0xff]  ;;  %v6169_v63 = vld [vmem:[#allocation12 + $0x1f10] sm:$0xff] }
 0xd4a   :  { %6452 = vmatpush2.msra.mxu1 %v6117_v20  ;;  %9384 = vmatpush3.msra.mxu0 %v6014_v23  ;;  %v6194_v5 = vld [vmem:[#allocation12 + $0x1fd8] sm:$0xff]  ;;  %v6164_v20 = vld [vmem:[#allocation12 + $0x1ee8] sm:$0xff]  ;;  %v6159_v23 = vld [vmem:[#allocation12 + $0x1ec0] sm:$0xff] }
 0xd4b   :  { %6453 = vmatprep.subr.mxu1 %v6113_v32  ;;  %9385 = vmatprep.subr.mxu0 %v6089_v56  ;;  %v6174_v39 = vld [vmem:[#allocation12 + $0x1f38] sm:$0xff]  ;;  %v6149_v56 = vld [vmem:[#allocation12 + $0x1e70] sm:$0xff] }
 0xd4c   :  { %6454 = vmatpush2.msra.mxu1 %v6112_v61  ;;  %9386 = vmatpush3.msra.mxu0 %v6009_v18  ;;  %v6154_v32 = vld [vmem:[#allocation12 + $0x1e98] sm:$0xff]  ;;  %v6249_v61 = vld [vmem:[#allocation12 + $0x2190] sm:$0xff]  ;;  %v6244_v18 = vld [vmem:[#allocation12 + $0x2168] sm:$0xff] }
 0xd4d   :  { %6455 = vmatprep.subr.mxu1 %v6108_v26  ;;  %9387 = vmatprep.subr.mxu0 %v6084_v59  ;;  %v6254_v19 = vld [vmem:[#allocation12 + $0x21b8] sm:$0xff]  ;;  %v6239_v59 = vld [vmem:[#allocation12 + $0x2140] sm:$0xff] }
 0xd4e   :  { %6456 = vmatpush2.msra.mxu1 %v6107_v27  ;;  %9388 = vmatpush3.msra.mxu0 %v6004_v22 }
 0xd4f   :  { %6457 = vmatprep.subr.mxu1 %v6103_v11  ;;  %9389 = vmatprep.subr.mxu0 %v6079_v55  ;;  %v6234_v11 = vld [vmem:[#allocation12 + $0x2118] sm:$0xff] }
 0xd50   :  { %6458 = vmatpush2.msra.mxu1 %v6102_v42  ;;  %9390 = vmatpush3.msra.mxu0 %v5999_v2  ;;  %v6229_v2 = vld [vmem:[#allocation12 + $0x20f0] sm:$0xff] }
 0xd51   :  { %6459 = vmatprep.subr.mxu1 %v6098_v4  ;;  %9391 = vmatprep.subr.mxu0 %v6074_v29 }
 0xd52   :  { %6460 = vmatpush2.msra.mxu1 %v6097_v52  ;;  %9392 = vmatpush3.msra.mxu0 %v5994_v21 }
 0xd53   :  { %6461 = vmatprep.subr.mxu1 %v6093_v53  ;;  %9393 = vmatprep.subr.mxu0 %v6069_v36  ;;  %v7039_v36 = vld [vmem:[#allocation16 + $0xf8] sm:$0xff] }
 0xd54   :  { %6462 = vmatpush2.msra.mxu1 %v6092_v51  ;;  %9394 = vmatpush3.msra.mxu0 %v5989_v41  ;;  %v7037_v51 = vld [vmem:[#allocation16 + $0xe8] sm:$0xff]  ;;  %v7036_v41 = vld [vmem:[#allocation16 + $0xe0] sm:$0xff] }
 0xd55   :  { %6463 = vmatprep.subr.mxu1 %v6088_v38  ;;  %6628 = vmatmul.mubr.f32.vlgmr.msra.gmra.mxu0 %v11039_v25 }
 0xd56   :  { %6464 = vmatpush2.msra.mxu1 %v6087_v40  ;;  %6632 = vmatprep.mubr.f32.mxu0 %v11043_v31 }
 0xd57   :  { %6465 = vmatprep.subr.mxu1 %v6083_v44  ;;  %v7031_v44 = vld [vmem:[#allocation16 + $0xb8] sm:$0xff] }
 0xd58   :  { %6466 = vmatpush2.msra.mxu1 %v6082_v46  ;;  %v7030_v46 = vld [vmem:[#allocation16 + $0xb0] sm:$0xff] }
 0xd59   :  { %6467 = vmatprep.subr.mxu1 %v6078_v50  ;;  %6633 = vmatmul.mubr.f32.gmra.mxu0 %v11045_v34 }
 0xd5a   :  { %6468 = vmatpush2.msra.mxu1 %v6077_v47  ;;  %6786 = vmatprep.mubr.f32.mxu0 %v9986_v0  ;;  %v7029_v47 = vld [vmem:[#allocation16 + $0xa8] sm:$0xff] }
 0xd5b   :  { %6469 = vmatprep.subr.mxu1 %v6073_v35  ;;  %v7028_v35 = vld [vmem:[#allocation16 + $0xa0] sm:$0xff] }
 0xd5c   :  { %6470 = vmatpush2.msra.mxu1 %v6072_v49 }
 0xd5d   :  { %6471 = vmatprep.subr.mxu1 %v6068_v10  ;;  %v7027_v10 = vld [vmem:[#allocation16 + $0x98] sm:$0xff] }
 0xd5e   :  { %6472 = vmatpush2.msra.mxu1 %v6067_v30  ;;  %v7026_v30 = vld [vmem:[#allocation16 + $0x90] sm:$0xff] }
 0xd5f   :  { %6474 = vmatmul.mubr.f32.vlgmr.msra.gmra.mxu1 %v11039_v25  ;;  %6638 = vmatprep.subr.mxu1 %v9986_v0  ;;  %v6204_v25 = vld [vmem:[#allocation12 + $0x2028] sm:$0xff] }
 0xd60   :  { %6479 = vmatprep.mubr.f32.mxu1 %v11043_v31  ;;  %6639 = vmatpush1.msra.mxu1 %v6224_v33  ;;  %v6199_v31 = vld [vmem:[#allocation12 + $0x2000] sm:$0xff] }
 0xd61   :  { %6640 = vmatprep.subr.mxu1 %v9986_v0 }
 0xd62   :  { %6641 = vmatpush1.msra.mxu1 %v6219_v54 }
 0xd63   :  { %6480 = vmatmul.mubr.f32.gmra.mxu1 %v11045_v34  ;;  %6642 = vmatprep.subr.mxu1 %v9986_v0  ;;  %v6189_v34 = vld [vmem:[#allocation12 + $0x1fb0] sm:$0xff] }
 0xd64   :  { %6643 = vmatpush1.msra.mxu1 %v6214_v16  ;;  %9097 = vmatprep.mubr.msk.f32.mxu1 %vm3337_vm5, %v11049_v37  ;;  %v6179_v37 = vld [vmem:[#allocation12 + $0x1f60] sm:$0xff]  ;;  %v7025_v16 = vld [vmem:[#allocation16 + $0x88] sm:$0xff] }
 0xd65   :  { %6644 = vmatprep.subr.mxu1 %v9986_v0 }
 0xd66   :  { %6645 = vmatpush1.msra.mxu1 %v6209_v6 }
 0xd67   :  { %6646 = vmatprep.subr.mxu1 %v9986_v0 }
 0xd68   :  { %6647 = vmatpush1.msra.mxu1 %v6204_v25  ;;  %v7024_v25 = vld [vmem:[#allocation16 + $0x80] sm:$0xff] }
 0xd69   :  { %6648 = vmatprep.subr.mxu1 %v9986_v0 }
 0xd6a   :  { %6649 = vmatpush1.msra.mxu1 %v6199_v31 }
 0xd6b   :  { %6650 = vmatprep.subr.mxu1 %v9986_v0 }
 0xd6c   :  { %6651 = vmatpush1.msra.mxu1 %v6194_v5  ;;  %v7023_v5 = vld [vmem:[#allocation16 + $0x78] sm:$0xff] }
 0xd6d   :  { %6652 = vmatprep.subr.mxu1 %v9986_v0 }
 0xd6e   :  { %6653 = vmatpush1.msra.mxu1 %v6189_v34 }
 0xd6f   :  { %6654 = vmatprep.subr.mxu1 %v9986_v0 }
 0xd70   :  { %6655 = vmatpush1.msra.mxu1 %v6184_v17  ;;  %v7022_v17 = vld [vmem:[#allocation16 + $0x70] sm:$0xff] }
 0xd71   :  { %6656 = vmatprep.subr.mxu1 %v9986_v0 }
 0xd72   :  { %6657 = vmatpush1.msra.mxu1 %v6179_v37 }
 0xd73   :  { %6658 = vmatprep.subr.mxu1 %v9986_v0 }
 0xd74   :  { %6659 = vmatpush1.msra.mxu1 %v6174_v39  ;;  %v11408_v39 = vld [vmem:[#allocation10 + $0x30] sm:$0xff] }
 0xd75   :  { %6660 = vmatprep.subr.mxu1 %v9986_v0 }
 0xd76   :  { %6661 = vmatpush1.msra.mxu1 %v6169_v63  ;;  %v7021_v63 = vld [vmem:[#allocation16 + $0x68] sm:$0xff] }
 0xd77   :  { %6662 = vmatprep.subr.mxu1 %v9986_v0 }
 0xd78   :  { %6663 = vmatpush1.msra.mxu1 %v6164_v20  ;;  %v7020_v20 = vld [vmem:[#allocation16 + $0x60] sm:$0xff] }
 0xd79   :  { %6664 = vmatprep.subr.mxu1 %v9986_v0 }
 0xd7a   :  { %6665 = vmatpush1.msra.mxu1 %v6159_v23  ;;  %v7019_v23 = vld [vmem:[#allocation16 + $0x58] sm:$0xff] }
 0xd7b   :  { %6666 = vmatprep.subr.mxu1 %v9986_v0 }
 0xd7c   :  { %6667 = vmatpush1.msra.mxu1 %v6154_v32  ;;  %v7018_v32 = vld [vmem:[#allocation16 + $0x50] sm:$0xff] }
 0xd7d   :  { %6668 = vmatprep.subr.mxu1 %v9986_v0 }
 0xd7e   :  { %6669 = vmatpush1.msra.mxu1 %v6149_v56  ;;  %v11413_v56 = vld [vmem:[#allocation10 + $0x38] sm:$0x7f] }
 0xd7f   :  { %6690 = vmatprep.subr.mxu1 %v9986_v0 }
 0xd80   :  { %6691 = vmatpush2.msra.mxu1 %v6254_v19  ;;  %v7017_v19 = vld [vmem:[#allocation16 + $0x48] sm:$0xff] }
 0xd81   :  { %6692 = vmatprep.subr.mxu1 %v9986_v0 }
 0xd82   :  { %6693 = vmatpush2.msra.mxu1 %v6249_v61  ;;  %v5888_v26 = vpop.f32.mrf.mxu0  ;;  %v7016_v61 = vld [vmem:[#allocation16 + $0x40] sm:$0xff] }
 0xd83   :  { %6694 = vmatprep.subr.mxu1 %v9986_v0  ;;  %v11384_v27 = vadd.f32 %v5888_v26, %v11277_v13  ;;  %v7014_v26 = vld [vmem:[#allocation16 + $0x30] sm:$0xff] }
 0xd84   :  { %6695 = vmatpush2.msra.mxu1 %v6244_v18  ;;  %v5890_v22 = vpop.f32.mrf.mxu0  ;;  %v7015_v18 = vld [vmem:[#allocation16 + $0x38] sm:$0xff] }
 0xd85   :  { %6696 = vmatprep.subr.mxu1 %v9986_v0  ;;  %v11388_v55 = vadd.f32 %v5890_v22, %v11280_v48  ;;  %v7012_v22 = vld [vmem:[#allocation16 + $0x20] sm:$0xff] }
 0xd86   :  { %6697 = vmatpush2.msra.mxu1 %v6239_v59  ;;  %v5894_v42 = vpop.f32.mrf.mxu0  ;;  %v7013_v59 = vld [vmem:[#allocation16 + $0x28] sm:$0xff] }
 0xd87   :  { %6698 = vmatprep.subr.mxu1 %v9986_v0  ;;  %v11392_v4 = vadd.f32 %v5894_v42, %v11283_v58  ;;  %v7010_v42 = vld [vmem:[#allocation16 + $0x10] sm:$0xff] }
 0xd88   :  { %6699 = vmatpush2.msra.mxu1 %v6234_v11  ;;  %v5896_v29 = vpop.f32.mrf.mxu0  ;;  %v7011_v11 = vld [vmem:[#allocation16 + $0x18] sm:$0xff] }
 0xd89   :  { %6700 = vmatprep.subr.mxu1 %v9986_v0  ;;  %v11396_v13 = vadd.f32 %v5896_v29, %v11286_v12  ;;  %v7038_v12 = vld [vmem:[#allocation16 + $0xf0] sm:$0xff]  ;;  %v7008_v29 = vld [vmem:[#allocation16] sm:$0xff] }
 0xd8a   :  { %6701 = vmatpush2.msra.mxu1 %v6229_v2  ;;  %v7009_v2 = vld [vmem:[#allocation16 + $0x8] sm:$0xff] }
 0xd8b   :  { %6703 = vmatmul.mubr.f32.vlgmr.msra.gmra.mxu1 %v11051_v57  ;;  %7165 = vmatprep.subr.mxu1 %v7039_v36  ;;  %v7035_v57 = vld [vmem:[#allocation16 + $0xd8] sm:$0xff]  ;;  %v7068_v36 = vld [vmem:[#allocation16 + $0x1e0] sm:$0xff] }
 0xd8c   :  { %9098 = vmatprep.mubr.msk.f32.mxu1 %vm3337_vm5, %v11056_v3  ;;  %7166 = vmatpush1.msra.mxu1 %v7038_v12  ;;  %v7034_v3 = vld [vmem:[#allocation16 + $0xd0] sm:$0xff]  ;;  %v7067_v12 = vld [vmem:[#allocation16 + $0x1d8] sm:$0xff] }
 0xd8d   :  { %7167 = vmatprep.subr.mxu1 %v7037_v51  ;;  %v7066_v51 = vld [vmem:[#allocation16 + $0x1d0] sm:$0xff] }
 0xd8e   :  { %7168 = vmatpush1.msra.mxu1 %v7036_v41  ;;  %v7065_v41 = vld [vmem:[#allocation16 + $0x1c8] sm:$0xff] }
 0xd8f   :  { %6708 = vmatmul.mubr.f32.gmra.mxu1 %v11058_v28  ;;  %v7033_v28 = vld [vmem:[#allocation16 + $0xc8] sm:$0xff]  ;;  %7169 = vmatprep.subr.mxu1 %v7035_v57  ;;  %v7064_v57 = vld [vmem:[#allocation16 + $0x1c0] sm:$0xff] }
 0xd90   :  { %7170 = vmatpush1.msra.mxu1 %v7034_v3  ;;  %v7063_v3 = vld [vmem:[#allocation16 + $0x1b8] sm:$0xff] }
 0xd91   :  { %7171 = vmatprep.subr.mxu1 %v7033_v28 }
 0xdac   :  { %v9633_v48 = vpop.f32.mrf.mxu1 }
 0xdad   :  { %v11403_v52 = vadd.f32 %v9633_v48, %v11305_v15  ;;  %v7032_v15 = vld [vmem:[#allocation16 + $0xc0] sm:$0xff]  ;;  %v7071_v48 = vld [vmem:[#allocation16 + $0x1f8] sm:$0xff] }
 0xdae   :  { %v5965_v58 = vpop.f32.mrf.mxu1  ;;  %7172 = vmatpush1.msra.mxu1 %v7032_v15 }
 0xdaf   :  { %v11406_v21 = vadd.f32 %v5965_v58, %v11307_v24  ;;  %7173 = vmatprep.subr.mxu1 %v7031_v44  ;;  %v7070_v58 = vld [vmem:[#allocation16 + $0x1f0] sm:$0xff] }
 0xdb0   :  { %7174 = vmatpush1.msra.mxu1 %v7030_v46 }
 0xdb1   :  { %7175 = vmatprep.subr.mxu1 %v7029_v47 }
 0xdb2   :  { %7176 = vmatpush1.msra.mxu1 %v7028_v35 }
 0xdb3   :  { %7177 = vmatprep.subr.mxu1 %v7027_v10 }
 0xdb4   :  { %7178 = vmatpush1.msra.mxu1 %v7026_v30 }
 0xdb5   :  { %7179 = vmatprep.subr.mxu1 %v7025_v16  ;;  %v7059_v16 = vld [vmem:[#allocation16 + $0x198] sm:$0xff] }
 0xdb6   :  { %7180 = vmatpush1.msra.mxu1 %v7024_v25  ;;  %v7057_v25 = vld [vmem:[#allocation16 + $0x188] sm:$0xff] }
 0xdb7   :  { %7181 = vmatprep.subr.mxu1 %v7023_v5  ;;  %v7055_v5 = vld [vmem:[#allocation16 + $0x178] sm:$0xff] }
 0xdb8   :  { %7182 = vmatpush1.msra.mxu1 %v7022_v17  ;;  %v7053_v17 = vld [vmem:[#allocation16 + $0x168] sm:$0xff] }
 0xdb9   :  { %7183 = vmatprep.subr.mxu1 %v7021_v63  ;;  %v7051_v63 = vld [vmem:[#allocation16 + $0x158] sm:$0xff] }
 0xdba   :  { %7184 = vmatpush1.msra.mxu1 %v7020_v20  ;;  %v7050_v20 = vld [vmem:[#allocation16 + $0x150] sm:$0xff] }
 0xdbb   :  { %7185 = vmatprep.subr.mxu1 %v7019_v23  ;;  %v7049_v23 = vld [vmem:[#allocation16 + $0x148] sm:$0xff] }
 0xdbc   :  { %7186 = vmatpush1.msra.mxu1 %v7018_v32  ;;  %v7048_v32 = vld [vmem:[#allocation16 + $0x140] sm:$0xff] }
 0xdbd   :  { %7187 = vmatprep.subr.mxu1 %v7017_v19  ;;  %v7047_v19 = vld [vmem:[#allocation16 + $0x138] sm:$0xff] }
 0xdbe   :  { %7188 = vmatpush1.msra.mxu1 %v7016_v61  ;;  %v7046_v61 = vld [vmem:[#allocation16 + $0x130] sm:$0xff] }
 0xdbf   :  { %7189 = vmatprep.subr.mxu1 %v7015_v18  ;;  %v7044_v18 = vld [vmem:[#allocation16 + $0x120] sm:$0xff] }
 0xdc0   :  { %7190 = vmatpush1.msra.mxu1 %v7014_v26  ;;  %v7043_v26 = vld [vmem:[#allocation16 + $0x118] sm:$0xff] }
 0xdc1   :  { %7191 = vmatprep.subr.mxu1 %v7013_v59  ;;  %v7042_v59 = vld [vmem:[#allocation16 + $0x110] sm:$0xff] }
 0xdc2   :  { %7192 = vmatpush1.msra.mxu1 %v7012_v22  ;;  %v7041_v22 = vld [vmem:[#allocation16 + $0x108] sm:$0xff] }
 0xdc3   :  { %v6321_v53 = vpop.f32.mrf.mxu0  ;;  %7193 = vmatprep.subr.mxu1 %v7011_v11  ;;  %v7040_v11 = vld [vmem:[#allocation16 + $0x100] sm:$0xff] }
 0xdc4   :  { %7194 = vmatpush1.msra.mxu1 %v7010_v42 }
 0xdc5   :  { %v6323_v38 = vpop.f32.mrf.mxu0  ;;  %7195 = vmatprep.subr.mxu1 %v7009_v2 }
 0xdc6   :  { %7196 = vmatpush1.msra.mxu1 %v7008_v29 }
 0xdc7   :  { %7197 = vmatprep.subr.mxu1 %v7071_v48 }
 0xdc8   :  { %v6327_v50 = vpop.f32.mrf.mxu0  ;;  %7198 = vmatpush2.msra.mxu1 %v7070_v58 }
 0xdca   :  { %v6329_v33 = vpop.f32.mrf.mxu0 }
 0xddb   :  { %v6398_v40 = vpop.f32.mrf.mxu1 }
 0xddc   :  { %v6399_v37 = vadd.f32 %v6398_v40, %v6321_v53  ;;  %v7069_v53 = vld [vmem:[#allocation16 + $0x1e8] sm:$0xff] }
 0xddd   :  { %v6400_v24 = vpop.f32.mrf.mxu1  ;;  %7199 = vmatprep.subr.mxu1 %v7069_v53 }
 0xdde   :  { %v6401_v34 = vadd.f32 %v6400_v24, %v6323_v38  ;;  %7200 = vmatpush2.msra.mxu1 %v7068_v36  ;;  %v7062_v38 = vld [vmem:[#allocation16 + $0x1b0] sm:$0xff] }
 0xddf   :  { %7201 = vmatprep.subr.mxu1 %v7067_v12 }
 0xde0   :  { %v6404_v49 = vpop.f32.mrf.mxu1  ;;  %7202 = vmatpush2.msra.mxu1 %v7066_v51 }
 0xde1   :  { %v6405_v31 = vadd.f32 %v6404_v49, %v6327_v50  ;;  %7203 = vmatprep.subr.mxu1 %v7065_v41 }
 0xde2   :  { %v6406_v54 = vpop.f32.mrf.mxu1  ;;  %7204 = vmatpush2.msra.mxu1 %v7064_v57 }
 0xde3   :  { %v6407_v6 = vadd.f32 %v6406_v54, %v6329_v33  ;;  %7205 = vmatprep.subr.mxu1 %v7063_v3  ;;  %v7061_v33 = vld [vmem:[#allocation16 + $0x1a8] sm:$0xff]  ;;  %v7060_v54 = vld [vmem:[#allocation16 + $0x1a0] sm:$0xff] }
 0xde4   :  { %7206 = vmatpush2.msra.mxu1 %v7062_v38  ;;  %v7103_v38 = vld [vmem:[#allocation16 + $0x2f8] sm:$0xff] }
 0xde5   :  { %6750 = vmatprep.subr.mxu0 %v6407_v6  ;;  %7207 = vmatprep.subr.mxu1 %v7061_v33  ;;  %v7058_v6 = vld [vmem:[#allocation16 + $0x190] sm:$0xff]  ;;  %v7089_v33 = vld [vmem:[#allocation16 + $0x288] sm:$0xff] }
 0xde6   :  { %6751 = vmatpush1.msra.mxu0 %v6405_v31  ;;  %7208 = vmatpush2.msra.mxu1 %v7060_v54  ;;  %v7056_v31 = vld [vmem:[#allocation16 + $0x180] sm:$0xff] }
 0xde7   :  { %6752 = vmatprep.subr.mxu0 %v6401_v34  ;;  %7209 = vmatprep.subr.mxu1 %v7059_v16  ;;  %v7054_v34 = vld [vmem:[#allocation16 + $0x170] sm:$0xff]  ;;  %v7088_v54 = vld [vmem:[#allocation16 + $0x280] sm:$0xff]  ;;  %v7087_v16 = vld [vmem:[#allocation16 + $0x278] sm:$0xff] }
 0xde8   :  { %6753 = vmatpush1.msra.mxu0 %v6399_v37  ;;  %7210 = vmatpush2.msra.mxu1 %v7058_v6  ;;  %v7052_v37 = vld [vmem:[#allocation16 + $0x160] sm:$0xff]  ;;  %v7086_v6 = vld [vmem:[#allocation16 + $0x270] sm:$0xff] }
 0xde9   :  { %9099 = vmatmul.mubr.msk.f32.vlgmr.msra.gmra.mxu0 %vm4536_vm6, %v11408_v39  ;;  %7211 = vmatprep.subr.mxu1 %v7057_v25  ;;  %v7085_v25 = vld [vmem:[#allocation16 + $0x268] sm:$0xff] }
 0xdea   :  { %6792 = vmatprep.mubr.f32.mxu0 %v9986_v0  ;;  %7212 = vmatpush2.msra.mxu1 %v7056_v31  ;;  %v7084_v31 = vld [vmem:[#allocation16 + $0x260] sm:$0xff] }
 0xdeb   :  { %7213 = vmatprep.subr.mxu1 %v7055_v5  ;;  %v7083_v5 = vld [vmem:[#allocation16 + $0x258] sm:$0xff] }
 0xdec   :  { %7214 = vmatpush2.msra.mxu1 %v7054_v34  ;;  %v7082_v34 = vld [vmem:[#allocation16 + $0x250] sm:$0xff] }
 0xded   :  { %9100 = vmatmul.mubr.msk.f32.gmra.mxu0 %vm4536_vm6, %v11413_v56  ;;  %7215 = vmatprep.subr.mxu1 %v7053_v17  ;;  %v7081_v17 = vld [vmem:[#allocation16 + $0x248] sm:$0xff] }
 0xdee   :  { %6863 = vmatprep.mubr.f32.mxu0 %v9986_v0  ;;  %7216 = vmatpush2.msra.mxu1 %v7052_v37  ;;  %v7080_v37 = vld [vmem:[#allocation16 + $0x240] sm:$0xff] }
 0xdef   :  { %7217 = vmatprep.subr.mxu1 %v7051_v63  ;;  %v7079_v63 = vld [vmem:[#allocation16 + $0x238] sm:$0xff] }
 0xdf0   :  { %7218 = vmatpush2.msra.mxu1 %v7050_v20  ;;  %v7078_v20 = vld [vmem:[#allocation16 + $0x230] sm:$0xff] }
 0xdf1   :  { %7219 = vmatprep.subr.mxu1 %v7049_v23  ;;  %v7077_v23 = vld [vmem:[#allocation16 + $0x228] sm:$0xff] }
 0xdf2   :  { %7220 = vmatpush2.msra.mxu1 %v7048_v32  ;;  %v7076_v32 = vld [vmem:[#allocation16 + $0x220] sm:$0xff] }
 0xdf3   :  { %v6552_v28 = vpop.f32.mrf.mxu0  ;;  %7221 = vmatprep.subr.mxu1 %v7047_v19  ;;  %v7075_v19 = vld [vmem:[#allocation16 + $0x218] sm:$0xff] }
 0xdf4   :  { %7222 = vmatpush2.msra.mxu1 %v7046_v61  ;;  %v7074_v61 = vld [vmem:[#allocation16 + $0x210] sm:$0xff] }
 0xdf5   :  { %v6554_v40 = vpop.f32.mrf.mxu0 }
 0xdf8   :  { %v6558_v44 = vpop.f32.mrf.mxu0 }
 0xdfa   :  { %v6560_v50 = vpop.f32.mrf.mxu0 }
 0xe15   :  { %v9395_v42 = vpop.f32.mrf.mxu0 }
 0xe17   :  { %v9396_v2 = vpop.f32.mrf.mxu0 }
 0xe18   :  { %v9397_v51 = vadd.f32 %v9396_v2, %v9395_v42  ;;  %v7131_v42 = vld [vmem:[#allocation16 + $0x3d8] sm:$0xff]  ;;  %v7130_v2 = vld [vmem:[#allocation16 + $0x3d0] sm:$0xff] }
 0xe19   :  { %v9398_v29 = vpop.f32.mrf.mxu0 }
 0xe1b   :  { %v9399_v48 = vpop.f32.mrf.mxu0 }
 0xe1c   :  { %v9400_v36 = vadd.f32 %v9399_v48, %v9398_v29  ;;  %v7129_v29 = vld [vmem:[#allocation16 + $0x3c8] sm:$0xff]  ;;  %v7128_v48 = vld [vmem:[#allocation16 + $0x3c0] sm:$0xff] }
 0xe1f   :  { %v6475_v15 = vpop.f32.mrf.mxu1 }
 0xe20   :  { %v6553_v30 = vadd.f32 %v6552_v28, %v6475_v15  ;;  %v7102_v28 = vld [vmem:[#allocation16 + $0x2f0] sm:$0xff]  ;;  %v7100_v15 = vld [vmem:[#allocation16 + $0x2e0] sm:$0xff] }
 0xe21   :  { %v6477_v24 = vpop.f32.mrf.mxu1 }
 0xe22   :  { %v6555_v10 = vadd.f32 %v6554_v40, %v6477_v24  ;;  %v7101_v40 = vld [vmem:[#allocation16 + $0x2e8] sm:$0xff]  ;;  %v7098_v24 = vld [vmem:[#allocation16 + $0x2d0] sm:$0xff] }
 0xe23   :  { %v6481_v46 = vpop.f32.mrf.mxu1 }
 0xe24   :  { %v6559_v49 = vadd.f32 %v6558_v44, %v6481_v46  ;;  %v7099_v44 = vld [vmem:[#allocation16 + $0x2d8] sm:$0xff]  ;;  %v7097_v46 = vld [vmem:[#allocation16 + $0x2c8] sm:$0xff] }
 0xe25   :  { %v6483_v47 = vpop.f32.mrf.mxu1 }
 0xe26   :  { %v6561_v35 = vadd.f32 %v6560_v50, %v6483_v47  ;;  %v7096_v50 = vld [vmem:[#allocation16 + $0x2c0] sm:$0xff]  ;;  %v7095_v47 = vld [vmem:[#allocation16 + $0x2b8] sm:$0xff] }
 0xe28   :  { %6827 = vmatprep.subr.mxu0 %v6561_v35  ;;  %v7094_v35 = vld [vmem:[#allocation16 + $0x2b0] sm:$0xff] }
 0xe29   :  { %6828 = vmatpush1.msra.mxu0 %v6559_v49  ;;  %v7093_v49 = vld [vmem:[#allocation16 + $0x2a8] sm:$0xff] }
 0xe2a   :  { %6829 = vmatprep.subr.mxu0 %v6555_v10  ;;  %v7092_v10 = vld [vmem:[#allocation16 + $0x2a0] sm:$0xff] }
 0xe2b   :  { %6830 = vmatpush1.msra.mxu0 %v6553_v30  ;;  %v7090_v30 = vld [vmem:[#allocation16 + $0x290] sm:$0xff] }
 0xe2c   :  { %9101 = vmatmul.mubr.msk.f32.vlgmr.msra.gmra.mxu0 %vm4536_vm6, %v11408_v39 }
 0xe2d   :  { %6869 = vmatprep.mubr.f32.mxu0 %v9986_v0 }
 0xe30   :  { %9102 = vmatmul.mubr.msk.f32.gmra.mxu0 %vm4536_vm6, %v11413_v56 }
 0xe31   :  { %9638 = vmatprep.mubr.msk.f32.mxu0 %vm4536_vm6, %v11408_v39  ;;  %v7045_v39 = vld [vmem:[#allocation16 + $0x128] sm:$0xff] }
 0xe32   :  { %7223 = vmatprep.subr.mxu1 %v7045_v39  ;;  %v7073_v39 = vld [vmem:[#allocation16 + $0x208] sm:$0xff] }
 0xe33   :  { %7224 = vmatpush2.msra.mxu1 %v7044_v18  ;;  %v7072_v18 = vld [vmem:[#allocation16 + $0x200] sm:$0xff] }
 0xe34   :  { %7225 = vmatprep.subr.mxu1 %v7043_v26  ;;  %v7135_v26 = vld [vmem:[#allocation16 + $0x3f8] sm:$0xff] }
 0xe35   :  { %7226 = vmatpush2.msra.mxu1 %v7042_v59  ;;  %v7134_v59 = vld [vmem:[#allocation16 + $0x3f0] sm:$0xff] }
 0xe36   :  { %7227 = vmatprep.subr.mxu1 %v7041_v22  ;;  %v7133_v22 = vld [vmem:[#allocation16 + $0x3e8] sm:$0xff] }
 0xe37   :  { %7228 = vmatpush2.msra.mxu1 %v7040_v11  ;;  %v7132_v11 = vld [vmem:[#allocation16 + $0x3e0] sm:$0xff] }
 0xe4b   :  { %v6704_v58 = vpop.f32.mrf.mxu1 }
 0xe4c   :  { %v6705_v3 = vadd.f32 %v9397_v51, %v6704_v58  ;;  %v7127_v58 = vld [vmem:[#allocation16 + $0x3b8] sm:$0xff] }
 0xe4d   :  { %v6706_v53 = vpop.f32.mrf.mxu1  ;;  %v7123_v51 = vld [vmem:[#allocation16 + $0x398] sm:$0xff] }
 0xe4e   :  { %v7126_v53 = vld [vmem:[#allocation16 + $0x3b0] sm:$0xff] }
 0xe4f   :  { %v6709_v12 = vpop.f32.mrf.mxu1 }
 0xe50   :  { %v6710_v41 = vadd.f32 %v9400_v36, %v6709_v12  ;;  %v7125_v36 = vld [vmem:[#allocation16 + $0x3a8] sm:$0xff]  ;;  %v7124_v12 = vld [vmem:[#allocation16 + $0x3a0] sm:$0xff] }
 0xe51   :  { %v6711_v57 = vpop.f32.mrf.mxu1 }
 0xe52   :  { %9634 = vmatprep.subr.mxu0 %v6710_v41  ;;  %v7121_v57 = vld [vmem:[#allocation16 + $0x388] sm:$0xff] }
 0xe53   :  { %9635 = vmatpush3.msra.mxu0 %v6710_v41  ;;  %v7122_v41 = vld [vmem:[#allocation16 + $0x390] sm:$0xff] }
 0xe54   :  { %9636 = vmatprep.subr.mxu0 %v6705_v3 }
 0xe55   :  { %9637 = vmatpush3.msra.mxu0 %v6705_v3  ;;  %v7120_v3 = vld [vmem:[#allocation16 + $0x380] sm:$0xff] }
 0xe56   :  { %9639 = vmatmul.mubr.msk.f32.vlgmr.msra.gmra.mxu0 %vm4536_vm6, %v11413_v56  ;;  %7242 = vmatprep.subr.mxu0 %v7103_v38  ;;  %v7091_v56 = vld [vmem:[#allocation16 + $0x298] sm:$0xff] }
 0xe57   :  { %7243 = vmatpush1.msra.mxu0 %v7102_v28  ;;  %v7119_v38 = vld [vmem:[#allocation16 + $0x378] sm:$0xff]  ;;  %v7118_v28 = vld [vmem:[#allocation16 + $0x370] sm:$0xff] }
 0xe58   :  { %7244 = vmatprep.subr.mxu0 %v7101_v40  ;;  %v7117_v40 = vld [vmem:[#allocation16 + $0x368] sm:$0xff] }
 0xe59   :  { %7245 = vmatpush1.msra.mxu0 %v7100_v15  ;;  %v7116_v15 = vld [vmem:[#allocation16 + $0x360] sm:$0xff] }
 0xe5a   :  { %7246 = vmatprep.subr.mxu0 %v7099_v44  ;;  %v7115_v44 = vld [vmem:[#allocation16 + $0x358] sm:$0xff] }
 0xe5b   :  { %7247 = vmatpush1.msra.mxu0 %v7098_v24  ;;  %v7114_v24 = vld [vmem:[#allocation16 + $0x350] sm:$0xff] }
 0xe5c   :  { %7248 = vmatprep.subr.mxu0 %v7097_v46  ;;  %v7113_v46 = vld [vmem:[#allocation16 + $0x348] sm:$0xff] }
 0xe5d   :  { %7249 = vmatpush1.msra.mxu0 %v7096_v50  ;;  %v7112_v50 = vld [vmem:[#allocation16 + $0x340] sm:$0xff] }
 0xe5e   :  { %7250 = vmatprep.subr.mxu0 %v7095_v47  ;;  %v7111_v47 = vld [vmem:[#allocation16 + $0x338] sm:$0xff] }
 0xe5f   :  { %7251 = vmatpush1.msra.mxu0 %v7094_v35  ;;  %v7110_v35 = vld [vmem:[#allocation16 + $0x330] sm:$0xff] }
 0xe60   :  { %7252 = vmatprep.subr.mxu0 %v7093_v49  ;;  %v7109_v49 = vld [vmem:[#allocation16 + $0x328] sm:$0xff] }
 0xe61   :  { %7253 = vmatpush1.msra.mxu0 %v7092_v10  ;;  %v7108_v10 = vld [vmem:[#allocation16 + $0x320] sm:$0xff] }
 0xe62   :  { %7254 = vmatprep.subr.mxu0 %v7091_v56  ;;  %v7107_v56 = vld [vmem:[#allocation16 + $0x318] sm:$0xff] }
 0xe63   :  { %7255 = vmatpush1.msra.mxu0 %v7090_v30  ;;  %v7106_v30 = vld [vmem:[#allocation16 + $0x310] sm:$0xff] }
 0xe64   :  { %7256 = vmatprep.subr.mxu0 %v7089_v33  ;;  %v7105_v33 = vld [vmem:[#allocation16 + $0x308] sm:$0xff] }
 0xe65   :  { %7257 = vmatpush1.msra.mxu0 %v7088_v54  ;;  %v7104_v54 = vld [vmem:[#allocation16 + $0x300] sm:$0xff] }
 0xe66   :  { %7258 = vmatprep.subr.mxu0 %v7087_v16  ;;  %v7429_v16 = vld [vmem:[#allocation16 + $0x5a8] sm:$0xff] }
 0xe67   :  { %7259 = vmatpush1.msra.mxu0 %v7086_v6  ;;  %v7157_v6 = vld [vmem:[#allocation16 + $0x4a8] sm:$0xff] }
 0xe68   :  { %7260 = vmatprep.subr.mxu0 %v7085_v25  ;;  %7329 = vmatprep.subr.mxu1 %v7157_v6  ;;  %v11427_v25 = vld [vmem:[#allocation13] sm:$0x1f] }
 0xe69   :  { %7261 = vmatpush1.msra.mxu0 %v7084_v31 }
 0xe6a   :  { %7262 = vmatprep.subr.mxu0 %v7083_v5  ;;  %v6966_v5 = vrot.slane %v11427_v25, %v11024_v45 }
 0xe6b   :  { %7263 = vmatpush1.msra.mxu0 %v7082_v34 }
 0xe6c   :  { %7264 = vmatprep.subr.mxu0 %v7081_v17  ;;  %v6970_v17 = vrot.slane %v11427_v25, %v11027_v8 }
 0xe6d   :  { %7265 = vmatpush1.msra.mxu0 %v7080_v37 }
 0xe6e   :  { %7266 = vmatprep.subr.mxu0 %v7079_v63 }
 0xe6f   :  { %7267 = vmatpush1.msra.mxu0 %v7078_v20 }
 0xe70   :  { %7268 = vmatprep.subr.mxu0 %v7077_v23 }
 0xe71   :  { %7269 = vmatpush1.msra.mxu0 %v7076_v32 }
 0xe72   :  { %7270 = vmatprep.subr.mxu0 %v7075_v19 }
 0xe73   :  { %7271 = vmatpush1.msra.mxu0 %v7074_v61 }
 0xe74   :  { %7272 = vmatprep.subr.mxu0 %v7073_v39 }
 0xe75   :  { %7273 = vmatpush1.msra.mxu0 %v7072_v18 }
 0xe76   :  { %7274 = vmatprep.subr.mxu0 %v7135_v26 }
 0xe77   :  { %7275 = vmatpush2.msra.mxu0 %v7134_v59  ;;  %v7156_v59 = vld [vmem:[#allocation16 + $0x4a0] sm:$0xff] }
 0xe78   :  { %7276 = vmatprep.subr.mxu0 %v7133_v22 }
 0xe79   :  { %7277 = vmatpush2.msra.mxu0 %v7132_v11  ;;  %v7153_v11 = vld [vmem:[#allocation16 + $0x488] sm:$0xff] }
 0xe7a   :  { %7278 = vmatprep.subr.mxu0 %v7131_v42 }
 0xe7b   :  { %7279 = vmatpush2.msra.mxu0 %v7130_v2 }
 0xe7c   :  { %7280 = vmatprep.subr.mxu0 %v7129_v29  ;;  %v7151_v29 = vld [vmem:[#allocation16 + $0x478] sm:$0xff] }
 0xe7d   :  { %7281 = vmatpush2.msra.mxu0 %v7128_v48  ;;  %v7150_v48 = vld [vmem:[#allocation16 + $0x470] sm:$0xff] }
 0xe7e   :  { %7282 = vmatprep.subr.mxu0 %v7127_v58  ;;  %v7149_v58 = vld [vmem:[#allocation16 + $0x468] sm:$0xff] }
 0xe7f   :  { %7283 = vmatpush2.msra.mxu0 %v7126_v53  ;;  %v7148_v53 = vld [vmem:[#allocation16 + $0x460] sm:$0xff] }
 0xe80   :  { %7284 = vmatprep.subr.mxu0 %v7125_v36  ;;  %v7147_v36 = vld [vmem:[#allocation16 + $0x458] sm:$0xff] }
 0xe81   :  { %7285 = vmatpush2.msra.mxu0 %v7124_v12  ;;  %v7146_v12 = vld [vmem:[#allocation16 + $0x450] sm:$0xff] }
 0xe82   :  { %7286 = vmatprep.subr.mxu0 %v7123_v51  ;;  %v7145_v51 = vld [vmem:[#allocation16 + $0x448] sm:$0xff] }
 0xe83   :  { %7287 = vmatpush2.msra.mxu0 %v7122_v41  ;;  %v7144_v41 = vld [vmem:[#allocation16 + $0x440] sm:$0xff] }
 0xe84   :  { %7288 = vmatprep.subr.mxu0 %v7121_v57  ;;  %v7143_v57 = vld [vmem:[#allocation16 + $0x438] sm:$0xff] }
 0xe85   :  { %7289 = vmatpush2.msra.mxu0 %v7120_v3  ;;  %v7142_v3 = vld [vmem:[#allocation16 + $0x430] sm:$0xff] }
 0xe86   :  { %7290 = vmatprep.subr.mxu0 %v7119_v38  ;;  %v7141_v38 = vld [vmem:[#allocation16 + $0x428] sm:$0xff] }
 0xe87   :  { %7291 = vmatpush2.msra.mxu0 %v7118_v28  ;;  %v7140_v28 = vld [vmem:[#allocation16 + $0x420] sm:$0xff] }
 0xe88   :  { %7292 = vmatprep.subr.mxu0 %v7117_v40  ;;  %v7139_v40 = vld [vmem:[#allocation16 + $0x418] sm:$0xff] }
 0xe89   :  { %7293 = vmatpush2.msra.mxu0 %v7116_v15  ;;  %v7138_v15 = vld [vmem:[#allocation16 + $0x410] sm:$0xff] }
 0xe8a   :  { %7294 = vmatprep.subr.mxu0 %v7115_v44  ;;  %v7137_v44 = vld [vmem:[#allocation16 + $0x408] sm:$0xff] }
 0xe8b   :  { %7295 = vmatpush2.msra.mxu0 %v7114_v24  ;;  %v7136_v24 = vld [vmem:[#allocation16 + $0x400] sm:$0xff] }
 0xe8c   :  { %7296 = vmatprep.subr.mxu0 %v7113_v46  ;;  %v7493_v46 = vld [vmem:[#allocation16 + $0x7a8] sm:$0xff] }
 0xe8d   :  { %7297 = vmatpush2.msra.mxu0 %v7112_v50 }
 0xe8e   :  { %7298 = vmatprep.subr.mxu0 %v7111_v47  ;;  %v6974_v47 = vrot.slane %v11427_v25, %v3041_v62 }
 0xe8f   :  { %7299 = vmatpush2.msra.mxu0 %v7110_v35 }
 0xe90   :  { %7300 = vmatprep.subr.mxu0 %v7109_v49  ;;  %v6978_v49 = vrot.slane %v11427_v25, %v3045_v7  ;;  %v7428_v7 = vld [vmem:[#allocation16 + $0x5a0] sm:$0xff] }
 0xe91   :  { %7301 = vmatpush2.msra.mxu0 %v7108_v10 }
 0xe92   :  { %7302 = vmatprep.subr.mxu0 %v7107_v56 }
 0xe93   :  { %7303 = vmatpush2.msra.mxu0 %v7106_v30 }
 0xe94   :  { %7304 = vmatprep.subr.mxu0 %v7105_v33 }
 0xe95   :  { %7305 = vmatpush2.msra.mxu0 %v7104_v54 }
 0xe96   :  { %7548 = vmatprep.subr.mxu0 %v7429_v16 }
 0xea9   :  { %v6788_v31 = vpop.f32.mrf.mxu0 }
 0xeaa   :  { %v6951_v34 = vadd.f32 %v6788_v31, %v11344_v14 }
 0xeab   :  { %v6790_v37 = vpop.f32.mrf.mxu0 }
 0xeac   :  { %v6952_v63 = vadd.f32 %v6790_v37, %v11348_v60  ;;  %v6988_v20 = vadd.f32 %v6966_v5, %v6951_v34  ;;  %v7155_v60 = vld [vmem:[#allocation16 + $0x498] sm:$0xff] }
 0xead   :  { %v6794_v23 = vpop.f32.mrf.mxu0 }
 0xeae   :  { %v6989_v32 = vadd.f32 %v6970_v17, %v6952_v63  ;;  %v6956_v19 = vadd.f32 %v6794_v23, %v11350_v9  ;;  %v7154_v9 = vld [vmem:[#allocation16 + $0x490] sm:$0xff] }
 0xeaf   :  { %v6796_v61 = vpop.f32.mrf.mxu0  ;;  %v7422_v23 = vld [vmem:[#allocation16 + $0x570] sm:$0xff] }
 0xeb0   :  { %9689 = vtanh.f32 %v6989_v32  ;;  %v6957_v39 = vadd.f32 %v6796_v61, %v11353_v1  ;;  %v6993_v18 = vadd.f32 %v6966_v5, %v6956_v19  ;;  %v7152_v1 = vld [vmem:[#allocation16 + $0x480] sm:$0xff]  ;;  %v7421_v32 = vld [vmem:[#allocation16 + $0x568] sm:$0xff]  ;;  %v7419_v61 = vld [vmem:[#allocation16 + $0x558] sm:$0xff] }
 0xeb1   :  { %9691 = vtanh.f32 %v6988_v20  ;;  %v7423_v20 = vld [vmem:[#allocation16 + $0x578] sm:$0xff]  ;;  %v7420_v19 = vld [vmem:[#allocation16 + $0x560] sm:$0xff] }
 0xeb2   :  { %v6994_v26 = vadd.f32 %v6970_v17, %v6957_v39  ;;  %v7425_v17 = vld [vmem:[#allocation16 + $0x588] sm:$0xff]  ;;  %v7418_v39 = vld [vmem:[#allocation16 + $0x550] sm:$0xff] }
 0xeb4   :  { %9693 = vtanh.f32 %v6994_v26  ;;  %v7416_v26 = vld [vmem:[#allocation16 + $0x540] sm:$0xff] }
 0xeb5   :  { %9695 = vtanh.f32 %v6993_v18  ;;  %v7417_v18 = vld [vmem:[#allocation16 + $0x548] sm:$0xff] }
 0xebd   :  { %v11437_v14 = vpop.eup %9689 }
 0xebe   :  { %v11439_v22 = vpop.eup %9691  ;;  %7229 = vmatprep.mubr.f32.mxu1 %v11437_v14 }
 0xebf   :  { %7230 = vmatmul.mubr.f32.vlgmr.msra.gmra.mxu1 %v11439_v22 }
 0xec0   :  { %7330 = vmatpush1.msra.mxu1 %v7156_v59  ;;  %v7415_v59 = vld [vmem:[#allocation16 + $0x538] sm:$0xff] }
 0xec1   :  { %v11443_v42 = vpop.eup %9693  ;;  %7331 = vmatprep.subr.mxu1 %v7155_v60  ;;  %v7414_v60 = vld [vmem:[#allocation16 + $0x530] sm:$0xff] }
 0xec2   :  { %v11445_v2 = vpop.eup %9695  ;;  %7235 = vmatprep.mubr.f32.mxu1 %v11443_v42  ;;  %7332 = vmatpush1.msra.mxu1 %v7154_v9  ;;  %v7413_v9 = vld [vmem:[#allocation16 + $0x528] sm:$0xff] }
 0xec3   :  { %7236 = vmatmul.mubr.f32.gmra.mxu1 %v11445_v2  ;;  %7333 = vmatprep.subr.mxu1 %v7153_v11  ;;  %v7412_v11 = vld [vmem:[#allocation16 + $0x520] sm:$0xff] }
 0xec4   :  { %7334 = vmatpush1.msra.mxu1 %v7152_v1  ;;  %7383 = vmatprep.mubr.f32.mxu1 %v9986_v0  ;;  %v7411_v1 = vld [vmem:[#allocation16 + $0x518] sm:$0xff] }
 0xec5   :  { %7335 = vmatprep.subr.mxu1 %v7151_v29  ;;  %v7410_v29 = vld [vmem:[#allocation16 + $0x510] sm:$0xff] }
 0xec6   :  { %7336 = vmatpush1.msra.mxu1 %v7150_v48  ;;  %v7409_v48 = vld [vmem:[#allocation16 + $0x508] sm:$0xff] }
 0xec7   :  { %7337 = vmatprep.subr.mxu1 %v7149_v58  ;;  %v7408_v58 = vld [vmem:[#allocation16 + $0x500] sm:$0xff] }
 0xec8   :  { %7338 = vmatpush1.msra.mxu1 %v7148_v53  ;;  %v6981_v53 = vsub.s32 4, %v11021_v43 }
 0xec9   :  { %7339 = vmatprep.subr.mxu1 %v7147_v36  ;;  %v7407_v36 = vld [vmem:[#allocation16 + $0x4f8] sm:$0xff] }
 0xeca   :  { %7340 = vmatpush1.msra.mxu1 %v7146_v12 }
 0xecb   :  { %7341 = vmatprep.subr.mxu1 %v7145_v51  ;;  %v7406_v51 = vld [vmem:[#allocation16 + $0x4f0] sm:$0xff] }
 0xecc   :  { %7342 = vmatpush1.msra.mxu1 %v7144_v41  ;;  %v7405_v41 = vld [vmem:[#allocation16 + $0x4e8] sm:$0xff] }
 0xecd   :  { %7343 = vmatprep.subr.mxu1 %v7143_v57 }
 0xece   :  { %7344 = vmatpush1.msra.mxu1 %v7142_v3  ;;  %v7404_v3 = vld [vmem:[#allocation16 + $0x4e0] sm:$0xff] }
 0xecf   :  { %7345 = vmatprep.subr.mxu1 %v7141_v38  ;;  %v6982_v38 = vrot.slane %v11427_v25, %v6981_v53  ;;  %v7461_v25 = vld [vmem:[#allocation16 + $0x6a8] sm:$0xff] }
 0xed0   :  { %7346 = vmatpush1.msra.mxu1 %v7140_v28  ;;  %v7481_v53 = vld [vmem:[#allocation16 + $0x748] sm:$0xff] }
 0xed1   :  { %7347 = vmatprep.subr.mxu1 %v7139_v40  ;;  %v7403_v40 = vld [vmem:[#allocation16 + $0x4d8] sm:$0xff] }
 0xed2   :  { %7348 = vmatpush1.msra.mxu1 %v7138_v15 }
 0xed3   :  { %7349 = vmatprep.subr.mxu1 %v7137_v44  ;;  %v7402_v44 = vld [vmem:[#allocation16 + $0x4d0] sm:$0xff] }
 0xed4   :  { %7350 = vmatpush1.msra.mxu1 %v7136_v24  ;;  %v7401_v24 = vld [vmem:[#allocation16 + $0x4c8] sm:$0xff] }
 0xed5   :  { %7625 = vmatprep.subr.mxu1 %v7493_v46  ;;  %v7400_v46 = vld [vmem:[#allocation16 + $0x4c0] sm:$0xff] }
 0xeec   :  { %v6865_v50 = vpop.f32.mrf.mxu0 }
 0xeed   :  { %v6953_v35 = vadd.f32 %v6865_v50, %v11384_v27  ;;  %v7399_v50 = vld [vmem:[#allocation16 + $0x4b8] sm:$0xff] }
 0xeee   :  { %v6867_v10 = vpop.f32.mrf.mxu0 }
 0xeef   :  { %v6954_v56 = vadd.f32 %v6867_v10, %v11388_v55  ;;  %v6990_v30 = vadd.f32 %v6974_v47, %v6953_v35  ;;  %v7427_v55 = vld [vmem:[#allocation16 + $0x598] sm:$0xff]  ;;  %v7398_v35 = vld [vmem:[#allocation16 + $0x4b0] sm:$0xff]  ;;  %v7457_v10 = vld [vmem:[#allocation16 + $0x688] sm:$0xff] }
 0xef0   :  { %v6871_v33 = vpop.f32.mrf.mxu0 }
 0xef1   :  { %v6991_v54 = vadd.f32 %v6978_v49, %v6954_v56  ;;  %v6958_v16 = vadd.f32 %v6871_v33, %v11392_v4  ;;  %v7426_v4 = vld [vmem:[#allocation16 + $0x590] sm:$0xff]  ;;  %v7456_v56 = vld [vmem:[#allocation16 + $0x680] sm:$0xff] }
 0xef2   :  { %v6873_v6 = vpop.f32.mrf.mxu0  ;;  %v7454_v33 = vld [vmem:[#allocation16 + $0x670] sm:$0xff] }
 0xef3   :  { %9697 = vtanh.f32 %v6991_v54  ;;  %v6959_v31 = vadd.f32 %v6873_v6, %v11396_v13  ;;  %v6995_v62 = vadd.f32 %v6974_v47, %v6958_v16  ;;  %v7424_v13 = vld [vmem:[#allocation16 + $0x580] sm:$0xff]  ;;  %v7453_v54 = vld [vmem:[#allocation16 + $0x668] sm:$0xff]  ;;  %v7451_v6 = vld [vmem:[#allocation16 + $0x658] sm:$0xff] }
 0xef4   :  { %9699 = vtanh.f32 %v6990_v30  ;;  %v7455_v30 = vld [vmem:[#allocation16 + $0x678] sm:$0xff]  ;;  %v7452_v16 = vld [vmem:[#allocation16 + $0x660] sm:$0xff] }
 0xef5   :  { %v6996_v5 = vadd.f32 %v6978_v49, %v6959_v31  ;;  %v7459_v49 = vld [vmem:[#allocation16 + $0x698] sm:$0xff]  ;;  %v7492_v31 = vld [vmem:[#allocation16 + $0x7a0] sm:$0xff] }
 0xef7   :  { %9701 = vtanh.f32 %v6996_v5  ;;  %v7450_v5 = vld [vmem:[#allocation16 + $0x650] sm:$0xff] }
 0xef8   :  { %9703 = vtanh.f32 %v6995_v62 }
 0xf00   :  { %v11460_v27 = vpop.eup %9697 }
 0xf01   :  { %v11462_v34 = vpop.eup %9699  ;;  %7306 = vmatprep.mubr.f32.mxu0 %v11460_v27 }
 0xf02   :  { %7307 = vmatmul.mubr.f32.vlgmr.msra.gmra.mxu0 %v11462_v34 }
 0xf03   :  { %7549 = vmatpush1.msra.mxu0 %v7428_v7  ;;  %v7491_v7 = vld [vmem:[#allocation16 + $0x798] sm:$0xff] }
 0xf04   :  { %v11466_v37 = vpop.eup %9701  ;;  %7550 = vmatprep.subr.mxu0 %v7427_v55  ;;  %v7449_v55 = vld [vmem:[#allocation16 + $0x648] sm:$0xff] }
 0xf05   :  { %v11468_v63 = vpop.eup %9703  ;;  %7551 = vmatpush1.msra.mxu0 %v7426_v4  ;;  %7312 = vmatprep.mubr.f32.mxu0 %v11466_v37  ;;  %v7490_v4 = vld [vmem:[#allocation16 + $0x790] sm:$0xff] }
 0xf06   :  { %7552 = vmatprep.subr.mxu0 %v7425_v17  ;;  %7313 = vmatmul.mubr.f32.gmra.mxu0 %v11468_v63  ;;  %v7448_v17 = vld [vmem:[#allocation16 + $0x640] sm:$0xff] }
 0xf07   :  { %7553 = vmatpush1.msra.mxu0 %v7424_v13  ;;  %7612 = vmatprep.mubr.f32.mxu0 %v11437_v14  ;;  %v7489_v13 = vld [vmem:[#allocation16 + $0x788] sm:$0xff] }
 0xf08   :  { %7554 = vmatprep.subr.mxu0 %v7423_v20  ;;  %v7447_v20 = vld [vmem:[#allocation16 + $0x638] sm:$0xff] }
 0xf09   :  { %7555 = vmatpush1.msra.mxu0 %v7422_v23  ;;  %v7488_v23 = vld [vmem:[#allocation16 + $0x780] sm:$0xff] }
 0xf0a   :  { %7556 = vmatprep.subr.mxu0 %v7421_v32 }
 0xf0b   :  { %7557 = vmatpush1.msra.mxu0 %v7420_v19  ;;  %v7446_v19 = vld [vmem:[#allocation16 + $0x630] sm:$0xff] }
 0xf0c   :  { %7558 = vmatprep.subr.mxu0 %v7419_v61  ;;  %v7487_v61 = vld [vmem:[#allocation16 + $0x778] sm:$0xff] }
 0xf0d   :  { %7559 = vmatpush1.msra.mxu0 %v7418_v39  ;;  %v7445_v39 = vld [vmem:[#allocation16 + $0x628] sm:$0xff] }
 0xf0e   :  { %7560 = vmatprep.subr.mxu0 %v7417_v18  ;;  %v7486_v18 = vld [vmem:[#allocation16 + $0x770] sm:$0xff] }
 0xf0f   :  { %7561 = vmatpush1.msra.mxu0 %v7416_v26  ;;  %v7444_v26 = vld [vmem:[#allocation16 + $0x620] sm:$0xff] }
 0xf10   :  { %7562 = vmatprep.subr.mxu0 %v7415_v59  ;;  %v7485_v59 = vld [vmem:[#allocation16 + $0x768] sm:$0xff] }
 0xf11   :  { %7563 = vmatpush1.msra.mxu0 %v7414_v60  ;;  %v7443_v60 = vld [vmem:[#allocation16 + $0x618] sm:$0xff] }
 0xf12   :  { %7564 = vmatprep.subr.mxu0 %v7413_v9  ;;  %v7484_v9 = vld [vmem:[#allocation16 + $0x760] sm:$0xff] }
 0xf13   :  { %7565 = vmatpush1.msra.mxu0 %v7412_v11  ;;  %v7442_v11 = vld [vmem:[#allocation16 + $0x610] sm:$0xff] }
 0xf14   :  { %7566 = vmatprep.subr.mxu0 %v7411_v1  ;;  %v7483_v1 = vld [vmem:[#allocation16 + $0x758] sm:$0xff] }
 0xf15   :  { %7567 = vmatpush1.msra.mxu0 %v7410_v29  ;;  %v7441_v29 = vld [vmem:[#allocation16 + $0x608] sm:$0xff] }
 0xf16   :  { %7568 = vmatprep.subr.mxu0 %v7409_v48  ;;  %v9640_v12 = vpop.f32.mrf.mxu0  ;;  %v7482_v48 = vld [vmem:[#allocation16 + $0x750] sm:$0xff] }
 0xf17   :  { %7569 = vmatpush1.msra.mxu0 %v7408_v58  ;;  %v6960_v15 = vadd.f32 %v9640_v12, %v11403_v52  ;;  %v7458_v52 = vld [vmem:[#allocation16 + $0x690] sm:$0xff]  ;;  %v7440_v58 = vld [vmem:[#allocation16 + $0x600] sm:$0xff] }
 0xf18   :  { %7570 = vmatprep.subr.mxu0 %v7407_v36  ;;  %v6942_v57 = vpop.f32.mrf.mxu0  ;;  %v7439_v36 = vld [vmem:[#allocation16 + $0x5f8] sm:$0xff]  ;;  %v7480_v12 = vld [vmem:[#allocation16 + $0x740] sm:$0xff] }
 0xf19   :  { %v6955_v28 = vadd.f32 %v6942_v57, %v11406_v21  ;;  %7571 = vmatpush1.msra.mxu0 %v7406_v51  ;;  %v6997_v47 = vadd.f32 %v6982_v38, %v6960_v15  ;;  %v7460_v21 = vld [vmem:[#allocation16 + $0x6a0] sm:$0xff]  ;;  %v7438_v51 = vld [vmem:[#allocation16 + $0x5f0] sm:$0xff]  ;;  %v7437_v57 = vld [vmem:[#allocation16 + $0x5e8] sm:$0xff] }
 0xf1a   :  { %7572 = vmatprep.subr.mxu0 %v7405_v41  ;;  %v7479_v41 = vld [vmem:[#allocation16 + $0x738] sm:$0xff]  ;;  %v7476_v15 = vld [vmem:[#allocation16 + $0x720] sm:$0xff] }
 0xf1b   :  { %v6992_v43 = vadd.f32 %v6982_v38, %v6955_v28  ;;  %7573 = vmatpush1.msra.mxu0 %v7404_v3  ;;  %v7478_v3 = vld [vmem:[#allocation16 + $0x730] sm:$0xff]  ;;  %v7436_v38 = vld [vmem:[#allocation16 + $0x5e0] sm:$0xff]  ;;  %v7477_v28 = vld [vmem:[#allocation16 + $0x728] sm:$0xff] }
 0xf1c   :  { %7574 = vmatprep.subr.mxu0 %v7403_v40  ;;  %v7435_v40 = vld [vmem:[#allocation16 + $0x5d8] sm:$0xff] }
 0xf1d   :  { %9705 = vtanh.f32 %v6992_v43  ;;  %7575 = vmatpush1.msra.mxu0 %v7402_v44  ;;  %v7434_v44 = vld [vmem:[#allocation16 + $0x5d0] sm:$0xff]  ;;  %v7475_v43 = vld [vmem:[#allocation16 + $0x718] sm:$0xff] }
 0xf1e   :  { %7576 = vmatprep.subr.mxu0 %v7401_v24  ;;  %9707 = vtanh.f32 %v6997_v47  ;;  %v7433_v24 = vld [vmem:[#allocation16 + $0x5c8] sm:$0xff] }
 0xf1f   :  { %7577 = vmatpush1.msra.mxu0 %v7400_v46  ;;  %v7474_v46 = vld [vmem:[#allocation16 + $0x710] sm:$0xff]  ;;  %v7473_v47 = vld [vmem:[#allocation16 + $0x708] sm:$0xff] }
 0xf20   :  { %7578 = vmatprep.subr.mxu0 %v7399_v50  ;;  %v7432_v50 = vld [vmem:[#allocation16 + $0x5c0] sm:$0xff] }
 0xf21   :  { %7579 = vmatpush1.msra.mxu0 %v7398_v35  ;;  %v7431_v35 = vld [vmem:[#allocation16 + $0x5b8] sm:$0xff] }
 0xf22   :  { %7580 = vmatprep.subr.mxu0 %v7461_v25  ;;  %v7472_v25 = vld [vmem:[#allocation16 + $0x700] sm:$0xff] }
 0xf23   :  { %7581 = vmatpush2.msra.mxu0 %v7460_v21  ;;  %v7430_v21 = vld [vmem:[#allocation16 + $0x5b0] sm:$0xff] }
 0xf24   :  { %7582 = vmatprep.subr.mxu0 %v7459_v49  ;;  %v7471_v49 = vld [vmem:[#allocation16 + $0x6f8] sm:$0xff] }
 0xf25   :  { %7583 = vmatpush2.msra.mxu0 %v7458_v52  ;;  %v7470_v52 = vld [vmem:[#allocation16 + $0x6f0] sm:$0xff] }
 0xf26   :  { %7584 = vmatprep.subr.mxu0 %v7457_v10  ;;  %v7547_v10 = vld [vmem:[#allocation16 + $0x958] sm:$0xff] }
 0xf27   :  { %7585 = vmatpush2.msra.mxu0 %v7456_v56  ;;  %v7469_v56 = vld [vmem:[#allocation16 + $0x6e8] sm:$0xff] }
 0xf28   :  { %7586 = vmatprep.subr.mxu0 %v7455_v30  ;;  %v7546_v30 = vld [vmem:[#allocation16 + $0x950] sm:$0xff] }
 0xf29   :  { %7587 = vmatpush2.msra.mxu0 %v7454_v33  ;;  %v7468_v33 = vld [vmem:[#allocation16 + $0x6e0] sm:$0xff] }
 0xf2a   :  { %v11477_v62 = vpop.eup %9705  ;;  %7588 = vmatprep.subr.mxu0 %v7453_v54  ;;  %v7545_v54 = vld [vmem:[#allocation16 + $0x948] sm:$0xff] }
 0xf2b   :  { %7589 = vmatpush2.msra.mxu0 %v7452_v16  ;;  %9105 = vmatmul.mubr.msk.f32.vlgmr.msra.gmra.mxu1 %vm7158_vm7, %v11477_v62  ;;  %v11481_v32 = vpop.eup %9707  ;;  %v7467_v16 = vld [vmem:[#allocation16 + $0x6d8] sm:$0xff] }
 0xf2c   :  { %7590 = vmatprep.subr.mxu0 %v7451_v6  ;;  %7626 = vmatpush1.msra.mxu1 %v7492_v31  ;;  %v7544_v6 = vld [vmem:[#allocation16 + $0x940] sm:$0xff]  ;;  %v7466_v31 = vld [vmem:[#allocation16 + $0x6d0] sm:$0xff] }
 0xf2d   :  { %7591 = vmatpush2.msra.mxu0 %v7450_v5  ;;  %7627 = vmatprep.subr.mxu1 %v7491_v7  ;;  %v7543_v5 = vld [vmem:[#allocation16 + $0x938] sm:$0xff]  ;;  %v7465_v7 = vld [vmem:[#allocation16 + $0x6c8] sm:$0xff] }
 0xf2e   :  { %7592 = vmatprep.subr.mxu0 %v7449_v55  ;;  %7628 = vmatpush1.msra.mxu1 %v7490_v4  ;;  %v7542_v55 = vld [vmem:[#allocation16 + $0x930] sm:$0xff]  ;;  %v7464_v4 = vld [vmem:[#allocation16 + $0x6c0] sm:$0xff] }
 0xf2f   :  { %7389 = vmatprep.mubr.f32.mxu1 %v9986_v0  ;;  %7593 = vmatpush2.msra.mxu0 %v7448_v17  ;;  %v7541_v17 = vld [vmem:[#allocation16 + $0x928] sm:$0xff] }
 0xf30   :  { %7629 = vmatprep.subr.mxu1 %v7489_v13  ;;  %9106 = vmatmul.mubr.msk.f32.gmra.mxu1 %vm7158_vm7, %v11481_v32  ;;  %v7463_v13 = vld [vmem:[#allocation16 + $0x6b8] sm:$0xff] }
 0xf31   :  { %7594 = vmatprep.subr.mxu0 %v7447_v20  ;;  %7630 = vmatpush1.msra.mxu1 %v7488_v23  ;;  %v7540_v20 = vld [vmem:[#allocation16 + $0x920] sm:$0xff]  ;;  %v7462_v23 = vld [vmem:[#allocation16 + $0x6b0] sm:$0xff] }
 0xf32   :  { %7595 = vmatpush2.msra.mxu0 %v7446_v19  ;;  %7631 = vmatprep.subr.mxu1 %v7487_v61  ;;  %v7539_v19 = vld [vmem:[#allocation16 + $0x918] sm:$0xff]  ;;  %v7525_v61 = vld [vmem:[#allocation16 + $0x8a8] sm:$0xff] }
 0xf33   :  { %7689 = vmatprep.mubr.f32.mxu1 %v11460_v27  ;;  %7596 = vmatprep.subr.mxu0 %v7445_v39  ;;  %v7538_v39 = vld [vmem:[#allocation16 + $0x910] sm:$0xff] }
 0xf34   :  { %7632 = vmatpush1.msra.mxu1 %v7486_v18  ;;  %7597 = vmatpush2.msra.mxu0 %v7444_v26  ;;  %v7524_v18 = vld [vmem:[#allocation16 + $0x8a0] sm:$0xff]  ;;  %v7537_v26 = vld [vmem:[#allocation16 + $0x908] sm:$0xff] }
 0xf35   :  { %7633 = vmatprep.subr.mxu1 %v7485_v59  ;;  %7598 = vmatprep.subr.mxu0 %v7443_v60  ;;  %v7523_v59 = vld [vmem:[#allocation16 + $0x898] sm:$0xff]  ;;  %v7536_v60 = vld [vmem:[#allocation16 + $0x900] sm:$0xff] }
 0xf36   :  { %7634 = vmatpush1.msra.mxu1 %v7484_v9  ;;  %7599 = vmatpush2.msra.mxu0 %v7442_v11  ;;  %v7522_v9 = vld [vmem:[#allocation16 + $0x890] sm:$0xff]  ;;  %v7535_v11 = vld [vmem:[#allocation16 + $0x8f8] sm:$0xff] }
 0xf37   :  { %7635 = vmatprep.subr.mxu1 %v7483_v1  ;;  %7600 = vmatprep.subr.mxu0 %v7441_v29  ;;  %v7521_v1 = vld [vmem:[#allocation16 + $0x888] sm:$0xff]  ;;  %v7534_v29 = vld [vmem:[#allocation16 + $0x8f0] sm:$0xff] }
 0xf38   :  { %7636 = vmatpush1.msra.mxu1 %v7482_v48  ;;  %7601 = vmatpush2.msra.mxu0 %v7440_v58  ;;  %v7520_v48 = vld [vmem:[#allocation16 + $0x880] sm:$0xff]  ;;  %v7533_v58 = vld [vmem:[#allocation16 + $0x8e8] sm:$0xff] }
 0xf39   :  { %7637 = vmatprep.subr.mxu1 %v7481_v53  ;;  %7602 = vmatprep.subr.mxu0 %v7439_v36  ;;  %v7519_v53 = vld [vmem:[#allocation16 + $0x878] sm:$0xff]  ;;  %v7532_v36 = vld [vmem:[#allocation16 + $0x8e0] sm:$0xff] }
 0xf3a   :  { %7638 = vmatpush1.msra.mxu1 %v7480_v12  ;;  %7603 = vmatpush2.msra.mxu0 %v7438_v51  ;;  %v7518_v12 = vld [vmem:[#allocation16 + $0x870] sm:$0xff]  ;;  %v7531_v51 = vld [vmem:[#allocation16 + $0x8d8] sm:$0xff] }
 0xf3b   :  { %7639 = vmatprep.subr.mxu1 %v7479_v41  ;;  %7604 = vmatprep.subr.mxu0 %v7437_v57  ;;  %v7517_v41 = vld [vmem:[#allocation16 + $0x868] sm:$0xff]  ;;  %v7530_v57 = vld [vmem:[#allocation16 + $0x8d0] sm:$0xff] }
 0xf3c   :  { %7640 = vmatpush1.msra.mxu1 %v7478_v3  ;;  %7605 = vmatpush2.msra.mxu0 %v7436_v38  ;;  %v7516_v3 = vld [vmem:[#allocation16 + $0x860] sm:$0xff]  ;;  %v7529_v38 = vld [vmem:[#allocation16 + $0x8c8] sm:$0xff] }
 0xf3d   :  { %7641 = vmatprep.subr.mxu1 %v7477_v28  ;;  %7606 = vmatprep.subr.mxu0 %v7435_v40  ;;  %v7515_v28 = vld [vmem:[#allocation16 + $0x858] sm:$0xff]  ;;  %v7528_v40 = vld [vmem:[#allocation16 + $0x8c0] sm:$0xff] }
 0xf3e   :  { %7642 = vmatpush1.msra.mxu1 %v7476_v15  ;;  %7607 = vmatpush2.msra.mxu0 %v7434_v44  ;;  %v7514_v15 = vld [vmem:[#allocation16 + $0x850] sm:$0xff]  ;;  %v7527_v44 = vld [vmem:[#allocation16 + $0x8b8] sm:$0xff] }
 0xf3f   :  { %7643 = vmatprep.subr.mxu1 %v7475_v43  ;;  %7608 = vmatprep.subr.mxu0 %v7433_v24  ;;  %v7513_v43 = vld [vmem:[#allocation16 + $0x848] sm:$0xff]  ;;  %v7526_v24 = vld [vmem:[#allocation16 + $0x8b0] sm:$0xff] }
 0xf40   :  { %7644 = vmatpush1.msra.mxu1 %v7474_v46  ;;  %7609 = vmatpush2.msra.mxu0 %v7432_v50  ;;  %v7512_v46 = vld [vmem:[#allocation16 + $0x840] sm:$0xff]  ;;  %v7975_v50 = vld [vmem:[#allocation16 + $0xa58] sm:$0xff] }
 0xf41   :  { %7645 = vmatprep.subr.mxu1 %v7473_v47  ;;  %7610 = vmatprep.subr.mxu0 %v7431_v35  ;;  %v7511_v47 = vld [vmem:[#allocation16 + $0x838] sm:$0xff]  ;;  %v7974_v35 = vld [vmem:[#allocation16 + $0xa50] sm:$0xff] }
 0xf42   :  { %7646 = vmatpush1.msra.mxu1 %v7472_v25  ;;  %7611 = vmatpush2.msra.mxu0 %v7430_v21  ;;  %v7510_v25 = vld [vmem:[#allocation16 + $0x830] sm:$0xff]  ;;  %v7973_v21 = vld [vmem:[#allocation16 + $0xa48] sm:$0xff] }
 0xf43   :  { %7647 = vmatprep.subr.mxu1 %v7471_v49  ;;  %7613 = vmatmul.mubr.f32.vlgmr.msra.gmra.mxu0 %v11439_v22  ;;  %v7509_v49 = vld [vmem:[#allocation16 + $0x828] sm:$0xff] }
 0xf44   :  { %7648 = vmatpush1.msra.mxu1 %v7470_v52  ;;  %7712 = vmatprep.subr.mxu0 %v7547_v10  ;;  %v7972_v52 = vld [vmem:[#allocation16 + $0xa40] sm:$0xff] }
 0xf45   :  { %7618 = vmatprep.mubr.f32.mxu0 %v11443_v42  ;;  %7649 = vmatprep.subr.mxu1 %v7469_v56  ;;  %v7508_v10 = vld [vmem:[#allocation16 + $0x820] sm:$0xff]  ;;  %v7971_v56 = vld [vmem:[#allocation16 + $0xa38] sm:$0xff] }
 0xf46   :  { %7713 = vmatpush1.msra.mxu0 %v7546_v30  ;;  %7650 = vmatpush1.msra.mxu1 %v7468_v33  ;;  %v7507_v30 = vld [vmem:[#allocation16 + $0x818] sm:$0xff]  ;;  %v7970_v33 = vld [vmem:[#allocation16 + $0xa30] sm:$0xff] }
 0xf47   :  { %7714 = vmatprep.subr.mxu0 %v7545_v54  ;;  %7651 = vmatprep.subr.mxu1 %v7467_v16  ;;  %v7506_v54 = vld [vmem:[#allocation16 + $0x810] sm:$0xff]  ;;  %v7969_v16 = vld [vmem:[#allocation16 + $0xa28] sm:$0xff] }
 0xf48   :  { %7715 = vmatpush1.msra.mxu0 %v7544_v6  ;;  %7652 = vmatpush1.msra.mxu1 %v7466_v31  ;;  %v7505_v6 = vld [vmem:[#allocation16 + $0x808] sm:$0xff]  ;;  %v7968_v31 = vld [vmem:[#allocation16 + $0xa20] sm:$0xff] }
 0xf49   :  { %7619 = vmatmul.mubr.f32.gmra.mxu0 %v11445_v2  ;;  %7716 = vmatprep.subr.mxu0 %v7543_v5  ;;  %v7504_v5 = vld [vmem:[#allocation16 + $0x800] sm:$0xff] }
 0xf4a   :  { %7653 = vmatprep.subr.mxu1 %v7465_v7  ;;  %7717 = vmatpush1.msra.mxu0 %v7542_v55  ;;  %v7967_v7 = vld [vmem:[#allocation16 + $0xa18] sm:$0xff] }
 0xf4b   :  { %7654 = vmatpush1.msra.mxu1 %v7464_v4  ;;  %7718 = vmatprep.subr.mxu0 %v7541_v17  ;;  %v7503_v55 = vld [vmem:[#allocation16 + $0x7f8] sm:$0xff]  ;;  %v7966_v4 = vld [vmem:[#allocation16 + $0xa10] sm:$0xff] }
 0xf4c   :  { %7655 = vmatprep.subr.mxu1 %v7463_v13  ;;  %7719 = vmatpush1.msra.mxu0 %v7540_v20  ;;  %v7502_v17 = vld [vmem:[#allocation16 + $0x7f0] sm:$0xff]  ;;  %v7965_v13 = vld [vmem:[#allocation16 + $0xa08] sm:$0xff] }
 0xf4d   :  { %7656 = vmatpush1.msra.mxu1 %v7462_v23  ;;  %7720 = vmatprep.subr.mxu0 %v7539_v19  ;;  %v7501_v20 = vld [vmem:[#allocation16 + $0x7e8] sm:$0xff]  ;;  %v7964_v23 = vld [vmem:[#allocation16 + $0xa00] sm:$0xff] }
 0xf4e   :  { %7657 = vmatprep.subr.mxu1 %v7525_v61  ;;  %7721 = vmatpush1.msra.mxu0 %v7538_v39  ;;  %v7500_v19 = vld [vmem:[#allocation16 + $0x7e0] sm:$0xff]  ;;  %v7963_v61 = vld [vmem:[#allocation16 + $0x9f8] sm:$0xff] }
 0xf4f   :  { %7658 = vmatpush2.msra.mxu1 %v7524_v18  ;;  %7722 = vmatprep.subr.mxu0 %v7537_v26  ;;  %v7499_v39 = vld [vmem:[#allocation16 + $0x7d8] sm:$0xff]  ;;  %v7962_v18 = vld [vmem:[#allocation16 + $0x9f0] sm:$0xff] }
 0xf50   :  { %7659 = vmatprep.subr.mxu1 %v7523_v59  ;;  %7723 = vmatpush1.msra.mxu0 %v7536_v60  ;;  %v7498_v26 = vld [vmem:[#allocation16 + $0x7d0] sm:$0xff]  ;;  %v7961_v59 = vld [vmem:[#allocation16 + $0x9e8] sm:$0xff] }
 0xf51   :  { %7660 = vmatpush2.msra.mxu1 %v7522_v9  ;;  %7724 = vmatprep.subr.mxu0 %v7535_v11  ;;  %v7497_v60 = vld [vmem:[#allocation16 + $0x7c8] sm:$0xff]  ;;  %v7960_v9 = vld [vmem:[#allocation16 + $0x9e0] sm:$0xff] }
 0xf52   :  { %7661 = vmatprep.subr.mxu1 %v7521_v1  ;;  %7725 = vmatpush1.msra.mxu0 %v7534_v29  ;;  %v7496_v11 = vld [vmem:[#allocation16 + $0x7c0] sm:$0xff]  ;;  %v7959_v1 = vld [vmem:[#allocation16 + $0x9d8] sm:$0xff] }
 0xf53   :  { %7662 = vmatpush2.msra.mxu1 %v7520_v48  ;;  %7726 = vmatprep.subr.mxu0 %v7533_v58  ;;  %v7495_v29 = vld [vmem:[#allocation16 + $0x7b8] sm:$0xff]  ;;  %v7958_v48 = vld [vmem:[#allocation16 + $0x9d0] sm:$0xff] }
 0xf54   :  { %7663 = vmatprep.subr.mxu1 %v7519_v53  ;;  %7727 = vmatpush1.msra.mxu0 %v7532_v36  ;;  %v7494_v58 = vld [vmem:[#allocation16 + $0x7b0] sm:$0xff]  ;;  %v7957_v53 = vld [vmem:[#allocation16 + $0x9c8] sm:$0xff]  ;;  %v7956_v36 = vld [vmem:[#allocation16 + $0x9c0] sm:$0xff] }
 0xf55   :  { %7664 = vmatpush2.msra.mxu1 %v7518_v12  ;;  %7728 = vmatprep.subr.mxu0 %v7531_v51  ;;  %v7955_v12 = vld [vmem:[#allocation16 + $0x9b8] sm:$0xff]  ;;  %v7954_v51 = vld [vmem:[#allocation16 + $0x9b0] sm:$0xff] }
 0xf56   :  { %7665 = vmatprep.subr.mxu1 %v7517_v41  ;;  %7729 = vmatpush1.msra.mxu0 %v7530_v57  ;;  %v7953_v41 = vld [vmem:[#allocation16 + $0x9a8] sm:$0xff]  ;;  %v7952_v57 = vld [vmem:[#allocation16 + $0x9a0] sm:$0xff] }
 0xf57   :  { %7666 = vmatpush2.msra.mxu1 %v7516_v3  ;;  %7730 = vmatprep.subr.mxu0 %v7529_v38  ;;  %v7951_v3 = vld [vmem:[#allocation16 + $0x998] sm:$0xff]  ;;  %v7950_v38 = vld [vmem:[#allocation16 + $0x990] sm:$0xff] }
 0xf58   :  { %7667 = vmatprep.subr.mxu1 %v7515_v28  ;;  %7731 = vmatpush1.msra.mxu0 %v7528_v40  ;;  %v7949_v28 = vld [vmem:[#allocation16 + $0x988] sm:$0xff]  ;;  %v7948_v40 = vld [vmem:[#allocation16 + $0x980] sm:$0xff] }
 0xf59   :  { %7668 = vmatpush2.msra.mxu1 %v7514_v15  ;;  %7732 = vmatprep.subr.mxu0 %v7527_v44  ;;  %v7947_v15 = vld [vmem:[#allocation16 + $0x978] sm:$0xff]  ;;  %v7946_v44 = vld [vmem:[#allocation16 + $0x970] sm:$0xff] }
 0xf5a   :  { %7669 = vmatprep.subr.mxu1 %v7513_v43  ;;  %7733 = vmatpush1.msra.mxu0 %v7526_v24  ;;  %v7945_v43 = vld [vmem:[#allocation16 + $0x968] sm:$0xff]  ;;  %v7944_v24 = vld [vmem:[#allocation16 + $0x960] sm:$0xff] }
 0xf5b   :  { %7766 = vmatprep.mubr.f32.mxu0 %v9986_v0  ;;  %7670 = vmatpush2.msra.mxu1 %v7512_v46  ;;  %v8007_v46 = vld [vmem:[#allocation16 + $0xb58] sm:$0xff] }
 0xf5c   :  { %9107 = vmatmul.mubr.msk.f32.vlgmr.msra.gmra.mxu0 %vm7158_vm7, %v11477_v62  ;;  %8094 = vmatprep.subr.mxu0 %v7975_v50  ;;  %v8006_v50 = vld [vmem:[#allocation16 + $0xb50] sm:$0xff] }
 0xf5d   :  { %7671 = vmatprep.subr.mxu1 %v7511_v47  ;;  %8095 = vmatpush1.msra.mxu0 %v7974_v35  ;;  %v8005_v47 = vld [vmem:[#allocation16 + $0xb48] sm:$0xff]  ;;  %v8004_v35 = vld [vmem:[#allocation16 + $0xb40] sm:$0xff] }
 0xf5e   :  { %7672 = vmatpush2.msra.mxu1 %v7510_v25  ;;  %8096 = vmatprep.subr.mxu0 %v7973_v21  ;;  %v8003_v25 = vld [vmem:[#allocation16 + $0xb38] sm:$0xff]  ;;  %v8002_v21 = vld [vmem:[#allocation16 + $0xb30] sm:$0xff] }
 0xf5f   :  { %7673 = vmatprep.subr.mxu1 %v7509_v49  ;;  %7772 = vmatprep.mubr.f32.mxu0 %v9986_v0  ;;  %v8001_v49 = vld [vmem:[#allocation16 + $0xb28] sm:$0xff] }
 0xf60   :  { %8097 = vmatpush1.msra.mxu0 %v7972_v52  ;;  %7674 = vmatpush2.msra.mxu1 %v7508_v10  ;;  %v8000_v52 = vld [vmem:[#allocation16 + $0xb20] sm:$0xff]  ;;  %v7999_v10 = vld [vmem:[#allocation16 + $0xb18] sm:$0xff] }
 0xf61   :  { %9108 = vmatmul.mubr.msk.f32.gmra.mxu0 %vm7158_vm7, %v11481_v32  ;;  %8098 = vmatprep.subr.mxu0 %v7971_v56  ;;  %v7998_v56 = vld [vmem:[#allocation16 + $0xb10] sm:$0xff] }
 0xf62   :  { %7675 = vmatprep.subr.mxu1 %v7507_v30  ;;  %8099 = vmatpush1.msra.mxu0 %v7970_v33  ;;  %v7997_v30 = vld [vmem:[#allocation16 + $0xb08] sm:$0xff]  ;;  %v7996_v33 = vld [vmem:[#allocation16 + $0xb00] sm:$0xff] }
 0xf63   :  { %8158 = vmatprep.mubr.f32.mxu0 %v11437_v14  ;;  %7676 = vmatpush2.msra.mxu1 %v7506_v54  ;;  %v7995_v54 = vld [vmem:[#allocation16 + $0xaf8] sm:$0xff] }
 0xf64   :  { %8100 = vmatprep.subr.mxu0 %v7969_v16  ;;  %7677 = vmatprep.subr.mxu1 %v7505_v6  ;;  %v7994_v16 = vld [vmem:[#allocation16 + $0xaf0] sm:$0xff]  ;;  %v7993_v6 = vld [vmem:[#allocation16 + $0xae8] sm:$0xff] }
 0xf65   :  { %8101 = vmatpush1.msra.mxu0 %v7968_v31  ;;  %7678 = vmatpush2.msra.mxu1 %v7504_v5  ;;  %v7992_v31 = vld [vmem:[#allocation16 + $0xae0] sm:$0xff]  ;;  %v7991_v5 = vld [vmem:[#allocation16 + $0xad8] sm:$0xff] }
 0xf66   :  { %8102 = vmatprep.subr.mxu0 %v7967_v7  ;;  %7679 = vmatprep.subr.mxu1 %v7503_v55  ;;  %v7990_v7 = vld [vmem:[#allocation16 + $0xad0] sm:$0xff]  ;;  %v7989_v55 = vld [vmem:[#allocation16 + $0xac8] sm:$0xff] }
 0xf67   :  { %8103 = vmatpush1.msra.mxu0 %v7966_v4  ;;  %7680 = vmatpush2.msra.mxu1 %v7502_v17  ;;  %v7988_v4 = vld [vmem:[#allocation16 + $0xac0] sm:$0xff]  ;;  %v7987_v17 = vld [vmem:[#allocation16 + $0xab8] sm:$0xff] }
 0xf68   :  { %8104 = vmatprep.subr.mxu0 %v7965_v13  ;;  %7681 = vmatprep.subr.mxu1 %v7501_v20  ;;  %v7986_v13 = vld [vmem:[#allocation16 + $0xab0] sm:$0xff]  ;;  %v7985_v20 = vld [vmem:[#allocation16 + $0xaa8] sm:$0xff] }
 0xf69   :  { %8105 = vmatpush1.msra.mxu0 %v7964_v23  ;;  %7682 = vmatpush2.msra.mxu1 %v7500_v19  ;;  %v7984_v23 = vld [vmem:[#allocation16 + $0xaa0] sm:$0xff]  ;;  %v7983_v19 = vld [vmem:[#allocation16 + $0xa98] sm:$0xff] }
 0xf6a   :  { %8106 = vmatprep.subr.mxu0 %v7963_v61  ;;  %7683 = vmatprep.subr.mxu1 %v7499_v39  ;;  %v7982_v61 = vld [vmem:[#allocation16 + $0xa90] sm:$0xff]  ;;  %v7981_v39 = vld [vmem:[#allocation16 + $0xa88] sm:$0xff] }
 0xf6b   :  { %8107 = vmatpush1.msra.mxu0 %v7962_v18  ;;  %7684 = vmatpush2.msra.mxu1 %v7498_v26  ;;  %v7980_v18 = vld [vmem:[#allocation16 + $0xa80] sm:$0xff]  ;;  %v7979_v26 = vld [vmem:[#allocation16 + $0xa78] sm:$0xff] }
 0xf6c   :  { %8108 = vmatprep.subr.mxu0 %v7961_v59  ;;  %7685 = vmatprep.subr.mxu1 %v7497_v60  ;;  %v7978_v59 = vld [vmem:[#allocation16 + $0xa70] sm:$0xff]  ;;  %v7977_v60 = vld [vmem:[#allocation16 + $0xa68] sm:$0xff] }
 0xf6d   :  { %8109 = vmatpush1.msra.mxu0 %v7960_v9  ;;  %7686 = vmatpush2.msra.mxu1 %v7496_v11  ;;  %v7976_v9 = vld [vmem:[#allocation16 + $0xa60] sm:$0xff]  ;;  %v8093_v11 = vld [vmem:[#allocation16 + $0xe08] sm:$0xff] }
 0xf6e   :  { %8110 = vmatprep.subr.mxu0 %v7959_v1  ;;  %7687 = vmatprep.subr.mxu1 %v7495_v29  ;;  %v8092_v1 = vld [vmem:[#allocation16 + $0xe00] sm:$0xff]  ;;  %v8091_v29 = vld [vmem:[#allocation16 + $0xdf8] sm:$0xff] }
 0xf6f   :  { %8111 = vmatpush1.msra.mxu0 %v7958_v48  ;;  %7688 = vmatpush2.msra.mxu1 %v7494_v58  ;;  %v8090_v48 = vld [vmem:[#allocation16 + $0xdf0] sm:$0xff]  ;;  %v8089_v58 = vld [vmem:[#allocation16 + $0xde8] sm:$0xff] }
 0xf70   :  { %8112 = vmatprep.subr.mxu0 %v7957_v53  ;;  %7690 = vmatmul.mubr.f32.vlgmr.msra.gmra.mxu1 %v11462_v34  ;;  %v8088_v53 = vld [vmem:[#allocation16 + $0xde0] sm:$0xff] }
 0xf71   :  { %8113 = vmatpush1.msra.mxu0 %v7956_v36  ;;  %7695 = vmatprep.mubr.f32.mxu1 %v11466_v37  ;;  %v8087_v36 = vld [vmem:[#allocation16 + $0xdd8] sm:$0xff] }
 0xf72   :  { %8114 = vmatprep.subr.mxu0 %v7955_v12  ;;  %v8086_v12 = vld [vmem:[#allocation16 + $0xdd0] sm:$0xff] }
 0xf73   :  { %8115 = vmatpush1.msra.mxu0 %v7954_v51  ;;  %v8085_v51 = vld [vmem:[#allocation16 + $0xdc8] sm:$0xff] }
 0xf74   :  { %8116 = vmatprep.subr.mxu0 %v7953_v41  ;;  %7696 = vmatmul.mubr.f32.gmra.mxu1 %v11468_v63  ;;  %v8084_v41 = vld [vmem:[#allocation16 + $0xdc0] sm:$0xff] }
 0xf75   :  { %8117 = vmatpush1.msra.mxu0 %v7952_v57  ;;  %7856 = vmatprep.mubr.f32.mxu1 %v9986_v0  ;;  %v8083_v57 = vld [vmem:[#allocation16 + $0xdb8] sm:$0xff] }
 0xf76   :  { %8118 = vmatprep.subr.mxu0 %v7951_v3  ;;  %v8082_v3 = vld [vmem:[#allocation16 + $0xdb0] sm:$0xff] }
 0xf77   :  { %8119 = vmatpush1.msra.mxu0 %v7950_v38  ;;  %v8081_v38 = vld [vmem:[#allocation16 + $0xda8] sm:$0xff] }
 0xf78   :  { %8120 = vmatprep.subr.mxu0 %v7949_v28  ;;  %v8080_v28 = vld [vmem:[#allocation16 + $0xda0] sm:$0xff] }
 0xf79   :  { %8121 = vmatpush1.msra.mxu0 %v7948_v40  ;;  %v8079_v40 = vld [vmem:[#allocation16 + $0xd98] sm:$0xff] }
 0xf7a   :  { %8122 = vmatprep.subr.mxu0 %v7947_v15  ;;  %v8078_v15 = vld [vmem:[#allocation16 + $0xd90] sm:$0xff] }
 0xf7b   :  { %8123 = vmatpush1.msra.mxu0 %v7946_v44  ;;  %v8077_v44 = vld [vmem:[#allocation16 + $0xd88] sm:$0xff] }
 0xf7c   :  { %8124 = vmatprep.subr.mxu0 %v7945_v43  ;;  %v8076_v43 = vld [vmem:[#allocation16 + $0xd80] sm:$0xff] }
 0xf7d   :  { %8125 = vmatpush1.msra.mxu0 %v7944_v24  ;;  %v8075_v24 = vld [vmem:[#allocation16 + $0xd78] sm:$0xff] }
 0xf7e   :  { %8126 = vmatprep.subr.mxu0 %v8007_v46  ;;  %v8074_v46 = vld [vmem:[#allocation16 + $0xd70] sm:$0xff] }
 0xf7f   :  { %8127 = vmatpush2.msra.mxu0 %v8006_v50  ;;  %v8073_v50 = vld [vmem:[#allocation16 + $0xd68] sm:$0xff] }
 0xf80   :  { %8128 = vmatprep.subr.mxu0 %v8005_v47  ;;  %v8072_v47 = vld [vmem:[#allocation16 + $0xd60] sm:$0xff] }
 0xf81   :  { %8129 = vmatpush2.msra.mxu0 %v8004_v35  ;;  %v8505_v35 = vld [vmem:[#allocation16 + $0x1108] sm:$0xff] }
 0xf82   :  { %8130 = vmatprep.subr.mxu0 %v8003_v25  ;;  %v8504_v25 = vld [vmem:[#allocation16 + $0x1100] sm:$0xff] }
 0xf83   :  { %8131 = vmatpush2.msra.mxu0 %v8002_v21  ;;  %v8503_v21 = vld [vmem:[#allocation16 + $0x10f8] sm:$0xff] }
 0xf84   :  { %8132 = vmatprep.subr.mxu0 %v8001_v49  ;;  %v8502_v49 = vld [vmem:[#allocation16 + $0x10f0] sm:$0xff] }
 0xf85   :  { %8133 = vmatpush2.msra.mxu0 %v8000_v52  ;;  %v8501_v52 = vld [vmem:[#allocation16 + $0x10e8] sm:$0xff] }
 0xf86   :  { %8134 = vmatprep.subr.mxu0 %v7999_v10  ;;  %v8500_v10 = vld [vmem:[#allocation16 + $0x10e0] sm:$0xff] }
 0xf87   :  { %8135 = vmatpush2.msra.mxu0 %v7998_v56  ;;  %v8499_v56 = vld [vmem:[#allocation16 + $0x10d8] sm:$0xff] }
 0xf88   :  { %8136 = vmatprep.subr.mxu0 %v7997_v30  ;;  %v8498_v30 = vld [vmem:[#allocation16 + $0x10d0] sm:$0xff] }
 0xf89   :  { %8137 = vmatpush2.msra.mxu0 %v7996_v33  ;;  %v8497_v33 = vld [vmem:[#allocation16 + $0x10c8] sm:$0xff] }
 0xf8a   :  { %8138 = vmatprep.subr.mxu0 %v7995_v54  ;;  %v8496_v54 = vld [vmem:[#allocation16 + $0x10c0] sm:$0xff] }
 0xf8b   :  { %8139 = vmatpush2.msra.mxu0 %v7994_v16  ;;  %v8495_v16 = vld [vmem:[#allocation16 + $0x10b8] sm:$0xff] }
 0xf8c   :  { %8140 = vmatprep.subr.mxu0 %v7993_v6  ;;  %v8494_v6 = vld [vmem:[#allocation16 + $0x10b0] sm:$0xff] }
 0xf8d   :  { %8141 = vmatpush2.msra.mxu0 %v7992_v31  ;;  %v8493_v31 = vld [vmem:[#allocation16 + $0x10a8] sm:$0xff] }
 0xf8e   :  { %8142 = vmatprep.subr.mxu0 %v7991_v5  ;;  %v8492_v5 = vld [vmem:[#allocation16 + $0x10a0] sm:$0xff] }
 0xf8f   :  { %8143 = vmatpush2.msra.mxu0 %v7990_v7  ;;  %v8491_v7 = vld [vmem:[#allocation16 + $0x1098] sm:$0xff] }
 0xf90   :  { %8144 = vmatprep.subr.mxu0 %v7989_v55  ;;  %v8490_v55 = vld [vmem:[#allocation16 + $0x1090] sm:$0xff] }
 0xf91   :  { %8145 = vmatpush2.msra.mxu0 %v7988_v4  ;;  %v8489_v4 = vld [vmem:[#allocation16 + $0x1088] sm:$0xff] }
 0xf92   :  { %8146 = vmatprep.subr.mxu0 %v7987_v17  ;;  %v8488_v17 = vld [vmem:[#allocation16 + $0x1080] sm:$0xff] }
 0xf93   :  { %8147 = vmatpush2.msra.mxu0 %v7986_v13  ;;  %v8487_v13 = vld [vmem:[#allocation16 + $0x1078] sm:$0xff] }
 0xf94   :  { %8148 = vmatprep.subr.mxu0 %v7985_v20  ;;  %v8486_v20 = vld [vmem:[#allocation16 + $0x1070] sm:$0xff] }
 0xf95   :  { %8149 = vmatpush2.msra.mxu0 %v7984_v23  ;;  %v8485_v23 = vld [vmem:[#allocation16 + $0x1068] sm:$0xff] }
 0xf96   :  { %8150 = vmatprep.subr.mxu0 %v7983_v19  ;;  %v8484_v19 = vld [vmem:[#allocation16 + $0x1060] sm:$0xff] }
 0xf97   :  { %8151 = vmatpush2.msra.mxu0 %v7982_v61  ;;  %v8483_v61 = vld [vmem:[#allocation16 + $0x1058] sm:$0xff] }
 0xf98   :  { %8152 = vmatprep.subr.mxu0 %v7981_v39  ;;  %v8482_v39 = vld [vmem:[#allocation16 + $0x1050] sm:$0xff] }
 0xf99   :  { %8153 = vmatpush2.msra.mxu0 %v7980_v18  ;;  %v8481_v18 = vld [vmem:[#allocation16 + $0x1048] sm:$0xff] }
 0xf9a   :  { %8154 = vmatprep.subr.mxu0 %v7979_v26  ;;  %v8480_v26 = vld [vmem:[#allocation16 + $0x1040] sm:$0xff] }
 0xf9b   :  { %8155 = vmatpush2.msra.mxu0 %v7978_v59  ;;  %v8479_v59 = vld [vmem:[#allocation16 + $0x1038] sm:$0xff] }
 0xf9c   :  { %8156 = vmatprep.subr.mxu0 %v7977_v60  ;;  %v8478_v60 = vld [vmem:[#allocation16 + $0x1030] sm:$0xff] }
 0xf9d   :  { %8157 = vmatpush2.msra.mxu0 %v7976_v9  ;;  %v8477_v9 = vld [vmem:[#allocation16 + $0x1028] sm:$0xff] }
 0xf9e   :  { %8159 = vmatmul.mubr.f32.vlgmr.msra.gmra.mxu0 %v11439_v22  ;;  %8258 = vmatprep.subr.mxu0 %v8093_v11  ;;  %v8476_v11 = vld [vmem:[#allocation16 + $0x1020] sm:$0xff] }
 0xf9f   :  { %8164 = vmatprep.mubr.f32.mxu0 %v11443_v42  ;;  %8259 = vmatpush1.msra.mxu0 %v8092_v1  ;;  %v8475_v1 = vld [vmem:[#allocation16 + $0x1018] sm:$0xff] }
 0xfa0   :  { %8260 = vmatprep.subr.mxu0 %v8091_v29  ;;  %v8474_v29 = vld [vmem:[#allocation16 + $0x1010] sm:$0xff] }
 0xfa1   :  { %8261 = vmatpush1.msra.mxu0 %v8090_v48  ;;  %v8537_v48 = vld [vmem:[#allocation16 + $0x1208] sm:$0xff] }
 0xfa2   :  { %8165 = vmatmul.mubr.f32.gmra.mxu0 %v11445_v2  ;;  %8262 = vmatprep.subr.mxu0 %v8089_v58  ;;  %v8536_v58 = vld [vmem:[#allocation16 + $0x1200] sm:$0xff] }
 0xfa3   :  { %8263 = vmatpush1.msra.mxu0 %v8088_v53  ;;  %8312 = vmatprep.mubr.f32.mxu0 %v9986_v0  ;;  %v8535_v53 = vld [vmem:[#allocation16 + $0x11f8] sm:$0xff] }
 0xfa4   :  { %8264 = vmatprep.subr.mxu0 %v8087_v36  ;;  %v8534_v36 = vld [vmem:[#allocation16 + $0x11f0] sm:$0xff] }
 0xfa5   :  { %8265 = vmatpush1.msra.mxu0 %v8086_v12  ;;  %v8533_v12 = vld [vmem:[#allocation16 + $0x11e8] sm:$0xff] }
 0xfa6   :  { %8266 = vmatprep.subr.mxu0 %v8085_v51  ;;  %v8532_v51 = vld [vmem:[#allocation16 + $0x11e0] sm:$0xff] }
 0xfa7   :  { %8267 = vmatpush1.msra.mxu0 %v8084_v41  ;;  %v8531_v41 = vld [vmem:[#allocation16 + $0x11d8] sm:$0xff] }
 0xfa8   :  { %8268 = vmatprep.subr.mxu0 %v8083_v57  ;;  %v8530_v57 = vld [vmem:[#allocation16 + $0x11d0] sm:$0xff] }
 0xfa9   :  { %8269 = vmatpush1.msra.mxu0 %v8082_v3  ;;  %v8529_v3 = vld [vmem:[#allocation16 + $0x11c8] sm:$0xff] }
 0xfaa   :  { %8270 = vmatprep.subr.mxu0 %v8081_v38  ;;  %v8528_v38 = vld [vmem:[#allocation16 + $0x11c0] sm:$0xff] }
 0xfab   :  { %8271 = vmatpush1.msra.mxu0 %v8080_v28  ;;  %v8527_v28 = vld [vmem:[#allocation16 + $0x11b8] sm:$0xff] }
 0xfac   :  { %8272 = vmatprep.subr.mxu0 %v8079_v40  ;;  %v8526_v40 = vld [vmem:[#allocation16 + $0x11b0] sm:$0xff] }
 0xfad   :  { %8273 = vmatpush1.msra.mxu0 %v8078_v15  ;;  %v8525_v15 = vld [vmem:[#allocation16 + $0x11a8] sm:$0xff] }
 0xfae   :  { %8274 = vmatprep.subr.mxu0 %v8077_v44  ;;  %v8524_v44 = vld [vmem:[#allocation16 + $0x11a0] sm:$0xff] }
 0xfaf   :  { %8275 = vmatpush1.msra.mxu0 %v8076_v43  ;;  %v8523_v43 = vld [vmem:[#allocation16 + $0x1198] sm:$0xff] }
 0xfb0   :  { %8276 = vmatprep.subr.mxu0 %v8075_v24  ;;  %v8522_v24 = vld [vmem:[#allocation16 + $0x1190] sm:$0xff] }
 0xfb1   :  { %8277 = vmatpush1.msra.mxu0 %v8074_v46  ;;  %v8521_v46 = vld [vmem:[#allocation16 + $0x1188] sm:$0xff] }
 0xfb2   :  { %8278 = vmatprep.subr.mxu0 %v8073_v50  ;;  %v8520_v50 = vld [vmem:[#allocation16 + $0x1180] sm:$0xff] }
 0xfb3   :  { %8279 = vmatpush1.msra.mxu0 %v8072_v47  ;;  %v8519_v47 = vld [vmem:[#allocation16 + $0x1178] sm:$0xff] }
 0xfb4   :  { %9115 = vmatmul.mubr.msk.f32.vlgmr.msra.gmra.mxu0 %vm7158_vm7, %v11477_v62  ;;  %8637 = vmatprep.subr.mxu0 %v8505_v35  ;;  %v8518_v35 = vld [vmem:[#allocation16 + $0x1170] sm:$0xff] }
 0xfb5   :  { %8638 = vmatpush1.msra.mxu0 %v8504_v25  ;;  %8318 = vmatprep.mubr.f32.mxu0 %v9986_v0  ;;  %v8517_v25 = vld [vmem:[#allocation16 + $0x1168] sm:$0xff] }
 0xfb6   :  { %8639 = vmatprep.subr.mxu0 %v8503_v21  ;;  %v8516_v21 = vld [vmem:[#allocation16 + $0x1160] sm:$0xff] }
 0xfb7   :  { %8640 = vmatpush1.msra.mxu0 %v8502_v49  ;;  %v8515_v49 = vld [vmem:[#allocation16 + $0x1158] sm:$0xff] }
 0xfb8   :  { %9116 = vmatmul.mubr.msk.f32.gmra.mxu0 %vm7158_vm7, %v11481_v32  ;;  %8641 = vmatprep.subr.mxu0 %v8501_v52  ;;  %v8514_v52 = vld [vmem:[#allocation16 + $0x1150] sm:$0xff] }
 0xfb9   :  { %8642 = vmatpush1.msra.mxu0 %v8500_v10  ;;  %8701 = vmatprep.mubr.f32.mxu0 %v11460_v27  ;;  %v8513_v10 = vld [vmem:[#allocation16 + $0x1148] sm:$0xff] }
 0xfba   :  { %8643 = vmatprep.subr.mxu0 %v8499_v56  ;;  %v8512_v56 = vld [vmem:[#allocation16 + $0x1140] sm:$0xff] }
 0xfbb   :  { %8644 = vmatpush1.msra.mxu0 %v8498_v30  ;;  %v8511_v30 = vld [vmem:[#allocation16 + $0x1138] sm:$0xff] }
 0xfbc   :  { %8645 = vmatprep.subr.mxu0 %v8497_v33  ;;  %v8510_v33 = vld [vmem:[#allocation16 + $0x1130] sm:$0xff] }
 0xfbd   :  { %8646 = vmatpush1.msra.mxu0 %v8496_v54  ;;  %v8509_v54 = vld [vmem:[#allocation16 + $0x1128] sm:$0xff] }
 0xfbe   :  { %8647 = vmatprep.subr.mxu0 %v8495_v16  ;;  %v8508_v16 = vld [vmem:[#allocation16 + $0x1120] sm:$0xff] }
 0xfbf   :  { %8648 = vmatpush1.msra.mxu0 %v8494_v6  ;;  %v8507_v6 = vld [vmem:[#allocation16 + $0x1118] sm:$0xff] }
 0xfc0   :  { %8649 = vmatprep.subr.mxu0 %v8493_v31  ;;  %v8506_v31 = vld [vmem:[#allocation16 + $0x1110] sm:$0xff] }
 0xfc1   :  { %8650 = vmatpush1.msra.mxu0 %v8492_v5 }
 0xfc2   :  { %8651 = vmatprep.subr.mxu0 %v8491_v7  ;;  %v7308_v5 = vpop.f32.mrf.mxu0  ;;  %v7231_v7 = vpop.f32.mrf.mxu1 }
 0xfc3   :  { %8652 = vmatpush1.msra.mxu0 %v8490_v55 }
 0xfc4   :  { %8653 = vmatprep.subr.mxu0 %v8489_v4  ;;  %v7310_v55 = vpop.f32.mrf.mxu0  ;;  %v7233_v4 = vpop.f32.mrf.mxu1 }
 0xfc5   :  { %8654 = vmatpush1.msra.mxu0 %v8488_v17 }
 0xfc6   :  { %8655 = vmatprep.subr.mxu0 %v8487_v13  ;;  %v7314_v17 = vpop.f32.mrf.mxu0  ;;  %v7237_v13 = vpop.f32.mrf.mxu1 }
 0xfc7   :  { %8656 = vmatpush1.msra.mxu0 %v8486_v20 }
 0xfc8   :  { %8657 = vmatprep.subr.mxu0 %v8485_v23  ;;  %v7316_v20 = vpop.f32.mrf.mxu0 }
 0xfc9   :  { %8658 = vmatpush1.msra.mxu0 %v8484_v19  ;;  %v7239_v19 = vpop.f32.mrf.mxu1 }
 0xfca   :  { %8659 = vmatprep.subr.mxu0 %v8483_v61 }
 0xfcb   :  { %8660 = vmatpush1.msra.mxu0 %v8482_v39 }
 0xfcc   :  { %8661 = vmatprep.subr.mxu0 %v8481_v18 }
 0xfcd   :  { %8662 = vmatpush1.msra.mxu0 %v8480_v26 }
 0xfce   :  { %8663 = vmatprep.subr.mxu0 %v8479_v59 }
 0xfcf   :  { %8664 = vmatpush1.msra.mxu0 %v8478_v60 }
 0xfd0   :  { %8665 = vmatprep.subr.mxu0 %v8477_v9 }
 0xfd1   :  { %8666 = vmatpush1.msra.mxu0 %v8476_v11 }
 0xfd2   :  { %8667 = vmatprep.subr.mxu0 %v8475_v1 }
 0xfd3   :  { %8668 = vmatpush1.msra.mxu0 %v8474_v29 }
 0xfd4   :  { %8669 = vmatprep.subr.mxu0 %v8537_v48 }
 0xfd5   :  { %8670 = vmatpush2.msra.mxu0 %v8536_v58 }
 0xfd6   :  { %8671 = vmatprep.subr.mxu0 %v8535_v53 }
 0xfd7   :  { %8672 = vmatpush2.msra.mxu0 %v8534_v36 }
 0xfd8   :  { %8673 = vmatprep.subr.mxu0 %v8533_v12 }
 0xfd9   :  { %8674 = vmatpush2.msra.mxu0 %v8532_v51 }
 0xfda   :  { %8675 = vmatprep.subr.mxu0 %v8531_v41 }
 0xfdb   :  { %8676 = vmatpush2.msra.mxu0 %v8530_v57 }
 0xfdc   :  { %8677 = vmatprep.subr.mxu0 %v8529_v3 }
 0xfdd   :  { %8678 = vmatpush2.msra.mxu0 %v8528_v38 }
 0xfde   :  { %8679 = vmatprep.subr.mxu0 %v8527_v28 }
 0xfdf   :  { %8680 = vmatpush2.msra.mxu0 %v8526_v40  ;;  %v7317_v40 = vadd.f32 %v7316_v20, %v7239_v19  ;;  %v8023_v20 = vld [vmem:[#allocation16 + $0xbd8] sm:$0xff]  ;;  %v8021_v19 = vld [vmem:[#allocation16 + $0xbc8] sm:$0xff] }
 0xfe0   :  { %8681 = vmatprep.subr.mxu0 %v8525_v15 }
 0xfe1   :  { %8682 = vmatpush2.msra.mxu0 %v8524_v44  ;;  %v7315_v44 = vadd.f32 %v7314_v17, %v7237_v13  ;;  %v8026_v17 = vld [vmem:[#allocation16 + $0xbf0] sm:$0xff]  ;;  %v8024_v13 = vld [vmem:[#allocation16 + $0xbe0] sm:$0xff] }
 0xfe2   :  { %8683 = vmatprep.subr.mxu0 %v8523_v43 }
 0xfe3   :  { %8684 = vmatpush2.msra.mxu0 %v8522_v24  ;;  %v7780_v24 = vld [vmem:[#allocation15 + $0x8] sm:$0x7f] }
 0xfe4   :  { %8685 = vmatprep.subr.mxu0 %v8521_v46  ;;  %v7311_v46 = vadd.f32 %v7310_v55, %v7233_v4  ;;  %v8028_v55 = vld [vmem:[#allocation16 + $0xc00] sm:$0xff]  ;;  %v8027_v4 = vld [vmem:[#allocation16 + $0xbf8] sm:$0xff] }
 0xfe5   :  { %8686 = vmatpush2.msra.mxu0 %v8520_v50 }
 0xfe6   :  { %8687 = vmatprep.subr.mxu0 %v8519_v47  ;;  %v7309_v47 = vadd.f32 %v7308_v5, %v7231_v7  ;;  %v8030_v5 = vld [vmem:[#allocation16 + $0xc10] sm:$0xff]  ;;  %v8029_v7 = vld [vmem:[#allocation16 + $0xc08] sm:$0xff] }
 0xfe7   :  { %8688 = vmatpush2.msra.mxu0 %v8518_v35 }
 0xfe8   :  { %8689 = vmatprep.subr.mxu0 %v8517_v25 }
 0xfe9   :  { %8690 = vmatpush2.msra.mxu0 %v8516_v21 }
 0xfea   :  { %8691 = vmatprep.subr.mxu0 %v8515_v49  ;;  %v7396_v49 = vld [vmem:[#allocation15] sm:$0x7f] }
 0xfeb   :  { %8692 = vmatpush2.msra.mxu0 %v8514_v52  ;;  %v7385_v61 = vpop.f32.mrf.mxu1  ;;  %v8039_v52 = vld [vmem:[#allocation16 + $0xc58] sm:$0xff] }
 0xfec   :  { %8693 = vmatprep.subr.mxu0 %v8513_v10  ;;  %v7386_v21 = vadd.f32 %v7385_v61, %v7309_v47  ;;  %v8038_v10 = vld [vmem:[#allocation16 + $0xc50] sm:$0xff]  ;;  %v8020_v61 = vld [vmem:[#allocation16 + $0xbc0] sm:$0xff] }
 0xfed   :  { %8694 = vmatpush2.msra.mxu0 %v8512_v56  ;;  %v7387_v18 = vpop.f32.mrf.mxu1  ;;  %v8037_v56 = vld [vmem:[#allocation16 + $0xc48] sm:$0xff]  ;;  %v8056_v47 = vld [vmem:[#allocation16 + $0xce0] sm:$0xff] }
 0xfee   :  { %8695 = vmatprep.subr.mxu0 %v8511_v30  ;;  %v7388_v25 = vadd.f32 %v7387_v18, %v7311_v46  ;;  %v8036_v30 = vld [vmem:[#allocation16 + $0xc40] sm:$0xff]  ;;  %v8018_v18 = vld [vmem:[#allocation16 + $0xbb0] sm:$0xff] }
 0xfef   :  { %8696 = vmatpush2.msra.mxu0 %v8510_v33  ;;  %v8035_v33 = vld [vmem:[#allocation16 + $0xc38] sm:$0xff]  ;;  %v8058_v46 = vld [vmem:[#allocation16 + $0xcf0] sm:$0xff] }
 0xff0   :  { %8697 = vmatprep.subr.mxu0 %v8509_v54  ;;  %v7391_v59 = vpop.f32.mrf.mxu1  ;;  %v8034_v54 = vld [vmem:[#allocation16 + $0xc30] sm:$0xff] }
 0xff1   :  { %8698 = vmatpush2.msra.mxu0 %v8508_v16  ;;  %v7392_v35 = vadd.f32 %v7391_v59, %v7315_v44  ;;  %v8033_v16 = vld [vmem:[#allocation16 + $0xc28] sm:$0xff]  ;;  %v8016_v59 = vld [vmem:[#allocation16 + $0xba0] sm:$0xff] }
 0xff2   :  { %8699 = vmatprep.subr.mxu0 %v8507_v6  ;;  %v7393_v11 = vpop.f32.mrf.mxu1  ;;  %v8032_v6 = vld [vmem:[#allocation16 + $0xc20] sm:$0xff]  ;;  %v8061_v44 = vld [vmem:[#allocation16 + $0xd08] sm:$0xff] }
 0xff3   :  { %8700 = vmatpush2.msra.mxu0 %v8506_v31  ;;  %v7394_v50 = vadd.f32 %v7393_v11, %v7317_v40  ;;  %v8031_v31 = vld [vmem:[#allocation16 + $0xc18] sm:$0xff]  ;;  %v8013_v11 = vld [vmem:[#allocation16 + $0xb88] sm:$0xff] }
 0xff4   :  { %8702 = vmatmul.mubr.f32.vlgmr.msra.gmra.mxu0 %v11462_v34  ;;  %v8063_v40 = vld [vmem:[#allocation16 + $0xd18] sm:$0xff] }
 0xff5   :  { %8707 = vmatprep.mubr.f32.mxu0 %v11466_v37 }
 0xff8   :  { %8708 = vmatmul.mubr.f32.gmra.mxu0 %v11468_v63 }
 0xff9   :  { %8866 = vmatprep.mubr.f32.mxu0 %v9986_v0 }
0x1003   :  { %v7614_v23 = vpop.f32.mrf.mxu0 }
0x1005   :  { %v7616_v39 = vpop.f32.mrf.mxu0 }
0x1009   :  { %v7620_v26 = vpop.f32.mrf.mxu0 }
0x100b   :  { %v7622_v60 = vpop.f32.mrf.mxu0 }
0x101c   :  { %v7768_v9 = vpop.f32.mrf.mxu0 }
0x101e   :  { %v7770_v1 = vpop.f32.mrf.mxu0 }
0x1021   :  { %v7774_v58 = vpop.f32.mrf.mxu0 }
0x1023   :  { %v7776_v57 = vpop.f32.mrf.mxu0 }
0x1030   :  { %v7691_v29 = vpop.f32.mrf.mxu1 }
0x1031   :  { %v7692_v3 = vadd.f32 %v7691_v29, %v7614_v23  ;;  %v8022_v23 = vld [vmem:[#allocation16 + $0xbd0] sm:$0xff]  ;;  %v8011_v29 = vld [vmem:[#allocation16 + $0xb78] sm:$0xff] }
0x1032   :  { %v7693_v48 = vpop.f32.mrf.mxu1 }
0x1033   :  { %v7694_v51 = vadd.f32 %v7693_v48, %v7616_v39  ;;  %v7769_v43 = vadd.f32 %v7768_v9, %v7692_v3  ;;  %v8019_v39 = vld [vmem:[#allocation16 + $0xbb8] sm:$0xff]  ;;  %v8014_v9 = vld [vmem:[#allocation16 + $0xb90] sm:$0xff] }
0x1034   :  { %v7697_v53 = vpop.f32.mrf.mxu1  ;;  %v8010_v48 = vld [vmem:[#allocation16 + $0xb70] sm:$0xff] }
0x1035   :  { %v7698_v36 = vadd.f32 %v7697_v53, %v7620_v26  ;;  %v7771_v15 = vadd.f32 %v7770_v1, %v7694_v51  ;;  %v8017_v26 = vld [vmem:[#allocation16 + $0xba8] sm:$0xff]  ;;  %v8012_v1 = vld [vmem:[#allocation16 + $0xb80] sm:$0xff]  ;;  %v8066_v3 = vld [vmem:[#allocation16 + $0xd30] sm:$0xff] }
0x1036   :  { %v7699_v12 = vpop.f32.mrf.mxu1  ;;  %v8008_v53 = vld [vmem:[#allocation16 + $0xb60] sm:$0xff]  ;;  %v8069_v51 = vld [vmem:[#allocation16 + $0xd48] sm:$0xff] }
0x1037   :  { %v7700_v41 = vadd.f32 %v7699_v12, %v7622_v60  ;;  %v7775_v28 = vadd.f32 %v7774_v58, %v7698_v36  ;;  %v8015_v60 = vld [vmem:[#allocation16 + $0xb98] sm:$0xff]  ;;  %v8009_v58 = vld [vmem:[#allocation16 + $0xb68] sm:$0xff]  ;;  %v8070_v12 = vld [vmem:[#allocation16 + $0xd50] sm:$0xff] }
0x1038   :  { %v8071_v36 = vld [vmem:[#allocation16 + $0xd58] sm:$0xff] }
0x1039   :  { %v7777_v38 = vadd.f32 %v7776_v57, %v7700_v41  ;;  %v8068_v41 = vld [vmem:[#allocation16 + $0xd40] sm:$0xff]  ;;  %v8067_v57 = vld [vmem:[#allocation16 + $0xd38] sm:$0xff] }
0x103b   :  { %9109 = vmatprep.subr.msk.mxu1 %vm7785_vm8, %v7777_v38  ;;  %v8065_v38 = vld [vmem:[#allocation16 + $0xd28] sm:$0xff] }
0x103c   :  { %9110 = vmatpush1.msk.msra.mxu1 %vm7785_vm8, %v7775_v28  ;;  %v8064_v28 = vld [vmem:[#allocation16 + $0xd20] sm:$0xff] }
0x103d   :  { %7822 = vmatprep.subr.mxu1 %v7771_v15  ;;  %v8062_v15 = vld [vmem:[#allocation16 + $0xd10] sm:$0xff] }
0x103e   :  { %7823 = vmatpush1.msra.mxu1 %v7769_v43  ;;  %v8060_v43 = vld [vmem:[#allocation16 + $0xd00] sm:$0xff] }
0x103f   :  { %9111 = vmatmul.mubr.msk.f32.vlgmr.msra.gmra.mxu1 %vm7781_vm9, %v7780_v24  ;;  %9112 = vmatprep.subr.msk.mxu1 %vm7785_vm8, %v7394_v50  ;;  %v8059_v24 = vld [vmem:[#allocation16 + $0xcf8] sm:$0xff]  ;;  %v8057_v50 = vld [vmem:[#allocation16 + $0xce8] sm:$0xff] }
0x1040   :  { %9113 = vmatpush1.msk.msra.mxu1 %vm7785_vm8, %v7392_v35  ;;  %7936 = vmatprep.mubr.f32.mxu1 %v9986_v0  ;;  %v8055_v35 = vld [vmem:[#allocation16 + $0xcd8] sm:$0xff] }
0x1041   :  { %7902 = vmatprep.subr.mxu1 %v7388_v25  ;;  %v8054_v25 = vld [vmem:[#allocation16 + $0xcd0] sm:$0xff] }
0x1042   :  { %7903 = vmatpush1.msra.mxu1 %v7386_v21  ;;  %v8053_v21 = vld [vmem:[#allocation16 + $0xcc8] sm:$0xff] }
0x1043   :  { %9114 = vmatmul.mubr.msk.f32.vlgmr.msra.gmra.mxu1 %vm7781_vm9, %v7396_v49  ;;  %8171 = vmatprep.subr.mxu1 %v8039_v52  ;;  %v8052_v49 = vld [vmem:[#allocation16 + $0xcc0] sm:$0xff]  ;;  %v8051_v52 = vld [vmem:[#allocation16 + $0xcb8] sm:$0xff] }
0x1044   :  { %8172 = vmatpush1.msra.mxu1 %v8038_v10  ;;  %8235 = vmatprep.mubr.f32.mxu1 %v11460_v27  ;;  %v8025_v27 = vld [vmem:[#allocation16 + $0xbe8] sm:$0xff]  ;;  %v8050_v10 = vld [vmem:[#allocation16 + $0xcb0] sm:$0xff] }
0x1045   :  { %8173 = vmatprep.subr.mxu1 %v8037_v56  ;;  %v8049_v56 = vld [vmem:[#allocation16 + $0xca8] sm:$0xff] }
0x1046   :  { %8174 = vmatpush1.msra.mxu1 %v8036_v30  ;;  %v8048_v30 = vld [vmem:[#allocation16 + $0xca0] sm:$0xff] }
0x1047   :  { %8175 = vmatprep.subr.mxu1 %v8035_v33  ;;  %v8047_v33 = vld [vmem:[#allocation16 + $0xc98] sm:$0xff] }
0x1048   :  { %8176 = vmatpush1.msra.mxu1 %v8034_v54  ;;  %v8046_v54 = vld [vmem:[#allocation16 + $0xc90] sm:$0xff] }
0x1049   :  { %8177 = vmatprep.subr.mxu1 %v8033_v16  ;;  %v8045_v16 = vld [vmem:[#allocation16 + $0xc88] sm:$0xff] }
0x104a   :  { %8178 = vmatpush1.msra.mxu1 %v8032_v6  ;;  %v8044_v6 = vld [vmem:[#allocation16 + $0xc80] sm:$0xff] }
0x104b   :  { %8179 = vmatprep.subr.mxu1 %v8031_v31  ;;  %v8043_v31 = vld [vmem:[#allocation16 + $0xc78] sm:$0xff] }
0x104c   :  { %8180 = vmatpush1.msra.mxu1 %v8030_v5  ;;  %v8042_v5 = vld [vmem:[#allocation16 + $0xc70] sm:$0xff] }
0x104d   :  { %8181 = vmatprep.subr.mxu1 %v8029_v7  ;;  %v8041_v7 = vld [vmem:[#allocation16 + $0xc68] sm:$0xff] }
0x104e   :  { %8182 = vmatpush1.msra.mxu1 %v8028_v55  ;;  %v8040_v55 = vld [vmem:[#allocation16 + $0xc60] sm:$0xff] }
0x104f   :  { %8183 = vmatprep.subr.mxu1 %v8027_v4 }
0x1050   :  { %8184 = vmatpush1.msra.mxu1 %v8026_v17 }
0x1051   :  { %8185 = vmatprep.subr.mxu1 %v8025_v27 }
0x1052   :  { %8186 = vmatpush1.msra.mxu1 %v8024_v13 }
0x1053   :  { %8187 = vmatprep.subr.mxu1 %v8023_v20 }
0x1054   :  { %8188 = vmatpush1.msra.mxu1 %v8022_v23 }
0x1055   :  { %8189 = vmatprep.subr.mxu1 %v8021_v19 }
0x1056   :  { %8190 = vmatpush1.msra.mxu1 %v8020_v61 }
0x1057   :  { %8191 = vmatprep.subr.mxu1 %v8019_v39 }
0x1058   :  { %8192 = vmatpush1.msra.mxu1 %v8018_v18 }
0x1059   :  { %8193 = vmatprep.subr.mxu1 %v8017_v26 }
0x105a   :  { %8194 = vmatpush1.msra.mxu1 %v8016_v59 }
0x105b   :  { %8195 = vmatprep.subr.mxu1 %v8015_v60 }
0x105c   :  { %8196 = vmatpush1.msra.mxu1 %v8014_v9 }
0x105d   :  { %8197 = vmatprep.subr.mxu1 %v8013_v11 }
0x105e   :  { %8198 = vmatpush1.msra.mxu1 %v8012_v1  ;;  %v8160_v19 = vpop.f32.mrf.mxu0 }
0x105f   :  { %8199 = vmatprep.subr.mxu1 %v8011_v29 }
0x1060   :  { %8200 = vmatpush1.msra.mxu1 %v8010_v48  ;;  %v8162_v61 = vpop.f32.mrf.mxu0 }
0x1061   :  { %8201 = vmatprep.subr.mxu1 %v8009_v58 }
0x1062   :  { %8202 = vmatpush1.msra.mxu1 %v8008_v53  ;;  %v8166_v39 = vpop.f32.mrf.mxu0 }
0x1063   :  { %8203 = vmatprep.subr.mxu1 %v8071_v36 }
0x1064   :  { %8204 = vmatpush2.msra.mxu1 %v8070_v12  ;;  %v8168_v18 = vpop.f32.mrf.mxu0 }
0x1065   :  { %8205 = vmatprep.subr.mxu1 %v8069_v51 }
0x1066   :  { %8206 = vmatpush2.msra.mxu1 %v8068_v41  ;;  %v8326_v41 = vld [vmem:[#allocation15 + $0x10] sm:$0x7f] }
0x1067   :  { %8207 = vmatprep.subr.mxu1 %v8067_v57  ;;  %v8441_v57 = vld [vmem:[#allocation16 + $0xf08] sm:$0xff] }
0x1068   :  { %8208 = vmatpush2.msra.mxu1 %v8066_v3  ;;  %v8440_v3 = vld [vmem:[#allocation16 + $0xf00] sm:$0xff] }
0x1069   :  { %8209 = vmatprep.subr.mxu1 %v8065_v38  ;;  %v8439_v38 = vld [vmem:[#allocation16 + $0xef8] sm:$0xff] }
0x106a   :  { %8210 = vmatpush2.msra.mxu1 %v8064_v28  ;;  %v8438_v28 = vld [vmem:[#allocation16 + $0xef0] sm:$0xff] }
0x106b   :  { %8211 = vmatprep.subr.mxu1 %v8063_v40  ;;  %v8437_v40 = vld [vmem:[#allocation16 + $0xee8] sm:$0xff] }
0x106c   :  { %8212 = vmatpush2.msra.mxu1 %v8062_v15  ;;  %v8436_v15 = vld [vmem:[#allocation16 + $0xee0] sm:$0xff] }
0x106d   :  { %8213 = vmatprep.subr.mxu1 %v8061_v44  ;;  %v8435_v44 = vld [vmem:[#allocation16 + $0xed8] sm:$0xff] }
0x106e   :  { %8214 = vmatpush2.msra.mxu1 %v8060_v43  ;;  %v8434_v43 = vld [vmem:[#allocation16 + $0xed0] sm:$0xff] }
0x106f   :  { %8215 = vmatprep.subr.mxu1 %v8059_v24  ;;  %v8433_v24 = vld [vmem:[#allocation16 + $0xec8] sm:$0xff] }
0x1070   :  { %8216 = vmatpush2.msra.mxu1 %v8058_v46  ;;  %v8432_v46 = vld [vmem:[#allocation16 + $0xec0] sm:$0xff] }
0x1071   :  { %8217 = vmatprep.subr.mxu1 %v8057_v50  ;;  %v8431_v50 = vld [vmem:[#allocation16 + $0xeb8] sm:$0xff] }
0x1072   :  { %8218 = vmatpush2.msra.mxu1 %v8056_v47  ;;  %v8430_v47 = vld [vmem:[#allocation16 + $0xeb0] sm:$0xff] }
0x1073   :  { %8219 = vmatprep.subr.mxu1 %v8055_v35  ;;  %v8429_v35 = vld [vmem:[#allocation16 + $0xea8] sm:$0xff] }
0x1074   :  { %8220 = vmatpush2.msra.mxu1 %v8054_v25  ;;  %v8314_v26 = vpop.f32.mrf.mxu0  ;;  %v8428_v25 = vld [vmem:[#allocation16 + $0xea0] sm:$0xff] }
0x1075   :  { %8221 = vmatprep.subr.mxu1 %v8053_v21  ;;  %v8426_v21 = vld [vmem:[#allocation16 + $0xe90] sm:$0xff] }
0x1076   :  { %8222 = vmatpush2.msra.mxu1 %v8052_v49  ;;  %v8425_v49 = vld [vmem:[#allocation16 + $0xe88] sm:$0xff] }
0x1077   :  { %8223 = vmatprep.subr.mxu1 %v8051_v52  ;;  %v8424_v52 = vld [vmem:[#allocation16 + $0xe80] sm:$0xff] }
0x1078   :  { %8224 = vmatpush2.msra.mxu1 %v8050_v10  ;;  %v8423_v10 = vld [vmem:[#allocation16 + $0xe78] sm:$0xff] }
0x1079   :  { %8225 = vmatprep.subr.mxu1 %v8049_v56  ;;  %v8422_v56 = vld [vmem:[#allocation16 + $0xe70] sm:$0xff] }
0x107a   :  { %8226 = vmatpush2.msra.mxu1 %v8048_v30  ;;  %v8421_v30 = vld [vmem:[#allocation16 + $0xe68] sm:$0xff] }
0x107b   :  { %8227 = vmatprep.subr.mxu1 %v8047_v33  ;;  %v8420_v33 = vld [vmem:[#allocation16 + $0xe60] sm:$0xff] }
0x107c   :  { %8228 = vmatpush2.msra.mxu1 %v8046_v54  ;;  %v8419_v54 = vld [vmem:[#allocation16 + $0xe58] sm:$0xff] }
0x107d   :  { %8229 = vmatprep.subr.mxu1 %v8045_v16  ;;  %v8418_v16 = vld [vmem:[#allocation16 + $0xe50] sm:$0xff] }
0x107e   :  { %8230 = vmatpush2.msra.mxu1 %v8044_v6  ;;  %v8417_v6 = vld [vmem:[#allocation16 + $0xe48] sm:$0xff] }
0x107f   :  { %8231 = vmatprep.subr.mxu1 %v8043_v31  ;;  %v8416_v31 = vld [vmem:[#allocation16 + $0xe40] sm:$0xff] }
0x1080   :  { %8232 = vmatpush2.msra.mxu1 %v8042_v5  ;;  %v8415_v5 = vld [vmem:[#allocation16 + $0xe38] sm:$0xff] }
0x1081   :  { %8233 = vmatprep.subr.mxu1 %v8041_v7  ;;  %v8414_v7 = vld [vmem:[#allocation16 + $0xe30] sm:$0xff] }
0x1082   :  { %8234 = vmatpush2.msra.mxu1 %v8040_v55  ;;  %v8413_v55 = vld [vmem:[#allocation16 + $0xe28] sm:$0xff] }
0x1083   :  { %8236 = vmatmul.mubr.f32.vlgmr.msra.gmra.mxu1 %v11462_v34  ;;  %v8316_v34 = vpop.f32.mrf.mxu0 }
0x1084   :  { %8241 = vmatprep.mubr.f32.mxu1 %v11466_v37 }
0x1085   :  { %v8320_v60 = vpop.f32.mrf.mxu0 }
0x1087   :  { %8242 = vmatmul.mubr.f32.gmra.mxu1 %v11468_v63  ;;  %v8322_v48 = vpop.f32.mrf.mxu0 }
0x1088   :  { %8400 = vmatprep.mubr.f32.mxu1 %v9986_v0 }
0x10ff   :  { %v7858_v4 = vpop.f32.mrf.mxu1 }
0x1101   :  { %v7860_v17 = vpop.f32.mrf.mxu1 }
0x1103   :  { %v7938_v27 = vpop.f32.mrf.mxu1 }
0x1104   :  { %v11527_v13 = vadd.f32 %v7938_v27, %v7858_v4  ;;  %v8412_v4 = vld [vmem:[#allocation16 + $0xe20] sm:$0xff]  ;;  %v8410_v27 = vld [vmem:[#allocation16 + $0xe10] sm:$0xff] }
0x1105   :  { %v7940_v20 = vpop.f32.mrf.mxu1 }
0x1106   :  { %v11529_v23 = vadd.f32 %v7940_v20, %v7860_v17  ;;  %v8411_v17 = vld [vmem:[#allocation16 + $0xe18] sm:$0xff]  ;;  %v8473_v20 = vld [vmem:[#allocation16 + $0x1008] sm:$0xff] }
0x1143   :  { %v8237_v59 = vpop.f32.mrf.mxu1 }
0x1144   :  { %v8238_v58 = vadd.f32 %v8237_v59, %v8160_v19  ;;  %v8472_v19 = vld [vmem:[#allocation16 + $0x1000] sm:$0xff]  ;;  %v8466_v59 = vld [vmem:[#allocation16 + $0xfd0] sm:$0xff] }
0x1145   :  { %v8239_v37 = vpop.f32.mrf.mxu1 }
0x1146   :  { %v8240_v1 = vadd.f32 %v8239_v37, %v8162_v61  ;;  %v8315_v51 = vadd.f32 %v8314_v26, %v8238_v58  ;;  %v8471_v61 = vld [vmem:[#allocation16 + $0xff8] sm:$0xff]  ;;  %v8468_v26 = vld [vmem:[#allocation16 + $0xfe0] sm:$0xff]  ;;  %v8465_v37 = vld [vmem:[#allocation16 + $0xfc8] sm:$0xff] }
0x1147   :  { %v8243_v63 = vpop.f32.mrf.mxu1  ;;  %v8457_v58 = vld [vmem:[#allocation16 + $0xf88] sm:$0xff] }
0x1148   :  { %v8244_v9 = vadd.f32 %v8243_v63, %v8166_v39  ;;  %v8317_v12 = vadd.f32 %v8316_v34, %v8240_v1  ;;  %v8470_v39 = vld [vmem:[#allocation16 + $0xff0] sm:$0xff]  ;;  %v8467_v34 = vld [vmem:[#allocation16 + $0xfd8] sm:$0xff]  ;;  %v8460_v1 = vld [vmem:[#allocation16 + $0xfa0] sm:$0xff] }
0x1149   :  { %v8245_v11 = vpop.f32.mrf.mxu1  ;;  %v8463_v63 = vld [vmem:[#allocation16 + $0xfb8] sm:$0xff] }
0x114a   :  { %v8246_v29 = vadd.f32 %v8245_v11, %v8168_v18  ;;  %v8321_v36 = vadd.f32 %v8320_v60, %v8244_v9  ;;  %v8469_v18 = vld [vmem:[#allocation16 + $0xfe8] sm:$0xff]  ;;  %v8464_v60 = vld [vmem:[#allocation16 + $0xfc0] sm:$0xff]  ;;  %v8462_v9 = vld [vmem:[#allocation16 + $0xfb0] sm:$0xff] }
0x114b   :  { %v8461_v11 = vld [vmem:[#allocation16 + $0xfa8] sm:$0xff] }
0x114c   :  { %v8323_v53 = vadd.f32 %v8322_v48, %v8246_v29  ;;  %v8459_v29 = vld [vmem:[#allocation16 + $0xf98] sm:$0xff]  ;;  %v8458_v48 = vld [vmem:[#allocation16 + $0xf90] sm:$0xff] }
0x114e   :  { %9117 = vmatprep.subr.msk.mxu1 %vm7785_vm8, %v8323_v53  ;;  %v8456_v53 = vld [vmem:[#allocation16 + $0xf80] sm:$0xff] }
0x114f   :  { %9118 = vmatpush1.msk.msra.mxu1 %vm7785_vm8, %v8321_v36  ;;  %v8455_v36 = vld [vmem:[#allocation16 + $0xf78] sm:$0xff] }
0x1150   :  { %8366 = vmatprep.subr.mxu1 %v8317_v12  ;;  %v8454_v12 = vld [vmem:[#allocation16 + $0xf70] sm:$0xff] }
0x1151   :  { %8367 = vmatpush1.msra.mxu1 %v8315_v51  ;;  %v8453_v51 = vld [vmem:[#allocation16 + $0xf68] sm:$0xff] }
0x1152   :  { %9119 = vmatmul.mubr.msk.f32.vlgmr.msra.gmra.mxu1 %vm7781_vm9, %v8326_v41  ;;  %8560 = vmatprep.subr.mxu1 %v8441_v57  ;;  %v8452_v41 = vld [vmem:[#allocation16 + $0xf60] sm:$0xff]  ;;  %v8451_v57 = vld [vmem:[#allocation16 + $0xf58] sm:$0xff] }
0x1153   :  { %8561 = vmatpush1.msra.mxu1 %v8440_v3  ;;  %8624 = vmatprep.mubr.f32.mxu1 %v11437_v14  ;;  %v8427_v14 = vld [vmem:[#allocation16 + $0xe98] sm:$0xff]  ;;  %v8450_v3 = vld [vmem:[#allocation16 + $0xf50] sm:$0xff] }
0x1154   :  { %8562 = vmatprep.subr.mxu1 %v8439_v38  ;;  %v8449_v38 = vld [vmem:[#allocation16 + $0xf48] sm:$0xff] }
0x1155   :  { %8563 = vmatpush1.msra.mxu1 %v8438_v28  ;;  %v8448_v28 = vld [vmem:[#allocation16 + $0xf40] sm:$0xff] }
0x1156   :  { %8564 = vmatprep.subr.mxu1 %v8437_v40  ;;  %v8447_v40 = vld [vmem:[#allocation16 + $0xf38] sm:$0xff] }
0x1157   :  { %8565 = vmatpush1.msra.mxu1 %v8436_v15  ;;  %v8446_v15 = vld [vmem:[#allocation16 + $0xf30] sm:$0xff] }
0x1158   :  { %8566 = vmatprep.subr.mxu1 %v8435_v44  ;;  %v8445_v44 = vld [vmem:[#allocation16 + $0xf28] sm:$0xff] }
0x1159   :  { %8567 = vmatpush1.msra.mxu1 %v8434_v43  ;;  %v8444_v43 = vld [vmem:[#allocation16 + $0xf20] sm:$0xff] }
0x115a   :  { %8568 = vmatprep.subr.mxu1 %v8433_v24  ;;  %v8443_v24 = vld [vmem:[#allocation16 + $0xf18] sm:$0xff] }
0x115b   :  { %8569 = vmatpush1.msra.mxu1 %v8432_v46  ;;  %v8442_v46 = vld [vmem:[#allocation16 + $0xf10] sm:$0xff] }
0x115c   :  { %8570 = vmatprep.subr.mxu1 %v8431_v50  ;;  %v8559_v50 = vld [vmem:[#allocation16 + $0x12b8] sm:$0xff] }
0x115d   :  { %8571 = vmatpush1.msra.mxu1 %v8430_v47  ;;  %v8558_v47 = vld [vmem:[#allocation16 + $0x12b0] sm:$0xff] }
0x115e   :  { %8572 = vmatprep.subr.mxu1 %v8429_v35  ;;  %v8557_v35 = vld [vmem:[#allocation16 + $0x12a8] sm:$0xff] }
0x115f   :  { %8573 = vmatpush1.msra.mxu1 %v8428_v25  ;;  %v8556_v25 = vld [vmem:[#allocation16 + $0x12a0] sm:$0xff] }
0x1160   :  { %8574 = vmatprep.subr.mxu1 %v8427_v14  ;;  %v8555_v14 = vld [vmem:[#allocation16 + $0x1298] sm:$0xff] }
0x1161   :  { %8575 = vmatpush1.msra.mxu1 %v8426_v21  ;;  %v8554_v21 = vld [vmem:[#allocation16 + $0x1290] sm:$0xff] }
0x1162   :  { %8576 = vmatprep.subr.mxu1 %v8425_v49  ;;  %v8553_v49 = vld [vmem:[#allocation16 + $0x1288] sm:$0xff] }
0x1163   :  { %8577 = vmatpush1.msra.mxu1 %v8424_v52  ;;  %v8552_v52 = vld [vmem:[#allocation16 + $0x1280] sm:$0xff] }
0x1164   :  { %8578 = vmatprep.subr.mxu1 %v8423_v10  ;;  %v8551_v10 = vld [vmem:[#allocation16 + $0x1278] sm:$0xff] }
0x1165   :  { %8579 = vmatpush1.msra.mxu1 %v8422_v56  ;;  %v8549_v56 = vld [vmem:[#allocation16 + $0x1268] sm:$0xff] }
0x1166   :  { %8580 = vmatprep.subr.mxu1 %v8421_v30  ;;  %v8547_v30 = vld [vmem:[#allocation16 + $0x1258] sm:$0xff] }
0x1167   :  { %8581 = vmatpush1.msra.mxu1 %v8420_v33  ;;  %v8546_v33 = vld [vmem:[#allocation16 + $0x1250] sm:$0xff] }
0x1168   :  { %8582 = vmatprep.subr.mxu1 %v8419_v54  ;;  %v8545_v54 = vld [vmem:[#allocation16 + $0x1248] sm:$0xff] }
0x1169   :  { %8583 = vmatpush1.msra.mxu1 %v8418_v16  ;;  %v8543_v16 = vld [vmem:[#allocation16 + $0x1238] sm:$0xff] }
0x116a   :  { %8584 = vmatprep.subr.mxu1 %v8417_v6  ;;  %v8542_v6 = vld [vmem:[#allocation16 + $0x1230] sm:$0xff] }
0x116b   :  { %8585 = vmatpush1.msra.mxu1 %v8416_v31  ;;  %v8541_v31 = vld [vmem:[#allocation16 + $0x1228] sm:$0xff] }
0x116c   :  { %8586 = vmatprep.subr.mxu1 %v8415_v5  ;;  %v8540_v5 = vld [vmem:[#allocation16 + $0x1220] sm:$0xff] }
0x116d   :  { %8587 = vmatpush1.msra.mxu1 %v8414_v7  ;;  %v8539_v7 = vld [vmem:[#allocation16 + $0x1218] sm:$0xff] }
0x116e   :  { %8588 = vmatprep.subr.mxu1 %v8413_v55  ;;  %v8538_v55 = vld [vmem:[#allocation16 + $0x1210] sm:$0xff] }
0x116f   :  { %8589 = vmatpush1.msra.mxu1 %v8412_v4 }
0x1170   :  { %8590 = vmatprep.subr.mxu1 %v8411_v17 }
0x1171   :  { %8591 = vmatpush1.msra.mxu1 %v8410_v27 }
0x1172   :  { %8592 = vmatprep.subr.mxu1 %v8473_v20 }
0x1173   :  { %8593 = vmatpush2.msra.mxu1 %v8472_v19 }
0x1174   :  { %8594 = vmatprep.subr.mxu1 %v8471_v61 }
0x1175   :  { %8595 = vmatpush2.msra.mxu1 %v8470_v39  ;;  %v8703_v39 = vpop.f32.mrf.mxu0 }
0x1176   :  { %8596 = vmatprep.subr.mxu1 %v8469_v18 }
0x1177   :  { %8597 = vmatpush2.msra.mxu1 %v8468_v26  ;;  %v8705_v26 = vpop.f32.mrf.mxu0 }
0x1178   :  { %8598 = vmatprep.subr.mxu1 %v8467_v34 }
0x1179   :  { %8599 = vmatpush2.msra.mxu1 %v8466_v59  ;;  %v8709_v59 = vpop.f32.mrf.mxu0 }
0x117a   :  { %8600 = vmatprep.subr.mxu1 %v8465_v37 }
0x117b   :  { %8601 = vmatpush2.msra.mxu1 %v8464_v60  ;;  %v8711_v60 = vpop.f32.mrf.mxu0 }
0x117c   :  { %8602 = vmatprep.subr.mxu1 %v8463_v63 }
0x117d   :  { %8603 = vmatpush2.msra.mxu1 %v8462_v9 }
0x117e   :  { %8604 = vmatprep.subr.mxu1 %v8461_v11 }
0x117f   :  { %8605 = vmatpush2.msra.mxu1 %v8460_v1 }
0x1180   :  { %8606 = vmatprep.subr.mxu1 %v8459_v29 }
0x1181   :  { %8607 = vmatpush2.msra.mxu1 %v8458_v48 }
0x1182   :  { %8608 = vmatprep.subr.mxu1 %v8457_v58  ;;  %v8792_v58 = vld [vmem:[#allocation15 + $0x18] sm:$0x7f] }
0x1183   :  { %8609 = vmatpush2.msra.mxu1 %v8456_v53  ;;  %v8875_v53 = vld [vmem:[#allocation18] sm:$0x3] }
0x1184   :  { %8610 = vmatprep.subr.mxu1 %v8455_v36  ;;  %v8880_v36 = vrot.slane %v8875_v53, %v11024_v45 }
0x1185   :  { %8611 = vmatpush2.msra.mxu1 %v8454_v12 }
0x1186   :  { %8612 = vmatprep.subr.mxu1 %v8453_v51 }
0x1187   :  { %8613 = vmatpush2.msra.mxu1 %v8452_v41  ;;  %v8884_v41 = vrot.slane %v8875_v53, %v11027_v8 }
0x1188   :  { %8614 = vmatprep.subr.mxu1 %v8451_v57 }
0x1189   :  { %8615 = vmatpush2.msra.mxu1 %v8450_v3 }
0x118a   :  { %8616 = vmatprep.subr.mxu1 %v8449_v38 }
0x118b   :  { %8617 = vmatpush2.msra.mxu1 %v8448_v28 }
0x118c   :  { %8618 = vmatprep.subr.mxu1 %v8447_v40 }
0x118d   :  { %8619 = vmatpush2.msra.mxu1 %v8446_v15 }
0x118e   :  { %8620 = vmatprep.subr.mxu1 %v8445_v44 }
0x118f   :  { %8621 = vmatpush2.msra.mxu1 %v8444_v43 }
0x1190   :  { %8622 = vmatprep.subr.mxu1 %v8443_v24 }
0x1191   :  { %8623 = vmatpush2.msra.mxu1 %v8442_v46 }
0x1192   :  { %8625 = vmatmul.mubr.f32.vlgmr.msra.gmra.mxu1 %v11439_v22  ;;  %8724 = vmatprep.subr.mxu1 %v8559_v50  ;;  %v8550_v22 = vld [vmem:[#allocation16 + $0x1270] sm:$0xff] }
0x1193   :  { %8630 = vmatprep.mubr.f32.mxu1 %v11443_v42  ;;  %8725 = vmatpush1.msra.mxu1 %v8558_v47  ;;  %v8548_v42 = vld [vmem:[#allocation16 + $0x1260] sm:$0xff] }
0x1194   :  { %8726 = vmatprep.subr.mxu1 %v8557_v35 }
0x1195   :  { %8727 = vmatpush1.msra.mxu1 %v8556_v25 }
0x1196   :  { %8631 = vmatmul.mubr.f32.gmra.mxu1 %v11445_v2  ;;  %8728 = vmatprep.subr.mxu1 %v8555_v14  ;;  %v8544_v2 = vld [vmem:[#allocation16 + $0x1240] sm:$0xff] }
0x1197   :  { %8729 = vmatpush1.msra.mxu1 %v8554_v21  ;;  %8778 = vmatprep.mubr.f32.mxu1 %v9986_v0 }
0x1198   :  { %8730 = vmatprep.subr.mxu1 %v8553_v49 }
0x1199   :  { %8731 = vmatpush1.msra.mxu1 %v8552_v52 }
0x119a   :  { %8732 = vmatprep.subr.mxu1 %v8551_v10 }
0x119b   :  { %8733 = vmatpush1.msra.mxu1 %v8550_v22 }
0x119c   :  { %8734 = vmatprep.subr.mxu1 %v8549_v56 }
0x119d   :  { %8735 = vmatpush1.msra.mxu1 %v8548_v42 }
0x119e   :  { %8736 = vmatprep.subr.mxu1 %v8547_v30 }
0x119f   :  { %8737 = vmatpush1.msra.mxu1 %v8546_v33 }
0x11a0   :  { %8738 = vmatprep.subr.mxu1 %v8545_v54 }
0x11a1   :  { %8739 = vmatpush1.msra.mxu1 %v8544_v2 }
0x11a2   :  { %8740 = vmatprep.subr.mxu1 %v8543_v16 }
0x11a3   :  { %8741 = vmatpush1.msra.mxu1 %v8542_v6 }
0x11a4   :  { %8742 = vmatprep.subr.mxu1 %v8541_v31 }
0x11a5   :  { %8743 = vmatpush1.msra.mxu1 %v8540_v5 }
0x11a6   :  { %8744 = vmatprep.subr.mxu1 %v8539_v7 }
0x11a7   :  { %8745 = vmatpush1.msra.mxu1 %v8538_v55 }
0x11a8   :  { %9120 = vmatmul.mubr.msk.f32.vlgmr.msra.gmra.mxu1 %vm7158_vm7, %v11477_v62 }
0x11a9   :  { %8784 = vmatprep.mubr.f32.mxu1 %v9986_v0 }
0x11ac   :  { %9121 = vmatmul.mubr.msk.f32.gmra.mxu1 %vm7158_vm7, %v11481_v32 }
0x1212   :  { %v8402_v4 = vpop.f32.mrf.mxu1 }
0x1213   :  { %v8407_v17 = vadd.f32 %v8402_v4, %v11527_v13 }
0x1214   :  { %v8404_v27 = vpop.f32.mrf.mxu1 }
0x1215   :  { %v8408_v20 = vadd.f32 %v8404_v27, %v11529_v23 }
0x1252   :  { %v8626_v19 = vpop.f32.mrf.mxu1 }
0x1253   :  { %v8704_v13 = vadd.f32 %v8703_v39, %v8626_v19 }
0x1254   :  { %v8628_v61 = vpop.f32.mrf.mxu1 }
0x1255   :  { %v8706_v11 = vadd.f32 %v8705_v26, %v8628_v61 }
0x1256   :  { %v8632_v18 = vpop.f32.mrf.mxu1 }
0x1257   :  { %v8710_v9 = vadd.f32 %v8709_v59, %v8632_v18 }
0x1258   :  { %v8634_v34 = vpop.f32.mrf.mxu1 }
0x1259   :  { %v8712_v63 = vadd.f32 %v8711_v60, %v8634_v34 }
0x1268   :  { %v8780_v37 = vpop.f32.mrf.mxu1 }
0x1269   :  { %v8781_v23 = vadd.f32 %v8780_v37, %v8704_v13 }
0x126a   :  { %v8782_v62 = vpop.f32.mrf.mxu1 }
0x126b   :  { %v8783_v48 = vadd.f32 %v8782_v62, %v8706_v11 }
0x126c   :  { %v8786_v0 = vpop.f32.mrf.mxu1 }
0x126d   :  { %v8787_v29 = vadd.f32 %v8786_v0, %v8710_v9 }
0x126e   :  { %v8788_v32 = vpop.f32.mrf.mxu1 }
0x126f   :  { %v8789_v1 = vadd.f32 %v8788_v32, %v8712_v63 }
0x1271   :  { %9122 = vmatprep.subr.msk.mxu0 %vm7785_vm8, %v8789_v1 }
0x1272   :  { %9123 = vmatpush1.msk.msra.mxu0 %vm7785_vm8, %v8787_v29 }
0x1273   :  { %8832 = vmatprep.subr.mxu0 %v8783_v48 }
0x1274   :  { %8833 = vmatpush1.msra.mxu0 %v8781_v23 }
0x1275   :  { %9124 = vmatmul.mubr.msk.f32.vlgmr.msra.gmra.mxu0 %vm7781_vm9, %v8792_v58 }
0x1335   :  { %v8868_v12 = vpop.f32.mrf.mxu0 }
0x1336   :  { %v8873_v51 = vadd.f32 %v8868_v12, %v8407_v17 }
0x1337   :  { %v8870_v57 = vpop.f32.mrf.mxu0 }
0x1338   :  { %v8887_v3 = vadd.f32 %v8880_v36, %v8873_v51  ;;  %v8874_v38 = vadd.f32 %v8870_v57, %v8408_v20 }
0x133a   :  { %9709 = vtanh.f32 %v8887_v3  ;;  %v8888_v28 = vadd.f32 %v8884_v41, %v8874_v38 }
0x133c   :  { %9711 = vtanh.f32 %v8888_v28 }
0x1347   :  { %v9710_v40 = vpop.eup %9709 }
0x1348   :  { %8891 = vst [vmem:[%s11570_s13] sm:$0x7f] %v9710_v40 }
0x1349   :  { %v9712_v15 = vpop.eup %9711 }
0x134a   :  { %8893 = vst.msk [vmem:[%s11570_s13 + $0x8] sm:$0x7f] %vm8892_vm10, %v9712_v15 }
0x134b   :  { %8898 = vsyncpa [#allocation3], 1 }
0x134c   :  { %8899 = vsyncpa [#allocation5], 1 }
0x134d   :  { %8900 = vsyncpa [#allocation8], 1 }
0x134e   :  { %8901 = vsyncpa [#allocation11], 1 }
0x134f   :  { %8902 = vsyncpa [#allocation14], 1 }
0x1350   :  { %8903 = vsyncpa [#allocation17], 1 }

</bundles_post_ra>
